<compile_context>
chip_gen: v6e
topology: v6e:2x2x1
jax: 0.10.0
libtpu: 0.0.40
codegen_flags: <defaults>
</compile_context>

<pallas_src>
import math

import jax
import jax.numpy as jnp
from jax.experimental import pallas as pl
from jax.experimental.pallas import tpu as pltpu

# ---------------- small synthetic CLIP configuration ----------------
B = 2                        # image batch
IMG = 16                     # image H == W
PATCH = 8
N_PATCH = (IMG // PATCH) ** 2            # 4 patches
PDIM = 3 * PATCH * PATCH                 # 192 (flattened patch)
VIS_DIM = 256                # vision width (stands in for 768; multiple of 128)
VIS_HEADS = 4
VIS_LAYERS = 2
CTX_DIM = 128                # text width == embed dim (stands in for 512)
TXT_HEADS = 4
TXT_LAYERS = 2
EMBED_DIM = CTX_DIM
N_CLS = 3
N_CTX = 2
PROMPT_DEPTH = 2
NUM_CP = PROMPT_DEPTH - 1    # compound prompts per modality
SEQ = 8                      # 1 (prefix) + N_CTX + 5 (suffix)
SUF = SEQ - 1 - N_CTX
VIS_VALID = 1 + N_PATCH + N_CTX          # 7 valid vision tokens
VIS_LPAD = 8                             # padded to a full sublane tile
DTYPE = jnp.float32          # residual stream / LN / softmax dtype
WDTYPE = jnp.bfloat16        # matmul-operand (weight) dtype
VMEM_LIMIT = 32 * 1024 * 1024

BLOCK_KEYS = ('ln1_g', 'ln1_b', 'in_w', 'in_b', 'out_w', 'out_b',
              'ln2_g', 'ln2_b', 'fc_w', 'fc_b', 'pj_w', 'pj_b')

# ============================ in-kernel helpers ============================


def _ln(x, g, b, eps=1e-5):
    """LayerNorm in f32."""
    m = jnp.mean(x, axis=-1, keepdims=True)
    c = x - m
    v = jnp.mean(c * c, axis=-1, keepdims=True)
    return c * jax.lax.rsqrt(v + eps) * g + b


def _transformer_block(x2, S, L, heads, mask_bias,
                       ln1g, ln1b, inw, inb, outw, outb,
                       ln2g, ln2b, fcw, fcb, pjw, pjb):
    """Fused CLIP ResidualAttentionBlock on a flat (S*L, D) activation slab.

    QKV / out-proj / FFN matmuls see all S*L rows; only the softmax part is
    per-sequence.  Per-head scores use one batched einsum over a (H, L, hd)
    stack; per-head contexts are concatenated back to (L, D) so the
    out-projection is a single K=D matmul.
    """
    D = x2.shape[-1]
    hd = D // heads
    cdt = inw.dtype
    scale = 1.0 / math.sqrt(hd)

    y = _ln(x2, ln1g, ln1b)
    qkv = jnp.dot(y.astype(cdt), inw, preferred_element_type=jnp.float32) + inb

    ctx_seqs = []
    for s in range(S):
        r0 = s * L
        q = jnp.concatenate(
            [qkv[None, r0:r0 + L, h * hd:(h + 1) * hd] for h in range(heads)], 0)
        k = jnp.concatenate(
            [qkv[None, r0:r0 + L, D + h * hd:D + (h + 1) * hd] for h in range(heads)], 0)
        v = jnp.concatenate(
            [qkv[None, r0:r0 + L, 2 * D + h * hd:2 * D + (h + 1) * hd] for h in range(heads)], 0)
        sc = jnp.einsum('hld,hmd->hlm', q.astype(cdt), k.astype(cdt),
                        preferred_element_type=jnp.float32) * scale
        sc = sc + mask_bias                                  # (H, L, L) + (L, L)
        sc = sc - jnp.max(sc, axis=-1, keepdims=True)
        p = jnp.exp(sc)
        p = p * pl.reciprocal(jnp.sum(p, axis=-1, keepdims=True), approx=True)
        o = jnp.einsum('hlm,hmd->hld', p.astype(cdt), v.astype(cdt),
                       preferred_element_type=jnp.float32)   # (H, L, hd)
        ctx_seqs.append(jnp.concatenate([o[h] for h in range(heads)], axis=-1))
    ctx2 = ctx_seqs[0] if S == 1 else jnp.concatenate(ctx_seqs, axis=0)   # (S*L, D)

    x2 = x2 + jnp.dot(ctx2.astype(cdt), outw,
                      preferred_element_type=jnp.float32) + outb
    y = _ln(x2, ln2g, ln2b)
    h1 = jnp.dot(y.astype(cdt), fcw, preferred_element_type=jnp.float32) + fcb
    h1 = h1 * pl.reciprocal(1.0 + jnp.exp(-1.702 * h1), approx=True)      # QuickGELU
    return x2 + jnp.dot(h1.astype(cdt), pjw,
                        preferred_element_type=jnp.float32) + pjb

# ============================ vision kernel ============================


def _vision_kernel(patch_ref, convw_ref, cls_ref, pos_ref, ctx_ref, projw_ref, projb_ref,
                   lnpre_g_ref, lnpre_b_ref, cpv_ref,
                   ln1g_ref, ln1b_ref, inw_ref, inb_ref, outw_ref, outb_ref,
                   ln2g_ref, ln2b_ref, fcw_ref, fcb_ref, pjw_ref, pjb_ref,
                   lnpost_g_ref, lnpost_b_ref, vproj_ref,
                   o_ref, act_ref):
    l = pl.program_id(1)
    n_layers = pl.num_programs(1)
    cdt = convw_ref.dtype

    # ---- l == 0 : conv1-as-matmul + cls/pos embed + visual ctx + ln_pre ----
    @pl.when(l == 0)
    def _init():
        patches = patch_ref[0]                                     # (N_PATCH, PDIM)
        pe = jnp.dot(patches.astype(cdt), convw_ref[...],
                     preferred_element_type=jnp.float32)           # (N_PATCH, D)
        pos = pos_ref[...]                                         # (1+N_PATCH, D)
        vctx = jnp.dot(ctx_ref[...].astype(cdt), projw_ref[...],
                       preferred_element_type=jnp.float32) + projb_ref[...]   # (N_CTX, D)
        x0 = jnp.concatenate([
            cls_ref[...] + pos[0:1, :],
            pe + pos[1:1 + N_PATCH, :],
            vctx,
            jnp.zeros((VIS_LPAD - VIS_VALID, VIS_DIM), jnp.float32),   # pad row
        ], axis=0)                                                 # (VIS_LPAD, D)
        act_ref[...] = _ln(x0, lnpre_g_ref[...], lnpre_b_ref[...])

    # ---- MaPLe compound visual prompt replacement (before layer l >= 1) ----
    if NUM_CP > 0:
        @pl.when((l >= 1) & (l < 1 + NUM_CP))
        def _replace():
            act_ref[VIS_VALID - N_CTX:VIS_VALID, :] = cpv_ref[l - 1]

    # ---- pad-key attention mask generated in-kernel ----
    col = jax.lax.broadcasted_iota(jnp.int32, (VIS_LPAD, VIS_LPAD), 1)
    mask = jnp.where(col < VIS_VALID, 0.0, -1e9)

    x = act_ref[...]
    x = _transformer_block(
        x, 1, VIS_LPAD, VIS_HEADS, mask,
        ln1g_ref[0], ln1b_ref[0], inw_ref[0], inb_ref[0], outw_ref[0], outb_ref[0],
        ln2g_ref[0], ln2b_ref[0], fcw_ref[0], fcb_ref[0], pjw_ref[0], pjb_ref[0])
    act_ref[...] = x

    # ---- last layer: ln_post + visual projection + L2 norm ----
    @pl.when(l == n_layers - 1)
    def _final():
        cls_tok = _ln(x[0:1, :], lnpost_g_ref[...], lnpost_b_ref[...])   # (1, D)
        feat = jnp.dot(cls_tok.astype(vproj_ref.dtype), vproj_ref[...],
                       preferred_element_type=jnp.float32)               # (1, E)
        feat = feat * jax.lax.rsqrt(jnp.sum(feat * feat, axis=-1, keepdims=True))
        o_ref[0] = feat.astype(o_ref.dtype)

# ============================ text (+logits) kernel ============================


def _text_kernel(imf_ref, mw1_ref, mb1_ref, mw2_ref, mb2_ref,
                 ctx_ref, pre_ref, suf_ref, pos_ref,
                 cpv_ref, v2tw_ref, v2tb_ref,
                 ln1g_ref, ln1b_ref, inw_ref, inb_ref, outw_ref, outb_ref,
                 ln2g_ref, ln2b_ref, fcw_ref, fcb_ref, pjw_ref, pjb_ref,
                 lnf_g_ref, lnf_b_ref, tproj_ref, eot_ref, scale_ref,
                 o_ref, act_ref):
    l = pl.program_id(1)
    n_layers = pl.num_programs(1)
    cdt = inw_ref.dtype

    # ---- l == 0 : meta_net MLP + prompt construction + pos embed ----
    @pl.when(l == 0)
    def _init():
        imf = imf_ref[0]                                           # (1, E) normalized
        h = jnp.maximum(
            jnp.dot(imf.astype(mw1_ref.dtype), mw1_ref[...],
                    preferred_element_type=jnp.float32) + mb1_ref[...], 0.0)
        bias = jnp.dot(h.astype(mw2_ref.dtype), mw2_ref[...],
                       preferred_element_type=jnp.float32) + mb2_ref[...]   # (1, CTX_DIM)
        ctx_shift = ctx_ref[...] + bias                            # (N_CTX, CTX_DIM)
        rows = []
        for c in range(N_CLS):
            rows += [pre_ref[c], ctx_shift, suf_ref[c]]
        x0 = jnp.concatenate(rows, axis=0)                         # (N_CLS*SEQ, CTX_DIM)
        pos = jnp.concatenate([pos_ref[...]] * N_CLS, axis=0)
        act_ref[...] = x0 + pos

    # ---- MaPLe compound text prompt replacement (v2t projection in-kernel) ----
    if NUM_CP > 0:
        @pl.when((l >= 1) & (l < 1 + NUM_CP))
        def _replace():
            cpt = jnp.dot(cpv_ref[l - 1].astype(v2tw_ref.dtype), v2tw_ref[l - 1],
                          preferred_element_type=jnp.float32) + v2tb_ref[l - 1]
            for c in range(N_CLS):
                act_ref[c * SEQ + 1:c * SEQ + 1 + N_CTX, :] = cpt

    # ---- causal mask generated in-kernel ----
    row = jax.lax.broadcasted_iota(jnp.int32, (SEQ, SEQ), 0)
    col = jax.lax.broadcasted_iota(jnp.int32, (SEQ, SEQ), 1)
    causal = jnp.where(col <= row, 0.0, -1e9)

    x = act_ref[...]
    x = _transformer_block(
        x, N_CLS, SEQ, TXT_HEADS, causal,
        ln1g_ref[0], ln1b_ref[0], inw_ref[0], inb_ref[0], outw_ref[0], outb_ref[0],
        ln2g_ref[0], ln2b_ref[0], fcw_ref[0], fcb_ref[0], pjw_ref[0], pjb_ref[0])
    act_ref[...] = x

    # ---- last layer: ln_final + EOT pooling + text proj + L2 norm + logits ----
    @pl.when(l == n_layers - 1)
    def _final():
        masked = x * eot_ref[...]                                  # (N_CLS*SEQ, D)
        pooled = jnp.sum(masked.reshape(N_CLS, SEQ, CTX_DIM), axis=1)   # (N_CLS, D)
        pooled = _ln(pooled, lnf_g_ref[...], lnf_b_ref[...])
        tf = jnp.dot(pooled.astype(tproj_ref.dtype), tproj_ref[...],
                     preferred_element_type=jnp.float32)           # (N_CLS, E)
        tf = tf * jax.lax.rsqrt(jnp.sum(tf * tf, axis=-1, keepdims=True))
        imf = imf_ref[0]                                           # (1, E) normalized
        lg = jnp.sum(imf * tf, axis=-1, keepdims=True)             # (N_CLS, 1), VPU+XLU
        o_ref[0] = (scale_ref[0] * lg).astype(o_ref.dtype)

# ============================ pallas_call wrappers ============================


def _rep_spec(a):
    nd = a.ndim
    return pl.BlockSpec(a.shape, lambda b, l, nd=nd: (0,) * nd)


def _layer_spec(a):
    return pl.BlockSpec((1,) + a.shape[1:], lambda b, l: (l, 0, 0))


def _batch_spec(a):
    return pl.BlockSpec((1,) + a.shape[1:], lambda b, l: (b, 0, 0))


def encode_image(image, params):
    """Full image encoder (conv1 .. ln_post .. proj .. L2-norm) in one pallas_call."""
    vp = params['visual']
    Bv = image.shape[0]
    gp = IMG // PATCH
    patches = image.reshape(Bv, 3, gp, PATCH, gp, PATCH)
    patches = patches.transpose(0, 2, 4, 1, 3, 5).reshape(Bv, N_PATCH, PDIM)

    blk = vp['blocks']
    rep_in = [vp['conv_w'], vp['cls_emb'], vp['pos_emb'],
              params['ctx'], params['proj_w'], params['proj_b'],
              vp['ln_pre_g'], vp['ln_pre_b'], params['cpv']]
    layer_in = [blk[k] for k in BLOCK_KEYS]
    tail_in = [vp['ln_post_g'], vp['ln_post_b'], vp['proj']]

    return pl.pallas_call(
        _vision_kernel,
        out_shape=jax.ShapeDtypeStruct((Bv, 1, EMBED_DIM), DTYPE),
        grid=(Bv, VIS_LAYERS),
        in_specs=([_batch_spec(patches)]
                  + [_rep_spec(a) for a in rep_in]
                  + [_layer_spec(a) for a in layer_in]
                  + [_rep_spec(a) for a in tail_in]),
        out_specs=pl.BlockSpec((1, 1, EMBED_DIM), lambda b, l: (b, 0, 0)),
        scratch_shapes=[pltpu.VMEM((VIS_LPAD, VIS_DIM), jnp.float32)],
        compiler_params=pltpu.CompilerParams(
            dimension_semantics=("parallel", "arbitrary"),
            vmem_limit_bytes=VMEM_LIMIT),
    )(patches, *rep_in, *layer_in, *tail_in)


def encode_text_and_logits(image_features, params, eot_sel, logit_scale):
    """Prompt learner + text transformer + EOT pooling + logits in one pallas_call."""
    tp = params['text']
    Bv = image_features.shape[0]
    blk = tp['blocks']
    scale = jnp.reshape(logit_scale, (1,)).astype(jnp.float32)

    rep_in = [params['meta_w1'], params['meta_b1'], params['meta_w2'], params['meta_b2'],
              params['ctx'], params['token_prefix'], params['token_suffix'], tp['pos_emb'],
              params['cpv'], params['v2t_w'], params['v2t_b']]
    layer_in = [blk[k] for k in BLOCK_KEYS]
    tail_in = [tp['ln_final_g'], tp['ln_final_b'], tp['text_projection'], eot_sel]

    return pl.pallas_call(
        _text_kernel,
        out_shape=jax.ShapeDtypeStruct((Bv, N_CLS, 1), DTYPE),
        grid=(Bv, TXT_LAYERS),
        in_specs=([_batch_spec(image_features)]
                  + [_rep_spec(a) for a in rep_in]
                  + [_layer_spec(a) for a in layer_in]
                  + [_rep_spec(a) for a in tail_in]
                  + [pl.BlockSpec(memory_space=pltpu.MemorySpace.SMEM)]),
        out_specs=pl.BlockSpec((1, N_CLS, 1), lambda b, l: (b, 0, 0)),
        scratch_shapes=[pltpu.VMEM((N_CLS * SEQ, CTX_DIM), jnp.float32)],
        compiler_params=pltpu.CompilerParams(
            dimension_semantics=("parallel", "arbitrary"),
            vmem_limit_bytes=VMEM_LIMIT),
    )(image_features, *rep_in, *layer_in, *tail_in, scale)


def custom_clip_forward(image, params, tokenized_prompts):
    logit_scale = jnp.exp(params['logit_scale'])
    eot = jnp.argmax(tokenized_prompts, axis=-1)                           # (n_cls,)
    eot_sel = jax.nn.one_hot(eot, SEQ, dtype=jnp.float32).reshape(N_CLS * SEQ, 1)
    image_features = encode_image(image, params)                          # (B, 1, E), L2-normed
    logits = encode_text_and_logits(image_features, params, eot_sel, logit_scale)
    # TODO(synk): training branch (F.cross_entropy(logits, label)) not implemented;
    # this returns the eval-path logits.
    return logits[:, :, 0]                                                 # (B, n_cls)

# ============================ parameter init ============================


def init_params(key):
    ks = iter(jax.random.split(key, 64))

    def nrm(shape, std=0.02, dtype=DTYPE):
        return (std * jax.random.normal(next(ks), shape, jnp.float32)).astype(dtype)

    def stacked_blocks(d, n_layers):
        return dict(
            ln1_g=jnp.ones((n_layers, 1, d), DTYPE),
            ln1_b=jnp.zeros((n_layers, 1, d), DTYPE),
            in_w=nrm((n_layers, d, 3 * d), dtype=WDTYPE),
            in_b=nrm((n_layers, 1, 3 * d), std=0.01),
            out_w=nrm((n_layers, d, d), dtype=WDTYPE),
            out_b=nrm((n_layers, 1, d), std=0.01),
            ln2_g=jnp.ones((n_layers, 1, d), DTYPE),
            ln2_b=jnp.zeros((n_layers, 1, d), DTYPE),
            fc_w=nrm((n_layers, d, 4 * d), dtype=WDTYPE),
            fc_b=nrm((n_layers, 1, 4 * d), std=0.01),
            pj_w=nrm((n_layers, 4 * d, d), dtype=WDTYPE),
            pj_b=nrm((n_layers, 1, d), std=0.01),
        )

    params = dict(
        ctx=nrm((N_CTX, CTX_DIM)),
        proj_w=nrm((CTX_DIM, VIS_DIM), dtype=WDTYPE),
        proj_b=nrm((1, VIS_DIM), std=0.01),
        cpv=nrm((NUM_CP, N_CTX, VIS_DIM)),
        v2t_w=nrm((NUM_CP, VIS_DIM, CTX_DIM), dtype=WDTYPE),
        v2t_b=nrm((NUM_CP, 1, CTX_DIM), std=0.01),
        meta_w1=nrm((CTX_DIM, CTX_DIM // 4), dtype=WDTYPE),
        meta_b1=nrm((1, CTX_DIM // 4), std=0.01),
        meta_w2=nrm((CTX_DIM // 4, CTX_DIM), dtype=WDTYPE),
        meta_b2=nrm((1, CTX_DIM), std=0.01),
        token_prefix=nrm((N_CLS, 1, CTX_DIM)),
        token_suffix=nrm((N_CLS, SUF, CTX_DIM)),
        logit_scale=jnp.asarray(math.log(1.0 / 0.07), DTYPE),
        visual=dict(
            conv_w=nrm((PDIM, VIS_DIM), dtype=WDTYPE),
            cls_emb=nrm((1, VIS_DIM)),
            pos_emb=nrm((1 + N_PATCH, VIS_DIM), 0.01),
            ln_pre_g=jnp.ones((1, VIS_DIM), DTYPE),
            ln_pre_b=jnp.zeros((1, VIS_DIM), DTYPE),
            blocks=stacked_blocks(VIS_DIM, VIS_LAYERS),
            ln_post_g=jnp.ones((1, VIS_DIM), DTYPE),
            ln_post_b=jnp.zeros((1, VIS_DIM), DTYPE),
            proj=nrm((VIS_DIM, EMBED_DIM), dtype=WDTYPE),
        ),
        text=dict(
            pos_emb=nrm((SEQ, CTX_DIM), 0.01),
            blocks=stacked_blocks(CTX_DIM, TXT_LAYERS),
            ln_final_g=jnp.ones((1, CTX_DIM), DTYPE),
            ln_final_b=jnp.zeros((1, CTX_DIM), DTYPE),
            text_projection=nrm((CTX_DIM, EMBED_DIM), dtype=WDTYPE),
        ),
    )
    return params

# ============================ main ============================

if __name__ == "__main__":
    key = jax.random.PRNGKey(0)
    pkey, ikey = jax.random.split(key)
    params = init_params(pkey)

    # synthetic tokenized prompts: argmax (EOT position) differs per class
    tokenized_prompts = jnp.tile(jnp.arange(SEQ, dtype=jnp.int32)[None, :], (N_CLS, 1))
    eot_pos = jnp.array([4, 5, 6], dtype=jnp.int32)
    tokenized_prompts = tokenized_prompts.at[jnp.arange(N_CLS), eot_pos].set(49407)

    image = jax.random.normal(ikey, (B, 3, IMG, IMG), DTYPE)   # NCHW (PyTorch layout)

    fwd = jax.jit(custom_clip_forward)
    logits = fwd(image, params, tokenized_prompts)
    logits = jax.block_until_ready(logits)
    assert logits.shape == (B, N_CLS), logits.shape
    assert bool(jnp.all(jnp.isfinite(logits)))
    print("KERNEL_OK")
</pallas_src>

<mosaic_0001>
module attributes {stable_mosaic.version = 11 : i64} {
  func.func @_vision_kernel(%arg0: i32, %arg1: i32, %arg2: memref<1x4x192xf32, #tpu.memory_space<vmem>>, %arg3: memref<192x256xbf16, #tpu.memory_space<vmem>>, %arg4: memref<1x256xf32, #tpu.memory_space<vmem>>, %arg5: memref<5x256xf32, #tpu.memory_space<vmem>>, %arg6: memref<2x128xf32, #tpu.memory_space<vmem>>, %arg7: memref<128x256xbf16, #tpu.memory_space<vmem>>, %arg8: memref<1x256xf32, #tpu.memory_space<vmem>>, %arg9: memref<1x256xf32, #tpu.memory_space<vmem>>, %arg10: memref<1x256xf32, #tpu.memory_space<vmem>>, %arg11: memref<1x2x256xf32, #tpu.memory_space<vmem>>, %arg12: memref<1x1x256xf32, #tpu.memory_space<vmem>>, %arg13: memref<1x1x256xf32, #tpu.memory_space<vmem>>, %arg14: memref<1x256x768xbf16, #tpu.memory_space<vmem>>, %arg15: memref<1x1x768xf32, #tpu.memory_space<vmem>>, %arg16: memref<1x256x256xbf16, #tpu.memory_space<vmem>>, %arg17: memref<1x1x256xf32, #tpu.memory_space<vmem>>, %arg18: memref<1x1x256xf32, #tpu.memory_space<vmem>>, %arg19: memref<1x1x256xf32, #tpu.memory_space<vmem>>, %arg20: memref<1x256x1024xbf16, #tpu.memory_space<vmem>>, %arg21: memref<1x1x1024xf32, #tpu.memory_space<vmem>>, %arg22: memref<1x1024x256xbf16, #tpu.memory_space<vmem>>, %arg23: memref<1x1x256xf32, #tpu.memory_space<vmem>>, %arg24: memref<1x256xf32, #tpu.memory_space<vmem>>, %arg25: memref<1x256xf32, #tpu.memory_space<vmem>>, %arg26: memref<256x128xbf16, #tpu.memory_space<vmem>>, %arg27: memref<1x1x128xf32, #tpu.memory_space<vmem>>, %arg28: memref<8x256xf32, #tpu.memory_space<vmem>>) attributes {dimension_semantics = [#tpu.dimension_semantics<parallel>, #tpu.dimension_semantics<arbitrary>], iteration_bounds = array<i64: 2, 2>, scalar_prefetch = 0 : i64, scratch_operands = 1 : i64, tpu.core_type = #tpu.core_type<tc>, window_params = [{transform_indices = @transform_0, window_bounds = array<i64: 1, 4, 192>}, {pipeline_mode = #tpu.pipeline_mode<synchronous>, transform_indices = @transform_1, window_bounds = array<i64: 192, 256>}, {pipeline_mode = #tpu.pipeline_mode<synchronous>, transform_indices = @transform_2, window_bounds = array<i64: 1, 256>}, {pipeline_mode = #tpu.pipeline_mode<synchronous>, transform_indices = @transform_3, window_bounds = array<i64: 5, 256>}, {pipeline_mode = #tpu.pipeline_mode<synchronous>, transform_indices = @transform_4, window_bounds = array<i64: 2, 128>}, {pipeline_mode = #tpu.pipeline_mode<synchronous>, transform_indices = @transform_5, window_bounds = array<i64: 128, 256>}, {pipeline_mode = #tpu.pipeline_mode<synchronous>, transform_indices = @transform_6, window_bounds = array<i64: 1, 256>}, {pipeline_mode = #tpu.pipeline_mode<synchronous>, transform_indices = @transform_7, window_bounds = array<i64: 1, 256>}, {pipeline_mode = #tpu.pipeline_mode<synchronous>, transform_indices = @transform_8, window_bounds = array<i64: 1, 256>}, {pipeline_mode = #tpu.pipeline_mode<synchronous>, transform_indices = @transform_9, window_bounds = array<i64: 1, 2, 256>}, {transform_indices = @transform_10, window_bounds = array<i64: 1, 1, 256>}, {transform_indices = @transform_11, window_bounds = array<i64: 1, 1, 256>}, {transform_indices = @transform_12, window_bounds = array<i64: 1, 256, 768>}, {transform_indices = @transform_13, window_bounds = array<i64: 1, 1, 768>}, {transform_indices = @transform_14, window_bounds = array<i64: 1, 256, 256>}, {transform_indices = @transform_15, window_bounds = array<i64: 1, 1, 256>}, {transform_indices = @transform_16, window_bounds = array<i64: 1, 1, 256>}, {transform_indices = @transform_17, window_bounds = array<i64: 1, 1, 256>}, {transform_indices = @transform_18, window_bounds = array<i64: 1, 256, 1024>}, {transform_indices = @transform_19, window_bounds = array<i64: 1, 1, 1024>}, {transform_indices = @transform_20, window_bounds = array<i64: 1, 1024, 256>}, {transform_indices = @transform_21, window_bounds = array<i64: 1, 1, 256>}, {pipeline_mode = #tpu.pipeline_mode<synchronous>, transform_indices = @transform_22, window_bounds = array<i64: 1, 256>}, {pipeline_mode = #tpu.pipeline_mode<synchronous>, transform_indices = @transform_23, window_bounds = array<i64: 1, 256>}, {pipeline_mode = #tpu.pipeline_mode<synchronous>, transform_indices = @transform_24, window_bounds = array<i64: 256, 128>}, {transform_indices = @transform_25, window_bounds = array<i64: 1, 1, 128>}]} {
    %c0_i32 = arith.constant 0 : i32
    %0 = arith.cmpi eq, %arg1, %c0_i32 : i32
    %1 = arith.extui %0 : i1 to i32
    %c0_i32_0 = arith.constant 0 : i32
    %2 = arith.cmpi ne, %1, %c0_i32_0 : i32
    scf.if %2 {
      %c0_65 = arith.constant 0 : index
      %c0_66 = arith.constant 0 : index
      %c0_67 = arith.constant 0 : index
      %165 = vector.load %arg2[%c0_65, %c0_66, %c0_67] : memref<1x4x192xf32, #tpu.memory_space<vmem>>, vector<1x4x192xf32>
      %166 = vector.shape_cast %165 : vector<1x4x192xf32> to vector<4x192xf32>
      %167 = arith.truncf %166 : vector<4x192xf32> to vector<4x192xbf16>
      %c0_68 = arith.constant 0 : index
      %c0_69 = arith.constant 0 : index
      %168 = vector.load %arg3[%c0_68, %c0_69] : memref<192x256xbf16, #tpu.memory_space<vmem>>, vector<192x256xbf16>
      %cst_70 = arith.constant dense<0.000000e+00> : vector<4x256xf32>
      %169 = tpu.matmul %167, %168, %cst_70 {dimension_numbers = #tpu.dot_dimension_numbers<[1], [0], [0], [1], [0, 0, 1, 1], [], []>} : vector<4x192xbf16>, vector<192x256xbf16>, vector<4x256xf32> -> vector<4x256xf32>
      %c0_71 = arith.constant 0 : index
      %c0_72 = arith.constant 0 : index
      %170 = vector.load %arg5[%c0_71, %c0_72] : memref<5x256xf32, #tpu.memory_space<vmem>>, vector<5x256xf32>
      %c0_73 = arith.constant 0 : index
      %c0_74 = arith.constant 0 : index
      %171 = vector.load %arg6[%c0_73, %c0_74] : memref<2x128xf32, #tpu.memory_space<vmem>>, vector<2x128xf32>
      %172 = arith.truncf %171 : vector<2x128xf32> to vector<2x128xbf16>
      %c0_75 = arith.constant 0 : index
      %c0_76 = arith.constant 0 : index
      %173 = vector.load %arg7[%c0_75, %c0_76] : memref<128x256xbf16, #tpu.memory_space<vmem>>, vector<128x256xbf16>
      %cst_77 = arith.constant dense<0.000000e+00> : vector<2x256xf32>
      %174 = tpu.matmul %172, %173, %cst_77 {dimension_numbers = #tpu.dot_dimension_numbers<[1], [0], [0], [1], [0, 0, 1, 1], [], []>} : vector<2x128xbf16>, vector<128x256xbf16>, vector<2x256xf32> -> vector<2x256xf32>
      %c0_78 = arith.constant 0 : index
      %c0_79 = arith.constant 0 : index
      %175 = vector.load %arg8[%c0_78, %c0_79] : memref<1x256xf32, #tpu.memory_space<vmem>>, vector<1x256xf32>
      %176 = vector.broadcast %175 : vector<1x256xf32> to vector<2x256xf32>
      %177 = arith.addf %174, %176 : vector<2x256xf32>
      %c0_80 = arith.constant 0 : index
      %c0_81 = arith.constant 0 : index
      %178 = vector.load %arg4[%c0_80, %c0_81] : memref<1x256xf32, #tpu.memory_space<vmem>>, vector<1x256xf32>
      %179 = vector.extract_strided_slice %170 {offsets = [0, 0], sizes = [1, 256], strides = [1, 1]} : vector<5x256xf32> to vector<1x256xf32>
      %180 = arith.addf %178, %179 : vector<1x256xf32>
      %181 = vector.extract_strided_slice %170 {offsets = [1, 0], sizes = [4, 256], strides = [1, 1]} : vector<5x256xf32> to vector<4x256xf32>
      %182 = arith.addf %169, %181 : vector<4x256xf32>
      %cst_82 = arith.constant 0.000000e+00 : f32
      %183 = vector.broadcast %cst_82 : f32 to vector<1x256xf32>
      %184 = tpu.concatenate %180, %182, %177, %183 in 0 : vector<1x256xf32>, vector<4x256xf32>, vector<2x256xf32>, vector<1x256xf32> -> vector<8x256xf32>
      %c0_83 = arith.constant 0 : index
      %c0_84 = arith.constant 0 : index
      %185 = vector.load %arg9[%c0_83, %c0_84] : memref<1x256xf32, #tpu.memory_space<vmem>>, vector<1x256xf32>
      %c0_85 = arith.constant 0 : index
      %c0_86 = arith.constant 0 : index
      %186 = vector.load %arg10[%c0_85, %c0_86] : memref<1x256xf32, #tpu.memory_space<vmem>>, vector<1x256xf32>
      %cst_87 = arith.constant dense<0.000000e+00> : vector<8xf32>
      %187 = vector.multi_reduction <add>, %184, %cst_87 [1] : vector<8x256xf32> to vector<8xf32>
      %188 = vector.shape_cast %187 : vector<8xf32> to vector<8x1xf32>
      %cst_88 = arith.constant 2.560000e+02 : f32
      %189 = vector.broadcast %cst_88 : f32 to vector<8x1xf32>
      %190 = arith.divf %188, %189 : vector<8x1xf32>
      %191 = vector.broadcast %190 : vector<8x1xf32> to vector<8x256xf32>
      %192 = arith.subf %184, %191 : vector<8x256xf32>
      %193 = arith.mulf %192, %192 : vector<8x256xf32>
      %cst_89 = arith.constant dense<0.000000e+00> : vector<8xf32>
      %194 = vector.multi_reduction <add>, %193, %cst_89 [1] : vector<8x256xf32> to vector<8xf32>
      %195 = vector.shape_cast %194 : vector<8xf32> to vector<8x1xf32>
      %cst_90 = arith.constant 2.560000e+02 : f32
      %196 = vector.broadcast %cst_90 : f32 to vector<8x1xf32>
      %197 = arith.divf %195, %196 : vector<8x1xf32>
      %cst_91 = arith.constant 9.99999974E-6 : f32
      %198 = vector.broadcast %cst_91 : f32 to vector<8x1xf32>
      %199 = arith.addf %197, %198 : vector<8x1xf32>
      %200 = math.rsqrt %199 : vector<8x1xf32>
      %201 = vector.broadcast %200 : vector<8x1xf32> to vector<8x256xf32>
      %202 = arith.mulf %192, %201 : vector<8x256xf32>
      %203 = vector.broadcast %185 : vector<1x256xf32> to vector<8x256xf32>
      %204 = arith.mulf %202, %203 : vector<8x256xf32>
      %205 = vector.broadcast %186 : vector<1x256xf32> to vector<8x256xf32>
      %206 = arith.addf %204, %205 : vector<8x256xf32>
      %c0_92 = arith.constant 0 : index
      %c0_93 = arith.constant 0 : index
      %207 = vector.load %arg28[%c0_92, %c0_93] : memref<8x256xf32, #tpu.memory_space<vmem>>, vector<8x256xf32>
      tpu.vector_store %arg28[%c0_92, %c0_93], %206 {strides = array<i32>} : memref<8x256xf32, #tpu.memory_space<vmem>>, vector<8x256xf32>,
    } else {
    }
    %c1_i32 = arith.constant 1 : i32
    %3 = arith.cmpi sge, %arg1, %c1_i32 : i32
    %c2_i32 = arith.constant 2 : i32
    %4 = arith.cmpi slt, %arg1, %c2_i32 : i32
    %5 = arith.andi %3, %4 : i1
    %6 = arith.extui %5 : i1 to i32
    %c0_i32_1 = arith.constant 0 : i32
    %7 = arith.cmpi ne, %6, %c0_i32_1 : i32
    scf.if %7 {
      %c1_i32_65 = arith.constant 1 : i32
      %165 = arith.subi %arg1, %c1_i32_65 : i32
      %166 = arith.index_cast %165 : i32 to index
      %c0_66 = arith.constant 0 : index
      %c0_67 = arith.constant 0 : index
      %167 = vector.load %arg11[%166, %c0_66, %c0_67] : memref<1x2x256xf32, #tpu.memory_space<vmem>>, vector<1x2x256xf32>
      %168 = vector.shape_cast %167 : vector<1x2x256xf32> to vector<2x256xf32>
      %c5 = arith.constant 5 : index
      %c0_68 = arith.constant 0 : index
      %169 = vector.load %arg28[%c5, %c0_68] : memref<8x256xf32, #tpu.memory_space<vmem>>, vector<2x256xf32>
      tpu.vector_store %arg28[%c5, %c0_68], %168 {strides = array<i32>} : memref<8x256xf32, #tpu.memory_space<vmem>>, vector<2x256xf32>,
    } else {
    }
    %8 = tpu.iota {dimensions = array<i32: 1>} : vector<8x8xi32>
    %c7_i32 = arith.constant 7 : i32
    %9 = vector.broadcast %c7_i32 : i32 to vector<8x8xi32>
    %10 = arith.cmpi slt, %8, %9 : vector<8x8xi32>
    %cst = arith.constant 0.000000e+00 : f32
    %cst_2 = arith.constant -1.000000e+09 : f32
    %11 = vector.broadcast %cst : f32 to vector<8x8xf32>
    %12 = vector.broadcast %cst_2 : f32 to vector<8x8xf32>
    %13 = arith.select %10, %11, %12 : vector<8x8xi1>, vector<8x8xf32>
    %c0 = arith.constant 0 : index
    %c0_3 = arith.constant 0 : index
    %14 = vector.load %arg28[%c0, %c0_3] : memref<8x256xf32, #tpu.memory_space<vmem>>, vector<8x256xf32>
    %c0_4 = arith.constant 0 : index
    %c0_5 = arith.constant 0 : index
    %c0_6 = arith.constant 0 : index
    %15 = vector.load %arg12[%c0_4, %c0_5, %c0_6] : memref<1x1x256xf32, #tpu.memory_space<vmem>>, vector<1x1x256xf32>
    %16 = vector.shape_cast %15 : vector<1x1x256xf32> to vector<1x256xf32>
    %c0_7 = arith.constant 0 : index
    %c0_8 = arith.constant 0 : index
    %c0_9 = arith.constant 0 : index
    %17 = vector.load %arg13[%c0_7, %c0_8, %c0_9] : memref<1x1x256xf32, #tpu.memory_space<vmem>>, vector<1x1x256xf32>
    %18 = vector.shape_cast %17 : vector<1x1x256xf32> to vector<1x256xf32>
    %c0_10 = arith.constant 0 : index
    %c0_11 = arith.constant 0 : index
    %c0_12 = arith.constant 0 : index
    %19 = vector.load %arg14[%c0_10, %c0_11, %c0_12] : memref<1x256x768xbf16, #tpu.memory_space<vmem>>, vector<1x256x768xbf16>
    %20 = vector.shape_cast %19 : vector<1x256x768xbf16> to vector<256x768xbf16>
    %c0_13 = arith.constant 0 : index
    %c0_14 = arith.constant 0 : index
    %c0_15 = arith.constant 0 : index
    %21 = vector.load %arg15[%c0_13, %c0_14, %c0_15] : memref<1x1x768xf32, #tpu.memory_space<vmem>>, vector<1x1x768xf32>
    %22 = vector.shape_cast %21 : vector<1x1x768xf32> to vector<1x768xf32>
    %c0_16 = arith.constant 0 : index
    %c0_17 = arith.constant 0 : index
    %c0_18 = arith.constant 0 : index
    %23 = vector.load %arg16[%c0_16, %c0_17, %c0_18] : memref<1x256x256xbf16, #tpu.memory_space<vmem>>, vector<1x256x256xbf16>
    %24 = vector.shape_cast %23 : vector<1x256x256xbf16> to vector<256x256xbf16>
    %c0_19 = arith.constant 0 : index
    %c0_20 = arith.constant 0 : index
    %c0_21 = arith.constant 0 : index
    %25 = vector.load %arg17[%c0_19, %c0_20, %c0_21] : memref<1x1x256xf32, #tpu.memory_space<vmem>>, vector<1x1x256xf32>
    %26 = vector.shape_cast %25 : vector<1x1x256xf32> to vector<1x256xf32>
    %c0_22 = arith.constant 0 : index
    %c0_23 = arith.constant 0 : index
    %c0_24 = arith.constant 0 : index
    %27 = vector.load %arg18[%c0_22, %c0_23, %c0_24] : memref<1x1x256xf32, #tpu.memory_space<vmem>>, vector<1x1x256xf32>
    %28 = vector.shape_cast %27 : vector<1x1x256xf32> to vector<1x256xf32>
    %c0_25 = arith.constant 0 : index
    %c0_26 = arith.constant 0 : index
    %c0_27 = arith.constant 0 : index
    %29 = vector.load %arg19[%c0_25, %c0_26, %c0_27] : memref<1x1x256xf32, #tpu.memory_space<vmem>>, vector<1x1x256xf32>
    %30 = vector.shape_cast %29 : vector<1x1x256xf32> to vector<1x256xf32>
    %c0_28 = arith.constant 0 : index
    %c0_29 = arith.constant 0 : index
    %c0_30 = arith.constant 0 : index
    %31 = vector.load %arg20[%c0_28, %c0_29, %c0_30] : memref<1x256x1024xbf16, #tpu.memory_space<vmem>>, vector<1x256x1024xbf16>
    %32 = vector.shape_cast %31 : vector<1x256x1024xbf16> to vector<256x1024xbf16>
    %c0_31 = arith.constant 0 : index
    %c0_32 = arith.constant 0 : index
    %c0_33 = arith.constant 0 : index
    %33 = vector.load %arg21[%c0_31, %c0_32, %c0_33] : memref<1x1x1024xf32, #tpu.memory_space<vmem>>, vector<1x1x1024xf32>
    %34 = vector.shape_cast %33 : vector<1x1x1024xf32> to vector<1x1024xf32>
    %c0_34 = arith.constant 0 : index
    %c0_35 = arith.constant 0 : index
    %c0_36 = arith.constant 0 : index
    %35 = vector.load %arg22[%c0_34, %c0_35, %c0_36] : memref<1x1024x256xbf16, #tpu.memory_space<vmem>>, vector<1x1024x256xbf16>
    %36 = vector.shape_cast %35 : vector<1x1024x256xbf16> to vector<1024x256xbf16>
    %c0_37 = arith.constant 0 : index
    %c0_38 = arith.constant 0 : index
    %c0_39 = arith.constant 0 : index
    %37 = vector.load %arg23[%c0_37, %c0_38, %c0_39] : memref<1x1x256xf32, #tpu.memory_space<vmem>>, vector<1x1x256xf32>
    %38 = vector.shape_cast %37 : vector<1x1x256xf32> to vector<1x256xf32>
    %cst_40 = arith.constant dense<0.000000e+00> : vector<8xf32>
    %39 = vector.multi_reduction <add>, %14, %cst_40 [1] : vector<8x256xf32> to vector<8xf32>
    %40 = vector.shape_cast %39 : vector<8xf32> to vector<8x1xf32>
    %cst_41 = arith.constant 2.560000e+02 : f32
    %41 = vector.broadcast %cst_41 : f32 to vector<8x1xf32>
    %42 = arith.divf %40, %41 : vector<8x1xf32>
    %43 = vector.broadcast %42 : vector<8x1xf32> to vector<8x256xf32>
    %44 = arith.subf %14, %43 : vector<8x256xf32>
    %45 = arith.mulf %44, %44 : vector<8x256xf32>
    %cst_42 = arith.constant dense<0.000000e+00> : vector<8xf32>
    %46 = vector.multi_reduction <add>, %45, %cst_42 [1] : vector<8x256xf32> to vector<8xf32>
    %47 = vector.shape_cast %46 : vector<8xf32> to vector<8x1xf32>
    %cst_43 = arith.constant 2.560000e+02 : f32
    %48 = vector.broadcast %cst_43 : f32 to vector<8x1xf32>
    %49 = arith.divf %47, %48 : vector<8x1xf32>
    %cst_44 = arith.constant 9.99999974E-6 : f32
    %50 = vector.broadcast %cst_44 : f32 to vector<8x1xf32>
    %51 = arith.addf %49, %50 : vector<8x1xf32>
    %52 = math.rsqrt %51 : vector<8x1xf32>
    %53 = vector.broadcast %52 : vector<8x1xf32> to vector<8x256xf32>
    %54 = arith.mulf %44, %53 : vector<8x256xf32>
    %55 = vector.broadcast %16 : vector<1x256xf32> to vector<8x256xf32>
    %56 = arith.mulf %54, %55 : vector<8x256xf32>
    %57 = vector.broadcast %18 : vector<1x256xf32> to vector<8x256xf32>
    %58 = arith.addf %56, %57 : vector<8x256xf32>
    %59 = arith.truncf %58 : vector<8x256xf32> to vector<8x256xbf16>
    %cst_45 = arith.constant dense<0.000000e+00> : vector<8x768xf32>
    %60 = tpu.matmul %59, %20, %cst_45 {dimension_numbers = #tpu.dot_dimension_numbers<[1], [0], [0], [1], [0, 0, 1, 1], [], []>} : vector<8x256xbf16>, vector<256x768xbf16>, vector<8x768xf32> -> vector<8x768xf32>
    %61 = vector.broadcast %22 : vector<1x768xf32> to vector<8x768xf32>
    %62 = arith.addf %60, %61 : vector<8x768xf32>
    %63 = vector.extract_strided_slice %62 {offsets = [0, 0], sizes = [8, 64], strides = [1, 1]} : vector<8x768xf32> to vector<8x64xf32>
    %64 = vector.shape_cast %63 : vector<8x64xf32> to vector<1x8x64xf32>
    %65 = vector.extract_strided_slice %62 {offsets = [0, 64], sizes = [8, 64], strides = [1, 1]} : vector<8x768xf32> to vector<8x64xf32>
    %66 = vector.shape_cast %65 : vector<8x64xf32> to vector<1x8x64xf32>
    %67 = vector.extract_strided_slice %62 {offsets = [0, 128], sizes = [8, 64], strides = [1, 1]} : vector<8x768xf32> to vector<8x64xf32>
    %68 = vector.shape_cast %67 : vector<8x64xf32> to vector<1x8x64xf32>
    %69 = vector.extract_strided_slice %62 {offsets = [0, 192], sizes = [8, 64], strides = [1, 1]} : vector<8x768xf32> to vector<8x64xf32>
    %70 = vector.shape_cast %69 : vector<8x64xf32> to vector<1x8x64xf32>
    %71 = tpu.concatenate %64, %66, %68, %70 in 0 : vector<1x8x64xf32>, vector<1x8x64xf32>, vector<1x8x64xf32>, vector<1x8x64xf32> -> vector<4x8x64xf32>
    %72 = vector.extract_strided_slice %62 {offsets = [0, 256], sizes = [8, 64], strides = [1, 1]} : vector<8x768xf32> to vector<8x64xf32>
    %73 = vector.shape_cast %72 : vector<8x64xf32> to vector<1x8x64xf32>
    %74 = vector.extract_strided_slice %62 {offsets = [0, 320], sizes = [8, 64], strides = [1, 1]} : vector<8x768xf32> to vector<8x64xf32>
    %75 = vector.shape_cast %74 : vector<8x64xf32> to vector<1x8x64xf32>
    %76 = vector.extract_strided_slice %62 {offsets = [0, 384], sizes = [8, 64], strides = [1, 1]} : vector<8x768xf32> to vector<8x64xf32>
    %77 = vector.shape_cast %76 : vector<8x64xf32> to vector<1x8x64xf32>
    %78 = vector.extract_strided_slice %62 {offsets = [0, 448], sizes = [8, 64], strides = [1, 1]} : vector<8x768xf32> to vector<8x64xf32>
    %79 = vector.shape_cast %78 : vector<8x64xf32> to vector<1x8x64xf32>
    %80 = tpu.concatenate %73, %75, %77, %79 in 0 : vector<1x8x64xf32>, vector<1x8x64xf32>, vector<1x8x64xf32>, vector<1x8x64xf32> -> vector<4x8x64xf32>
    %81 = vector.extract_strided_slice %62 {offsets = [0, 512], sizes = [8, 64], strides = [1, 1]} : vector<8x768xf32> to vector<8x64xf32>
    %82 = vector.shape_cast %81 : vector<8x64xf32> to vector<1x8x64xf32>
    %83 = vector.extract_strided_slice %62 {offsets = [0, 576], sizes = [8, 64], strides = [1, 1]} : vector<8x768xf32> to vector<8x64xf32>
    %84 = vector.shape_cast %83 : vector<8x64xf32> to vector<1x8x64xf32>
    %85 = vector.extract_strided_slice %62 {offsets = [0, 640], sizes = [8, 64], strides = [1, 1]} : vector<8x768xf32> to vector<8x64xf32>
    %86 = vector.shape_cast %85 : vector<8x64xf32> to vector<1x8x64xf32>
    %87 = vector.extract_strided_slice %62 {offsets = [0, 704], sizes = [8, 64], strides = [1, 1]} : vector<8x768xf32> to vector<8x64xf32>
    %88 = vector.shape_cast %87 : vector<8x64xf32> to vector<1x8x64xf32>
    %89 = tpu.concatenate %82, %84, %86, %88 in 0 : vector<1x8x64xf32>, vector<1x8x64xf32>, vector<1x8x64xf32>, vector<1x8x64xf32> -> vector<4x8x64xf32>
    %90 = arith.truncf %71 : vector<4x8x64xf32> to vector<4x8x64xbf16>
    %91 = arith.truncf %80 : vector<4x8x64xf32> to vector<4x8x64xbf16>
    "tpu.trace_start"() <{level = 10 : i32, message = "hld,hmd->hlm"}> : () -> ()
    %cst_46 = arith.constant dense<0.000000e+00> : vector<4x8x8xf32>
    %92 = tpu.matmul %90, %91, %cst_46 {dimension_numbers = #tpu.dot_dimension_numbers<[2], [2], [1], [1], [0, 0, 0, 1, 1, 1], [0], [0]>} : vector<4x8x64xbf16>, vector<4x8x64xbf16>, vector<4x8x8xf32> -> vector<4x8x8xf32>
    "tpu.trace_stop"() : () -> ()
    %cst_47 = arith.constant 1.250000e-01 : f32
    %93 = vector.broadcast %cst_47 : f32 to vector<4x8x8xf32>
    %94 = arith.mulf %92, %93 : vector<4x8x8xf32>
    %95 = vector.shape_cast %13 : vector<8x8xf32> to vector<1x8x8xf32>
    %96 = vector.broadcast %95 : vector<1x8x8xf32> to vector<4x8x8xf32>
    %97 = arith.addf %94, %96 : vector<4x8x8xf32>
    %cst_48 = arith.constant dense<0xFF800000> : vector<4x8xf32>
    %98 = vector.multi_reduction <maximumf>, %97, %cst_48 [2] : vector<4x8x8xf32> to vector<4x8xf32>
    %99 = vector.shape_cast %98 : vector<4x8xf32> to vector<4x8x1xf32>
    %100 = vector.broadcast %99 : vector<4x8x1xf32> to vector<4x8x8xf32>
    %101 = arith.subf %97, %100 : vector<4x8x8xf32>
    %102 = math.exp %101 : vector<4x8x8xf32>
    %cst_49 = arith.constant dense<0.000000e+00> : vector<4x8xf32>
    %103 = vector.multi_reduction <add>, %102, %cst_49 [2] : vector<4x8x8xf32> to vector<4x8xf32>
    %104 = vector.shape_cast %103 : vector<4x8xf32> to vector<4x8x1xf32>
    %105 = tpu.reciprocal %104 {approx = true} : vector<4x8x1xf32> -> vector<4x8x1xf32>
    %106 = vector.broadcast %105 : vector<4x8x1xf32> to vector<4x8x8xf32>
    %107 = arith.mulf %102, %106 : vector<4x8x8xf32>
    %108 = arith.truncf %107 : vector<4x8x8xf32> to vector<4x8x8xbf16>
    %109 = arith.truncf %89 : vector<4x8x64xf32> to vector<4x8x64xbf16>
    "tpu.trace_start"() <{level = 10 : i32, message = "hlm,hmd->hld"}> : () -> ()
    %cst_50 = arith.constant dense<0.000000e+00> : vector<4x8x64xf32>
    %110 = tpu.matmul %108, %109, %cst_50 {dimension_numbers = #tpu.dot_dimension_numbers<[2], [1], [1], [2], [0, 0, 0, 1, 1, 2], [0], [0]>} : vector<4x8x8xbf16>, vector<4x8x64xbf16>, vector<4x8x64xf32> -> vector<4x8x64xf32>
    "tpu.trace_stop"() : () -> ()
    %111 = vector.extract_strided_slice %110 {offsets = [0, 0, 0], sizes = [1, 8, 64], strides = [1, 1, 1]} : vector<4x8x64xf32> to vector<1x8x64xf32>
    %112 = vector.shape_cast %111 : vector<1x8x64xf32> to vector<8x64xf32>
    %113 = vector.extract_strided_slice %110 {offsets = [1, 0, 0], sizes = [1, 8, 64], strides = [1, 1, 1]} : vector<4x8x64xf32> to vector<1x8x64xf32>
    %114 = vector.shape_cast %113 : vector<1x8x64xf32> to vector<8x64xf32>
    %115 = vector.extract_strided_slice %110 {offsets = [2, 0, 0], sizes = [1, 8, 64], strides = [1, 1, 1]} : vector<4x8x64xf32> to vector<1x8x64xf32>
    %116 = vector.shape_cast %115 : vector<1x8x64xf32> to vector<8x64xf32>
    %117 = vector.extract_strided_slice %110 {offsets = [3, 0, 0], sizes = [1, 8, 64], strides = [1, 1, 1]} : vector<4x8x64xf32> to vector<1x8x64xf32>
    %118 = vector.shape_cast %117 : vector<1x8x64xf32> to vector<8x64xf32>
    %119 = tpu.concatenate %112, %114, %116, %118 in 1 : vector<8x64xf32>, vector<8x64xf32>, vector<8x64xf32>, vector<8x64xf32> -> vector<8x256xf32>
    %120 = arith.truncf %119 : vector<8x256xf32> to vector<8x256xbf16>
    %cst_51 = arith.constant dense<0.000000e+00> : vector<8x256xf32>
    %121 = tpu.matmul %120, %24, %cst_51 {dimension_numbers = #tpu.dot_dimension_numbers<[1], [0], [0], [1], [0, 0, 1, 1], [], []>} : vector<8x256xbf16>, vector<256x256xbf16>, vector<8x256xf32> -> vector<8x256xf32>
    %122 = arith.addf %14, %121 : vector<8x256xf32>
    %123 = vector.broadcast %26 : vector<1x256xf32> to vector<8x256xf32>
    %124 = arith.addf %122, %123 : vector<8x256xf32>
    %cst_52 = arith.constant dense<0.000000e+00> : vector<8xf32>
    %125 = vector.multi_reduction <add>, %124, %cst_52 [1] : vector<8x256xf32> to vector<8xf32>
    %126 = vector.shape_cast %125 : vector<8xf32> to vector<8x1xf32>
    %cst_53 = arith.constant 2.560000e+02 : f32
    %127 = vector.broadcast %cst_53 : f32 to vector<8x1xf32>
    %128 = arith.divf %126, %127 : vector<8x1xf32>
    %129 = vector.broadcast %128 : vector<8x1xf32> to vector<8x256xf32>
    %130 = arith.subf %124, %129 : vector<8x256xf32>
    %131 = arith.mulf %130, %130 : vector<8x256xf32>
    %cst_54 = arith.constant dense<0.000000e+00> : vector<8xf32>
    %132 = vector.multi_reduction <add>, %131, %cst_54 [1] : vector<8x256xf32> to vector<8xf32>
    %133 = vector.shape_cast %132 : vector<8xf32> to vector<8x1xf32>
    %cst_55 = arith.constant 2.560000e+02 : f32
    %134 = vector.broadcast %cst_55 : f32 to vector<8x1xf32>
    %135 = arith.divf %133, %134 : vector<8x1xf32>
    %cst_56 = arith.constant 9.99999974E-6 : f32
    %136 = vector.broadcast %cst_56 : f32 to vector<8x1xf32>
    %137 = arith.addf %135, %136 : vector<8x1xf32>
    %138 = math.rsqrt %137 : vector<8x1xf32>
    %139 = vector.broadcast %138 : vector<8x1xf32> to vector<8x256xf32>
    %140 = arith.mulf %130, %139 : vector<8x256xf32>
    %141 = vector.broadcast %28 : vector<1x256xf32> to vector<8x256xf32>
    %142 = arith.mulf %140, %141 : vector<8x256xf32>
    %143 = vector.broadcast %30 : vector<1x256xf32> to vector<8x256xf32>
    %144 = arith.addf %142, %143 : vector<8x256xf32>
    %145 = arith.truncf %144 : vector<8x256xf32> to vector<8x256xbf16>
    %cst_57 = arith.constant dense<0.000000e+00> : vector<8x1024xf32>
    %146 = tpu.matmul %145, %32, %cst_57 {dimension_numbers = #tpu.dot_dimension_numbers<[1], [0], [0], [1], [0, 0, 1, 1], [], []>} : vector<8x256xbf16>, vector<256x1024xbf16>, vector<8x1024xf32> -> vector<8x1024xf32>
    %147 = vector.broadcast %34 : vector<1x1024xf32> to vector<8x1024xf32>
    %148 = arith.addf %146, %147 : vector<8x1024xf32>
    %cst_58 = arith.constant -1.702000e+00 : f32
    %149 = vector.broadcast %cst_58 : f32 to vector<8x1024xf32>
    %150 = arith.mulf %149, %148 : vector<8x1024xf32>
    %151 = math.exp %150 : vector<8x1024xf32>
    %cst_59 = arith.constant 1.000000e+00 : f32
    %152 = vector.broadcast %cst_59 : f32 to vector<8x1024xf32>
    %153 = arith.addf %152, %151 : vector<8x1024xf32>
    %154 = tpu.reciprocal %153 {approx = true} : vector<8x1024xf32> -> vector<8x1024xf32>
    %155 = arith.mulf %148, %154 : vector<8x1024xf32>
    %156 = arith.truncf %155 : vector<8x1024xf32> to vector<8x1024xbf16>
    %cst_60 = arith.constant dense<0.000000e+00> : vector<8x256xf32>
    %157 = tpu.matmul %156, %36, %cst_60 {dimension_numbers = #tpu.dot_dimension_numbers<[1], [0], [0], [1], [0, 0, 1, 1], [], []>} : vector<8x1024xbf16>, vector<1024x256xbf16>, vector<8x256xf32> -> vector<8x256xf32>
    %158 = arith.addf %124, %157 : vector<8x256xf32>
    %159 = vector.broadcast %38 : vector<1x256xf32> to vector<8x256xf32>
    %160 = arith.addf %158, %159 : vector<8x256xf32>
    %c0_61 = arith.constant 0 : index
    %c0_62 = arith.constant 0 : index
    %161 = vector.load %arg28[%c0_61, %c0_62] : memref<8x256xf32, #tpu.memory_space<vmem>>, vector<8x256xf32>
    tpu.vector_store %arg28[%c0_61, %c0_62], %160 {strides = array<i32>} : memref<8x256xf32, #tpu.memory_space<vmem>>, vector<8x256xf32>,
    %c1_i32_63 = arith.constant 1 : i32
    %162 = arith.cmpi eq, %arg1, %c1_i32_63 : i32
    %163 = arith.extui %162 : i1 to i32
    %c0_i32_64 = arith.constant 0 : i32
    %164 = arith.cmpi ne, %163, %c0_i32_64 : i32
    scf.if %164 {
      %165 = vector.extract_strided_slice %160 {offsets = [0, 0], sizes = [1, 256], strides = [1, 1]} : vector<8x256xf32> to vector<1x256xf32>
      %c0_65 = arith.constant 0 : index
      %c0_66 = arith.constant 0 : index
      %166 = vector.load %arg24[%c0_65, %c0_66] : memref<1x256xf32, #tpu.memory_space<vmem>>, vector<1x256xf32>
      %c0_67 = arith.constant 0 : index
      %c0_68 = arith.constant 0 : index
      %167 = vector.load %arg25[%c0_67, %c0_68] : memref<1x256xf32, #tpu.memory_space<vmem>>, vector<1x256xf32>
      %cst_69 = arith.constant dense<0.000000e+00> : vector<1xf32>
      %168 = vector.multi_reduction <add>, %165, %cst_69 [1] : vector<1x256xf32> to vector<1xf32>
      %169 = vector.shape_cast %168 : vector<1xf32> to vector<1x1xf32>
      %cst_70 = arith.constant 2.560000e+02 : f32
      %170 = vector.broadcast %cst_70 : f32 to vector<1x1xf32>
      %171 = arith.divf %169, %170 : vector<1x1xf32>
      %172 = vector.broadcast %171 : vector<1x1xf32> to vector<1x256xf32>
      %173 = arith.subf %165, %172 : vector<1x256xf32>
      %174 = arith.mulf %173, %173 : vector<1x256xf32>
      %cst_71 = arith.constant dense<0.000000e+00> : vector<1xf32>
      %175 = vector.multi_reduction <add>, %174, %cst_71 [1] : vector<1x256xf32> to vector<1xf32>
      %176 = vector.shape_cast %175 : vector<1xf32> to vector<1x1xf32>
      %cst_72 = arith.constant 2.560000e+02 : f32
      %177 = vector.broadcast %cst_72 : f32 to vector<1x1xf32>
      %178 = arith.divf %176, %177 : vector<1x1xf32>
      %cst_73 = arith.constant 9.99999974E-6 : f32
      %179 = vector.broadcast %cst_73 : f32 to vector<1x1xf32>
      %180 = arith.addf %178, %179 : vector<1x1xf32>
      %181 = math.rsqrt %180 : vector<1x1xf32>
      %182 = vector.broadcast %181 : vector<1x1xf32> to vector<1x256xf32>
      %183 = arith.mulf %173, %182 : vector<1x256xf32>
      %184 = arith.mulf %183, %166 : vector<1x256xf32>
      %185 = arith.addf %184, %167 : vector<1x256xf32>
      %186 = arith.truncf %185 : vector<1x256xf32> to vector<1x256xbf16>
      %c0_74 = arith.constant 0 : index
      %c0_75 = arith.constant 0 : index
      %187 = vector.load %arg26[%c0_74, %c0_75] : memref<256x128xbf16, #tpu.memory_space<vmem>>, vector<256x128xbf16>
      %cst_76 = arith.constant dense<0.000000e+00> : vector<1x128xf32>
      %188 = tpu.matmul %186, %187, %cst_76 {dimension_numbers = #tpu.dot_dimension_numbers<[1], [0], [0], [1], [0, 0, 1, 1], [], []>} : vector<1x256xbf16>, vector<256x128xbf16>, vector<1x128xf32> -> vector<1x128xf32>
      %189 = arith.mulf %188, %188 : vector<1x128xf32>
      %cst_77 = arith.constant dense<0.000000e+00> : vector<1xf32>
      %190 = vector.multi_reduction <add>, %189, %cst_77 [1] : vector<1x128xf32> to vector<1xf32>
      %191 = vector.shape_cast %190 : vector<1xf32> to vector<1x1xf32>
      %192 = math.rsqrt %191 : vector<1x1xf32>
      %193 = vector.broadcast %192 : vector<1x1xf32> to vector<1x128xf32>
      %194 = arith.mulf %188, %193 : vector<1x128xf32>
      %c0_78 = arith.constant 0 : index
      %c0_79 = arith.constant 0 : index
      %c0_80 = arith.constant 0 : index
      %195 = vector.load %arg27[%c0_78, %c0_79, %c0_80] : memref<1x1x128xf32, #tpu.memory_space<vmem>>, vector<1x1x128xf32>
      %196 = vector.shape_cast %195 : vector<1x1x128xf32> to vector<1x128xf32>
      %197 = vector.shape_cast %194 : vector<1x128xf32> to vector<1x1x128xf32>
      tpu.vector_store %arg27[%c0_78, %c0_79, %c0_80], %197 {strides = array<i32>} : memref<1x1x128xf32, #tpu.memory_space<vmem>>, vector<1x1x128xf32>,
    } else {
    }
    return
  }
  func.func @transform_0(%arg0: i32, %arg1: i32) -> (i32, i32, i32) {
    %c0_i32 = arith.constant 0 : i32
    %c0_i32_0 = arith.constant 0 : i32
    %c0_i32_1 = arith.constant 0 : i32
    return %arg0, %c0_i32, %c0_i32_0 : i32, i32, i32
  }
  func.func @transform_1(%arg0: i32, %arg1: i32) -> (i32, i32) {
    %c0_i32 = arith.constant 0 : i32
    %c0_i32_0 = arith.constant 0 : i32
    %c0_i32_1 = arith.constant 0 : i32
    return %c0_i32, %c0_i32_0 : i32, i32
  }
  func.func @transform_2(%arg0: i32, %arg1: i32) -> (i32, i32) {
    %c0_i32 = arith.constant 0 : i32
    %c0_i32_0 = arith.constant 0 : i32
    %c0_i32_1 = arith.constant 0 : i32
    return %c0_i32, %c0_i32_0 : i32, i32
  }
  func.func @transform_3(%arg0: i32, %arg1: i32) -> (i32, i32) {
    %c0_i32 = arith.constant 0 : i32
    %c0_i32_0 = arith.constant 0 : i32
    %c0_i32_1 = arith.constant 0 : i32
    return %c0_i32, %c0_i32_0 : i32, i32
  }
  func.func @transform_4(%arg0: i32, %arg1: i32) -> (i32, i32) {
    %c0_i32 = arith.constant 0 : i32
    %c0_i32_0 = arith.constant 0 : i32
    %c0_i32_1 = arith.constant 0 : i32
    return %c0_i32, %c0_i32_0 : i32, i32
  }
  func.func @transform_5(%arg0: i32, %arg1: i32) -> (i32, i32) {
    %c0_i32 = arith.constant 0 : i32
    %c0_i32_0 = arith.constant 0 : i32
    %c0_i32_1 = arith.constant 0 : i32
    return %c0_i32, %c0_i32_0 : i32, i32
  }
  func.func @transform_6(%arg0: i32, %arg1: i32) -> (i32, i32) {
    %c0_i32 = arith.constant 0 : i32
    %c0_i32_0 = arith.constant 0 : i32
    %c0_i32_1 = arith.constant 0 : i32
    return %c0_i32, %c0_i32_0 : i32, i32
  }
  func.func @transform_7(%arg0: i32, %arg1: i32) -> (i32, i32) {
    %c0_i32 = arith.constant 0 : i32
    %c0_i32_0 = arith.constant 0 : i32
    %c0_i32_1 = arith.constant 0 : i32
    return %c0_i32, %c0_i32_0 : i32, i32
  }
  func.func @transform_8(%arg0: i32, %arg1: i32) -> (i32, i32) {
    %c0_i32 = arith.constant 0 : i32
    %c0_i32_0 = arith.constant 0 : i32
    %c0_i32_1 = arith.constant 0 : i32
    return %c0_i32, %c0_i32_0 : i32, i32
  }
  func.func @transform_9(%arg0: i32, %arg1: i32) -> (i32, i32, i32) {
    %c0_i32 = arith.constant 0 : i32
    %c0_i32_0 = arith.constant 0 : i32
    %c0_i32_1 = arith.constant 0 : i32
    %c0_i32_2 = arith.constant 0 : i32
    return %c0_i32, %c0_i32_0, %c0_i32_1 : i32, i32, i32
  }
  func.func @transform_10(%arg0: i32, %arg1: i32) -> (i32, i32, i32) {
    %c0_i32 = arith.constant 0 : i32
    %c0_i32_0 = arith.constant 0 : i32
    %c0_i32_1 = arith.constant 0 : i32
    return %arg1, %c0_i32, %c0_i32_0 : i32, i32, i32
  }
  func.func @transform_11(%arg0: i32, %arg1: i32) -> (i32, i32, i32) {
    %c0_i32 = arith.constant 0 : i32
    %c0_i32_0 = arith.constant 0 : i32
    %c0_i32_1 = arith.constant 0 : i32
    return %arg1, %c0_i32, %c0_i32_0 : i32, i32, i32
  }
  func.func @transform_12(%arg0: i32, %arg1: i32) -> (i32, i32, i32) {
    %c0_i32 = arith.constant 0 : i32
    %c0_i32_0 = arith.constant 0 : i32
    %c0_i32_1 = arith.constant 0 : i32
    return %arg1, %c0_i32, %c0_i32_0 : i32, i32, i32
  }
  func.func @transform_13(%arg0: i32, %arg1: i32) -> (i32, i32, i32) {
    %c0_i32 = arith.constant 0 : i32
    %c0_i32_0 = arith.constant 0 : i32
    %c0_i32_1 = arith.constant 0 : i32
    return %arg1, %c0_i32, %c0_i32_0 : i32, i32, i32
  }
  func.func @transform_14(%arg0: i32, %arg1: i32) -> (i32, i32, i32) {
    %c0_i32 = arith.constant 0 : i32
    %c0_i32_0 = arith.constant 0 : i32
    %c0_i32_1 = arith.constant 0 : i32
    return %arg1, %c0_i32, %c0_i32_0 : i32, i32, i32
  }
  func.func @transform_15(%arg0: i32, %arg1: i32) -> (i32, i32, i32) {
    %c0_i32 = arith.constant 0 : i32
    %c0_i32_0 = arith.constant 0 : i32
    %c0_i32_1 = arith.constant 0 : i32
    return %arg1, %c0_i32, %c0_i32_0 : i32, i32, i32
  }
  func.func @transform_16(%arg0: i32, %arg1: i32) -> (i32, i32, i32) {
    %c0_i32 = arith.constant 0 : i32
    %c0_i32_0 = arith.constant 0 : i32
    %c0_i32_1 = arith.constant 0 : i32
    return %arg1, %c0_i32, %c0_i32_0 : i32, i32, i32
  }
  func.func @transform_17(%arg0: i32, %arg1: i32) -> (i32, i32, i32) {
    %c0_i32 = arith.constant 0 : i32
    %c0_i32_0 = arith.constant 0 : i32
    %c0_i32_1 = arith.constant 0 : i32
    return %arg1, %c0_i32, %c0_i32_0 : i32, i32, i32
  }
  func.func @transform_18(%arg0: i32, %arg1: i32) -> (i32, i32, i32) {
    %c0_i32 = arith.constant 0 : i32
    %c0_i32_0 = arith.constant 0 : i32
    %c0_i32_1 = arith.constant 0 : i32
    return %arg1, %c0_i32, %c0_i32_0 : i32, i32, i32
  }
  func.func @transform_19(%arg0: i32, %arg1: i32) -> (i32, i32, i32) {
    %c0_i32 = arith.constant 0 : i32
    %c0_i32_0 = arith.constant 0 : i32
    %c0_i32_1 = arith.constant 0 : i32
    return %arg1, %c0_i32, %c0_i32_0 : i32, i32, i32
  }
  func.func @transform_20(%arg0: i32, %arg1: i32) -> (i32, i32, i32) {
    %c0_i32 = arith.constant 0 : i32
    %c0_i32_0 = arith.constant 0 : i32
    %c0_i32_1 = arith.constant 0 : i32
    return %arg1, %c0_i32, %c0_i32_0 : i32, i32, i32
  }
  func.func @transform_21(%arg0: i32, %arg1: i32) -> (i32, i32, i32) {
    %c0_i32 = arith.constant 0 : i32
    %c0_i32_0 = arith.constant 0 : i32
    %c0_i32_1 = arith.constant 0 : i32
    return %arg1, %c0_i32, %c0_i32_0 : i32, i32, i32
  }
  func.func @transform_22(%arg0: i32, %arg1: i32) -> (i32, i32) {
    %c0_i32 = arith.constant 0 : i32
    %c0_i32_0 = arith.constant 0 : i32
    %c0_i32_1 = arith.constant 0 : i32
    return %c0_i32, %c0_i32_0 : i32, i32
  }
  func.func @transform_23(%arg0: i32, %arg1: i32) -> (i32, i32) {
    %c0_i32 = arith.constant 0 : i32
    %c0_i32_0 = arith.constant 0 : i32
    %c0_i32_1 = arith.constant 0 : i32
    return %c0_i32, %c0_i32_0 : i32, i32
  }
  func.func @transform_24(%arg0: i32, %arg1: i32) -> (i32, i32) {
    %c0_i32 = arith.constant 0 : i32
    %c0_i32_0 = arith.constant 0 : i32
    %c0_i32_1 = arith.constant 0 : i32
    return %c0_i32, %c0_i32_0 : i32, i32
  }
  func.func @transform_25(%arg0: i32, %arg1: i32) -> (i32, i32, i32) {
    %c0_i32 = arith.constant 0 : i32
    %c0_i32_0 = arith.constant 0 : i32
    %c0_i32_1 = arith.constant 0 : i32
    return %arg0, %c0_i32, %c0_i32_0 : i32, i32, i32
  }
}

module attributes {stable_mosaic.version = 11 : i64} {
  func.func @_text_kernel(%arg0: i32, %arg1: i32, %arg2: memref<1x1x128xf32, #tpu.memory_space<vmem>>, %arg3: memref<128x32xbf16, #tpu.memory_space<vmem>>, %arg4: memref<1x32xf32, #tpu.memory_space<vmem>>, %arg5: memref<32x128xbf16, #tpu.memory_space<vmem>>, %arg6: memref<1x128xf32, #tpu.memory_space<vmem>>, %arg7: memref<2x128xf32, #tpu.memory_space<vmem>>, %arg8: memref<3x1x128xf32, #tpu.memory_space<vmem>>, %arg9: memref<3x5x128xf32, #tpu.memory_space<vmem>>, %arg10: memref<8x128xf32, #tpu.memory_space<vmem>>, %arg11: memref<1x2x256xf32, #tpu.memory_space<vmem>>, %arg12: memref<1x256x128xbf16, #tpu.memory_space<vmem>>, %arg13: memref<1x1x128xf32, #tpu.memory_space<vmem>>, %arg14: memref<1x1x128xf32, #tpu.memory_space<vmem>>, %arg15: memref<1x1x128xf32, #tpu.memory_space<vmem>>, %arg16: memref<1x128x384xbf16, #tpu.memory_space<vmem>>, %arg17: memref<1x1x384xf32, #tpu.memory_space<vmem>>, %arg18: memref<1x128x128xbf16, #tpu.memory_space<vmem>>, %arg19: memref<1x1x128xf32, #tpu.memory_space<vmem>>, %arg20: memref<1x1x128xf32, #tpu.memory_space<vmem>>, %arg21: memref<1x1x128xf32, #tpu.memory_space<vmem>>, %arg22: memref<1x128x512xbf16, #tpu.memory_space<vmem>>, %arg23: memref<1x1x512xf32, #tpu.memory_space<vmem>>, %arg24: memref<1x512x128xbf16, #tpu.memory_space<vmem>>, %arg25: memref<1x1x128xf32, #tpu.memory_space<vmem>>, %arg26: memref<1x128xf32, #tpu.memory_space<vmem>>, %arg27: memref<1x128xf32, #tpu.memory_space<vmem>>, %arg28: memref<128x128xbf16, #tpu.memory_space<vmem>>, %arg29: memref<24x1xf32, #tpu.memory_space<vmem>>, %arg30: memref<1xf32, #tpu.memory_space<smem>>, %arg31: memref<1x3x1xf32, #tpu.memory_space<vmem>>, %arg32: memref<24x128xf32, #tpu.memory_space<vmem>>) attributes {dimension_semantics = [#tpu.dimension_semantics<parallel>, #tpu.dimension_semantics<arbitrary>], iteration_bounds = array<i64: 2, 2>, scalar_prefetch = 0 : i64, scratch_operands = 1 : i64, tpu.core_type = #tpu.core_type<tc>, window_params = [{transform_indices = @transform_0, window_bounds = array<i64: 1, 1, 128>}, {pipeline_mode = #tpu.pipeline_mode<synchronous>, transform_indices = @transform_1, window_bounds = array<i64: 128, 32>}, {pipeline_mode = #tpu.pipeline_mode<synchronous>, transform_indices = @transform_2, window_bounds = array<i64: 1, 32>}, {pipeline_mode = #tpu.pipeline_mode<synchronous>, transform_indices = @transform_3, window_bounds = array<i64: 32, 128>}, {pipeline_mode = #tpu.pipeline_mode<synchronous>, transform_indices = @transform_4, window_bounds = array<i64: 1, 128>}, {pipeline_mode = #tpu.pipeline_mode<synchronous>, transform_indices = @transform_5, window_bounds = array<i64: 2, 128>}, {pipeline_mode = #tpu.pipeline_mode<synchronous>, transform_indices = @transform_6, window_bounds = array<i64: 3, 1, 128>}, {pipeline_mode = #tpu.pipeline_mode<synchronous>, transform_indices = @transform_7, window_bounds = array<i64: 3, 5, 128>}, {pipeline_mode = #tpu.pipeline_mode<synchronous>, transform_indices = @transform_8, window_bounds = array<i64: 8, 128>}, {pipeline_mode = #tpu.pipeline_mode<synchronous>, transform_indices = @transform_9, window_bounds = array<i64: 1, 2, 256>}, {pipeline_mode = #tpu.pipeline_mode<synchronous>, transform_indices = @transform_10, window_bounds = array<i64: 1, 256, 128>}, {pipeline_mode = #tpu.pipeline_mode<synchronous>, transform_indices = @transform_11, window_bounds = array<i64: 1, 1, 128>}, {transform_indices = @transform_12, window_bounds = array<i64: 1, 1, 128>}, {transform_indices = @transform_13, window_bounds = array<i64: 1, 1, 128>}, {transform_indices = @transform_14, window_bounds = array<i64: 1, 128, 384>}, {transform_indices = @transform_15, window_bounds = array<i64: 1, 1, 384>}, {transform_indices = @transform_16, window_bounds = array<i64: 1, 128, 128>}, {transform_indices = @transform_17, window_bounds = array<i64: 1, 1, 128>}, {transform_indices = @transform_18, window_bounds = array<i64: 1, 1, 128>}, {transform_indices = @transform_19, window_bounds = array<i64: 1, 1, 128>}, {transform_indices = @transform_20, window_bounds = array<i64: 1, 128, 512>}, {transform_indices = @transform_21, window_bounds = array<i64: 1, 1, 512>}, {transform_indices = @transform_22, window_bounds = array<i64: 1, 512, 128>}, {transform_indices = @transform_23, window_bounds = array<i64: 1, 1, 128>}, {pipeline_mode = #tpu.pipeline_mode<synchronous>, transform_indices = @transform_24, window_bounds = array<i64: 1, 128>}, {pipeline_mode = #tpu.pipeline_mode<synchronous>, transform_indices = @transform_25, window_bounds = array<i64: 1, 128>}, {pipeline_mode = #tpu.pipeline_mode<synchronous>, transform_indices = @transform_26, window_bounds = array<i64: 128, 128>}, {pipeline_mode = #tpu.pipeline_mode<synchronous>, transform_indices = @transform_27, window_bounds = array<i64: 24, 1>}, {transform_indices = @transform_28, window_bounds = array<i64: 1>}, {transform_indices = @transform_29, window_bounds = array<i64: 1, 3, 1>}]} {
    %c0_i32 = arith.constant 0 : i32
    %0 = arith.cmpi eq, %arg1, %c0_i32 : i32
    %1 = arith.extui %0 : i1 to i32
    %c0_i32_0 = arith.constant 0 : i32
    %2 = arith.cmpi ne, %1, %c0_i32_0 : i32
    scf.if %2 {
      %c0_75 = arith.constant 0 : index
      %c0_76 = arith.constant 0 : index
      %c0_77 = arith.constant 0 : index
      %280 = vector.load %arg2[%c0_75, %c0_76, %c0_77] : memref<1x1x128xf32, #tpu.memory_space<vmem>>, vector<1x1x128xf32>
      %281 = vector.shape_cast %280 : vector<1x1x128xf32> to vector<1x128xf32>
      %282 = arith.truncf %281 : vector<1x128xf32> to vector<1x128xbf16>
      %c0_78 = arith.constant 0 : index
      %c0_79 = arith.constant 0 : index
      %283 = vector.load %arg3[%c0_78, %c0_79] : memref<128x32xbf16, #tpu.memory_space<vmem>>, vector<128x32xbf16>
      %cst_80 = arith.constant dense<0.000000e+00> : vector<1x32xf32>
      %284 = tpu.matmul %282, %283, %cst_80 {dimension_numbers = #tpu.dot_dimension_numbers<[1], [0], [0], [1], [0, 0, 1, 1], [], []>} : vector<1x128xbf16>, vector<128x32xbf16>, vector<1x32xf32> -> vector<1x32xf32>
      %c0_81 = arith.constant 0 : index
      %c0_82 = arith.constant 0 : index
      %285 = vector.load %arg4[%c0_81, %c0_82] : memref<1x32xf32, #tpu.memory_space<vmem>>, vector<1x32xf32>
      %286 = arith.addf %284, %285 : vector<1x32xf32>
      %cst_83 = arith.constant 0.000000e+00 : f32
      %287 = vector.broadcast %cst_83 : f32 to vector<1x32xf32>
      %288 = arith.maximumf %286, %287 : vector<1x32xf32>
      %289 = arith.truncf %288 : vector<1x32xf32> to vector<1x32xbf16>
      %c0_84 = arith.constant 0 : index
      %c0_85 = arith.constant 0 : index
      %290 = vector.load %arg5[%c0_84, %c0_85] : memref<32x128xbf16, #tpu.memory_space<vmem>>, vector<32x128xbf16>
      %cst_86 = arith.constant dense<0.000000e+00> : vector<1x128xf32>
      %291 = tpu.matmul %289, %290, %cst_86 {dimension_numbers = #tpu.dot_dimension_numbers<[1], [0], [0], [1], [0, 0, 1, 1], [], []>} : vector<1x32xbf16>, vector<32x128xbf16>, vector<1x128xf32> -> vector<1x128xf32>
      %c0_87 = arith.constant 0 : index
      %c0_88 = arith.constant 0 : index
      %292 = vector.load %arg6[%c0_87, %c0_88] : memref<1x128xf32, #tpu.memory_space<vmem>>, vector<1x128xf32>
      %293 = arith.addf %291, %292 : vector<1x128xf32>
      %c0_89 = arith.constant 0 : index
      %c0_90 = arith.constant 0 : index
      %294 = vector.load %arg7[%c0_89, %c0_90] : memref<2x128xf32, #tpu.memory_space<vmem>>, vector<2x128xf32>
      %295 = vector.broadcast %293 : vector<1x128xf32> to vector<2x128xf32>
      %296 = arith.addf %294, %295 : vector<2x128xf32>
      %c0_91 = arith.constant 0 : index
      %c0_92 = arith.constant 0 : index
      %c0_93 = arith.constant 0 : index
      %297 = vector.load %arg8[%c0_91, %c0_92, %c0_93] : memref<3x1x128xf32, #tpu.memory_space<vmem>>, vector<1x1x128xf32>
      %298 = vector.shape_cast %297 : vector<1x1x128xf32> to vector<1x128xf32>
      %c0_94 = arith.constant 0 : index
      %c0_95 = arith.constant 0 : index
      %c0_96 = arith.constant 0 : index
      %299 = vector.load %arg9[%c0_94, %c0_95, %c0_96] : memref<3x5x128xf32, #tpu.memory_space<vmem>>, vector<1x5x128xf32>
      %300 = vector.shape_cast %299 : vector<1x5x128xf32> to vector<5x128xf32>
      %c1 = arith.constant 1 : index
      %c0_97 = arith.constant 0 : index
      %c0_98 = arith.constant 0 : index
      %301 = vector.load %arg8[%c1, %c0_97, %c0_98] : memref<3x1x128xf32, #tpu.memory_space<vmem>>, vector<1x1x128xf32>
      %302 = vector.shape_cast %301 : vector<1x1x128xf32> to vector<1x128xf32>
      %c1_99 = arith.constant 1 : index
      %c0_100 = arith.constant 0 : index
      %c0_101 = arith.constant 0 : index
      %303 = vector.load %arg9[%c1_99, %c0_100, %c0_101] : memref<3x5x128xf32, #tpu.memory_space<vmem>>, vector<1x5x128xf32>
      %304 = vector.shape_cast %303 : vector<1x5x128xf32> to vector<5x128xf32>
      %c2 = arith.constant 2 : index
      %c0_102 = arith.constant 0 : index
      %c0_103 = arith.constant 0 : index
      %305 = vector.load %arg8[%c2, %c0_102, %c0_103] : memref<3x1x128xf32, #tpu.memory_space<vmem>>, vector<1x1x128xf32>
      %306 = vector.shape_cast %305 : vector<1x1x128xf32> to vector<1x128xf32>
      %c2_104 = arith.constant 2 : index
      %c0_105 = arith.constant 0 : index
      %c0_106 = arith.constant 0 : index
      %307 = vector.load %arg9[%c2_104, %c0_105, %c0_106] : memref<3x5x128xf32, #tpu.memory_space<vmem>>, vector<1x5x128xf32>
      %308 = vector.shape_cast %307 : vector<1x5x128xf32> to vector<5x128xf32>
      %309 = tpu.concatenate %298, %296, %300, %302, %296, %304, %306, %296, %308 in 0 : vector<1x128xf32>, vector<2x128xf32>, vector<5x128xf32>, vector<1x128xf32>, vector<2x128xf32>, vector<5x128xf32>, vector<1x128xf32>, vector<2x128xf32>, vector<5x128xf32> -> vector<24x128xf32>
      %c0_107 = arith.constant 0 : index
      %c0_108 = arith.constant 0 : index
      %310 = vector.load %arg10[%c0_107, %c0_108] : memref<8x128xf32, #tpu.memory_space<vmem>>, vector<8x128xf32>
      %311 = tpu.concatenate %310, %310, %310 in 0 : vector<8x128xf32>, vector<8x128xf32>, vector<8x128xf32> -> vector<24x128xf32>
      %312 = arith.addf %309, %311 : vector<24x128xf32>
      %c0_109 = arith.constant 0 : index
      %c0_110 = arith.constant 0 : index
      %313 = vector.load %arg32[%c0_109, %c0_110] : memref<24x128xf32, #tpu.memory_space<vmem>>, vector<24x128xf32>
      tpu.vector_store %arg32[%c0_109, %c0_110], %312 {strides = array<i32>} : memref<24x128xf32, #tpu.memory_space<vmem>>, vector<24x128xf32>,
    } else {
    }
    %c1_i32 = arith.constant 1 : i32
    %3 = arith.cmpi sge, %arg1, %c1_i32 : i32
    %c2_i32 = arith.constant 2 : i32
    %4 = arith.cmpi slt, %arg1, %c2_i32 : i32
    %5 = arith.andi %3, %4 : i1
    %6 = arith.extui %5 : i1 to i32
    %c0_i32_1 = arith.constant 0 : i32
    %7 = arith.cmpi ne, %6, %c0_i32_1 : i32
    scf.if %7 {
      %c1_i32_75 = arith.constant 1 : i32
      %280 = arith.subi %arg1, %c1_i32_75 : i32
      %281 = arith.index_cast %280 : i32 to index
      %c0_76 = arith.constant 0 : index
      %c0_77 = arith.constant 0 : index
      %282 = vector.load %arg11[%281, %c0_76, %c0_77] : memref<1x2x256xf32, #tpu.memory_space<vmem>>, vector<1x2x256xf32>
      %283 = vector.shape_cast %282 : vector<1x2x256xf32> to vector<2x256xf32>
      %284 = arith.truncf %283 : vector<2x256xf32> to vector<2x256xbf16>
      %c1_i32_78 = arith.constant 1 : i32
      %285 = arith.subi %arg1, %c1_i32_78 : i32
      %286 = arith.index_cast %285 : i32 to index
      %c0_79 = arith.constant 0 : index
      %c0_80 = arith.constant 0 : index
      %287 = vector.load %arg12[%286, %c0_79, %c0_80] : memref<1x256x128xbf16, #tpu.memory_space<vmem>>, vector<1x256x128xbf16>
      %288 = vector.shape_cast %287 : vector<1x256x128xbf16> to vector<256x128xbf16>
      %cst_81 = arith.constant dense<0.000000e+00> : vector<2x128xf32>
      %289 = tpu.matmul %284, %288, %cst_81 {dimension_numbers = #tpu.dot_dimension_numbers<[1], [0], [0], [1], [0, 0, 1, 1], [], []>} : vector<2x256xbf16>, vector<256x128xbf16>, vector<2x128xf32> -> vector<2x128xf32>
      %c1_i32_82 = arith.constant 1 : i32
      %290 = arith.subi %arg1, %c1_i32_82 : i32
      %291 = arith.index_cast %290 : i32 to index
      %c0_83 = arith.constant 0 : index
      %c0_84 = arith.constant 0 : index
      %292 = vector.load %arg13[%291, %c0_83, %c0_84] : memref<1x1x128xf32, #tpu.memory_space<vmem>>, vector<1x1x128xf32>
      %293 = vector.shape_cast %292 : vector<1x1x128xf32> to vector<1x128xf32>
      %294 = vector.broadcast %293 : vector<1x128xf32> to vector<2x128xf32>
      %295 = arith.addf %289, %294 : vector<2x128xf32>
      %c1 = arith.constant 1 : index
      %c0_85 = arith.constant 0 : index
      %296 = vector.load %arg32[%c1, %c0_85] : memref<24x128xf32, #tpu.memory_space<vmem>>, vector<2x128xf32>
      tpu.vector_store %arg32[%c1, %c0_85], %295 {strides = array<i32>} : memref<24x128xf32, #tpu.memory_space<vmem>>, vector<2x128xf32>,
      %c9 = arith.constant 9 : index
      %c0_86 = arith.constant 0 : index
      %297 = vector.load %arg32[%c9, %c0_86] : memref<24x128xf32, #tpu.memory_space<vmem>>, vector<2x128xf32>
      tpu.vector_store %arg32[%c9, %c0_86], %295 {strides = array<i32>} : memref<24x128xf32, #tpu.memory_space<vmem>>, vector<2x128xf32>,
      %c17 = arith.constant 17 : index
      %c0_87 = arith.constant 0 : index
      %298 = vector.load %arg32[%c17, %c0_87] : memref<24x128xf32, #tpu.memory_space<vmem>>, vector<2x128xf32>
      tpu.vector_store %arg32[%c17, %c0_87], %295 {strides = array<i32>} : memref<24x128xf32, #tpu.memory_space<vmem>>, vector<2x128xf32>,
    } else {
    }
    %8 = tpu.iota {dimensions = array<i32: 0>} : vector<8x8xi32>
    %9 = tpu.iota {dimensions = array<i32: 1>} : vector<8x8xi32>
    %10 = arith.cmpi sle, %9, %8 : vector<8x8xi32>
    %cst = arith.constant 0.000000e+00 : f32
    %cst_2 = arith.constant -1.000000e+09 : f32
    %11 = vector.broadcast %cst : f32 to vector<8x8xf32>
    %12 = vector.broadcast %cst_2 : f32 to vector<8x8xf32>
    %13 = arith.select %10, %11, %12 : vector<8x8xi1>, vector<8x8xf32>
    %c0 = arith.constant 0 : index
    %c0_3 = arith.constant 0 : index
    %14 = vector.load %arg32[%c0, %c0_3] : memref<24x128xf32, #tpu.memory_space<vmem>>, vector<24x128xf32>
    %c0_4 = arith.constant 0 : index
    %c0_5 = arith.constant 0 : index
    %c0_6 = arith.constant 0 : index
    %15 = vector.load %arg14[%c0_4, %c0_5, %c0_6] : memref<1x1x128xf32, #tpu.memory_space<vmem>>, vector<1x1x128xf32>
    %16 = vector.shape_cast %15 : vector<1x1x128xf32> to vector<1x128xf32>
    %c0_7 = arith.constant 0 : index
    %c0_8 = arith.constant 0 : index
    %c0_9 = arith.constant 0 : index
    %17 = vector.load %arg15[%c0_7, %c0_8, %c0_9] : memref<1x1x128xf32, #tpu.memory_space<vmem>>, vector<1x1x128xf32>
    %18 = vector.shape_cast %17 : vector<1x1x128xf32> to vector<1x128xf32>
    %c0_10 = arith.constant 0 : index
    %c0_11 = arith.constant 0 : index
    %c0_12 = arith.constant 0 : index
    %19 = vector.load %arg16[%c0_10, %c0_11, %c0_12] : memref<1x128x384xbf16, #tpu.memory_space<vmem>>, vector<1x128x384xbf16>
    %20 = vector.shape_cast %19 : vector<1x128x384xbf16> to vector<128x384xbf16>
    %c0_13 = arith.constant 0 : index
    %c0_14 = arith.constant 0 : index
    %c0_15 = arith.constant 0 : index
    %21 = vector.load %arg17[%c0_13, %c0_14, %c0_15] : memref<1x1x384xf32, #tpu.memory_space<vmem>>, vector<1x1x384xf32>
    %22 = vector.shape_cast %21 : vector<1x1x384xf32> to vector<1x384xf32>
    %c0_16 = arith.constant 0 : index
    %c0_17 = arith.constant 0 : index
    %c0_18 = arith.constant 0 : index
    %23 = vector.load %arg18[%c0_16, %c0_17, %c0_18] : memref<1x128x128xbf16, #tpu.memory_space<vmem>>, vector<1x128x128xbf16>
    %24 = vector.shape_cast %23 : vector<1x128x128xbf16> to vector<128x128xbf16>
    %c0_19 = arith.constant 0 : index
    %c0_20 = arith.constant 0 : index
    %c0_21 = arith.constant 0 : index
    %25 = vector.load %arg19[%c0_19, %c0_20, %c0_21] : memref<1x1x128xf32, #tpu.memory_space<vmem>>, vector<1x1x128xf32>
    %26 = vector.shape_cast %25 : vector<1x1x128xf32> to vector<1x128xf32>
    %c0_22 = arith.constant 0 : index
    %c0_23 = arith.constant 0 : index
    %c0_24 = arith.constant 0 : index
    %27 = vector.load %arg20[%c0_22, %c0_23, %c0_24] : memref<1x1x128xf32, #tpu.memory_space<vmem>>, vector<1x1x128xf32>
    %28 = vector.shape_cast %27 : vector<1x1x128xf32> to vector<1x128xf32>
    %c0_25 = arith.constant 0 : index
    %c0_26 = arith.constant 0 : index
    %c0_27 = arith.constant 0 : index
    %29 = vector.load %arg21[%c0_25, %c0_26, %c0_27] : memref<1x1x128xf32, #tpu.memory_space<vmem>>, vector<1x1x128xf32>
    %30 = vector.shape_cast %29 : vector<1x1x128xf32> to vector<1x128xf32>
    %c0_28 = arith.constant 0 : index
    %c0_29 = arith.constant 0 : index
    %c0_30 = arith.constant 0 : index
    %31 = vector.load %arg22[%c0_28, %c0_29, %c0_30] : memref<1x128x512xbf16, #tpu.memory_space<vmem>>, vector<1x128x512xbf16>
    %32 = vector.shape_cast %31 : vector<1x128x512xbf16> to vector<128x512xbf16>
    %c0_31 = arith.constant 0 : index
    %c0_32 = arith.constant 0 : index
    %c0_33 = arith.constant 0 : index
    %33 = vector.load %arg23[%c0_31, %c0_32, %c0_33] : memref<1x1x512xf32, #tpu.memory_space<vmem>>, vector<1x1x512xf32>
    %34 = vector.shape_cast %33 : vector<1x1x512xf32> to vector<1x512xf32>
    %c0_34 = arith.constant 0 : index
    %c0_35 = arith.constant 0 : index
    %c0_36 = arith.constant 0 : index
    %35 = vector.load %arg24[%c0_34, %c0_35, %c0_36] : memref<1x512x128xbf16, #tpu.memory_space<vmem>>, vector<1x512x128xbf16>
    %36 = vector.shape_cast %35 : vector<1x512x128xbf16> to vector<512x128xbf16>
    %c0_37 = arith.constant 0 : index
    %c0_38 = arith.constant 0 : index
    %c0_39 = arith.constant 0 : index
    %37 = vector.load %arg25[%c0_37, %c0_38, %c0_39] : memref<1x1x128xf32, #tpu.memory_space<vmem>>, vector<1x1x128xf32>
    %38 = vector.shape_cast %37 : vector<1x1x128xf32> to vector<1x128xf32>
    %cst_40 = arith.constant dense<0.000000e+00> : vector<24xf32>
    %39 = vector.multi_reduction <add>, %14, %cst_40 [1] : vector<24x128xf32> to vector<24xf32>
    %40 = vector.shape_cast %39 : vector<24xf32> to vector<24x1xf32>
    %cst_41 = arith.constant 1.280000e+02 : f32
    %41 = vector.broadcast %cst_41 : f32 to vector<24x1xf32>
    %42 = arith.divf %40, %41 : vector<24x1xf32>
    %43 = vector.broadcast %42 : vector<24x1xf32> to vector<24x128xf32>
    %44 = arith.subf %14, %43 : vector<24x128xf32>
    %45 = arith.mulf %44, %44 : vector<24x128xf32>
    %cst_42 = arith.constant dense<0.000000e+00> : vector<24xf32>
    %46 = vector.multi_reduction <add>, %45, %cst_42 [1] : vector<24x128xf32> to vector<24xf32>
    %47 = vector.shape_cast %46 : vector<24xf32> to vector<24x1xf32>
    %cst_43 = arith.constant 1.280000e+02 : f32
    %48 = vector.broadcast %cst_43 : f32 to vector<24x1xf32>
    %49 = arith.divf %47, %48 : vector<24x1xf32>
    %cst_44 = arith.constant 9.99999974E-6 : f32
    %50 = vector.broadcast %cst_44 : f32 to vector<24x1xf32>
    %51 = arith.addf %49, %50 : vector<24x1xf32>
    %52 = math.rsqrt %51 : vector<24x1xf32>
    %53 = vector.broadcast %52 : vector<24x1xf32> to vector<24x128xf32>
    %54 = arith.mulf %44, %53 : vector<24x128xf32>
    %55 = vector.broadcast %16 : vector<1x128xf32> to vector<24x128xf32>
    %56 = arith.mulf %54, %55 : vector<24x128xf32>
    %57 = vector.broadcast %18 : vector<1x128xf32> to vector<24x128xf32>
    %58 = arith.addf %56, %57 : vector<24x128xf32>
    %59 = arith.truncf %58 : vector<24x128xf32> to vector<24x128xbf16>
    %cst_45 = arith.constant dense<0.000000e+00> : vector<24x384xf32>
    %60 = tpu.matmul %59, %20, %cst_45 {dimension_numbers = #tpu.dot_dimension_numbers<[1], [0], [0], [1], [0, 0, 1, 1], [], []>} : vector<24x128xbf16>, vector<128x384xbf16>, vector<24x384xf32> -> vector<24x384xf32>
    %61 = vector.broadcast %22 : vector<1x384xf32> to vector<24x384xf32>
    %62 = arith.addf %60, %61 : vector<24x384xf32>
    %63 = vector.extract_strided_slice %62 {offsets = [0, 0], sizes = [8, 32], strides = [1, 1]} : vector<24x384xf32> to vector<8x32xf32>
    %64 = vector.shape_cast %63 : vector<8x32xf32> to vector<1x8x32xf32>
    %65 = vector.extract_strided_slice %62 {offsets = [0, 32], sizes = [8, 32], strides = [1, 1]} : vector<24x384xf32> to vector<8x32xf32>
    %66 = vector.shape_cast %65 : vector<8x32xf32> to vector<1x8x32xf32>
    %67 = vector.extract_strided_slice %62 {offsets = [0, 64], sizes = [8, 32], strides = [1, 1]} : vector<24x384xf32> to vector<8x32xf32>
    %68 = vector.shape_cast %67 : vector<8x32xf32> to vector<1x8x32xf32>
    %69 = vector.extract_strided_slice %62 {offsets = [0, 96], sizes = [8, 32], strides = [1, 1]} : vector<24x384xf32> to vector<8x32xf32>
    %70 = vector.shape_cast %69 : vector<8x32xf32> to vector<1x8x32xf32>
    %71 = tpu.concatenate %64, %66, %68, %70 in 0 : vector<1x8x32xf32>, vector<1x8x32xf32>, vector<1x8x32xf32>, vector<1x8x32xf32> -> vector<4x8x32xf32>
    %72 = vector.extract_strided_slice %62 {offsets = [0, 128], sizes = [8, 32], strides = [1, 1]} : vector<24x384xf32> to vector<8x32xf32>
    %73 = vector.shape_cast %72 : vector<8x32xf32> to vector<1x8x32xf32>
    %74 = vector.extract_strided_slice %62 {offsets = [0, 160], sizes = [8, 32], strides = [1, 1]} : vector<24x384xf32> to vector<8x32xf32>
    %75 = vector.shape_cast %74 : vector<8x32xf32> to vector<1x8x32xf32>
    %76 = vector.extract_strided_slice %62 {offsets = [0, 192], sizes = [8, 32], strides = [1, 1]} : vector<24x384xf32> to vector<8x32xf32>
    %77 = vector.shape_cast %76 : vector<8x32xf32> to vector<1x8x32xf32>
    %78 = vector.extract_strided_slice %62 {offsets = [0, 224], sizes = [8, 32], strides = [1, 1]} : vector<24x384xf32> to vector<8x32xf32>
    %79 = vector.shape_cast %78 : vector<8x32xf32> to vector<1x8x32xf32>
    %80 = tpu.concatenate %73, %75, %77, %79 in 0 : vector<1x8x32xf32>, vector<1x8x32xf32>, vector<1x8x32xf32>, vector<1x8x32xf32> -> vector<4x8x32xf32>
    %81 = vector.extract_strided_slice %62 {offsets = [0, 256], sizes = [8, 32], strides = [1, 1]} : vector<24x384xf32> to vector<8x32xf32>
    %82 = vector.shape_cast %81 : vector<8x32xf32> to vector<1x8x32xf32>
    %83 = vector.extract_strided_slice %62 {offsets = [0, 288], sizes = [8, 32], strides = [1, 1]} : vector<24x384xf32> to vector<8x32xf32>
    %84 = vector.shape_cast %83 : vector<8x32xf32> to vector<1x8x32xf32>
    %85 = vector.extract_strided_slice %62 {offsets = [0, 320], sizes = [8, 32], strides = [1, 1]} : vector<24x384xf32> to vector<8x32xf32>
    %86 = vector.shape_cast %85 : vector<8x32xf32> to vector<1x8x32xf32>
    %87 = vector.extract_strided_slice %62 {offsets = [0, 352], sizes = [8, 32], strides = [1, 1]} : vector<24x384xf32> to vector<8x32xf32>
    %88 = vector.shape_cast %87 : vector<8x32xf32> to vector<1x8x32xf32>
    %89 = tpu.concatenate %82, %84, %86, %88 in 0 : vector<1x8x32xf32>, vector<1x8x32xf32>, vector<1x8x32xf32>, vector<1x8x32xf32> -> vector<4x8x32xf32>
    %90 = arith.truncf %71 : vector<4x8x32xf32> to vector<4x8x32xbf16>
    %91 = arith.truncf %80 : vector<4x8x32xf32> to vector<4x8x32xbf16>
    "tpu.trace_start"() <{level = 10 : i32, message = "hld,hmd->hlm"}> : () -> ()
    %cst_46 = arith.constant dense<0.000000e+00> : vector<4x8x8xf32>
    %92 = tpu.matmul %90, %91, %cst_46 {dimension_numbers = #tpu.dot_dimension_numbers<[2], [2], [1], [1], [0, 0, 0, 1, 1, 1], [0], [0]>} : vector<4x8x32xbf16>, vector<4x8x32xbf16>, vector<4x8x8xf32> -> vector<4x8x8xf32>
    "tpu.trace_stop"() : () -> ()
    %cst_47 = arith.constant 0.176776692 : f32
    %93 = vector.broadcast %cst_47 : f32 to vector<4x8x8xf32>
    %94 = arith.mulf %92, %93 : vector<4x8x8xf32>
    %95 = vector.shape_cast %13 : vector<8x8xf32> to vector<1x8x8xf32>
    %96 = vector.broadcast %95 : vector<1x8x8xf32> to vector<4x8x8xf32>
    %97 = arith.addf %94, %96 : vector<4x8x8xf32>
    %cst_48 = arith.constant dense<0xFF800000> : vector<4x8xf32>
    %98 = vector.multi_reduction <maximumf>, %97, %cst_48 [2] : vector<4x8x8xf32> to vector<4x8xf32>
    %99 = vector.shape_cast %98 : vector<4x8xf32> to vector<4x8x1xf32>
    %100 = vector.broadcast %99 : vector<4x8x1xf32> to vector<4x8x8xf32>
    %101 = arith.subf %97, %100 : vector<4x8x8xf32>
    %102 = math.exp %101 : vector<4x8x8xf32>
    %cst_49 = arith.constant dense<0.000000e+00> : vector<4x8xf32>
    %103 = vector.multi_reduction <add>, %102, %cst_49 [2] : vector<4x8x8xf32> to vector<4x8xf32>
    %104 = vector.shape_cast %103 : vector<4x8xf32> to vector<4x8x1xf32>
    %105 = tpu.reciprocal %104 {approx = true} : vector<4x8x1xf32> -> vector<4x8x1xf32>
    %106 = vector.broadcast %105 : vector<4x8x1xf32> to vector<4x8x8xf32>
    %107 = arith.mulf %102, %106 : vector<4x8x8xf32>
    %108 = arith.truncf %107 : vector<4x8x8xf32> to vector<4x8x8xbf16>
    %109 = arith.truncf %89 : vector<4x8x32xf32> to vector<4x8x32xbf16>
    "tpu.trace_start"() <{level = 10 : i32, message = "hlm,hmd->hld"}> : () -> ()
    %cst_50 = arith.constant dense<0.000000e+00> : vector<4x8x32xf32>
    %110 = tpu.matmul %108, %109, %cst_50 {dimension_numbers = #tpu.dot_dimension_numbers<[2], [1], [1], [2], [0, 0, 0, 1, 1, 2], [0], [0]>} : vector<4x8x8xbf16>, vector<4x8x32xbf16>, vector<4x8x32xf32> -> vector<4x8x32xf32>
    "tpu.trace_stop"() : () -> ()
    %111 = vector.extract_strided_slice %110 {offsets = [0, 0, 0], sizes = [1, 8, 32], strides = [1, 1, 1]} : vector<4x8x32xf32> to vector<1x8x32xf32>
    %112 = vector.shape_cast %111 : vector<1x8x32xf32> to vector<8x32xf32>
    %113 = vector.extract_strided_slice %110 {offsets = [1, 0, 0], sizes = [1, 8, 32], strides = [1, 1, 1]} : vector<4x8x32xf32> to vector<1x8x32xf32>
    %114 = vector.shape_cast %113 : vector<1x8x32xf32> to vector<8x32xf32>
    %115 = vector.extract_strided_slice %110 {offsets = [2, 0, 0], sizes = [1, 8, 32], strides = [1, 1, 1]} : vector<4x8x32xf32> to vector<1x8x32xf32>
    %116 = vector.shape_cast %115 : vector<1x8x32xf32> to vector<8x32xf32>
    %117 = vector.extract_strided_slice %110 {offsets = [3, 0, 0], sizes = [1, 8, 32], strides = [1, 1, 1]} : vector<4x8x32xf32> to vector<1x8x32xf32>
    %118 = vector.shape_cast %117 : vector<1x8x32xf32> to vector<8x32xf32>
    %119 = tpu.concatenate %112, %114, %116, %118 in 1 : vector<8x32xf32>, vector<8x32xf32>, vector<8x32xf32>, vector<8x32xf32> -> vector<8x128xf32>
    %120 = vector.extract_strided_slice %62 {offsets = [8, 0], sizes = [8, 32], strides = [1, 1]} : vector<24x384xf32> to vector<8x32xf32>
    %121 = vector.shape_cast %120 : vector<8x32xf32> to vector<1x8x32xf32>
    %122 = vector.extract_strided_slice %62 {offsets = [8, 32], sizes = [8, 32], strides = [1, 1]} : vector<24x384xf32> to vector<8x32xf32>
    %123 = vector.shape_cast %122 : vector<8x32xf32> to vector<1x8x32xf32>
    %124 = vector.extract_strided_slice %62 {offsets = [8, 64], sizes = [8, 32], strides = [1, 1]} : vector<24x384xf32> to vector<8x32xf32>
    %125 = vector.shape_cast %124 : vector<8x32xf32> to vector<1x8x32xf32>
    %126 = vector.extract_strided_slice %62 {offsets = [8, 96], sizes = [8, 32], strides = [1, 1]} : vector<24x384xf32> to vector<8x32xf32>
    %127 = vector.shape_cast %126 : vector<8x32xf32> to vector<1x8x32xf32>
    %128 = tpu.concatenate %121, %123, %125, %127 in 0 : vector<1x8x32xf32>, vector<1x8x32xf32>, vector<1x8x32xf32>, vector<1x8x32xf32> -> vector<4x8x32xf32>
    %129 = vector.extract_strided_slice %62 {offsets = [8, 128], sizes = [8, 32], strides = [1, 1]} : vector<24x384xf32> to vector<8x32xf32>
    %130 = vector.shape_cast %129 : vector<8x32xf32> to vector<1x8x32xf32>
    %131 = vector.extract_strided_slice %62 {offsets = [8, 160], sizes = [8, 32], strides = [1, 1]} : vector<24x384xf32> to vector<8x32xf32>
    %132 = vector.shape_cast %131 : vector<8x32xf32> to vector<1x8x32xf32>
    %133 = vector.extract_strided_slice %62 {offsets = [8, 192], sizes = [8, 32], strides = [1, 1]} : vector<24x384xf32> to vector<8x32xf32>
    %134 = vector.shape_cast %133 : vector<8x32xf32> to vector<1x8x32xf32>
    %135 = vector.extract_strided_slice %62 {offsets = [8, 224], sizes = [8, 32], strides = [1, 1]} : vector<24x384xf32> to vector<8x32xf32>
    %136 = vector.shape_cast %135 : vector<8x32xf32> to vector<1x8x32xf32>
    %137 = tpu.concatenate %130, %132, %134, %136 in 0 : vector<1x8x32xf32>, vector<1x8x32xf32>, vector<1x8x32xf32>, vector<1x8x32xf32> -> vector<4x8x32xf32>
    %138 = vector.extract_strided_slice %62 {offsets = [8, 256], sizes = [8, 32], strides = [1, 1]} : vector<24x384xf32> to vector<8x32xf32>
    %139 = vector.shape_cast %138 : vector<8x32xf32> to vector<1x8x32xf32>
    %140 = vector.extract_strided_slice %62 {offsets = [8, 288], sizes = [8, 32], strides = [1, 1]} : vector<24x384xf32> to vector<8x32xf32>
    %141 = vector.shape_cast %140 : vector<8x32xf32> to vector<1x8x32xf32>
    %142 = vector.extract_strided_slice %62 {offsets = [8, 320], sizes = [8, 32], strides = [1, 1]} : vector<24x384xf32> to vector<8x32xf32>
    %143 = vector.shape_cast %142 : vector<8x32xf32> to vector<1x8x32xf32>
    %144 = vector.extract_strided_slice %62 {offsets = [8, 352], sizes = [8, 32], strides = [1, 1]} : vector<24x384xf32> to vector<8x32xf32>
    %145 = vector.shape_cast %144 : vector<8x32xf32> to vector<1x8x32xf32>
    %146 = tpu.concatenate %139, %141, %143, %145 in 0 : vector<1x8x32xf32>, vector<1x8x32xf32>, vector<1x8x32xf32>, vector<1x8x32xf32> -> vector<4x8x32xf32>
    %147 = arith.truncf %128 : vector<4x8x32xf32> to vector<4x8x32xbf16>
    %148 = arith.truncf %137 : vector<4x8x32xf32> to vector<4x8x32xbf16>
    "tpu.trace_start"() <{level = 10 : i32, message = "hld,hmd->hlm"}> : () -> ()
    %cst_51 = arith.constant dense<0.000000e+00> : vector<4x8x8xf32>
    %149 = tpu.matmul %147, %148, %cst_51 {dimension_numbers = #tpu.dot_dimension_numbers<[2], [2], [1], [1], [0, 0, 0, 1, 1, 1], [0], [0]>} : vector<4x8x32xbf16>, vector<4x8x32xbf16>, vector<4x8x8xf32> -> vector<4x8x8xf32>
    "tpu.trace_stop"() : () -> ()
    %cst_52 = arith.constant 0.176776692 : f32
    %150 = vector.broadcast %cst_52 : f32 to vector<4x8x8xf32>
    %151 = arith.mulf %149, %150 : vector<4x8x8xf32>
    %152 = vector.shape_cast %13 : vector<8x8xf32> to vector<1x8x8xf32>
    %153 = vector.broadcast %152 : vector<1x8x8xf32> to vector<4x8x8xf32>
    %154 = arith.addf %151, %153 : vector<4x8x8xf32>
    %cst_53 = arith.constant dense<0xFF800000> : vector<4x8xf32>
    %155 = vector.multi_reduction <maximumf>, %154, %cst_53 [2] : vector<4x8x8xf32> to vector<4x8xf32>
    %156 = vector.shape_cast %155 : vector<4x8xf32> to vector<4x8x1xf32>
    %157 = vector.broadcast %156 : vector<4x8x1xf32> to vector<4x8x8xf32>
    %158 = arith.subf %154, %157 : vector<4x8x8xf32>
    %159 = math.exp %158 : vector<4x8x8xf32>
    %cst_54 = arith.constant dense<0.000000e+00> : vector<4x8xf32>
    %160 = vector.multi_reduction <add>, %159, %cst_54 [2] : vector<4x8x8xf32> to vector<4x8xf32>
    %161 = vector.shape_cast %160 : vector<4x8xf32> to vector<4x8x1xf32>
    %162 = tpu.reciprocal %161 {approx = true} : vector<4x8x1xf32> -> vector<4x8x1xf32>
    %163 = vector.broadcast %162 : vector<4x8x1xf32> to vector<4x8x8xf32>
    %164 = arith.mulf %159, %163 : vector<4x8x8xf32>
    %165 = arith.truncf %164 : vector<4x8x8xf32> to vector<4x8x8xbf16>
    %166 = arith.truncf %146 : vector<4x8x32xf32> to vector<4x8x32xbf16>
    "tpu.trace_start"() <{level = 10 : i32, message = "hlm,hmd->hld"}> : () -> ()
    %cst_55 = arith.constant dense<0.000000e+00> : vector<4x8x32xf32>
    %167 = tpu.matmul %165, %166, %cst_55 {dimension_numbers = #tpu.dot_dimension_numbers<[2], [1], [1], [2], [0, 0, 0, 1, 1, 2], [0], [0]>} : vector<4x8x8xbf16>, vector<4x8x32xbf16>, vector<4x8x32xf32> -> vector<4x8x32xf32>
    "tpu.trace_stop"() : () -> ()
    %168 = vector.extract_strided_slice %167 {offsets = [0, 0, 0], sizes = [1, 8, 32], strides = [1, 1, 1]} : vector<4x8x32xf32> to vector<1x8x32xf32>
    %169 = vector.shape_cast %168 : vector<1x8x32xf32> to vector<8x32xf32>
    %170 = vector.extract_strided_slice %167 {offsets = [1, 0, 0], sizes = [1, 8, 32], strides = [1, 1, 1]} : vector<4x8x32xf32> to vector<1x8x32xf32>
    %171 = vector.shape_cast %170 : vector<1x8x32xf32> to vector<8x32xf32>
    %172 = vector.extract_strided_slice %167 {offsets = [2, 0, 0], sizes = [1, 8, 32], strides = [1, 1, 1]} : vector<4x8x32xf32> to vector<1x8x32xf32>
    %173 = vector.shape_cast %172 : vector<1x8x32xf32> to vector<8x32xf32>
    %174 = vector.extract_strided_slice %167 {offsets = [3, 0, 0], sizes = [1, 8, 32], strides = [1, 1, 1]} : vector<4x8x32xf32> to vector<1x8x32xf32>
    %175 = vector.shape_cast %174 : vector<1x8x32xf32> to vector<8x32xf32>
    %176 = tpu.concatenate %169, %171, %173, %175 in 1 : vector<8x32xf32>, vector<8x32xf32>, vector<8x32xf32>, vector<8x32xf32> -> vector<8x128xf32>
    %177 = vector.extract_strided_slice %62 {offsets = [16, 0], sizes = [8, 32], strides = [1, 1]} : vector<24x384xf32> to vector<8x32xf32>
    %178 = vector.shape_cast %177 : vector<8x32xf32> to vector<1x8x32xf32>
    %179 = vector.extract_strided_slice %62 {offsets = [16, 32], sizes = [8, 32], strides = [1, 1]} : vector<24x384xf32> to vector<8x32xf32>
    %180 = vector.shape_cast %179 : vector<8x32xf32> to vector<1x8x32xf32>
    %181 = vector.extract_strided_slice %62 {offsets = [16, 64], sizes = [8, 32], strides = [1, 1]} : vector<24x384xf32> to vector<8x32xf32>
    %182 = vector.shape_cast %181 : vector<8x32xf32> to vector<1x8x32xf32>
    %183 = vector.extract_strided_slice %62 {offsets = [16, 96], sizes = [8, 32], strides = [1, 1]} : vector<24x384xf32> to vector<8x32xf32>
    %184 = vector.shape_cast %183 : vector<8x32xf32> to vector<1x8x32xf32>
    %185 = tpu.concatenate %178, %180, %182, %184 in 0 : vector<1x8x32xf32>, vector<1x8x32xf32>, vector<1x8x32xf32>, vector<1x8x32xf32> -> vector<4x8x32xf32>
    %186 = vector.extract_strided_slice %62 {offsets = [16, 128], sizes = [8, 32], strides = [1, 1]} : vector<24x384xf32> to vector<8x32xf32>
    %187 = vector.shape_cast %186 : vector<8x32xf32> to vector<1x8x32xf32>
    %188 = vector.extract_strided_slice %62 {offsets = [16, 160], sizes = [8, 32], strides = [1, 1]} : vector<24x384xf32> to vector<8x32xf32>
    %189 = vector.shape_cast %188 : vector<8x32xf32> to vector<1x8x32xf32>
    %190 = vector.extract_strided_slice %62 {offsets = [16, 192], sizes = [8, 32], strides = [1, 1]} : vector<24x384xf32> to vector<8x32xf32>
    %191 = vector.shape_cast %190 : vector<8x32xf32> to vector<1x8x32xf32>
    %192 = vector.extract_strided_slice %62 {offsets = [16, 224], sizes = [8, 32], strides = [1, 1]} : vector<24x384xf32> to vector<8x32xf32>
    %193 = vector.shape_cast %192 : vector<8x32xf32> to vector<1x8x32xf32>
    %194 = tpu.concatenate %187, %189, %191, %193 in 0 : vector<1x8x32xf32>, vector<1x8x32xf32>, vector<1x8x32xf32>, vector<1x8x32xf32> -> vector<4x8x32xf32>
    %195 = vector.extract_strided_slice %62 {offsets = [16, 256], sizes = [8, 32], strides = [1, 1]} : vector<24x384xf32> to vector<8x32xf32>
    %196 = vector.shape_cast %195 : vector<8x32xf32> to vector<1x8x32xf32>
    %197 = vector.extract_strided_slice %62 {offsets = [16, 288], sizes = [8, 32], strides = [1, 1]} : vector<24x384xf32> to vector<8x32xf32>
    %198 = vector.shape_cast %197 : vector<8x32xf32> to vector<1x8x32xf32>
    %199 = vector.extract_strided_slice %62 {offsets = [16, 320], sizes = [8, 32], strides = [1, 1]} : vector<24x384xf32> to vector<8x32xf32>
    %200 = vector.shape_cast %199 : vector<8x32xf32> to vector<1x8x32xf32>
    %201 = vector.extract_strided_slice %62 {offsets = [16, 352], sizes = [8, 32], strides = [1, 1]} : vector<24x384xf32> to vector<8x32xf32>
    %202 = vector.shape_cast %201 : vector<8x32xf32> to vector<1x8x32xf32>
    %203 = tpu.concatenate %196, %198, %200, %202 in 0 : vector<1x8x32xf32>, vector<1x8x32xf32>, vector<1x8x32xf32>, vector<1x8x32xf32> -> vector<4x8x32xf32>
    %204 = arith.truncf %185 : vector<4x8x32xf32> to vector<4x8x32xbf16>
    %205 = arith.truncf %194 : vector<4x8x32xf32> to vector<4x8x32xbf16>
    "tpu.trace_start"() <{level = 10 : i32, message = "hld,hmd->hlm"}> : () -> ()
    %cst_56 = arith.constant dense<0.000000e+00> : vector<4x8x8xf32>
    %206 = tpu.matmul %204, %205, %cst_56 {dimension_numbers = #tpu.dot_dimension_numbers<[2], [2], [1], [1], [0, 0, 0, 1, 1, 1], [0], [0]>} : vector<4x8x32xbf16>, vector<4x8x32xbf16>, vector<4x8x8xf32> -> vector<4x8x8xf32>
    "tpu.trace_stop"() : () -> ()
    %cst_57 = arith.constant 0.176776692 : f32
    %207 = vector.broadcast %cst_57 : f32 to vector<4x8x8xf32>
    %208 = arith.mulf %206, %207 : vector<4x8x8xf32>
    %209 = vector.shape_cast %13 : vector<8x8xf32> to vector<1x8x8xf32>
    %210 = vector.broadcast %209 : vector<1x8x8xf32> to vector<4x8x8xf32>
    %211 = arith.addf %208, %210 : vector<4x8x8xf32>
    %cst_58 = arith.constant dense<0xFF800000> : vector<4x8xf32>
    %212 = vector.multi_reduction <maximumf>, %211, %cst_58 [2] : vector<4x8x8xf32> to vector<4x8xf32>
    %213 = vector.shape_cast %212 : vector<4x8xf32> to vector<4x8x1xf32>
    %214 = vector.broadcast %213 : vector<4x8x1xf32> to vector<4x8x8xf32>
    %215 = arith.subf %211, %214 : vector<4x8x8xf32>
    %216 = math.exp %215 : vector<4x8x8xf32>
    %cst_59 = arith.constant dense<0.000000e+00> : vector<4x8xf32>
    %217 = vector.multi_reduction <add>, %216, %cst_59 [2] : vector<4x8x8xf32> to vector<4x8xf32>
    %218 = vector.shape_cast %217 : vector<4x8xf32> to vector<4x8x1xf32>
    %219 = tpu.reciprocal %218 {approx = true} : vector<4x8x1xf32> -> vector<4x8x1xf32>
    %220 = vector.broadcast %219 : vector<4x8x1xf32> to vector<4x8x8xf32>
    %221 = arith.mulf %216, %220 : vector<4x8x8xf32>
    %222 = arith.truncf %221 : vector<4x8x8xf32> to vector<4x8x8xbf16>
    %223 = arith.truncf %203 : vector<4x8x32xf32> to vector<4x8x32xbf16>
    "tpu.trace_start"() <{level = 10 : i32, message = "hlm,hmd->hld"}> : () -> ()
    %cst_60 = arith.constant dense<0.000000e+00> : vector<4x8x32xf32>
    %224 = tpu.matmul %222, %223, %cst_60 {dimension_numbers = #tpu.dot_dimension_numbers<[2], [1], [1], [2], [0, 0, 0, 1, 1, 2], [0], [0]>} : vector<4x8x8xbf16>, vector<4x8x32xbf16>, vector<4x8x32xf32> -> vector<4x8x32xf32>
    "tpu.trace_stop"() : () -> ()
    %225 = vector.extract_strided_slice %224 {offsets = [0, 0, 0], sizes = [1, 8, 32], strides = [1, 1, 1]} : vector<4x8x32xf32> to vector<1x8x32xf32>
    %226 = vector.shape_cast %225 : vector<1x8x32xf32> to vector<8x32xf32>
    %227 = vector.extract_strided_slice %224 {offsets = [1, 0, 0], sizes = [1, 8, 32], strides = [1, 1, 1]} : vector<4x8x32xf32> to vector<1x8x32xf32>
    %228 = vector.shape_cast %227 : vector<1x8x32xf32> to vector<8x32xf32>
    %229 = vector.extract_strided_slice %224 {offsets = [2, 0, 0], sizes = [1, 8, 32], strides = [1, 1, 1]} : vector<4x8x32xf32> to vector<1x8x32xf32>
    %230 = vector.shape_cast %229 : vector<1x8x32xf32> to vector<8x32xf32>
    %231 = vector.extract_strided_slice %224 {offsets = [3, 0, 0], sizes = [1, 8, 32], strides = [1, 1, 1]} : vector<4x8x32xf32> to vector<1x8x32xf32>
    %232 = vector.shape_cast %231 : vector<1x8x32xf32> to vector<8x32xf32>
    %233 = tpu.concatenate %226, %228, %230, %232 in 1 : vector<8x32xf32>, vector<8x32xf32>, vector<8x32xf32>, vector<8x32xf32> -> vector<8x128xf32>
    %234 = tpu.concatenate %119, %176, %233 in 0 : vector<8x128xf32>, vector<8x128xf32>, vector<8x128xf32> -> vector<24x128xf32>
    %235 = arith.truncf %234 : vector<24x128xf32> to vector<24x128xbf16>
    %cst_61 = arith.constant dense<0.000000e+00> : vector<24x128xf32>
    %236 = tpu.matmul %235, %24, %cst_61 {dimension_numbers = #tpu.dot_dimension_numbers<[1], [0], [0], [1], [0, 0, 1, 1], [], []>} : vector<24x128xbf16>, vector<128x128xbf16>, vector<24x128xf32> -> vector<24x128xf32>
    %237 = arith.addf %14, %236 : vector<24x128xf32>
    %238 = vector.broadcast %26 : vector<1x128xf32> to vector<24x128xf32>
    %239 = arith.addf %237, %238 : vector<24x128xf32>
    %cst_62 = arith.constant dense<0.000000e+00> : vector<24xf32>
    %240 = vector.multi_reduction <add>, %239, %cst_62 [1] : vector<24x128xf32> to vector<24xf32>
    %241 = vector.shape_cast %240 : vector<24xf32> to vector<24x1xf32>
    %cst_63 = arith.constant 1.280000e+02 : f32
    %242 = vector.broadcast %cst_63 : f32 to vector<24x1xf32>
    %243 = arith.divf %241, %242 : vector<24x1xf32>
    %244 = vector.broadcast %243 : vector<24x1xf32> to vector<24x128xf32>
    %245 = arith.subf %239, %244 : vector<24x128xf32>
    %246 = arith.mulf %245, %245 : vector<24x128xf32>
    %cst_64 = arith.constant dense<0.000000e+00> : vector<24xf32>
    %247 = vector.multi_reduction <add>, %246, %cst_64 [1] : vector<24x128xf32> to vector<24xf32>
    %248 = vector.shape_cast %247 : vector<24xf32> to vector<24x1xf32>
    %cst_65 = arith.constant 1.280000e+02 : f32
    %249 = vector.broadcast %cst_65 : f32 to vector<24x1xf32>
    %250 = arith.divf %248, %249 : vector<24x1xf32>
    %cst_66 = arith.constant 9.99999974E-6 : f32
    %251 = vector.broadcast %cst_66 : f32 to vector<24x1xf32>
    %252 = arith.addf %250, %251 : vector<24x1xf32>
    %253 = math.rsqrt %252 : vector<24x1xf32>
    %254 = vector.broadcast %253 : vector<24x1xf32> to vector<24x128xf32>
    %255 = arith.mulf %245, %254 : vector<24x128xf32>
    %256 = vector.broadcast %28 : vector<1x128xf32> to vector<24x128xf32>
    %257 = arith.mulf %255, %256 : vector<24x128xf32>
    %258 = vector.broadcast %30 : vector<1x128xf32> to vector<24x128xf32>
    %259 = arith.addf %257, %258 : vector<24x128xf32>
    %260 = arith.truncf %259 : vector<24x128xf32> to vector<24x128xbf16>
    %cst_67 = arith.constant dense<0.000000e+00> : vector<24x512xf32>
    %261 = tpu.matmul %260, %32, %cst_67 {dimension_numbers = #tpu.dot_dimension_numbers<[1], [0], [0], [1], [0, 0, 1, 1], [], []>} : vector<24x128xbf16>, vector<128x512xbf16>, vector<24x512xf32> -> vector<24x512xf32>
    %262 = vector.broadcast %34 : vector<1x512xf32> to vector<24x512xf32>
    %263 = arith.addf %261, %262 : vector<24x512xf32>
    %cst_68 = arith.constant -1.702000e+00 : f32
    %264 = vector.broadcast %cst_68 : f32 to vector<24x512xf32>
    %265 = arith.mulf %264, %263 : vector<24x512xf32>
    %266 = math.exp %265 : vector<24x512xf32>
    %cst_69 = arith.constant 1.000000e+00 : f32
    %267 = vector.broadcast %cst_69 : f32 to vector<24x512xf32>
    %268 = arith.addf %267, %266 : vector<24x512xf32>
    %269 = tpu.reciprocal %268 {approx = true} : vector<24x512xf32> -> vector<24x512xf32>
    %270 = arith.mulf %263, %269 : vector<24x512xf32>
    %271 = arith.truncf %270 : vector<24x512xf32> to vector<24x512xbf16>
    %cst_70 = arith.constant dense<0.000000e+00> : vector<24x128xf32>
    %272 = tpu.matmul %271, %36, %cst_70 {dimension_numbers = #tpu.dot_dimension_numbers<[1], [0], [0], [1], [0, 0, 1, 1], [], []>} : vector<24x512xbf16>, vector<512x128xbf16>, vector<24x128xf32> -> vector<24x128xf32>
    %273 = arith.addf %239, %272 : vector<24x128xf32>
    %274 = vector.broadcast %38 : vector<1x128xf32> to vector<24x128xf32>
    %275 = arith.addf %273, %274 : vector<24x128xf32>
    %c0_71 = arith.constant 0 : index
    %c0_72 = arith.constant 0 : index
    %276 = vector.load %arg32[%c0_71, %c0_72] : memref<24x128xf32, #tpu.memory_space<vmem>>, vector<24x128xf32>
    tpu.vector_store %arg32[%c0_71, %c0_72], %275 {strides = array<i32>} : memref<24x128xf32, #tpu.memory_space<vmem>>, vector<24x128xf32>,
    %c1_i32_73 = arith.constant 1 : i32
    %277 = arith.cmpi eq, %arg1, %c1_i32_73 : i32
    %278 = arith.extui %277 : i1 to i32
    %c0_i32_74 = arith.constant 0 : i32
    %279 = arith.cmpi ne, %278, %c0_i32_74 : i32
    scf.if %279 {
      %c0_75 = arith.constant 0 : index
      %c0_76 = arith.constant 0 : index
      %280 = vector.load %arg29[%c0_75, %c0_76] : memref<24x1xf32, #tpu.memory_space<vmem>>, vector<24x1xf32>
      %281 = vector.broadcast %280 : vector<24x1xf32> to vector<24x128xf32>
      %282 = arith.mulf %275, %281 : vector<24x128xf32>
      %283 = vector.shape_cast %282 : vector<24x128xf32> to vector<3x8x128xf32>
      %cst_77 = arith.constant dense<0.000000e+00> : vector<3x128xf32>
      %284 = vector.multi_reduction <add>, %283, %cst_77 [1] : vector<3x8x128xf32> to vector<3x128xf32>
      %c0_78 = arith.constant 0 : index
      %c0_79 = arith.constant 0 : index
      %285 = vector.load %arg26[%c0_78, %c0_79] : memref<1x128xf32, #tpu.memory_space<vmem>>, vector<1x128xf32>
      %c0_80 = arith.constant 0 : index
      %c0_81 = arith.constant 0 : index
      %286 = vector.load %arg27[%c0_80, %c0_81] : memref<1x128xf32, #tpu.memory_space<vmem>>, vector<1x128xf32>
      %cst_82 = arith.constant dense<0.000000e+00> : vector<3xf32>
      %287 = vector.multi_reduction <add>, %284, %cst_82 [1] : vector<3x128xf32> to vector<3xf32>
      %288 = vector.shape_cast %287 : vector<3xf32> to vector<3x1xf32>
      %cst_83 = arith.constant 1.280000e+02 : f32
      %289 = vector.broadcast %cst_83 : f32 to vector<3x1xf32>
      %290 = arith.divf %288, %289 : vector<3x1xf32>
      %291 = vector.broadcast %290 : vector<3x1xf32> to vector<3x128xf32>
      %292 = arith.subf %284, %291 : vector<3x128xf32>
      %293 = arith.mulf %292, %292 : vector<3x128xf32>
      %cst_84 = arith.constant dense<0.000000e+00> : vector<3xf32>
      %294 = vector.multi_reduction <add>, %293, %cst_84 [1] : vector<3x128xf32> to vector<3xf32>
      %295 = vector.shape_cast %294 : vector<3xf32> to vector<3x1xf32>
      %cst_85 = arith.constant 1.280000e+02 : f32
      %296 = vector.broadcast %cst_85 : f32 to vector<3x1xf32>
      %297 = arith.divf %295, %296 : vector<3x1xf32>
      %cst_86 = arith.constant 9.99999974E-6 : f32
      %298 = vector.broadcast %cst_86 : f32 to vector<3x1xf32>
      %299 = arith.addf %297, %298 : vector<3x1xf32>
      %300 = math.rsqrt %299 : vector<3x1xf32>
      %301 = vector.broadcast %300 : vector<3x1xf32> to vector<3x128xf32>
      %302 = arith.mulf %292, %301 : vector<3x128xf32>
      %303 = vector.broadcast %285 : vector<1x128xf32> to vector<3x128xf32>
      %304 = arith.mulf %302, %303 : vector<3x128xf32>
      %305 = vector.broadcast %286 : vector<1x128xf32> to vector<3x128xf32>
      %306 = arith.addf %304, %305 : vector<3x128xf32>
      %307 = arith.truncf %306 : vector<3x128xf32> to vector<3x128xbf16>
      %c0_87 = arith.constant 0 : index
      %c0_88 = arith.constant 0 : index
      %308 = vector.load %arg28[%c0_87, %c0_88] : memref<128x128xbf16, #tpu.memory_space<vmem>>, vector<128x128xbf16>
      %cst_89 = arith.constant dense<0.000000e+00> : vector<3x128xf32>
      %309 = tpu.matmul %307, %308, %cst_89 {dimension_numbers = #tpu.dot_dimension_numbers<[1], [0], [0], [1], [0, 0, 1, 1], [], []>} : vector<3x128xbf16>, vector<128x128xbf16>, vector<3x128xf32> -> vector<3x128xf32>
      %310 = arith.mulf %309, %309 : vector<3x128xf32>
      %cst_90 = arith.constant dense<0.000000e+00> : vector<3xf32>
      %311 = vector.multi_reduction <add>, %310, %cst_90 [1] : vector<3x128xf32> to vector<3xf32>
      %312 = vector.shape_cast %311 : vector<3xf32> to vector<3x1xf32>
      %313 = math.rsqrt %312 : vector<3x1xf32>
      %314 = vector.broadcast %313 : vector<3x1xf32> to vector<3x128xf32>
      %315 = arith.mulf %309, %314 : vector<3x128xf32>
      %c0_91 = arith.constant 0 : index
      %c0_92 = arith.constant 0 : index
      %c0_93 = arith.constant 0 : index
      %316 = vector.load %arg2[%c0_91, %c0_92, %c0_93] : memref<1x1x128xf32, #tpu.memory_space<vmem>>, vector<1x1x128xf32>
      %317 = vector.shape_cast %316 : vector<1x1x128xf32> to vector<1x128xf32>
      %318 = vector.broadcast %317 : vector<1x128xf32> to vector<3x128xf32>
      %319 = arith.mulf %318, %315 : vector<3x128xf32>
      %cst_94 = arith.constant dense<0.000000e+00> : vector<3xf32>
      %320 = vector.multi_reduction <add>, %319, %cst_94 [1] : vector<3x128xf32> to vector<3xf32>
      %321 = vector.shape_cast %320 : vector<3xf32> to vector<3x1xf32>
      %c0_95 = arith.constant 0 : index
      %322 = memref.load %arg30[%c0_95] : memref<1xf32, #tpu.memory_space<smem>>
      %323 = vector.broadcast %322 : f32 to vector<3x1xf32>
      %324 = arith.mulf %323, %321 : vector<3x1xf32>
      %c0_96 = arith.constant 0 : index
      %c0_97 = arith.constant 0 : index
      %c0_98 = arith.constant 0 : index
      %325 = vector.load %arg31[%c0_96, %c0_97, %c0_98] : memref<1x3x1xf32, #tpu.memory_space<vmem>>, vector<1x3x1xf32>
      %326 = vector.shape_cast %325 : vector<1x3x1xf32> to vector<3x1xf32>
      %327 = vector.shape_cast %324 : vector<3x1xf32> to vector<1x3x1xf32>
      tpu.vector_store %arg31[%c0_96, %c0_97, %c0_98], %327 {strides = array<i32>} : memref<1x3x1xf32, #tpu.memory_space<vmem>>, vector<1x3x1xf32>,
    } else {
    }
    return
  }
  func.func @transform_0(%arg0: i32, %arg1: i32) -> (i32, i32, i32) {
    %c0_i32 = arith.constant 0 : i32
    %c0_i32_0 = arith.constant 0 : i32
    %c0_i32_1 = arith.constant 0 : i32
    return %arg0, %c0_i32, %c0_i32_0 : i32, i32, i32
  }
  func.func @transform_1(%arg0: i32, %arg1: i32) -> (i32, i32) {
    %c0_i32 = arith.constant 0 : i32
    %c0_i32_0 = arith.constant 0 : i32
    %c0_i32_1 = arith.constant 0 : i32
    return %c0_i32, %c0_i32_0 : i32, i32
  }
  func.func @transform_2(%arg0: i32, %arg1: i32) -> (i32, i32) {
    %c0_i32 = arith.constant 0 : i32
    %c0_i32_0 = arith.constant 0 : i32
    %c0_i32_1 = arith.constant 0 : i32
    return %c0_i32, %c0_i32_0 : i32, i32
  }
  func.func @transform_3(%arg0: i32, %arg1: i32) -> (i32, i32) {
    %c0_i32 = arith.constant 0 : i32
    %c0_i32_0 = arith.constant 0 : i32
    %c0_i32_1 = arith.constant 0 : i32
    return %c0_i32, %c0_i32_0 : i32, i32
  }
  func.func @transform_4(%arg0: i32, %arg1: i32) -> (i32, i32) {
    %c0_i32 = arith.constant 0 : i32
    %c0_i32_0 = arith.constant 0 : i32
    %c0_i32_1 = arith.constant 0 : i32
    return %c0_i32, %c0_i32_0 : i32, i32
  }
  func.func @transform_5(%arg0: i32, %arg1: i32) -> (i32, i32) {
    %c0_i32 = arith.constant 0 : i32
    %c0_i32_0 = arith.constant 0 : i32
    %c0_i32_1 = arith.constant 0 : i32
    return %c0_i32, %c0_i32_0 : i32, i32
  }
  func.func @transform_6(%arg0: i32, %arg1: i32) -> (i32, i32, i32) {
    %c0_i32 = arith.constant 0 : i32
    %c0_i32_0 = arith.constant 0 : i32
    %c0_i32_1 = arith.constant 0 : i32
    %c0_i32_2 = arith.constant 0 : i32
    return %c0_i32, %c0_i32_0, %c0_i32_1 : i32, i32, i32
  }
  func.func @transform_7(%arg0: i32, %arg1: i32) -> (i32, i32, i32) {
    %c0_i32 = arith.constant 0 : i32
    %c0_i32_0 = arith.constant 0 : i32
    %c0_i32_1 = arith.constant 0 : i32
    %c0_i32_2 = arith.constant 0 : i32
    return %c0_i32, %c0_i32_0, %c0_i32_1 : i32, i32, i32
  }
  func.func @transform_8(%arg0: i32, %arg1: i32) -> (i32, i32) {
    %c0_i32 = arith.constant 0 : i32
    %c0_i32_0 = arith.constant 0 : i32
    %c0_i32_1 = arith.constant 0 : i32
    return %c0_i32, %c0_i32_0 : i32, i32
  }
  func.func @transform_9(%arg0: i32, %arg1: i32) -> (i32, i32, i32) {
    %c0_i32 = arith.constant 0 : i32
    %c0_i32_0 = arith.constant 0 : i32
    %c0_i32_1 = arith.constant 0 : i32
    %c0_i32_2 = arith.constant 0 : i32
    return %c0_i32, %c0_i32_0, %c0_i32_1 : i32, i32, i32
  }
  func.func @transform_10(%arg0: i32, %arg1: i32) -> (i32, i32, i32) {
    %c0_i32 = arith.constant 0 : i32
    %c0_i32_0 = arith.constant 0 : i32
    %c0_i32_1 = arith.constant 0 : i32
    %c0_i32_2 = arith.constant 0 : i32
    return %c0_i32, %c0_i32_0, %c0_i32_1 : i32, i32, i32
  }
  func.func @transform_11(%arg0: i32, %arg1: i32) -> (i32, i32, i32) {
    %c0_i32 = arith.constant 0 : i32
    %c0_i32_0 = arith.constant 0 : i32
    %c0_i32_1 = arith.constant 0 : i32
    %c0_i32_2 = arith.constant 0 : i32
    return %c0_i32, %c0_i32_0, %c0_i32_1 : i32, i32, i32
  }
  func.func @transform_12(%arg0: i32, %arg1: i32) -> (i32, i32, i32) {
    %c0_i32 = arith.constant 0 : i32
    %c0_i32_0 = arith.constant 0 : i32
    %c0_i32_1 = arith.constant 0 : i32
    return %arg1, %c0_i32, %c0_i32_0 : i32, i32, i32
  }
  func.func @transform_13(%arg0: i32, %arg1: i32) -> (i32, i32, i32) {
    %c0_i32 = arith.constant 0 : i32
    %c0_i32_0 = arith.constant 0 : i32
    %c0_i32_1 = arith.constant 0 : i32
    return %arg1, %c0_i32, %c0_i32_0 : i32, i32, i32
  }
  func.func @transform_14(%arg0: i32, %arg1: i32) -> (i32, i32, i32) {
    %c0_i32 = arith.constant 0 : i32
    %c0_i32_0 = arith.constant 0 : i32
    %c0_i32_1 = arith.constant 0 : i32
    return %arg1, %c0_i32, %c0_i32_0 : i32, i32, i32
  }
  func.func @transform_15(%arg0: i32, %arg1: i32) -> (i32, i32, i32) {
    %c0_i32 = arith.constant 0 : i32
    %c0_i32_0 = arith.constant 0 : i32
    %c0_i32_1 = arith.constant 0 : i32
    return %arg1, %c0_i32, %c0_i32_0 : i32, i32, i32
  }
  func.func @transform_16(%arg0: i32, %arg1: i32) -> (i32, i32, i32) {
    %c0_i32 = arith.constant 0 : i32
    %c0_i32_0 = arith.constant 0 : i32
    %c0_i32_1 = arith.constant 0 : i32
    return %arg1, %c0_i32, %c0_i32_0 : i32, i32, i32
  }
  func.func @transform_17(%arg0: i32, %arg1: i32) -> (i32, i32, i32) {
    %c0_i32 = arith.constant 0 : i32
    %c0_i32_0 = arith.constant 0 : i32
    %c0_i32_1 = arith.constant 0 : i32
    return %arg1, %c0_i32, %c0_i32_0 : i32, i32, i32
  }
  func.func @transform_18(%arg0: i32, %arg1: i32) -> (i32, i32, i32) {
    %c0_i32 = arith.constant 0 : i32
    %c0_i32_0 = arith.constant 0 : i32
    %c0_i32_1 = arith.constant 0 : i32
    return %arg1, %c0_i32, %c0_i32_0 : i32, i32, i32
  }
  func.func @transform_19(%arg0: i32, %arg1: i32) -> (i32, i32, i32) {
    %c0_i32 = arith.constant 0 : i32
    %c0_i32_0 = arith.constant 0 : i32
    %c0_i32_1 = arith.constant 0 : i32
    return %arg1, %c0_i32, %c0_i32_0 : i32, i32, i32
  }
  func.func @transform_20(%arg0: i32, %arg1: i32) -> (i32, i32, i32) {
    %c0_i32 = arith.constant 0 : i32
    %c0_i32_0 = arith.constant 0 : i32
    %c0_i32_1 = arith.constant 0 : i32
    return %arg1, %c0_i32, %c0_i32_0 : i32, i32, i32
  }
  func.func @transform_21(%arg0: i32, %arg1: i32) -> (i32, i32, i32) {
    %c0_i32 = arith.constant 0 : i32
    %c0_i32_0 = arith.constant 0 : i32
    %c0_i32_1 = arith.constant 0 : i32
    return %arg1, %c0_i32, %c0_i32_0 : i32, i32, i32
  }
  func.func @transform_22(%arg0: i32, %arg1: i32) -> (i32, i32, i32) {
    %c0_i32 = arith.constant 0 : i32
    %c0_i32_0 = arith.constant 0 : i32
    %c0_i32_1 = arith.constant 0 : i32
    return %arg1, %c0_i32, %c0_i32_0 : i32, i32, i32
  }
  func.func @transform_23(%arg0: i32, %arg1: i32) -> (i32, i32, i32) {
    %c0_i32 = arith.constant 0 : i32
    %c0_i32_0 = arith.constant 0 : i32
    %c0_i32_1 = arith.constant 0 : i32
    return %arg1, %c0_i32, %c0_i32_0 : i32, i32, i32
  }
  func.func @transform_24(%arg0: i32, %arg1: i32) -> (i32, i32) {
    %c0_i32 = arith.constant 0 : i32
    %c0_i32_0 = arith.constant 0 : i32
    %c0_i32_1 = arith.constant 0 : i32
    return %c0_i32, %c0_i32_0 : i32, i32
  }
  func.func @transform_25(%arg0: i32, %arg1: i32) -> (i32, i32) {
    %c0_i32 = arith.constant 0 : i32
    %c0_i32_0 = arith.constant 0 : i32
    %c0_i32_1 = arith.constant 0 : i32
    return %c0_i32, %c0_i32_0 : i32, i32
  }
  func.func @transform_26(%arg0: i32, %arg1: i32) -> (i32, i32) {
    %c0_i32 = arith.constant 0 : i32
    %c0_i32_0 = arith.constant 0 : i32
    %c0_i32_1 = arith.constant 0 : i32
    return %c0_i32, %c0_i32_0 : i32, i32
  }
  func.func @transform_27(%arg0: i32, %arg1: i32) -> (i32, i32) {
    %c0_i32 = arith.constant 0 : i32
    %c0_i32_0 = arith.constant 0 : i32
    %c0_i32_1 = arith.constant 0 : i32
    return %c0_i32, %c0_i32_0 : i32, i32
  }
  func.func @transform_28(%arg0: i32, %arg1: i32) -> i32 {
    %c0_i32 = arith.constant 0 : i32
    %c0_i32_0 = arith.constant 0 : i32
    return %c0_i32 : i32
  }
  func.func @transform_29(%arg0: i32, %arg1: i32) -> (i32, i32, i32) {
    %c0_i32 = arith.constant 0 : i32
    %c0_i32_0 = arith.constant 0 : i32
    %c0_i32_1 = arith.constant 0 : i32
    return %arg0, %c0_i32, %c0_i32_0 : i32, i32, i32
  }
}

</mosaic_0001>

<bundles_post_ra>
// kernel: custom_clip_forward.3
= control target key start
LH: loop header
LB: loop body
LE: loop exit
PB: predicated region body
PF: predicated region fallthrough
CT: control target
= control target key end

     0   :  { %s6007_s6 = smov 1   ;;  %s6008_s10 = smov 2   ;;  %s6952_s0 = inlined_call_operand.smem [shape: u32[30], index: -1, kind: input, shape index: {}] }
   0x1   :  { %s6060_s5 = sld [smem:[%s6952_s0]]   ;;  %s6009_s14 = smov 3  }
   0x2   :  { %s6065_s9 = sld [smem:[%s6952_s0 + %s6007_s6]]   ;;  %s6010_s18 = smov 4  }
   0x3   :  { %s6070_s13 = sld [smem:[%s6952_s0 + %s6008_s10]]   ;;  %s6011_s22 = smov 5  }
   0x4   :  { %s6075_s17 = sld [smem:[%s6952_s0 + %s6009_s14]]   ;;  %s6012_s26 = smov 6  }
   0x5   :  { %s6080_s21 = sld [smem:[%s6952_s0 + %s6010_s18]]   ;;  %s6013_s30 = smov 7  }
   0x6   :  { %s6085_s25 = sld [smem:[%s6952_s0 + %s6011_s22]]   ;;  %s6014_s4 = smov 8  }
   0x7   :  { %6965 = sst [smem:[#allocation14_spill]] %s6060_s5  ;;  %s6015_s10 = smov 9  }
   0x8   :  { %6966 = sst [smem:[#allocation15_spill]] %s6065_s9  ;;  %s6016_s15 = smov 10  }
   0x9   :  { %6967 = sst [smem:[#allocation16_spill]] %s6070_s13  ;;  %s6017_s20 = smov 11  }
   0xa   :  { %6968 = sst [smem:[#allocation17_spill]] %s6075_s17  ;;  %s6019_s1 = smov 13  }
   0xb   :  { %6969 = sst [smem:[#allocation18_spill]] %s6080_s21  ;;  %s6020_s7 = smov 14  }
   0xc   :  { %6970 = sst [smem:[#allocation19_spill]] %s6085_s25  ;;  %s6022_s22 = smov 16  }
   0xd   :  { %s6090_s29 = sld [smem:[%s6952_s0 + %s6012_s26]]   ;;  %s6018_s26 = smov 12  }
   0xe   :  { %s6095_s3 = sld [smem:[%s6952_s0 + %s6013_s30]]   ;;  %s6023_s28 = smov 17  }
   0xf   :  { %s6100_s8 = sld [smem:[%s6952_s0 + %s6014_s4]]  }
  0x10   :  { %s6105_s14 = sld [smem:[%s6952_s0 + %s6015_s10]]  }
  0x11   :  { %s6110_s19 = sld [smem:[%s6952_s0 + %s6016_s15]]   ;;  %s6021_s15 = smov 15  }
  0x12   :  { %s6115_s24 = sld [smem:[%s6952_s0 + %s6017_s20]]  }
  0x13   :  { %6971 = sst [smem:[#allocation20_spill]] %s6090_s29 }
  0x14   :  { %6972 = sst [smem:[#allocation21_spill]] %s6095_s3 }
  0x15   :  { %6973 = sst [smem:[#allocation22_spill]] %s6100_s8 }
  0x16   :  { %6974 = sst [smem:[#allocation23_spill]] %s6105_s14 }
  0x17   :  { %6975 = sst [smem:[#allocation24_spill]] %s6110_s19 }
  0x18   :  { %6976 = sst [smem:[#allocation25_spill]] %s6115_s24 }
  0x19   :  { %s6120_s30 = sld [smem:[%s6952_s0 + %s6018_s26]]  }
  0x1a   :  { %s6125_s6 = sld [smem:[%s6952_s0 + %s6019_s1]]   ;;  %s6035_s1 = smov 29  }
  0x1b   :  { %s6130_s12 = sld [smem:[%s6952_s0 + %s6020_s7]]   ;;  %s6024_s7 = smov 18  }
  0x1c   :  { %s6135_s20 = sld [smem:[%s6952_s0 + %s6021_s15]]   ;;  %s6025_s15 = smov 19  }
  0x1d   :  { %s6140_s27 = sld [smem:[%s6952_s0 + %s6022_s22]]   ;;  %s6026_s22 = smov 20  }
  0x1e   :  { %s6145_s4 = sld [smem:[%s6952_s0 + %s6023_s28]]   ;;  %s6027_s28 = smov 21  }
  0x1f   :  { %6977 = sst [smem:[#allocation26_spill]] %s6120_s30 }
  0x20   :  { %6978 = sst [smem:[#allocation27_spill]] %s6125_s6 }
  0x21   :  { %s6150_s14 = sld [smem:[%s6952_s0 + %s6024_s7]]   ;;  %s6028_s7 = smov 22  }
  0x22   :  { %s6155_s19 = sld [smem:[%s6952_s0 + %s6025_s15]]   ;;  %s6029_s15 = smov 23  }
  0x23   :  { %s6160_s8 = sld [smem:[%s6952_s0 + %s6026_s22]]   ;;  %s6030_s22 = smov 24  }
  0x24   :  { %s6165_s29 = sld [smem:[%s6952_s0 + %s6027_s28]]   ;;  %s6031_s28 = smov 25  }
  0x25   :  { %s6170_s3 = sld [smem:[%s6952_s0 + %s6028_s7]]   ;;  %s6032_s7 = smov 26  }
  0x26   :  { %s6175_s25 = sld [smem:[%s6952_s0 + %s6029_s15]]   ;;  %s6033_s15 = smov 27  }
  0x27   :  { %s6180_s13 = sld [smem:[%s6952_s0 + %s6030_s22]]   ;;  %s6034_s22 = smov 28  }
  0x28   :  { %s6185_s17 = sld [smem:[%s6952_s0 + %s6031_s28]]  }
  0x29   :  { %s6190_s9 = sld [smem:[%s6952_s0 + %s6032_s7]]  }
  0x2a   :  { %6979 = sst [smem:[#allocation28_spill]] %s6165_s29 }
  0x2b   :  { %6980 = sst [smem:[#allocation29_spill]] %s6170_s3 }
  0x2c   :  { %6981 = sst [smem:[#allocation30_spill]] %s6175_s25 }
  0x2d   :  { %6982 = sst [smem:[#allocation31_spill]] %s6180_s13 }
  0x2e   :  { %6983 = sst [smem:[#allocation32_spill]] %s6185_s17 }
  0x2f   :  { %6984 = sst [smem:[#allocation33_spill]] %s6190_s9 }
  0x30   :  { %s6195_s25 = sld [smem:[%s6952_s0 + %s6033_s15]]  }
  0x31   :  { %s4829_s3 = sld [smem:[%s6952_s0 + %s6034_s22]]  }
  0x32   :  { %s6203_s29 = sld [smem:[%s6952_s0 + %s6035_s1]]  }
  0x36   :  { %6985 = sst [smem:[#allocation34_spill]] %s6195_s25 }
  0x37   :  { %64 = sst [smem:[#allocation3]] %s4829_s3 }
  0x38   :  { %65 = vsyncpa [#allocation5], 0 }
  0x39   :  { %66 = vsyncpa [#allocation7], 0 }
  0x3a   :  { %67 = vsyncpa [#allocation10], 0  ;;  %s6205_s7 = smov 0   ;;  %s6207_s10 = smov 0  }
  0x3b   :  { %s6209_s11 = smov 0   ;;  %s6211_s15 = smov 0  }
  0x3c   :  { %s6213_s16 = smov 0  }
  0x3d LB: > { %6986 = sst [smem:[#allocation35_spill]] %s5997_s11  ;;  %s6036_s0 = smov [#allocation6]   ;;  %s6005_s16 = sphi %s6213_s16, %s73_s16   ;;  %s6001_s15 = sphi %s6211_s15, %s7029_s15   ;;  %s5997_s11 = sphi %s6209_s11, %s7028_s11   ;;  %s5993_s10 = sphi %s6207_s10, %s7027_s10   ;;  %s5989_s7 = sphi %s6205_s7, %s7026_s7  }
  0x3e   : > { %6987 = sst [smem:[#allocation36_spill]] %s6001_s15  ;;  %s841_s3 = sshll.u32 %s6036_s0, 4  ;;  %s842_s3 = int_to_ptr.vmem [resolvable:$true] %s841_s3 }
  0x3f   : > { %6988 = sst [smem:[#allocation37_spill]] %s6005_s16  ;;  %s4831_s18 = sadd.s32 4294967295, %s6005_s16  }
  0x40   : > { %p4833_p0 = scmp.ge.s32.totalorder %s6005_s16, 1  ;;  %p790_p1 = scmp.lt.s32.totalorder %s6005_s16, 5 }
  0x41   : > { %p6233_p2 = scmp.eq.s32.totalorder %s4831_s18, 0  ;;  %s82_s1 = sadd.s32 1, %s5997_s11 }
  0x42   : > { %p6237_p3 = pnand %p4833_p0, %p790_p1  ;;  %p6250_p6 = scmp.ge.s32.totalorder %s82_s1, 2 }
  0x43   : > { %s6989_s22 = scalar_select %p6233_p2, 1, 0 }
  0x44   : > { %s6990_s23 = scalar_select %p6237_p3, 1, 0 }
  0x45   : > { %p5459_p4 = pneg %p6237_p3  ;;  %s5862_s2 = scalar_lea.vmem %s842_s3, 16 }
  0x46   : > { %p5863_p8 = scmp.ne.s32.totalorder %s842_s3, %s5862_s2  ;;  %s5869_s0 = scalar_lea.vmem %s842_s3, 32 }
  0x47   : > { %p6245_p5 = pnand %p6233_p2, %p5459_p4  ;;  %p5870_p11 = scmp.lt.s32.totalorder %s842_s3, %s842_s3 }
  0x48   : > { %p5871_p12 = scmp.lt.s32.totalorder %s5869_s0, %s5862_s2 }
  0x49   : > { %p5853_p7 = pneg %p6245_p5 }
  0x4a   : > { %p5872_p13 = por %p5871_p12, %p5870_p11 }
  0x4b   : > { %p5865_p9 = pnand %p5863_p8, %p5853_p7 }
  0x4d   : > { %p5866_p10 = pneg %p5865_p9 }
  0x4f   : > { %p5873_p0 = pnand %p5872_p13, %p5866_p10 }
  0x51   : > { %5876 = shalt.err (!%p5873_p0)
}
  0x52   : > { %s6993_s24 = sld [smem:[#allocation25_spill]]  ;;  %s7031_s1 = smov (%p6250_p6, %s82_s1), 0 }
  0x53   : > { %6994 = sst [smem:[#allocation38_spill]] %s7031_s1  ;;  %s85_s18 = sadd.s32 1, %s6001_s15 }
  0x54   : > { %s7033_s18 = smov (!%p6250_p6, %s85_s18), %s6001_s15  ;;  %s6037_s11 = smov [#allocation4]  }
  0x55   : > { %s812_s2 = sshll.u32 %s6037_s11, 4  ;;  %p87_p1 = scmp.ge.s32.totalorder %s7033_s18, 2  ;;  %s813_s2 = int_to_ptr.vmem [resolvable:$true] %s812_s2 }
  0x56   : > { %s5888_s0 = scalar_lea.vmem %s813_s2, 16  ;;  %s5895_s16 = scalar_lea.vmem %s813_s2, 32 }
  0x57   : > { %p5889_p4 = scmp.ne.s32.totalorder %s813_s2, %s5888_s0  ;;  %p5896_p10 = scmp.lt.s32.totalorder %s813_s2, %s813_s2 }
  0x58   : > { %5465 = dma.hbm_to_vmem [thread:$0]  (!%p6245_p5), %s6993_s24, 16, %s842_s3, [#allocation7]  }
  0x59   : > { %p5891_p8 = pnand %p5889_p4, %p5853_p7  ;;  %p5897_p11 = scmp.lt.s32.totalorder %s5895_s16, %s5888_s0 }
  0x5b   : > { %p5892_p9 = pneg %p5891_p8  ;;  %p5898_p12 = por %p5897_p11, %p5896_p10 }
  0x5d   : > { %p5899_p13 = pnand %p5898_p12, %p5892_p9 }
  0x5f   : > { %5902 = shalt.err (!%p5899_p13)
}
  0x60   : > { %s6995_s21 = sld [smem:[#allocation18_spill]]  ;;  %s7035_s18 = smov (%p87_p1, %s7033_s18), 0 }
  0x61   : > { %6996 = sst [smem:[#allocation39_spill]] %s7035_s18  ;;  %s6038_s11 = smov [#allocation8]  }
  0x62   : > { %s852_s3 = sshll.u32 %s6038_s11, 4  ;;  %s6039_s28 = smov [#allocation9]   ;;  %s853_s3 = int_to_ptr.vmem [resolvable:$true] %s852_s3 }
  0x63   : > { %s863_s24 = sshll.u32 %s6039_s28, 4  ;;  %s5914_s1 = scalar_lea.vmem %s853_s3, 16  ;;  %s864_s24 = int_to_ptr.vmem [resolvable:$true] %s863_s24 }
  0x64   : > { %p5915_p6 = scmp.ne.s32.totalorder %s853_s3, %s5914_s1  ;;  %s5921_s16 = scalar_lea.vmem %s853_s3, 32 }
  0x65   : > { %p5922_p8 = scmp.lt.s32.totalorder %s853_s3, %s853_s3  ;;  %p5923_p9 = scmp.lt.s32.totalorder %s5921_s16, %s5914_s1 }
  0x66   : > { %5462 = dma.hbm_to_vmem [thread:$0]  (!%p6245_p5), %s6995_s21, 16, %s813_s2, [#allocation5]  }
  0x67   : > { %p5917_p0 = pnand %p5915_p6, %p5853_p7  ;;  %p5924_p10 = por %p5923_p9, %p5922_p8 }
  0x69   : > { %p5918_p4 = pneg %p5917_p0 }
  0x6b   : > { %p5925_p11 = pnand %p5924_p10, %p5918_p4 }
  0x6d   : > { %5928 = shalt.err (!%p5925_p11)
}
  0x6e   : > { %s6997_s13 = sld [smem:[#allocation31_spill]]  ;;  %s5940_s2 = scalar_lea.vmem %s864_s24, 16 }
  0x6f   : > { %p5941_p1 = scmp.ne.s32.totalorder %s864_s24, %s5940_s2  ;;  %s5947_s0 = scalar_lea.vmem %s864_s24, 32 }
  0x70   : > { %p5948_p6 = scmp.lt.s32.totalorder %s864_s24, %s864_s24  ;;  %p5949_p0 = scmp.lt.s32.totalorder %s5947_s0, %s5940_s2 }
  0x71   : > { %p5943_p12 = pnand %p5941_p1, %p5853_p7 }
  0x72   : > { %p5950_p2 = por %p5949_p0, %p5948_p6 }
  0x73   : > { %p5944_p13 = pneg %p5943_p12 }
  0x74   : > { %5468 = dma.hbm_to_vmem [thread:$0]  (!%p6245_p5), %s6997_s13, 16, %s853_s3, [#allocation7]  }
  0x75   : > { %p5951_p3 = pnand %p5950_p2, %p5944_p13 }
  0x77   : > { %5954 = shalt.err (!%p5951_p3)
}
  0x78   : > { %s6998_s17 = sld [smem:[#allocation32_spill]]  ;;  %p6999_p4 = scmp.ne.s32.totalorder %s6990_s23, 0 }
  0x79   : > { %p7000_p8 = scmp.ne.s32.totalorder (!%p6999_p4), %s6989_s22, 0 }
  0x7a   : > { %973 = sbr.rel (%p6999_p4) target bundleno = 5387 (0x150b), region = 136 }
  0x7e   : > { %5471 = dma.hbm_to_vmem [thread:$0]  (!%p6245_p5), %s6998_s17, 16, %s864_s24, [#allocation10]  }
  0x7f   : > { %5976 = dma.done.wait (%p7000_p8), [#allocation5], 16  }
  0x80   : > { %5978 = vsyncadd (%p7000_p8), [#allocation5], 4294967280 }
  0x81   : > { %5980 = dma.done.wait (%p7000_p8), [#allocation7], 32  }
  0x82   : > { %5982 = vsyncadd (%p7000_p8), [#allocation7], 4294967264 }
  0x83   : > { %5984 = dma.done.wait (%p7000_p8), [#allocation10], 16  }
  0x84   : > { %5986 = vsyncadd (%p7000_p8), [#allocation10], 4294967280  ;;  %s7001_s5 = sld [smem:[#allocation14_spill]]  ;;  %p1104_p2 = scmp.lt.s32.totalorder %s5993_s10, 1 }
  0x85   : > { %p1107_p3 = scmp.lt.s32.totalorder %s5989_s7, 1  ;;  %s7004_s23 = sld [smem:[#allocation28_spill]] }
  0x86   : > { %s7037_s10 = smov (!%p1104_p2, %s5993_s10), 1  ;;  %s7005_s1 = sld [smem:[#allocation29_spill]] }
  0x87   : > { %s6308_s24 = scalar_select %p1107_p3, %s5989_s7, 1 }
  0x88   : > { %s4852_s26 = sshll.u32 %s7037_s10, 2  ;;  %s7006_s3 = sld [smem:[#allocation30_spill]] }
  0x89   : > { %s5441_s16 = smul.u32 192, %s6308_s24  ;;  %s5033_s2 = sshll.u32 %s6308_s24, 6 }
  0x8a   : > { %s6311_s22 = scalar_lea.vmem %s7001_s5, %s7037_s10  ;;  %s5442_s0 = smul.u32 3, %s6308_s24 }
  0x8b   : > { %s6321_s13 = scalar_lea.vmem %s6140_s27, %s5033_s2  ;;  %s6324_s17 = scalar_lea.vmem %s6130_s12, %s5441_s16 }
  0x8c   : > { %s1129_s21 = scalar_lea.vmem %s6145_s4, %s6308_s24  ;;  %s6329_s18 = scalar_lea.vmem %s6135_s20, %s5442_s0 }
  0x8d   : > { %s1132_s5 = scalar_lea.vmem %s6150_s14, %s6308_s24  ;;  %s1135_s15 = scalar_lea.vmem %s6155_s19, %s6308_s24 }
  0x8e   : > { %s5034_s9 = sshll.u32 %s6308_s24, 8  ;;  %s4849_s11 = sshll.u32 %s6308_s24, 2 }
  0x8f   : > { %s6337_s10 = scalar_lea.vmem %s6160_s8, %s5034_s9  ;;  %s6341_s25 = scalar_lea.vmem %s7004_s23, %s4849_s11 }
  0x90   : > { %s6344_s28 = scalar_lea.vmem %s7005_s1, %s5034_s9  ;;  %s1152_s6 = scalar_lea.vmem %s7006_s3, %s6308_s24 }
  0x91   : > { %s6349_s30 = scalar_lea.vmem %s6203_s29, %s4852_s26  ;;  %p4853_p5 = scmp.ne.s32.totalorder %s5989_s7, 0 }
  0x92   : > { %s7007_s16 = sld [smem:[#allocation15_spill]] (!%p4853_p5) }
  0x93   : > { %1161 = sbr.rel (%p4853_p5) target bundleno = 591 (0x24f), region = 156  ;;  %s7009_s9 = sld [smem:[#allocation17_spill]] (!%p4853_p5) }
  0x94   : > { %s7010_s23 = sld [smem:[#allocation16_spill]] (!%p4853_p5) }
  0x95   : > { %s7011_s26 = sld [smem:[#allocation19_spill]] (!%p4853_p5) }
  0x96   : > { %s7012_s1 = sld [smem:[#allocation21_spill]] (!%p4853_p5) }
  0x97   : > { %s7013_s11 = sld [smem:[#allocation20_spill]] (!%p4853_p5) }
  0x98   : > { %s7008_s2 = smov %s7007_s16  ;;  %v5565_v0 = vld [vmem:[%s7007_s16 + $0x38] sm:$0xff]   ;;  %v6040_v1 = vmov 0.0   ;;  %vm6041_vm0 = vmmov 0   ;;  %v1162_v9 = vld [vmem:[%s6311_s22] sm:$0x1]  ;;  %vm1288_vm1 = vcmask 261120   ;;  %v1333_v21 = vlaneseq }
  0x99   : > { %5209 = vmatprep.subr.bf16.mxu0 %v6040_v1  ;;  %5229 = vmatprep.subr.bf16.mxu1 %v6040_v1  ;;  %v5566_v2 = vld [vmem:[%s7008_s2 + $0x30] sm:$0xff]   ;;  %v5567_v3 = vld [vmem:[%s7008_s2 + $0x28] sm:$0xff]   ;;  %v5568_v4 = vld [vmem:[%s7008_s2 + $0x20] sm:$0xff]   ;;  %v1163_v10 = vpack.c.bf16 %v1162_v9, %v1162_v9  ;;  %s7015_s0 = sld [smem:[#allocation22_spill]]  ;;  %vm1360_vm2 = vcmask 1040384   ;;  %vm1362_vm3 = vcmask 1042432  }
  0x9a   : > { %5210 = vmatpush3.bf16.msra.mxu0 %v5565_v0  ;;  %5225 = vmatprep.mubr.msk.bf16.mxu0 %vm6041_vm0, %v6040_v1  ;;  %v5569_v5 = vld [vmem:[%s7008_s2 + $0x18] sm:$0xff]   ;;  %v5570_v6 = vld [vmem:[%s7008_s2 + $0x10] sm:$0xff]   ;;  %v5571_v7 = vld [vmem:[%s7008_s2 + $0x8] sm:$0xff]   ;;  %v1334_v22 = vshrl.u32 %v1333_v21, 7 }
  0x9b   : > { %5211 = vmatprep.subr.bf16.mxu0 %v6040_v1  ;;  %5233 = vmatprep.mubr.msk.bf16.mxu1 %vm6041_vm0, %v6040_v1  ;;  %v5572_v8 = vld [vmem:[%s7008_s2] sm:$0xff]   ;;  %v5573_v11 = vld [vmem:[%s7009_s9 + $0x8] sm:$0xff]   ;;  %v1275_v23 = vld [vmem:[#allocation4] sm:$0x1] }
  0x9c   : > { %5230 = vmatpush3.bf16.msra.mxu1 %v5573_v11  ;;  %v5574_v12 = vld [vmem:[%s7009_s9] sm:$0xff]   ;;  %v1335_v24 = vsub.s32 0, %v1334_v22  ;;  %v4866_v31 = vld [vmem:[%s7012_s1 + $0x8] sm:$0x1f]  ;;  %v4868_v32 = vld [vmem:[%s7012_s1 + $0x10] sm:$0x1f] }
  0x9d   : > { %5231 = vmatprep.subr.bf16.mxu1 %v6040_v1  ;;  %v1180_v13 = vld [vmem:[%s7010_s23] sm:$0x1]  ;;  %s7014_s3 = smov %s7013_s11  ;;  %v1355_v39 = vrot.slane %v4866_v31, 5  ;;  %v1358_v40 = vrot.slane %v4868_v32, 5 }
  0x9e   : > { %5212 = vmatpush3.bf16.msra.mxu0 %v5566_v2  ;;  %v1332_v27 = vld [vmem:[%s7011_s26] sm:$0x3]  ;;  %v4867_v37 = vld [vmem:[%s7014_s3 + $0x2] sm:$0x1] }
  0x9f   : > { %5213 = vmatprep.subr.bf16.mxu0 %v6040_v1  ;;  %v1339_v30 = vld [vmem:[%s7012_s1] sm:$0x1f] }
  0xa0   : > { %5232 = vmatpush3.bf16.msra.mxu1 %v5574_v12  ;;  %v1338_v35 = vld [vmem:[%s7013_s11] sm:$0x1]  ;;  %v4865_v36 = vld [vmem:[%s7014_s3 + $0x1] sm:$0x1]  ;;  %v1352_v38 = vrot.slane %v1339_v30, 5 }
  0xa1   : > { %v1368_v43 = vld [vmem:[%s7015_s0] sm:$0xff] }
  0xa2   : > { %5214 = vmatpush3.bf16.msra.mxu0 %v5567_v3 }
  0xa3   : > { %5215 = vmatprep.subr.bf16.mxu0 %v6040_v1 }
  0xa6   : > { %5216 = vmatpush3.bf16.msra.mxu0 %v5568_v4 }
  0xa7   : > { %5217 = vmatprep.subr.bf16.mxu0 %v6040_v1 }
  0xaa   : > { %5218 = vmatpush3.bf16.msra.mxu0 %v5569_v5 }
  0xab   : > { %5219 = vmatprep.subr.bf16.mxu0 %v6040_v1 }
  0xae   : > { %5220 = vmatpush3.bf16.msra.mxu0 %v5570_v6 }
  0xaf   : > { %5221 = vmatprep.subr.bf16.mxu0 %v6040_v1 }
  0xb2   : > { %5222 = vmatpush3.bf16.msra.mxu0 %v5571_v7 }
  0xb3   : > { %5223 = vmatprep.subr.bf16.mxu0 %v6040_v1 }
  0xb6   : > { %5224 = vmatpush3.bf16.msra.mxu0 %v5572_v8 }
  0xb9   : > { %5226 = vmatmul.mubr.bf16.vlgmr.msra.gmra.mxu0 %v1163_v10 }
 0x179   : > { %v1263_v14 = vpop.f32.mrf.mxu0 }
 0x17a   : > { %v1264_v15 = vadd.f32 %v1263_v14, %v1180_v13 }
 0x17b   : > { %v5227_v16 = vpop.f32.mrf.mxu0 }
 0x17c   : > { %v1269_v17 = vmax.f32 %v1264_v15, 0.0 }
 0x17d   : > { %v1266_v18 = vpop.f32.mrf.mxu0 }
 0x17e   : > { %v1270_v19 = vpack.c.bf16 %v1269_v17, %v1269_v17 }
 0x17f   : > { %v5228_v20 = vpop.f32.mrf.mxu0 }
 0x180   : > { %5234 = vmatmul.mubr.msk.bf16.vlgmr.msra.gmra.mxu1 %vm1288_vm1, %v1270_v19 }
 0x240   : > { %v1326_v25 = vpop.f32.mrf.mxu1 }
 0x241   : > { %v1327_v26 = vadd.f32 %v1326_v25, %v1275_v23 }
 0x242   : > { %v5235_v28 = vpop.f32.mrf.mxu1 }
 0x243   : > { %v1336_v29 = vrot.slane %v1327_v26, %v1335_v24 }
 0x244   : > { %v1329_v33 = vpop.f32.mrf.mxu1 }
 0x245   : > { %v1337_v34 = vadd.f32 %v1336_v29, %v1332_v27 }
 0x246   : > { %v5236_v41 = vpop.f32.mrf.mxu1 }
 0x247   : > { %v1349_v42 = vrot.slane %v1337_v34, 7 }
 0x249   : > { %v1361_v44 = vsel %vm1360_vm2, %v1338_v35, %v1349_v42  ;;  %v1364_v45 = vsel %vm1360_vm2, %v4865_v36, %v1349_v42  ;;  %v1366_v46 = vsel %vm1360_vm2, %v4867_v37, %v1349_v42 }
 0x24a   : > { %v1363_v47 = vsel %vm1362_vm3, %v1361_v44, %v1352_v38  ;;  %v1365_v48 = vsel %vm1362_vm3, %v1364_v45, %v1355_v39  ;;  %v1367_v49 = vsel %vm1362_vm3, %v1366_v46, %v1358_v40 }
 0x24b   : > { %v1369_v50 = vadd.f32 %v1368_v43, %v1363_v47  ;;  %v1370_v51 = vadd.f32 %v1368_v43, %v1365_v48  ;;  %v1371_v52 = vadd.f32 %v1368_v43, %v1367_v49 }
 0x24d   : > { %1372 = vst [vmem:[#allocation2] sm:$0xff] %v1369_v50  ;;  %1373 = vst [vmem:[#allocation2 + $0x8] sm:$0xff] %v1370_v51 }
 0x24e   : > { %1374 = vst [vmem:[#allocation2 + $0x10] sm:$0xff] %v1371_v52 }
 0x24f PF: > { %p1375_p7 = scmp.ge.s32.totalorder %s5989_s7, 1  ;;  %p1376_p9 = scmp.lt.s32.totalorder %s5989_s7, 2 }
 0x251   : > { %p1377_p10 = pnand %p1376_p9, %p1375_p7 }
 0x252   : > { %s7016_s16 = sld [smem:[#allocation24_spill]] (!%p1377_p10)  ;;  %s4869_s23 = sadd.s32 (!%p1377_p10), 4294967295, %s5989_s7 }
 0x253   : > { %1380 = sbr.rel (%p1377_p10) target bundleno = 835 (0x343), region = 160  ;;  %s5037_s26 = sshll.u32 (!%p1377_p10), %s4869_s23, 7 }
 0x254   : > { %s7017_s0 = sld [smem:[#allocation23_spill]] (!%p1377_p10) }
 0x258   : > { %s6376_s11 = scalar_lea.vmem %s7016_s16, %s5037_s26  ;;  %s5036_s16 = sshll.u32 %s4869_s23, 2 }
 0x259   : > { %v5575_v53 = vld [vmem:[%s6376_s11 + $0x78] sm:$0xff]   ;;  %v5577_v55 = vld [vmem:[%s6376_s11 + $0x70] sm:$0xff]   ;;  %v5579_v57 = vld [vmem:[%s6376_s11 + $0x68] sm:$0xff]   ;;  %s5038_s23 = scalar_lea.vmem [#allocation6], %s5989_s7 }
 0x25a   : > { %v5576_v54 = vld [vmem:[%s6376_s11 + $0x38] sm:$0xff]   ;;  %5054 = vmatprep.subr.bf16.mxu0 %v5575_v53  ;;  %v5578_v56 = vld [vmem:[%s6376_s11 + $0x30] sm:$0xff]   ;;  %v5580_v58 = vld [vmem:[%s6376_s11 + $0x28] sm:$0xff]   ;;  %s1384_s26 = scalar_lea.vmem %s7017_s0, %s5036_s16 }
 0x25b   : > { %5055 = vmatpush3.bf16.msra.mxu0 %v5576_v54  ;;  %v5581_v59 = vld [vmem:[%s6376_s11 + $0x60] sm:$0xff]   ;;  %v5583_v61 = vld [vmem:[%s6376_s11 + $0x58] sm:$0xff]   ;;  %v5585_v63 = vld [vmem:[%s6376_s11 + $0x50] sm:$0xff]  }
 0x25c   : > { %5056 = vmatprep.subr.bf16.mxu0 %v5577_v55  ;;  %v5582_v60 = vld [vmem:[%s6376_s11 + $0x20] sm:$0xff]   ;;  %v5584_v62 = vld [vmem:[%s6376_s11 + $0x18] sm:$0xff]   ;;  %v5586_v2 = vld [vmem:[%s6376_s11 + $0x10] sm:$0xff]  }
 0x25d   : > { %v4872_v0 = vld.sshfl [vmem:[%s1384_s26] sm:$0x33 pattern:$0x76325410]  ;;  %v5587_v4 = vld [vmem:[%s6376_s11 + $0x48] sm:$0xff]  }
 0x25e   : > { %v1394_v1 = vcombine.high %v4872_v0, %v4872_v0  ;;  %v5588_v5 = vld [vmem:[%s6376_s11 + $0x8] sm:$0xff]   ;;  %v5589_v6 = vld [vmem:[%s6376_s11 + $0x40] sm:$0xff]   ;;  %v1397_v8 = vpack.c.bf16 %v4872_v0, %v4872_v0  ;;  %v5041_v10 = vld [vmem:[%s5038_s23 - $0x1] ss:$0 sm:$0xff] }
 0x25f   : > { %5057 = vmatpush3.bf16.msra.mxu0 %v5578_v56  ;;  %v5590_v7 = vld [vmem:[%s6376_s11] sm:$0xff]  }
 0x260   : > { %5058 = vmatprep.subr.bf16.mxu0 %v5579_v57  ;;  %v1398_v3 = vpack.c.bf16 %v1394_v1, %v1394_v1 }
 0x262   : > { %1570 = vmatprep.mubr.bf16.mxu0 %v1398_v3 }
 0x263   : > { %5059 = vmatpush3.bf16.msra.mxu0 %v5580_v58 }
 0x264   : > { %5060 = vmatprep.subr.bf16.mxu0 %v5581_v59 }
 0x267   : > { %5061 = vmatpush3.bf16.msra.mxu0 %v5582_v60 }
 0x268   : > { %5062 = vmatprep.subr.bf16.mxu0 %v5583_v61 }
 0x26b   : > { %5063 = vmatpush3.bf16.msra.mxu0 %v5584_v62 }
 0x26c   : > { %5064 = vmatprep.subr.bf16.mxu0 %v5585_v63 }
 0x26f   : > { %5065 = vmatpush3.bf16.msra.mxu0 %v5586_v2 }
 0x270   : > { %5066 = vmatprep.subr.bf16.mxu0 %v5587_v4 }
 0x273   : > { %5067 = vmatpush3.bf16.msra.mxu0 %v5588_v5 }
 0x274   : > { %5068 = vmatprep.subr.bf16.mxu0 %v5589_v6 }
 0x277   : > { %5069 = vmatpush3.bf16.msra.mxu0 %v5590_v7 }
 0x27a   : > { %1571 = vmatmul.mubr.bf16.vlgmr.msra.gmra.mxu0 %v1397_v8 }
 0x33a   : > { %v5070_v9 = vpop.f32.mrf.mxu0 }
 0x33c   : > { %v5071_v11 = vpop.f32.mrf.mxu0 }
 0x33d   : > { %v5072_v12 = vadd.f32 %v5071_v11, %v5070_v9 }
 0x33e   : > { %v5073_v13 = vpop.f32.mrf.mxu0 }
 0x33f   : > { %v1573_v14 = vadd.f32 %v5072_v12, %v5041_v10 }
 0x340   : > { %v5074_v15 = vpop.f32.mrf.mxu0 }
 0x341   : > { %1578 = vst [vmem:[#allocation2 + $0x1] sm:$0x3] %v1573_v14  ;;  %1579 = vst [vmem:[#allocation2 + $0x9] sm:$0x3] %v1573_v14 }
 0x342   : > { %1580 = vst [vmem:[#allocation2 + $0x11] sm:$0x3] %v1573_v14 }
 0x343 PF: > { %v5606_v19 = vld [vmem:[%s6324_s17 + $0xac] ss:$12 sps:$4 sm:$0xff]   ;;  %v5608_v20 = vld [vmem:[%s6324_s17 + $0xa8] ss:$12 sps:$4 sm:$0xff]   ;;  %v5611_v31 = vld [vmem:[%s6324_s17 + $0x90] ss:$12 sps:$4 sm:$0xff]  }
 0x344   : > { %1940 = vmatprep.subr.bf16.mxu0 %v5606_v19  ;;  %v5609_v29 = vld [vmem:[%s6324_s17 + $0x94] ss:$12 sps:$4 sm:$0xff]   ;;  %v5612_v34 = vld [vmem:[%s6324_s17 + $0x7c] ss:$12 sps:$4 sm:$0xff]   ;;  %v5614_v35 = vld [vmem:[%s6324_s17 + $0x78] ss:$12 sps:$4 sm:$0xff]  }
 0x345   : > { %1941 = vmatpush1.bf16.msra.mxu0 %v5608_v20  ;;  %v5615_v37 = vld [vmem:[%s6324_s17 + $0x64] ss:$12 sps:$4 sm:$0xff]   ;;  %v5617_v38 = vld [vmem:[%s6324_s17 + $0x60] ss:$12 sps:$4 sm:$0xff]   ;;  %v5620_v40 = vld [vmem:[%s6324_s17 + $0x48] ss:$12 sps:$4 sm:$0xff]  }
 0x346   : > { %1942 = vmatprep.subr.bf16.mxu0 %v5609_v29  ;;  %v5618_v39 = vld [vmem:[%s6324_s17 + $0x4c] ss:$12 sps:$4 sm:$0xff]   ;;  %v5621_v41 = vld [vmem:[%s6324_s17 + $0x34] ss:$12 sps:$4 sm:$0xff]   ;;  %v6042_v42 = vmov 0   ;;  %s7018_s11 = sld [smem:[#allocation26_spill]] }
 0x347   : > { %1972 = vmatprep.mubr.bf16.mxu0 %v6042_v42  ;;  %v5623_v43 = vld [vmem:[%s6324_s17 + $0x30] ss:$12 sps:$4 sm:$0xff]   ;;  %v5626_v45 = vld [vmem:[%s6324_s17 + $0x18] ss:$12 sps:$4 sm:$0xff]   ;;  %v5629_v47 = vld [vmem:[%s6324_s17] ss:$12 sps:$4 sm:$0xff]  }
 0x348   : > { %v1587_v16 = vld [vmem:[#allocation2] sm:$0xff]  ;;  %v1588_v17 = vld [vmem:[#allocation2 + $0x8] sm:$0xff]  ;;  %v5630_v48 = vld [vmem:[%s6324_s17 + $0xb0] ss:$12 sps:$4 sm:$0xff]   ;;  %s7019_s0 = sld [smem:[#allocation27_spill]]  ;;  %vm6044_vm4 = vmmov 0  }
 0x349   : > { %1742 = vadd.xlane.f32.xlu0 %v1587_v16  ;;  %v1589_v18 = vld [vmem:[#allocation2 + $0x10] sm:$0xff]  ;;  %1943 = vmatpush1.bf16.msra.mxu0 %v5611_v31  ;;  %v5624_v44 = vld [vmem:[%s6324_s17 + $0x1c] ss:$12 sps:$4 sm:$0xff]   ;;  %v5631_v49 = vld [vmem:[%s6324_s17 + $0x98] ss:$12 sps:$4 sm:$0xff]   ;;  %s6045_s26 = smov 96  }
 0x34a   : > { %1944 = vmatprep.subr.bf16.mxu0 %v5612_v34  ;;  %v5627_v46 = vld [vmem:[%s6324_s17 + $0x4] ss:$12 sps:$4 sm:$0xff]   ;;  %5237 = vmatprep.subr.bf16.mxu1 %v5630_v48  ;;  %v5632_v50 = vld [vmem:[%s6324_s17 + $0x80] ss:$12 sps:$4 sm:$0xff]   ;;  %v5633_v51 = vld [vmem:[%s6324_s17 + $0x68] ss:$12 sps:$4 sm:$0xff]  }
 0x34b   : > { %5238 = vmatpush3.bf16.msra.mxu1 %v5630_v48  ;;  %v5634_v52 = vld [vmem:[%s6324_s17 + $0x50] ss:$12 sps:$4 sm:$0xff]   ;;  %v5635_v53 = vld [vmem:[%s6324_s17 + $0x38] ss:$12 sps:$4 sm:$0xff]   ;;  %v5636_v54 = vld [vmem:[%s6324_s17 + $0x20] ss:$12 sps:$4 sm:$0xff]  }
 0x34c   : > { %5239 = vmatprep.subr.bf16.mxu1 %v5631_v49  ;;  %v5637_v55 = vld [vmem:[%s6324_s17 + $0x8] ss:$12 sps:$4 sm:$0xff]   ;;  %s7020_s17 = scalar_lea.vmem %s7018_s11, %s6308_s24  ;;  %vm2077_vm5 = vcmask 261120   ;;  %s6047_s23 = smov 32   ;;  %vm2326_vm6 = vcmask 1043456   ;;  %vm2270_vm8 = vcmask 64512  }
 0x34d   : > { %1744 = vadd.xlane.f32.xlu0 %v1588_v17  ;;  %1945 = vmatpush1.bf16.msra.mxu0 %v5614_v35  ;;  %v4893_v2 = vld [vmem:[%s7020_s17] ss:$0 sm:$0xff]  ;;  %vm2521_vm9 = vcmask 523264   ;;  %vm2523_vm10 = vcmask 785408   ;;  %p5019_p11 = scmp.ne.s32.totalorder %s5989_s7, 1 }
 0x34e   : > { %1946 = vmatprep.subr.bf16.mxu0 %v5615_v37  ;;  %s7021_s16 = scalar_lea.vmem %s7019_s0, %s6308_s24 }
 0x34f   : > { %5240 = vmatpush3.bf16.msra.mxu1 %v5631_v49  ;;  %v4894_v7 = vld [vmem:[%s7021_s16] ss:$0 sm:$0xff] }
 0x350   : > { %5241 = vmatprep.subr.bf16.mxu1 %v5632_v50 }
 0x351   : > { %1746 = vadd.xlane.f32.xlu0 %v1589_v18  ;;  %1947 = vmatpush1.bf16.msra.mxu0 %v5617_v38 }
 0x352   : > { %1948 = vmatprep.subr.bf16.mxu0 %v5618_v39 }
 0x353   : > { %5242 = vmatpush3.bf16.msra.mxu1 %v5632_v50 }
 0x354   : > { %5243 = vmatprep.subr.bf16.mxu1 %v5633_v51 }
 0x355   : > { %1949 = vmatpush1.bf16.msra.mxu0 %v5620_v40 }
 0x356   : > { %1950 = vmatprep.subr.bf16.mxu0 %v5621_v41 }
 0x357   : > { %5244 = vmatpush3.bf16.msra.mxu1 %v5633_v51 }
 0x358   : > { %5245 = vmatprep.subr.bf16.mxu1 %v5634_v52 }
 0x359   : > { %1951 = vmatpush1.bf16.msra.mxu0 %v5623_v43 }
 0x35a   : > { %1952 = vmatprep.subr.bf16.mxu0 %v5624_v44 }
 0x35b   : > { %5246 = vmatpush3.bf16.msra.mxu1 %v5634_v52 }
 0x35c   : > { %5247 = vmatprep.subr.bf16.mxu1 %v5635_v53 }
 0x35d   : > { %1953 = vmatpush1.bf16.msra.mxu0 %v5626_v45 }
 0x35e   : > { %1954 = vmatprep.subr.bf16.mxu0 %v5627_v46 }
 0x35f   : > { %5248 = vmatpush3.bf16.msra.mxu1 %v5635_v53 }
 0x360   : > { %5249 = vmatprep.subr.bf16.mxu1 %v5636_v54 }
 0x361   : > { %1955 = vmatpush1.bf16.msra.mxu0 %v5629_v47 }
 0x363   : > { %5250 = vmatpush3.bf16.msra.mxu1 %v5636_v54 }
 0x364   : > { %5251 = vmatprep.subr.bf16.mxu1 %v5637_v55 }
 0x367   : > { %5252 = vmatpush3.bf16.msra.mxu1 %v5637_v55 }
 0x3d2   : > { %v1743_v21 = vpop.xlane.xlu0 %1742 }
 0x3d3   : > { %v1749_v22 = vmul.f32 0.0078125, %v1743_v21  ;;  %v1624_v21 = vld [vmem:[%s6329_s18] sm:$0x7]  ;;  %s6046_s18 = smov 64  }
 0x3d5   : > { %v6398_v23 = vsub.f32 %v1587_v16, %v1749_v22 }
 0x3d6   : > { %v1745_v24 = vpop.xlane.xlu0 %1744 }
 0x3d7   : > { %v1750_v25 = vmul.f32 0.0078125, %v1745_v24  ;;  %v1755_v26 = vmul.f32 %v6398_v23, %v6398_v23 }
 0x3d9   : > { %v6402_v27 = vsub.f32 %v1588_v17, %v1750_v25  ;;  %1758 = vadd.xlane.f32.xlu1 %v1755_v26  ;;  %v6043_v17 = vmov 0.0  }
 0x3da   : > { %v1747_v30 = vpop.xlane.xlu0 %1746  ;;  %5257 = vmatprep.subr.bf16.mxu0 %v6043_v17  ;;  %5269 = vmatprep.subr.bf16.mxu1 %v6043_v17 }
 0x3db   : > { %v1756_v28 = vmul.f32 %v6402_v27, %v6402_v27  ;;  %v1751_v32 = vmul.f32 0.0078125, %v1747_v30 }
 0x3dd   : > { %1760 = vadd.xlane.f32.xlu1 %v1756_v28  ;;  %v6408_v33 = vsub.f32 %v1589_v18, %v1751_v32  ;;  %v1581_v18 = vlaneseq }
 0x3df   : > { %v1757_v36 = vmul.f32 %v6408_v33, %v6408_v33  ;;  %v6450_v19 = vshrl.u32 %v1581_v18, 7 }
 0x3e1   : > { %1762 = vadd.xlane.f32.xlu1 %v1757_v36  ;;  %v1799_v20 = vsub.s32 0, %v6450_v19  ;;  %v1803_v22 = vsub.s32 1, %v6450_v19  ;;  %v1807_v35 = vsub.s32 2, %v6450_v19 }
 0x3e3   : > { %v1804_v24 = vrot.slane %v1624_v21, %v1803_v22  ;;  %v6473_v36 = vrot.slane %v1624_v21, %v1807_v35 }
 0x462   : > { %v1759_v56 = vpop.xlane.xlu1 %1758 }
 0x463   : > { %v1764_v57 = vmul.f32 0.0078125, %v1759_v56 }
 0x465   : > { %v1767_v58 = vadd.f32 1e-05, %v1764_v57 }
 0x466   : > { %v1761_v59 = vpop.xlane.xlu1 %1760 }
 0x467   : > { %5726 = vrsqrt.f32 %v1767_v58  ;;  %v1765_v60 = vmul.f32 0.0078125, %v1761_v59 }
 0x469   : > { %v1768_v61 = vadd.f32 1e-05, %v1765_v60 }
 0x46a   : > { %v1763_v63 = vpop.xlane.xlu1 %1762 }
 0x46b   : > { %5728 = vrsqrt.f32 %v1768_v61  ;;  %v1766_v1 = vmul.f32 0.0078125, %v1763_v63 }
 0x46d   : > { %v1769_v3 = vadd.f32 1e-05, %v1766_v1 }
 0x46f   : > { %5730 = vrsqrt.f32 %v1769_v3  ;;  %v1584_v3 = vand.u32 127, %v1581_v18 }
 0x471   : > { %vm1585_vm7 = vcmp.le.s32.totalorder %v1584_v3, %v6450_v19 }
 0x474   : > { %v5727_v62 = vpop.eup %5726 }
 0x475   : > { %v1773_v0 = vmul.f32 %v5727_v62, %v6398_v23  ;;  %v1800_v23 = vrot.slane %v1624_v21, %v1799_v20 }
 0x477   : > { %v1782_v6 = vmul.f32 %v4893_v2, %v1773_v0 }
 0x478   : > { %v5729_v4 = vpop.eup %5728 }
 0x479   : > { %v1774_v5 = vmul.f32 %v5729_v4, %v6402_v27  ;;  %v1791_v9 = vadd.f32 %v4894_v7, %v1782_v6  ;;  %v6048_v4 = vmov -1e+09  }
 0x47b   : > { %v1783_v8 = vmul.f32 %v4893_v2, %v1774_v5  ;;  %v6510_v5 = vsel %vm1585_vm7, 0.0, %v6048_v4 }
 0x47c   : > { %v5731_v12 = vpop.eup %5730 }
 0x47d   : > { %v1792_v10 = vadd.f32 %v4894_v7, %v1783_v8  ;;  %v1775_v13 = vmul.f32 %v5731_v12, %v6408_v33 }
 0x47f   : > { %v1794_v11 = vpack.c.bf16 %v1792_v10, %v1791_v9  ;;  %v1784_v14 = vmul.f32 %v4893_v2, %v1775_v13 }
 0x481   : > { %1973 = vmatmul.mubr.bf16.vlgmr.msra.gmra.mxu0 %v1794_v11  ;;  %5253 = vmatprep.mubr.bf16.mxu1 %v1794_v11  ;;  %v1793_v15 = vadd.f32 %v4894_v7, %v1784_v14 }
 0x482   : > { %1982 = vmatprep.mubr.bf16.mxu0 %v6042_v42 }
 0x483   : > { %v1795_v16 = vpack.c.bf16 %v1793_v15, %v1793_v15 }
 0x485   : > { %5254 = vmatmul.mubr.bf16.vlgmr.msra.gmra.mxu1 %v1795_v16 }
 0x486   : > { %5271 = vmatprep.mubr.msk.bf16.mxu1 %vm6044_vm4, %v6043_v17 }
 0x489   : > { %1983 = vmatmul.mubr.bf16.gmra.mxu0 %v1795_v16 }
 0x48a   : > { %5259 = vmatprep.mubr.msk.bf16.mxu0 %vm6044_vm4, %v6043_v17 }
 0x541   : > { %v1974_v25 = vpop.f32.mrf.mxu0 }
 0x542   : > { %v1975_v26 = vadd.f32 %v1974_v25, %v1800_v23 }
 0x543   : > { %v1976_v27 = vpop.f32.mrf.mxu0 }
 0x544   : > { %v1977_v28 = vadd.f32 %v1976_v27, %v1804_v24  ;;  %2040 = vrot.lane.b32.xlu1 %v1975_v26, %s6045_s26  ;;  %v2069_v37 = vpack.c.bf16 %v1975_v26, %v1975_v26 }
 0x545   : > { %v1978_v29 = vpop.f32.mrf.mxu0  ;;  %v5255_v39 = vpop.f32.mrf.mxu1 }
 0x546   : > { %v6460_v30 = vadd.f32 %v1978_v29, %v1800_v23  ;;  %2050 = vrot.lane.b32.xlu0 %v1977_v28, %s6045_s26  ;;  %v2073_v31 = vpack.c.bf16 %v1977_v28, %v1977_v28  ;;  %v6480_v41 = vadd.f32 %v5255_v39, %v6473_v36 }
 0x547   : > { %v1980_v32 = vpop.f32.mrf.mxu0  ;;  %v2025_v44 = vpop.f32.mrf.mxu1 }
 0x548   : > { %v6463_v33 = vadd.f32 %v1980_v32, %v1804_v24  ;;  %2053 = vrot.lane.b32.xlu1 %v1977_v28, %s6046_s18  ;;  %v2082_v34 = vsel %vm2077_vm5, %v2073_v31, 0  ;;  %v6488_v55 = vadd.f32 %v2025_v44, %v6473_v36 }
 0x549   : > { %5258 = vmatpush3.bf16.xpose.msra.mxu0 %v2082_v34  ;;  %v1984_v38 = vpop.f32.mrf.mxu0  ;;  %v5256_v47 = vpop.f32.mrf.mxu1 }
 0x54a   : > { %2043 = vrot.lane.b32.xlu0 %v1975_v26, %s6046_s18  ;;  %5263 = vmatprep.subr.bf16.mxu0 %v6043_v17  ;;  %v6477_v40 = vadd.f32 %v1984_v38, %v1800_v23  ;;  %v2319_v59 = vpack.c.bf16 %v6488_v55, %v6488_v55 }
 0x54b   : > { %v1986_v43 = vpop.f32.mrf.mxu0  ;;  %v6514_v13 = vpop.f32.mrf.mxu1 }
 0x54c   : > { %2056 = vrot.lane.b32.xlu1 %v1977_v28, %s6047_s23  ;;  %v6484_v45 = vadd.f32 %v1986_v43, %v1804_v24  ;;  %v2328_v0 = vsel %vm2326_vm6, %v2319_v59, 0 }
 0x54d   : > { %v1988_v46 = vpop.f32.mrf.mxu0 }
 0x54f   : > { %v1989_v48 = vpop.f32.mrf.mxu0 }
 0x550   : > { %2046 = vrot.lane.b32.xlu1 %v1975_v26, %s6047_s23  ;;  %5260 = vmatmul.mubr.msk.bf16.vlgmr.msra.gmra.mxu0 %vm2077_vm5, %v2069_v37 }
 0x551   : > { %5265 = vmatprep.mubr.msk.bf16.mxu0 %vm6044_vm4, %v6043_v17 }
 0x5b6   : > { %v2041_v49 = vpop.permute.xlu1 %2040 }
 0x5b7   : > { %v2070_v61 = vpack.c.bf16 %v2041_v49, %v2041_v49 }
 0x5b8   : > { %v2051_v50 = vpop.permute.xlu0 %2050 }
 0x5b9   : > { %v2074_v51 = vpack.c.bf16 %v2051_v50, %v2051_v50 }
 0x5ba   : > { %v2054_v52 = vpop.permute.xlu1 %2053 }
 0x5bb   : > { %v2128_v53 = vsel %vm2077_vm5, %v2074_v51, 0  ;;  %v2075_v54 = vpack.c.bf16 %v2054_v52, %v2054_v52 }
 0x5bc   : > { %5264 = vmatpush3.bf16.xpose.msra.mxu0 %v2128_v53  ;;  %v2044_v60 = vpop.permute.xlu0 %2043 }
 0x5bd   : > { %v2174_v56 = vsel %vm2077_vm5, %v2075_v54, 0  ;;  %5275 = vmatprep.subr.bf16.mxu0 %v6043_v17  ;;  %v2071_v62 = vpack.c.bf16 %v2044_v60, %v2044_v60 }
 0x5be   : > { %5270 = vmatpush3.bf16.xpose.msra.mxu1 %v2174_v56  ;;  %v2057_v57 = vpop.permute.xlu1 %2056 }
 0x5bf   : > { %v2076_v58 = vpack.c.bf16 %v2057_v57, %v2057_v57  ;;  %5281 = vmatprep.subr.bf16.mxu1 %v6043_v17 }
 0x5c1   : > { %v2220_v63 = vsel %vm2077_vm5, %v2076_v58, 0 }
 0x5c2   : > { %v2047_v1 = vpop.permute.xlu1 %2046 }
 0x5c3   : > { %5266 = vmatmul.mubr.msk.bf16.vlgmr.msra.gmra.mxu0 %vm2077_vm5, %v2070_v61  ;;  %v2072_v2 = vpack.c.bf16 %v2047_v1, %v2047_v1 }
 0x5c4   : > { %5276 = vmatpush3.bf16.xpose.msra.mxu0 %v2220_v63  ;;  %5277 = vmatprep.mubr.msk.bf16.mxu0 %vm6044_vm4, %v6043_v17 }
 0x5c5   : > { %5272 = vmatmul.mubr.msk.bf16.vlgmr.msra.gmra.mxu1 %vm2077_vm5, %v2071_v62  ;;  %5287 = vmatprep.subr.bf16.mxu0 %v6043_v17 }
 0x5c6   : > { %5282 = vmatpush3.bf16.msra.mxu1 %v2328_v0  ;;  %5283 = vmatprep.mubr.msk.bf16.mxu1 %vm6044_vm4, %v6043_v17 }
 0x5c7   : > { %5293 = vmatprep.subr.bf16.mxu1 %v6043_v17 }
 0x5cb   : > { %5278 = vmatmul.mubr.msk.bf16.vlgmr.msra.gmra.mxu0 %vm2077_vm5, %v2072_v2 }
 0x5cc   : > { %5289 = vmatprep.mubr.msk.bf16.mxu0 %vm6044_vm4, %v6043_v17 }
 0x610   : > { %v2118_v6 = vpop.f32.mrf.mxu0 }
 0x611   : > { %v2262_v7 = vmul.f32 0.17677669, %v2118_v6 }
 0x612   : > { %v5261_v8 = vpop.f32.mrf.mxu0 }
 0x613   : > { %v2266_v9 = vadd.f32 %v2262_v7, %v6510_v5 }
 0x614   : > { %v2121_v10 = vpop.f32.mrf.mxu0 }
 0x615   : > { %v2271_v11 = vsel %vm2270_vm8, %v2266_v9, -inf }
 0x616   : > { %v5262_v12 = vpop.f32.mrf.mxu0  ;;  %2272 = vmax.xlane.f32.xlu0 %v2271_v11 }
 0x683   : > { %v2164_v14 = vpop.f32.mrf.mxu0 }
 0x684   : > { %v2263_v15 = vmul.f32 0.17677669, %v2164_v14 }
 0x685   : > { %v5267_v16 = vpop.f32.mrf.mxu0  ;;  %v2210_v18 = vpop.f32.mrf.mxu1 }
 0x686   : > { %v2264_v21 = vmul.f32 0.17677669, %v2210_v18  ;;  %v2267_v23 = vadd.f32 %v2263_v15, %v6510_v5 }
 0x687   : > { %v2167_v24 = vpop.f32.mrf.mxu0  ;;  %v5273_v25 = vpop.f32.mrf.mxu1 }
 0x688   : > { %v2274_v26 = vsel %vm2270_vm8, %v2267_v23, -inf  ;;  %v2268_v27 = vadd.f32 %v2264_v21, %v6510_v5 }
 0x689   : > { %v5268_v28 = vpop.f32.mrf.mxu0  ;;  %v2213_v29 = vpop.f32.mrf.mxu1  ;;  %2275 = vmax.xlane.f32.xlu1 %v2274_v26 }
 0x68a   : > { %v2277_v31 = vsel %vm2270_vm8, %v2268_v27, -inf  ;;  %v2559_v28 = vpack.c.bf16 %v6463_v33, %v6463_v33 }
 0x68b   : > { %v5274_v32 = vpop.f32.mrf.mxu1  ;;  %v2256_v34 = vpop.f32.mrf.mxu0  ;;  %2278 = vmax.xlane.f32.xlu0 %v2277_v31 }
 0x68c   : > { %v2265_v37 = vmul.f32 0.17677669, %v2256_v34  ;;  %v2567_v32 = vsel %vm2077_vm5, %v2559_v28, 0 }
 0x68d   : > { %v5279_v38 = vpop.f32.mrf.mxu0 }
 0x68e   : > { %v2269_v39 = vadd.f32 %v2265_v37, %v6510_v5  ;;  %v2555_v37 = vpack.c.bf16 %v6460_v30, %v6460_v30 }
 0x68f   : > { %v2259_v43 = vpop.f32.mrf.mxu0 }
 0x690   : > { %v2280_v44 = vsel %vm2270_vm8, %v2269_v39, -inf }
 0x691   : > { %v5280_v46 = vpop.f32.mrf.mxu0  ;;  %2281 = vmax.xlane.f32.xlu0 %v2280_v44  ;;  %v6572_v44 = vadd.f32 %v6514_v13, %v6473_v36 }
 0x69f   : > { %v2273_v47 = vpop.xlane.xlu0 %2272 }
 0x6a0   : > { %v2283_v48 = vsub.f32 %v2266_v9, %v2273_v47 }
 0x6a2   : > { %v2287_v49 = vmul.f32 1.442695, %v2283_v48 }
 0x6a4   : > { %5732 = vpow2.f32 %v2287_v49 }
 0x6b1   : > { %v5733_v50 = vpop.eup %5732 }
 0x6b2   : > { %v2295_v51 = vsel %vm2270_vm8, %v5733_v50, 0.0 }
 0x6b3   : > { %2296 = vadd.xlane.f32.xlu0 %v2295_v51 }
 0x712   : > { %v2276_v52 = vpop.xlane.xlu1 %2275 }
 0x713   : > { %v2284_v53 = vsub.f32 %v2267_v23, %v2276_v52 }
 0x714   : > { %v2279_v54 = vpop.xlane.xlu0 %2278 }
 0x715   : > { %v2289_v56 = vmul.f32 1.442695, %v2284_v53  ;;  %v2285_v57 = vsub.f32 %v2268_v27, %v2279_v54 }
 0x717   : > { %5734 = vpow2.f32 %v2289_v56  ;;  %v2291_v58 = vmul.f32 1.442695, %v2285_v57 }
 0x719   : > { %5736 = vpow2.f32 %v2291_v58 }
 0x71a   : > { %v2282_v63 = vpop.xlane.xlu0 %2281 }
 0x71b   : > { %v2286_v2 = vsub.f32 %v2269_v39, %v2282_v63 }
 0x71d   : > { %v2293_v6 = vmul.f32 1.442695, %v2286_v2 }
 0x724   : > { %v5735_v59 = vpop.eup %5734 }
 0x725   : > { %v2298_v60 = vsel %vm2270_vm8, %v5735_v59, 0.0 }
 0x726   : > { %v5737_v61 = vpop.eup %5736  ;;  %2299 = vadd.xlane.f32.xlu1 %v2298_v60 }
 0x727   : > { %v2301_v62 = vsel %vm2270_vm8, %v5737_v61, 0.0 }
 0x728   : > { %2302 = vadd.xlane.f32.xlu0 %v2301_v62 }
 0x737   : > { %2063 = vrot.lane.b32.xlu1 %v6488_v55, %s6046_s18 }
 0x73b   : > { %2066 = vrot.lane.b32.xlu1 %v6488_v55, %s6047_s23 }
 0x73c   : > { %v2297_v0 = vpop.xlane.xlu0 %2296 }
 0x73d   : > { %5738 = vrcp.f32 %v2297_v0 }
 0x73e   : > { %2060 = vrot.lane.b32.xlu0 %v6488_v55, %s6045_s26  ;;  %5740 = vpow2.f32 %v2293_v6 }
 0x73f   : > { %2536 = vrot.lane.b32.xlu1 %v6463_v33, %s6045_s26 }
 0x742   : > { %2539 = vrot.lane.b32.xlu0 %v6463_v33, %s6046_s18 }
 0x746   : > { %2542 = vrot.lane.b32.xlu0 %v6463_v33, %s6047_s23 }
 0x74a   : > { %v5739_v1 = vpop.eup %5738  ;;  %2532 = vrot.lane.b32.xlu0 %v6460_v30, %s6047_s23 }
 0x74b   : > { %v2311_v3 = vmul.f32 %v5739_v1, %v5733_v50  ;;  %v5741_v55 = vpop.eup %5740 }
 0x74c   : > { %v2304_v7 = vsel %vm2270_vm8, %v5741_v55, 0.0 }
 0x74d   : > { %v2315_v4 = vpack.c.bf16 %v2311_v3, %v2311_v3 }
 0x74f   : > { %5284 = vmatmul.mubr.msk.bf16.vlgmr.msra.gmra.mxu1 %vm2270_vm8, %v2315_v4 }
 0x750   : > { %5295 = vmatprep.mubr.msk.bf16.mxu1 %vm6044_vm4, %v6043_v17 }
 0x763   : > { %2305 = vadd.xlane.f32.xlu1 %v2304_v7 }
 0x774   : > { %2526 = vrot.lane.b32.xlu1 %v6460_v30, %s6045_s26 }
 0x778   : > { %2529 = vrot.lane.b32.xlu1 %v6460_v30, %s6046_s18  ;;  %v2803_v30 = vpack.c.bf16 %v6572_v44, %v6572_v44 }
 0x77a   : > { %v2811_v49 = vsel %vm2326_vm6, %v2803_v30, 0 }
 0x7af   : > { %v2300_v8 = vpop.xlane.xlu1 %2299 }
 0x7b0   : > { %5742 = vrcp.f32 %v2300_v8 }
 0x7b1   : > { %v2303_v9 = vpop.xlane.xlu0 %2302 }
 0x7b2   : > { %5744 = vrcp.f32 %v2303_v9 }
 0x7b3   : > { %v2064_v10 = vpop.permute.xlu1 %2063 }
 0x7b4   : > { %v2321_v11 = vpack.c.bf16 %v2064_v10, %v2064_v10 }
 0x7b5   : > { %v2061_v12 = vpop.permute.xlu0 %2060 }
 0x7b6   : > { %v2420_v14 = vsel %vm2326_vm6, %v2321_v11, 0  ;;  %v2320_v15 = vpack.c.bf16 %v2061_v12, %v2061_v12 }
 0x7b7   : > { %5294 = vmatpush3.bf16.msra.mxu1 %v2420_v14  ;;  %v2067_v18 = vpop.permute.xlu1 %2066 }
 0x7b8   : > { %v2374_v16 = vsel %vm2326_vm6, %v2320_v15, 0  ;;  %5305 = vmatprep.subr.bf16.mxu1 %v6043_v17  ;;  %v2322_v23 = vpack.c.bf16 %v2067_v18, %v2067_v18 }
 0x7b9   : > { %5288 = vmatpush3.bf16.msra.mxu0 %v2374_v16  ;;  %v2540_v34 = vpop.permute.xlu0 %2539 }
 0x7ba   : > { %5299 = vmatprep.subr.bf16.mxu0 %v6043_v17  ;;  %v2466_v29 = vsel %vm2326_vm6, %v2322_v23, 0  ;;  %v2561_v33 = vpack.c.bf16 %v2540_v34, %v2540_v34 }
 0x7bb   : > { %v2537_v39 = vpop.permute.xlu1 %2536 }
 0x7bc   : > { %v2659_v38 = vsel %vm2077_vm5, %v2561_v33, 0  ;;  %v2560_v51 = vpack.c.bf16 %v2537_v39, %v2537_v39 }
 0x7bd   : > { %v5743_v21 = vpop.eup %5742  ;;  %v2543_v53 = vpop.permute.xlu0 %2542 }
 0x7be   : > { %v2312_v24 = vmul.f32 %v5743_v21, %v5735_v59  ;;  %v2613_v52 = vsel %vm2077_vm5, %v2560_v51, 0  ;;  %v2562_v54 = vpack.c.bf16 %v2543_v53, %v2543_v53 }
 0x7bf   : > { %v5745_v25 = vpop.eup %5744 }
 0x7c0   : > { %v2316_v26 = vpack.c.bf16 %v2312_v24, %v2312_v24  ;;  %v2313_v27 = vmul.f32 %v5745_v25, %v5737_v61  ;;  %v2705_v57 = vsel %vm2077_vm5, %v2562_v54, 0 }
 0x7c1   : > { %v2533_v58 = vpop.permute.xlu0 %2532 }
 0x7c2   : > { %5290 = vmatmul.mubr.msk.bf16.vlgmr.msra.gmra.mxu0 %vm2270_vm8, %v2316_v26  ;;  %v2317_v31 = vpack.c.bf16 %v2313_v27, %v2313_v27  ;;  %v2558_v59 = vpack.c.bf16 %v2533_v58, %v2533_v58 }
 0x7c3   : > { %5300 = vmatpush3.bf16.msra.mxu0 %v2466_v29  ;;  %5301 = vmatprep.mubr.msk.bf16.mxu0 %vm6044_vm4, %v6043_v17 }
 0x7c4   : > { %5296 = vmatmul.mubr.msk.bf16.vlgmr.msra.gmra.mxu1 %vm2270_vm8, %v2317_v31  ;;  %5311 = vmatprep.subr.bf16.mxu0 %v6043_v17 }
 0x7c5   : > { %5306 = vmatpush3.bf16.xpose.msra.mxu1 %v2567_v32  ;;  %5307 = vmatprep.mubr.msk.bf16.mxu1 %vm6044_vm4, %v6043_v17 }
 0x7c6   : > { %5317 = vmatprep.subr.bf16.mxu1 %v6043_v17 }
 0x7cc   : > { %5308 = vmatmul.mubr.msk.bf16.vlgmr.msra.gmra.mxu1 %vm2077_vm5, %v2555_v37 }
 0x7cd   : > { %5318 = vmatpush3.bf16.xpose.msra.mxu1 %v2659_v38  ;;  %5319 = vmatprep.mubr.msk.bf16.mxu1 %vm6044_vm4, %v6043_v17 }
 0x7ce   : > { %5329 = vmatprep.subr.bf16.mxu1 %v6043_v17 }
 0x7ec   : > { %v2306_v43 = vpop.xlane.xlu1 %2305 }
 0x7ed   : > { %5746 = vrcp.f32 %v2306_v43 }
 0x7f0   : > { %v2527_v46 = vpop.permute.xlu1 %2526 }
 0x7f1   : > { %v2556_v56 = vpack.c.bf16 %v2527_v46, %v2527_v46 }
 0x7f4   : > { %v2530_v47 = vpop.permute.xlu1 %2529 }
 0x7f5   : > { %v2557_v48 = vpack.c.bf16 %v2530_v47, %v2530_v47 }
 0x7f7   : > { %5320 = vmatmul.mubr.msk.bf16.vlgmr.msra.gmra.mxu1 %vm2077_vm5, %v2557_v48 }
 0x7f8   : > { %5330 = vmatpush3.bf16.msra.mxu1 %v2811_v49  ;;  %5331 = vmatprep.mubr.msk.bf16.mxu1 %vm6044_vm4, %v6043_v17 }
 0x7f9   : > { %5341 = vmatprep.subr.bf16.mxu1 %v6043_v17 }
 0x7fa   : > { %v5747_v50 = vpop.eup %5746 }
 0x7fb   : > { %v2314_v36 = vmul.f32 %v5747_v50, %v5741_v55 }
 0x7fd   : > { %v2318_v13 = vpack.c.bf16 %v2314_v36, %v2314_v36 }
 0x7ff   : > { %5302 = vmatmul.mubr.msk.bf16.vlgmr.msra.gmra.mxu0 %vm2270_vm8, %v2318_v13 }
 0x800   : > { %5312 = vmatpush3.bf16.xpose.msra.mxu0 %v2613_v52  ;;  %5313 = vmatprep.mubr.msk.bf16.mxu0 %vm6044_vm4, %v6043_v17 }
 0x801   : > { %5323 = vmatprep.subr.bf16.mxu0 %v6043_v17 }
 0x807   : > { %5314 = vmatmul.mubr.msk.bf16.vlgmr.msra.gmra.mxu0 %vm2077_vm5, %v2556_v56 }
 0x808   : > { %5324 = vmatpush3.bf16.xpose.msra.mxu0 %v2705_v57  ;;  %5325 = vmatprep.mubr.msk.bf16.mxu0 %vm6044_vm4, %v6043_v17 }
 0x809   : > { %5335 = vmatprep.subr.bf16.mxu0 %v6043_v17 }
 0x80f   : > { %v6591_v60 = vpop.f32.mrf.mxu1  ;;  %5326 = vmatmul.mubr.msk.bf16.vlgmr.msra.gmra.mxu0 %vm2077_vm5, %v2558_v59 }
 0x810   : > { %5337 = vmatprep.mubr.msk.bf16.mxu0 %vm6044_vm4, %v6043_v17 }
 0x811   : > { %v5285_v61 = vpop.f32.mrf.mxu1 }
 0x813   : > { %v2367_v62 = vpop.f32.mrf.mxu1 }
 0x815   : > { %v5286_v63 = vpop.f32.mrf.mxu1 }
 0x882   : > { %v6596_v0 = vpop.f32.mrf.mxu0 }
 0x884   : > { %v5291_v1 = vpop.f32.mrf.mxu0  ;;  %v6598_v2 = vpop.f32.mrf.mxu1 }
 0x886   : > { %v2413_v3 = vpop.f32.mrf.mxu0  ;;  %v5297_v4 = vpop.f32.mrf.mxu1 }
 0x888   : > { %v5292_v6 = vpop.f32.mrf.mxu0  ;;  %v2459_v55 = vpop.f32.mrf.mxu1 }
 0x88a   : > { %v5298_v7 = vpop.f32.mrf.mxu1 }
 0x88c   : > { %v2603_v8 = vpop.f32.mrf.mxu1 }
 0x88d   : > { %v2747_v9 = vmul.f32 0.17677669, %v2603_v8 }
 0x88e   : > { %v5309_v10 = vpop.f32.mrf.mxu1 }
 0x88f   : > { %v2751_v11 = vadd.f32 %v2747_v9, %v6510_v5 }
 0x890   : > { %v2606_v12 = vpop.f32.mrf.mxu1 }
 0x891   : > { %v2755_v14 = vsel %vm2270_vm8, %v2751_v11, -inf }
 0x892   : > { %2756 = vmax.xlane.f32.xlu1 %v2755_v14  ;;  %v5310_v15 = vpop.f32.mrf.mxu1 }
 0x8a3   : > { %2546 = vrot.lane.b32.xlu1 %v6572_v44, %s6045_s26 }
 0x8b7   : > { %v2695_v16 = vpop.f32.mrf.mxu1 }
 0x8b8   : > { %v2749_v29 = vmul.f32 0.17677669, %v2695_v16 }
 0x8b9   : > { %v5321_v18 = vpop.f32.mrf.mxu1 }
 0x8ba   : > { %v2753_v38 = vadd.f32 %v2749_v29, %v6510_v5 }
 0x8bb   : > { %v2698_v21 = vpop.f32.mrf.mxu1 }
 0x8bc   : > { %v2761_v30 = vsel %vm2270_vm8, %v2753_v38, -inf }
 0x8bd   : > { %v5322_v23 = vpop.f32.mrf.mxu1 }
 0x8bf   : > { %v6604_v24 = vpop.f32.mrf.mxu0 }
 0x8c1   : > { %v5303_v25 = vpop.f32.mrf.mxu0 }
 0x8c3   : > { %v2505_v26 = vpop.f32.mrf.mxu0 }
 0x8c5   : > { %v5304_v27 = vpop.f32.mrf.mxu0 }
 0x8c7   : > { %v2649_v28 = vpop.f32.mrf.mxu0 }
 0x8c8   : > { %v2748_v31 = vmul.f32 0.17677669, %v2649_v28 }
 0x8c9   : > { %v5315_v32 = vpop.f32.mrf.mxu0 }
 0x8ca   : > { %v2752_v34 = vadd.f32 %v2748_v31, %v6510_v5 }
 0x8cb   : > { %v2652_v33 = vpop.f32.mrf.mxu0 }
 0x8cc   : > { %v2758_v37 = vsel %vm2270_vm8, %v2752_v34, -inf }
 0x8cd   : > { %2759 = vmax.xlane.f32.xlu0 %v2758_v37  ;;  %v5316_v39 = vpop.f32.mrf.mxu0 }
 0x8cf   : > { %v2741_v43 = vpop.f32.mrf.mxu0 }
 0x8d0   : > { %v2750_v46 = vmul.f32 0.17677669, %v2741_v43  ;;  %v3040_v43 = vpack.c.bf16 %v6484_v45, %v6484_v45 }
 0x8d1   : > { %2762 = vmax.xlane.f32.xlu0 %v2761_v30  ;;  %v5327_v47 = vpop.f32.mrf.mxu0 }
 0x8d2   : > { %v2754_v48 = vadd.f32 %v2750_v46, %v6510_v5 }
 0x8d3   : > { %v2744_v49 = vpop.f32.mrf.mxu0 }
 0x8d4   : > { %v2764_v50 = vsel %vm2270_vm8, %v2754_v48, -inf  ;;  %v3048_v49 = vsel %vm2077_vm5, %v3040_v43, 0 }
 0x8d5   : > { %2765 = vmax.xlane.f32.xlu0 %v2764_v50  ;;  %v5328_v51 = vpop.f32.mrf.mxu0 }
 0x91b   : > { %v2757_v36 = vpop.xlane.xlu1 %2756 }
 0x91c   : > { %v2767_v13 = vsub.f32 %v2751_v11, %v2757_v36 }
 0x91e   : > { %v2771_v52 = vmul.f32 1.442695, %v2767_v13 }
 0x91f   : > { %v2547_v53 = vpop.permute.xlu1 %2546 }
 0x920   : > { %5748 = vpow2.f32 %v2771_v52  ;;  %v2804_v54 = vpack.c.bf16 %v2547_v53, %v2547_v53  ;;  %v3036_v53 = vpack.c.bf16 %v6477_v40, %v6477_v40 }
 0x922   : > { %v2857_v56 = vsel %vm2326_vm6, %v2804_v54, 0 }
 0x923   : > { %5336 = vmatpush3.bf16.msra.mxu0 %v2857_v56 }
 0x924   : > { %5347 = vmatprep.subr.bf16.mxu0 %v6043_v17 }
 0x92d   : > { %v5749_v57 = vpop.eup %5748 }
 0x92e   : > { %v2779_v58 = vsel %vm2270_vm8, %v5749_v57, 0.0 }
 0x92f   : > { %2780 = vadd.xlane.f32.xlu1 %v2779_v58 }
 0x956   : > { %v2760_v59 = vpop.xlane.xlu0 %2759 }
 0x957   : > { %v2768_v61 = vsub.f32 %v2752_v34, %v2760_v59 }
 0x959   : > { %v2773_v62 = vmul.f32 1.442695, %v2768_v61 }
 0x95a   : > { %v2763_v63 = vpop.xlane.xlu0 %2762 }
 0x95b   : > { %5750 = vpow2.f32 %v2773_v62  ;;  %v2769_v1 = vsub.f32 %v2753_v38, %v2763_v63 }
 0x95d   : > { %v2775_v3 = vmul.f32 1.442695, %v2769_v1 }
 0x95e   : > { %v2766_v4 = vpop.xlane.xlu0 %2765 }
 0x95f   : > { %5752 = vpow2.f32 %v2775_v3  ;;  %v2770_v6 = vsub.f32 %v2754_v48, %v2766_v4 }
 0x961   : > { %v2777_v55 = vmul.f32 1.442695, %v2770_v6 }
 0x963   : > { %5754 = vpow2.f32 %v2777_v55 }
 0x968   : > { %v5751_v7 = vpop.eup %5750 }
 0x969   : > { %v2782_v8 = vsel %vm2270_vm8, %v5751_v7, 0.0 }
 0x96a   : > { %2783 = vadd.xlane.f32.xlu0 %v2782_v8 }
 0x96c   : > { %v5753_v9 = vpop.eup %5752 }
 0x96d   : > { %v2785_v10 = vsel %vm2270_vm8, %v5753_v9, 0.0 }
 0x96e   : > { %2786 = vadd.xlane.f32.xlu1 %v2785_v10 }
 0x970   : > { %v5755_v11 = vpop.eup %5754 }
 0x971   : > { %v2788_v12 = vsel %vm2270_vm8, %v5755_v11, 0.0 }
 0x972   : > { %2789 = vadd.xlane.f32.xlu0 %v2788_v12 }
 0x97f   : > { %2552 = vrot.lane.b32.xlu1 %v6572_v44, %s6047_s23 }
 0x983   : > { %3017 = vrot.lane.b32.xlu1 %v6484_v45, %s6045_s26 }
 0x987   : > { %3020 = vrot.lane.b32.xlu1 %v6484_v45, %s6046_s18 }
 0x988   : > { %2549 = vrot.lane.b32.xlu0 %v6572_v44, %s6046_s18 }
 0x98b   : > { %3023 = vrot.lane.b32.xlu1 %v6484_v45, %s6047_s23 }
 0x98c   : > { %3007 = vrot.lane.b32.xlu0 %v6477_v40, %s6045_s26 }
 0x98f   : > { %3013 = vrot.lane.b32.xlu1 %v6477_v40, %s6047_s23 }
 0x990   : > { %3010 = vrot.lane.b32.xlu0 %v6477_v40, %s6046_s18  ;;  %v3284_v40 = vpack.c.bf16 %v6480_v41, %v6480_v41 }
 0x992   : > { %v3292_v63 = vsel %vm2326_vm6, %v3284_v40, 0 }
 0x9b8   : > { %v2781_v14 = vpop.xlane.xlu1 %2780 }
 0x9b9   : > { %5756 = vrcp.f32 %v2781_v14 }
 0x9c6   : > { %v5757_v15 = vpop.eup %5756 }
 0x9c7   : > { %v2795_v16 = vmul.f32 %v5757_v15, %v5749_v57 }
 0x9c9   : > { %v2799_v18 = vpack.c.bf16 %v2795_v16, %v2795_v16 }
 0x9cb   : > { %5332 = vmatmul.mubr.msk.bf16.vlgmr.msra.gmra.mxu1 %vm2270_vm8, %v2799_v18 }
 0x9cc   : > { %5343 = vmatprep.mubr.msk.bf16.mxu1 %vm6044_vm4, %v6043_v17 }
 0x9f3   : > { %v2784_v44 = vpop.xlane.xlu0 %2783 }
 0x9f4   : > { %5758 = vrcp.f32 %v2784_v44 }
 0x9f7   : > { %v2787_v21 = vpop.xlane.xlu1 %2786 }
 0x9f8   : > { %5760 = vrcp.f32 %v2787_v21 }
 0x9fb   : > { %v2790_v23 = vpop.xlane.xlu0 %2789  ;;  %v2553_v25 = vpop.permute.xlu1 %2552 }
 0x9fc   : > { %5762 = vrcp.f32 %v2790_v23  ;;  %v2806_v29 = vpack.c.bf16 %v2553_v25, %v2553_v25 }
 0x9fe   : > { %v2949_v38 = vsel %vm2326_vm6, %v2806_v29, 0 }
 0x9ff   : > { %v2550_v26 = vpop.permute.xlu0 %2549  ;;  %v3018_v34 = vpop.permute.xlu1 %3017 }
 0xa00   : > { %v2805_v27 = vpack.c.bf16 %v2550_v26, %v2550_v26  ;;  %v3041_v48 = vpack.c.bf16 %v3018_v34, %v3018_v34 }
 0xa01   : > { %v5759_v28 = vpop.eup %5758 }
 0xa02   : > { %v2903_v31 = vsel %vm2326_vm6, %v2805_v27, 0  ;;  %v2796_v32 = vmul.f32 %v5759_v28, %v5751_v7  ;;  %v3094_v51 = vsel %vm2077_vm5, %v3041_v48, 0 }
 0xa03   : > { %5342 = vmatpush3.bf16.msra.mxu1 %v2903_v31  ;;  %v3021_v47 = vpop.permute.xlu1 %3020  ;;  %v3008_v13 = vpop.permute.xlu0 %3007 }
 0xa04   : > { %v2800_v33 = vpack.c.bf16 %v2796_v32, %v2796_v32  ;;  %5353 = vmatprep.subr.bf16.mxu1 %v6043_v17  ;;  %v3042_v36 = vpack.c.bf16 %v3021_v47, %v3021_v47  ;;  %v3037_v57 = vpack.c.bf16 %v3008_v13, %v3008_v13 }
 0xa05   : > { %v5761_v37 = vpop.eup %5760 }
 0xa06   : > { %5338 = vmatmul.mubr.msk.bf16.vlgmr.msra.gmra.mxu0 %vm2270_vm8, %v2800_v33  ;;  %v2797_v39 = vmul.f32 %v5761_v37, %v5753_v9  ;;  %v3140_v54 = vsel %vm2077_vm5, %v3042_v36, 0 }
 0xa07   : > { %5348 = vmatpush3.bf16.msra.mxu0 %v2949_v38  ;;  %5349 = vmatprep.mubr.msk.bf16.mxu0 %vm6044_vm4, %v6043_v17  ;;  %v3024_v52 = vpop.permute.xlu1 %3023  ;;  %v3011_v58 = vpop.permute.xlu0 %3010 }
 0xa08   : > { %v2801_v46 = vpack.c.bf16 %v2797_v39, %v2797_v39  ;;  %5359 = vmatprep.subr.bf16.mxu0 %v6043_v17  ;;  %v3043_v56 = vpack.c.bf16 %v3024_v52, %v3024_v52  ;;  %v3038_v61 = vpack.c.bf16 %v3011_v58, %v3011_v58 }
 0xa09   : > { %v5763_v30 = vpop.eup %5762 }
 0xa0a   : > { %5344 = vmatmul.mubr.msk.bf16.vlgmr.msra.gmra.mxu1 %vm2270_vm8, %v2801_v46  ;;  %v2798_v50 = vmul.f32 %v5763_v30, %v5755_v11  ;;  %v3186_v59 = vsel %vm2077_vm5, %v3043_v56, 0 }
 0xa0b   : > { %5354 = vmatpush3.bf16.xpose.msra.mxu1 %v3048_v49  ;;  %5355 = vmatprep.mubr.msk.bf16.mxu1 %vm6044_vm4, %v6043_v17  ;;  %v3014_v62 = vpop.permute.xlu1 %3013 }
 0xa0c   : > { %v2802_v45 = vpack.c.bf16 %v2798_v50, %v2798_v50  ;;  %5365 = vmatprep.subr.bf16.mxu1 %v6043_v17  ;;  %v3039_v1 = vpack.c.bf16 %v3014_v62, %v3014_v62 }
 0xa0e   : > { %5350 = vmatmul.mubr.msk.bf16.vlgmr.msra.gmra.mxu0 %vm2270_vm8, %v2802_v45 }
 0xa0f   : > { %5360 = vmatpush3.bf16.xpose.msra.mxu0 %v3094_v51  ;;  %5361 = vmatprep.mubr.msk.bf16.mxu0 %vm6044_vm4, %v6043_v17 }
 0xa10   : > { %5371 = vmatprep.subr.bf16.mxu0 %v6043_v17 }
 0xa12   : > { %5356 = vmatmul.mubr.msk.bf16.vlgmr.msra.gmra.mxu1 %vm2077_vm5, %v3036_v53 }
 0xa13   : > { %5366 = vmatpush3.bf16.xpose.msra.mxu1 %v3140_v54  ;;  %5367 = vmatprep.mubr.msk.bf16.mxu1 %vm6044_vm4, %v6043_v17 }
 0xa14   : > { %5377 = vmatprep.subr.bf16.mxu1 %v6043_v17 }
 0xa16   : > { %5362 = vmatmul.mubr.msk.bf16.vlgmr.msra.gmra.mxu0 %vm2077_vm5, %v3037_v57 }
 0xa17   : > { %5372 = vmatpush3.bf16.xpose.msra.mxu0 %v3186_v59  ;;  %5373 = vmatprep.mubr.msk.bf16.mxu0 %vm6044_vm4, %v6043_v17 }
 0xa18   : > { %5383 = vmatprep.subr.bf16.mxu0 %v6043_v17 }
 0xa1a   : > { %5368 = vmatmul.mubr.msk.bf16.vlgmr.msra.gmra.mxu1 %vm2077_vm5, %v3038_v61 }
 0xa1b   : > { %5378 = vmatpush3.bf16.msra.mxu1 %v3292_v63  ;;  %5379 = vmatprep.mubr.msk.bf16.mxu1 %vm6044_vm4, %v6043_v17 }
 0xa1c   : > { %5389 = vmatprep.subr.bf16.mxu1 %v6043_v17 }
 0xa1e   : > { %5374 = vmatmul.mubr.msk.bf16.vlgmr.msra.gmra.mxu0 %vm2077_vm5, %v3039_v1 }
 0xa1f   : > { %5385 = vmatprep.mubr.msk.bf16.mxu0 %vm6044_vm4, %v6043_v17 }
 0xa8b   : > { %v6678_v3 = vpop.f32.mrf.mxu1 }
 0xa8d   : > { %v5333_v4 = vpop.f32.mrf.mxu1 }
 0xa8f   : > { %v2850_v6 = vpop.f32.mrf.mxu1 }
 0xa91   : > { %v5334_v55 = vpop.f32.mrf.mxu1 }
 0xac6   : > { %v6680_v7 = vpop.f32.mrf.mxu0 }
 0xac8   : > { %v5339_v8 = vpop.f32.mrf.mxu0 }
 0xaca   : > { %v2896_v9 = vpop.f32.mrf.mxu0  ;;  %v6682_v10 = vpop.f32.mrf.mxu1 }
 0xacc   : > { %v5340_v11 = vpop.f32.mrf.mxu0  ;;  %v5345_v12 = vpop.f32.mrf.mxu1 }
 0xace   : > { %v2942_v14 = vpop.f32.mrf.mxu1  ;;  %v6684_v15 = vpop.f32.mrf.mxu0 }
 0xacf   : > { %v5596_v14 = vpack.i.bf16 %v6682_v10, %v6598_v2  ;;  %v5591_v2 = vpack.i.bf16 %v6680_v7, %v6596_v0 }
 0xad0   : > { %v5346_v16 = vpop.f32.mrf.mxu1  ;;  %v5351_v18 = vpop.f32.mrf.mxu0 }
 0xad1   : > { %v5601_v18 = vpack.i.bf16 %v6684_v15, %v6604_v24 }
 0xad2   : > { %v2988_v44 = vpop.f32.mrf.mxu0  ;;  %v3084_v21 = vpop.f32.mrf.mxu1 }
 0xad3   : > { %v3228_v23 = vmul.f32 0.17677669, %v3084_v21 }
 0xad4   : > { %v5352_v25 = vpop.f32.mrf.mxu0  ;;  %v5357_v26 = vpop.f32.mrf.mxu1 }
 0xad5   : > { %v3232_v27 = vadd.f32 %v3228_v23, %v6510_v5 }
 0xad6   : > { %v3087_v28 = vpop.f32.mrf.mxu1  ;;  %v3130_v29 = vpop.f32.mrf.mxu0 }
 0xad7   : > { %v3229_v31 = vmul.f32 0.17677669, %v3130_v29  ;;  %v3236_v32 = vsel %vm2270_vm8, %v3232_v27, -inf }
 0xad8   : > { %3237 = vmax.xlane.f32.xlu0 %v3236_v32  ;;  %v5358_v34 = vpop.f32.mrf.mxu1  ;;  %v5363_v33 = vpop.f32.mrf.mxu0 }
 0xad9   : > { %v3233_v37 = vadd.f32 %v3229_v31, %v6510_v5 }
 0xada   : > { %v3133_v38 = vpop.f32.mrf.mxu0  ;;  %v3176_v39 = vpop.f32.mrf.mxu1 }
 0xadb   : > { %v3230_v43 = vmul.f32 0.17677669, %v3176_v39  ;;  %v3239_v46 = vsel %vm2270_vm8, %v3233_v37, -inf }
 0xadc   : > { %3240 = vmax.xlane.f32.xlu1 %v3239_v46  ;;  %v5364_v30 = vpop.f32.mrf.mxu0  ;;  %v5369_v47 = vpop.f32.mrf.mxu1 }
 0xadd   : > { %v3234_v48 = vadd.f32 %v3230_v43, %v6510_v5 }
 0xade   : > { %v3179_v49 = vpop.f32.mrf.mxu1  ;;  %v3222_v50 = vpop.f32.mrf.mxu0 }
 0xadf   : > { %v3231_v45 = vmul.f32 0.17677669, %v3222_v50  ;;  %v3242_v51 = vsel %vm2270_vm8, %v3234_v48, -inf }
 0xae0   : > { %v5375_v36 = vpop.f32.mrf.mxu0  ;;  %3243 = vmax.xlane.f32.xlu0 %v3242_v51  ;;  %v5370_v13 = vpop.f32.mrf.mxu1 }
 0xae1   : > { %v3235_v52 = vadd.f32 %v3231_v45, %v6510_v5 }
 0xae2   : > { %v3225_v53 = vpop.f32.mrf.mxu0 }
 0xae3   : > { %v3245_v54 = vsel %vm2270_vm8, %v3235_v52, -inf }
 0xae4   : > { %v5376_v56 = vpop.f32.mrf.mxu0  ;;  %3246 = vmax.xlane.f32.xlu0 %v3245_v54 }
 0xb61   : > { %v3238_v57 = vpop.xlane.xlu0 %3237 }
 0xb62   : > { %v3248_v58 = vsub.f32 %v3232_v27, %v3238_v57 }
 0xb64   : > { %v3252_v59 = vmul.f32 1.442695, %v3248_v58 }
 0xb65   : > { %v3241_v40 = vpop.xlane.xlu1 %3240 }
 0xb66   : > { %5764 = vpow2.f32 %v3252_v59  ;;  %v3249_v61 = vsub.f32 %v3233_v37, %v3241_v40 }
 0xb68   : > { %v3254_v62 = vmul.f32 1.442695, %v3249_v61 }
 0xb69   : > { %v3244_v63 = vpop.xlane.xlu0 %3243 }
 0xb6a   : > { %5766 = vpow2.f32 %v3254_v62  ;;  %v3250_v1 = vsub.f32 %v3234_v48, %v3244_v63 }
 0xb6c   : > { %v3256_v4 = vmul.f32 1.442695, %v3250_v1 }
 0xb6d   : > { %v3247_v12 = vpop.xlane.xlu0 %3246 }
 0xb6e   : > { %5768 = vpow2.f32 %v3256_v4  ;;  %v3251_v16 = vsub.f32 %v3235_v52, %v3247_v12  ;;  %v5640_v4 = vld [vmem:[%s6321_s13 + $0x28] sm:$0xff]  }
 0xb70   : > { %v3258_v44 = vmul.f32 1.442695, %v3251_v16  ;;  %v5642_v16 = vld [vmem:[%s6321_s13 + $0x18] sm:$0xff]  }
 0xb72   : > { %5770 = vpow2.f32 %v3258_v44 }
 0xb73   : > { %v5765_v6 = vpop.eup %5764 }
 0xb74   : > { %v3260_v5 = vsel %vm2270_vm8, %v5765_v6, 0.0 }
 0xb75   : > { %3261 = vadd.xlane.f32.xlu0 %v3260_v5 }
 0xb77   : > { %v5767_v55 = vpop.eup %5766 }
 0xb78   : > { %v3263_v8 = vsel %vm2270_vm8, %v5767_v55, 0.0 }
 0xb79   : > { %3264 = vadd.xlane.f32.xlu1 %v3263_v8  ;;  %v5641_v8 = vld [vmem:[%s6321_s13 + $0x20] sm:$0xff]  }
 0xb7b   : > { %v5769_v9 = vpop.eup %5768 }
 0xb7c   : > { %v3266_v11 = vsel %vm2270_vm8, %v5769_v9, 0.0 }
 0xb7d   : > { %3267 = vadd.xlane.f32.xlu0 %v3266_v11 }
 0xb7f   : > { %v5771_v21 = vpop.eup %5770 }
 0xb80   : > { %v3269_v23 = vsel %vm2270_vm8, %v5771_v21, 0.0 }
 0xb8a   : > { %3030 = vrot.lane.b32.xlu1 %v6480_v41, %s6046_s18 }
 0xb93   : > { %3027 = vrot.lane.b32.xlu0 %v6480_v41, %s6045_s26 }
 0xb97   : > { %5597 = vrot.lane.b32.xlu0 %v5596_v14, %s6046_s18 }
 0xb9b   : > { %5602 = vrot.lane.b32.xlu0 %v5601_v18, %s6045_s26 }
 0xbae   : > { %3270 = vadd.xlane.f32.xlu1 %v3269_v23  ;;  %v5643_v23 = vld [vmem:[%s6321_s13 + $0x10] sm:$0xff]  }
 0xbbf   : > { %3033 = vrot.lane.b32.xlu1 %v6480_v41, %s6047_s23 }
 0xbc3   : > { %5592 = vrot.lane.b32.xlu1 %v5591_v2, %s6047_s23 }
 0xbfe   : > { %v3262_v10 = vpop.xlane.xlu0 %3261 }
 0xbff   : > { %5772 = vrcp.f32 %v3262_v10  ;;  %v5644_v10 = vld [vmem:[%s6321_s13 + $0x8] sm:$0xff]  }
 0xc02   : > { %v3265_v25 = vpop.xlane.xlu1 %3264 }
 0xc03   : > { %5774 = vrcp.f32 %v3265_v25  ;;  %v5645_v25 = vld [vmem:[%s6321_s13] sm:$0xff]  }
 0xc06   : > { %v3268_v24 = vpop.xlane.xlu0 %3267  ;;  %v3031_v15 = vpop.permute.xlu1 %3030 }
 0xc07   : > { %5776 = vrcp.f32 %v3268_v24  ;;  %v3286_v29 = vpack.c.bf16 %v3031_v15, %v3031_v15 }
 0xc09   : > { %v3384_v7 = vsel %vm2326_vm6, %v3286_v29, 0 }
 0xc0a   : > { %v3028_v26 = vpop.permute.xlu0 %3027 }
 0xc0b   : > { %v3285_v27 = vpack.c.bf16 %v3028_v26, %v3028_v26 }
 0xc0c   : > { %v5773_v28 = vpop.eup %5772 }
 0xc0d   : > { %v3338_v31 = vsel %vm2326_vm6, %v3285_v27, 0  ;;  %v3276_v32 = vmul.f32 %v5773_v28, %v5765_v6 }
 0xc0e   : > { %5384 = vmatpush3.bf16.msra.mxu0 %v3338_v31  ;;  %v5598_v46 = vpop.permute.xlu0 %5597 }
 0xc0f   : > { %v3280_v41 = vpack.c.bf16 %v3276_v32, %v3276_v32  ;;  %5395 = vmatprep.subr.bf16.mxu0 %v6043_v17  ;;  %v5600_v36 = vunpack.i.h.bf16 %v5598_v46  ;;  %v5599_v13 = vunpack.i.l.bf16 %v5598_v46 }
 0xc10   : > { %v5775_v0 = vpop.eup %5774 }
 0xc11   : > { %5380 = vmatmul.mubr.msk.bf16.vlgmr.msra.gmra.mxu1 %vm2270_vm8, %v3280_v41  ;;  %v3277_v34 = vmul.f32 %v5775_v0, %v5767_v55 }
 0xc12   : > { %5390 = vmatpush3.bf16.msra.mxu1 %v3384_v7  ;;  %5391 = vmatprep.mubr.msk.bf16.mxu1 %vm6044_vm4, %v6043_v17  ;;  %v5603_v49 = vpop.permute.xlu0 %5602 }
 0xc13   : > { %v3281_v33 = vpack.c.bf16 %v3277_v34, %v3277_v34  ;;  %v5604_v52 = vunpack.i.l.bf16 %v5603_v49 }
 0xc14   : > { %v5777_v37 = vpop.eup %5776 }
 0xc15   : > { %5386 = vmatmul.mubr.msk.bf16.vlgmr.msra.gmra.mxu0 %vm2270_vm8, %v3281_v33  ;;  %v3278_v38 = vmul.f32 %v5777_v37, %v5769_v9  ;;  %v5834_v37 = vld [vmem:[#allocation2] sm:$0xff] }
 0xc16   : > { %5397 = vmatprep.mubr.msk.bf16.mxu0 %vm6044_vm4, %v6043_v17  ;;  %v5605_v17 = vunpack.i.h.bf16 %v5603_v49  ;;  %v5836_v49 = vld [vmem:[#allocation2 + $0x10] sm:$0xff] }
 0xc17   : > { %v3282_v39 = vpack.c.bf16 %v3278_v38, %v3278_v38 }
 0xc19   : > { %5392 = vmatmul.mubr.msk.bf16.vlgmr.msra.gmra.mxu1 %vm2270_vm8, %v3282_v39  ;;  %v4951_v39 = vld [vmem:[%s1129_s21] ss:$0 sm:$0xff]  ;;  %s7024_s21 = sld [smem:[#allocation33_spill]] (!%p5019_p11) }
 0xc37   : > { %v3271_v43 = vpop.xlane.xlu1 %3270 }
 0xc38   : > { %5778 = vrcp.f32 %v3271_v43 }
 0xc3b   : > { %v3034_v30 = vpop.permute.xlu1 %3033 }
 0xc3c   : > { %v3287_v47 = vpack.c.bf16 %v3034_v30, %v3034_v30 }
 0xc3e   : > { %v3430_v48 = vsel %vm2326_vm6, %v3287_v47, 0  ;;  %v5835_v47 = vld [vmem:[#allocation2 + $0x8] sm:$0xff] }
 0xc3f   : > { %v5593_v50 = vpop.permute.xlu1 %5592  ;;  %5396 = vmatpush3.bf16.msra.mxu0 %v3430_v48 }
 0xc40   : > { %v5595_v45 = vunpack.i.h.bf16 %v5593_v50  ;;  %v5594_v51 = vunpack.i.l.bf16 %v5593_v50 }
 0xc42   : > { %v3003_v53 = vsel %vm2077_vm5, %v6678_v3, %v5595_v45  ;;  %v2520_v54 = vsel %vm2077_vm5, %v6591_v60, %v5594_v51  ;;  %v5638_v60 = vld [vmem:[%s6321_s13 + $0x38] sm:$0xff]   ;;  %v5639_v3 = vld [vmem:[%s6321_s13 + $0x30] sm:$0xff]   ;;  %s7023_s13 = sld [smem:[#allocation34_spill]] (!%p5019_p11) }
 0xc43   : > { %v2522_v56 = vsel %vm2521_vm9, %v2520_v54, %v5599_v13  ;;  %v3004_v57 = vsel %vm2521_vm9, %v3003_v53, %v5600_v36  ;;  %5401 = vmatprep.subr.bf16.mxu1 %v5638_v60  ;;  %v5646_v36 = vld [vmem:[%s6337_s10 + $0xe0] ss:$16 sps:$4 sm:$0xff]   ;;  %v5648_v13 = vld [vmem:[%s6337_s10 + $0xe4] ss:$16 sps:$4 sm:$0xff]  }
 0xc44   : > { %v2524_v58 = vsel %vm2523_vm10, %v2522_v56, %v5604_v52  ;;  %v3005_v59 = vsel %vm2523_vm10, %v3004_v57, %v5605_v17  ;;  %5402 = vmatpush3.bf16.msra.mxu1 %v5638_v60  ;;  %v5649_v17 = vld [vmem:[%s6337_s10 + $0xe8] ss:$16 sps:$4 sm:$0xff]   ;;  %v5651_v52 = vld [vmem:[%s6337_s10 + $0xec] ss:$16 sps:$4 sm:$0xff]   ;;  %3831 = vmatprep.subr.bf16.mxu0 %v5648_v13 }
 0xc45   : > { %v5779_v40 = vpop.eup %5778  ;;  %v3487_v61 = vpack.c.bf16 %v3005_v59, %v2524_v58  ;;  %5403 = vmatprep.subr.bf16.mxu1 %v5639_v3 }
 0xc46   : > { %v3279_v62 = vmul.f32 %v5779_v40, %v5771_v21 }
 0xc47   : > { %5417 = vmatprep.mubr.bf16.mxu1 %v3487_v61 }
 0xc48   : > { %v3283_v63 = vpack.c.bf16 %v3279_v62, %v3279_v62  ;;  %5404 = vmatpush3.bf16.msra.mxu1 %v5639_v3 }
 0xc49   : > { %5405 = vmatprep.subr.bf16.mxu1 %v5640_v4 }
 0xc4a   : > { %5398 = vmatmul.mubr.msk.bf16.vlgmr.msra.gmra.mxu0 %vm2270_vm8, %v3283_v63 }
 0xc4b   : > { %3863 = vmatprep.mubr.bf16.mxu0 %v6042_v42  ;;  %3832 = vmatpush1.bf16.msra.mxu0 %v5646_v36 }
 0xc4c   : > { %5406 = vmatpush3.bf16.msra.mxu1 %v5640_v4  ;;  %v5657_v4 = vld [vmem:[%s6337_s10 + $0xcc] ss:$16 sps:$4 sm:$0xff]  }
 0xc4d   : > { %5407 = vmatprep.subr.bf16.mxu1 %v5641_v8 }
 0xc50   : > { %5408 = vmatpush3.bf16.msra.mxu1 %v5641_v8  ;;  %v5663_v8 = vld [vmem:[%s6337_s10 + $0xac] ss:$16 sps:$4 sm:$0xff]  }
 0xc51   : > { %5409 = vmatprep.subr.bf16.mxu1 %v5642_v16 }
 0xc54   : > { %5410 = vmatpush3.bf16.msra.mxu1 %v5642_v16  ;;  %v5664_v16 = vld [vmem:[%s6337_s10 + $0x80] ss:$16 sps:$4 sm:$0xff]  }
 0xc55   : > { %5411 = vmatprep.subr.bf16.mxu1 %v5643_v23 }
 0xc58   : > { %5412 = vmatpush3.bf16.msra.mxu1 %v5643_v23  ;;  %v5673_v23 = vld [vmem:[%s6337_s10 + $0x68] ss:$16 sps:$4 sm:$0xff]  }
 0xc59   : > { %5413 = vmatprep.subr.bf16.mxu1 %v5644_v10 }
 0xc5c   : > { %5414 = vmatpush3.bf16.msra.mxu1 %v5644_v10  ;;  %v5678_v10 = vld [vmem:[%s6337_s10 + $0x44] ss:$16 sps:$4 sm:$0xff]  }
 0xc5d   : > { %5415 = vmatprep.subr.bf16.mxu1 %v5645_v25 }
 0xc60   : > { %5416 = vmatpush3.bf16.msra.mxu1 %v5645_v25  ;;  %v5681_v25 = vld [vmem:[%s6337_s10 + $0x4c] ss:$16 sps:$4 sm:$0xff]  }
 0xc61   : > { %3882 = vmatprep.subr.bf16.mxu1 %v5651_v52  ;;  %v4953_v52 = vld [vmem:[%s1135_s15] ss:$0 sm:$0xff] }
 0xcd1   : > { %v3328_v1 = vpop.f32.mrf.mxu1 }
 0xcd3   : > { %v5381_v6 = vpop.f32.mrf.mxu1 }
 0xcd4   : > { %v5652_v6 = vld [vmem:[%s6337_s10 + $0xc0] ss:$16 sps:$4 sm:$0xff]  }
 0xcd5   : > { %v3331_v5 = vpop.f32.mrf.mxu1  ;;  %v3374_v55 = vpop.f32.mrf.mxu0 }
 0xcd6   : > { %3473 = vrot.lane.b32.xlu1 %v3374_v55, %s6047_s23  ;;  %v5655_v5 = vld [vmem:[%s6337_s10 + $0xc8] ss:$16 sps:$4 sm:$0xff]   ;;  %v5660_v55 = vld [vmem:[%s6337_s10 + $0xa4] ss:$16 sps:$4 sm:$0xff]  }
 0xcd7   : > { %v5382_v9 = vpop.f32.mrf.mxu1  ;;  %v5387_v11 = vpop.f32.mrf.mxu0 }
 0xcd8   : > { %v5658_v9 = vld [vmem:[%s6337_s10 + $0xa0] ss:$16 sps:$4 sm:$0xff]   ;;  %v5661_v11 = vld [vmem:[%s6337_s10 + $0xa8] ss:$16 sps:$4 sm:$0xff]  }
 0xcd9   : > { %v3377_v12 = vpop.f32.mrf.mxu0  ;;  %v3420_v14 = vpop.f32.mrf.mxu1 }
 0xcda   : > { %3477 = vrot.lane.b32.xlu1 %v3420_v14, %s6046_s18  ;;  %v5666_v12 = vld [vmem:[%s6337_s10 + $0x84] ss:$16 sps:$4 sm:$0xff]   ;;  %v5669_v14 = vld [vmem:[%s6337_s10 + $0x8c] ss:$16 sps:$4 sm:$0xff]  }
 0xcdb   : > { %v5388_v18 = vpop.f32.mrf.mxu0  ;;  %v5393_v44 = vpop.f32.mrf.mxu1 }
 0xcdc   : > { %v5667_v18 = vld [vmem:[%s6337_s10 + $0x88] ss:$16 sps:$4 sm:$0xff]   ;;  %v5670_v44 = vld [vmem:[%s6337_s10 + $0x60] ss:$16 sps:$4 sm:$0xff]  }
 0xcdd   : > { %v3423_v21 = vpop.f32.mrf.mxu1 }
 0xcde   : > { %v5672_v21 = vld [vmem:[%s6337_s10 + $0x64] ss:$16 sps:$4 sm:$0xff]  }
 0xcdf   : > { %v5394_v2 = vpop.f32.mrf.mxu1 }
 0xce0   : > { %v5675_v2 = vld [vmem:[%s6337_s10 + $0x6c] ss:$16 sps:$4 sm:$0xff]  }
 0xd0a   : > { %v3466_v24 = vpop.f32.mrf.mxu0 }
 0xd0b   : > { %3481 = vrot.lane.b32.xlu0 %v3466_v24, %s6045_s26  ;;  %v5676_v24 = vld [vmem:[%s6337_s10 + $0x40] ss:$16 sps:$4 sm:$0xff]  }
 0xd0c   : > { %v5399_v15 = vpop.f32.mrf.mxu0 }
 0xd0d   : > { %v5679_v15 = vld [vmem:[%s6337_s10 + $0x48] ss:$16 sps:$4 sm:$0xff]  }
 0xd0e   : > { %v3469_v26 = vpop.f32.mrf.mxu0 }
 0xd0f   : > { %v5684_v26 = vld [vmem:[%s6337_s10 + $0x24] ss:$16 sps:$4 sm:$0xff]  }
 0xd10   : > { %v5400_v27 = vpop.f32.mrf.mxu0 }
 0xd11   : > { %v5687_v27 = vld [vmem:[%s6337_s10 + $0x2c] ss:$16 sps:$4 sm:$0xff]  }
 0xd48   : > { %v3474_v28 = vpop.permute.xlu1 %3473 }
 0xd49   : > { %v3484_v31 = vsel %vm2077_vm5, %v3328_v1, %v3474_v28  ;;  %v5654_v1 = vld [vmem:[%s6337_s10 + $0xc4] ss:$16 sps:$4 sm:$0xff]   ;;  %v5682_v28 = vld [vmem:[%s6337_s10 + $0x20] ss:$16 sps:$4 sm:$0xff]  }
 0xd4a   : > { %3833 = vmatprep.subr.bf16.mxu0 %v5654_v1  ;;  %v5697_v1 = vld [vmem:[%s6344_s28 + $0xb8] sm:$0xff]  }
 0xd4b   : > { %3834 = vmatpush1.bf16.msra.mxu0 %v5652_v6  ;;  %v5700_v6 = vld [vmem:[%s6344_s28 + $0x30] sm:$0xff]  }
 0xd4c   : > { %v3478_v29 = vpop.permute.xlu1 %3477  ;;  %3835 = vmatprep.subr.bf16.mxu0 %v5660_v55  ;;  %v5702_v55 = vld [vmem:[%s6344_s28 + $0x68] sm:$0xff]  }
 0xd4d   : > { %v3485_v32 = vsel %vm2521_vm9, %v3484_v31, %v3478_v29  ;;  %v5685_v29 = vld [vmem:[%s6337_s10 + $0x28] ss:$16 sps:$4 sm:$0xff]   ;;  %v5690_v31 = vld [vmem:[%s6337_s10 + $0x4] ss:$16 sps:$4 sm:$0xff]  }
 0xd4f   : > { %3836 = vmatpush1.bf16.msra.mxu0 %v5658_v9  ;;  %v5704_v9 = vld [vmem:[%s6344_s28 + $0x28] sm:$0xff]  }
 0xd50   : > { %3837 = vmatprep.subr.bf16.mxu0 %v5666_v12  ;;  %v5706_v12 = vld [vmem:[%s6344_s28 + $0x60] sm:$0xff]  }
 0xd53   : > { %3838 = vmatpush1.bf16.msra.mxu0 %v5664_v16  ;;  %v5708_v16 = vld [vmem:[%s6344_s28 + $0x20] sm:$0xff]  }
 0xd54   : > { %3839 = vmatprep.subr.bf16.mxu0 %v5672_v21  ;;  %v5711_v21 = vld [vmem:[%s6344_s28 + $0xd8] sm:$0xff]  }
 0xd57   : > { %3840 = vmatpush1.bf16.msra.mxu0 %v5670_v44  ;;  %v5710_v44 = vld [vmem:[%s6344_s28 + $0x58] sm:$0xff]  }
 0xd58   : > { %3841 = vmatprep.subr.bf16.mxu0 %v5678_v10  ;;  %v5714_v10 = vld [vmem:[%s6344_s28 + $0x50] sm:$0xff]  }
 0xd5b   : > { %3842 = vmatpush1.bf16.msra.mxu0 %v5676_v24  ;;  %v5716_v24 = vld [vmem:[%s6344_s28 + $0x10] sm:$0xff]  }
 0xd5c   : > { %3843 = vmatprep.subr.bf16.mxu0 %v5684_v26  ;;  %v5718_v26 = vld [vmem:[%s6344_s28 + $0x48] sm:$0xff]  }
 0xd5f   : > { %3844 = vmatpush1.bf16.msra.mxu0 %v5682_v28  ;;  %v5720_v28 = vld [vmem:[%s6344_s28 + $0x8] sm:$0xff]  }
 0xd60   : > { %3845 = vmatprep.subr.bf16.mxu0 %v5690_v31  ;;  %v5722_v31 = vld [vmem:[%s6344_s28 + $0x40] sm:$0xff]  }
 0xd7d   : > { %v3482_v41 = vpop.permute.xlu0 %3481 }
 0xd7e   : > { %v3486_v0 = vsel %vm2523_vm10, %v3485_v32, %v3482_v41  ;;  %v5693_v32 = vld [vmem:[%s6337_s10 + $0xc] ss:$16 sps:$4 sm:$0xff]   ;;  %v5688_v41 = vld [vmem:[%s6337_s10] ss:$16 sps:$4 sm:$0xff]  }
 0xd7f   : > { %v3488_v7 = vpack.c.bf16 %v3486_v0, %v3486_v0  ;;  %v5691_v0 = vld [vmem:[%s6337_s10 + $0x8] ss:$16 sps:$4 sm:$0xff]   ;;  %3846 = vmatpush1.bf16.msra.mxu0 %v5688_v41  ;;  %v5724_v41 = vld [vmem:[%s6344_s28] sm:$0xff]  }
 0xd81   : > { %5418 = vmatmul.mubr.bf16.vlgmr.msra.gmra.mxu1 %v3488_v7 }
 0xd82   : > { %3914 = vmatprep.mubr.bf16.mxu1 %v6042_v42  ;;  %3883 = vmatpush1.bf16.msra.mxu1 %v5649_v17 }
 0xd83   : > { %3884 = vmatprep.subr.bf16.mxu1 %v5657_v4  ;;  %v5698_v4 = vld [vmem:[%s6344_s28 + $0x70] sm:$0xff]  }
 0xd86   : > { %3885 = vmatpush1.bf16.msra.mxu1 %v5655_v5  ;;  %v5701_v5 = vld [vmem:[%s6344_s28 + $0xb0] sm:$0xff]  }
 0xd87   : > { %3886 = vmatprep.subr.bf16.mxu1 %v5663_v8  ;;  %v5703_v8 = vld [vmem:[%s6344_s28 + $0xe8] sm:$0xff]  }
 0xd8a   : > { %3887 = vmatpush1.bf16.msra.mxu1 %v5661_v11  ;;  %v5705_v11 = vld [vmem:[%s6344_s28 + $0xa8] sm:$0xff]  }
 0xd8b   : > { %3888 = vmatprep.subr.bf16.mxu1 %v5669_v14  ;;  %v5707_v14 = vld [vmem:[%s6344_s28 + $0xe0] sm:$0xff]  }
 0xd8e   : > { %3889 = vmatpush1.bf16.msra.mxu1 %v5667_v18  ;;  %v5709_v18 = vld [vmem:[%s6344_s28 + $0xa0] sm:$0xff]  }
 0xd8f   : > { %3890 = vmatprep.subr.bf16.mxu1 %v5675_v2  ;;  %v5713_v2 = vld [vmem:[%s6344_s28 + $0x98] sm:$0xff]  }
 0xd92   : > { %3891 = vmatpush1.bf16.msra.mxu1 %v5673_v23  ;;  %v5712_v23 = vld [vmem:[%s6344_s28 + $0x18] sm:$0xff]  }
 0xd93   : > { %3892 = vmatprep.subr.bf16.mxu1 %v5681_v25  ;;  %v5715_v25 = vld [vmem:[%s6344_s28 + $0xd0] sm:$0xff]  }
 0xd96   : > { %3893 = vmatpush1.bf16.msra.mxu1 %v5679_v15  ;;  %v5717_v15 = vld [vmem:[%s6344_s28 + $0x90] sm:$0xff]  }
 0xd97   : > { %3894 = vmatprep.subr.bf16.mxu1 %v5687_v27  ;;  %v5719_v27 = vld [vmem:[%s6344_s28 + $0xc8] sm:$0xff]  }
 0xd9a   : > { %3895 = vmatpush1.bf16.msra.mxu1 %v5685_v29  ;;  %v5721_v29 = vld [vmem:[%s6344_s28 + $0x88] sm:$0xff]  }
 0xd9b   : > { %3896 = vmatprep.subr.bf16.mxu1 %v5693_v32  ;;  %v5723_v32 = vld [vmem:[%s6344_s28 + $0xc0] sm:$0xff]  }
 0xd9e   : > { %3897 = vmatpush1.bf16.msra.mxu1 %v5691_v0  ;;  %v5725_v0 = vld [vmem:[%s6344_s28 + $0x80] sm:$0xff]  }
 0xe41   : > { %v5419_v34 = vpop.f32.mrf.mxu1 }
 0xe42   : > { %v3587_v50 = vadd.f32 %v5836_v49, %v5419_v34 }
 0xe43   : > { %v3571_v33 = vpop.f32.mrf.mxu1 }
 0xe44   : > { %v3585_v38 = vadd.f32 %v5834_v37, %v3571_v33  ;;  %v6758_v51 = vadd.f32 %v4951_v39, %v3587_v50  ;;  %v4952_v50 = vld [vmem:[%s1132_s5] ss:$0 sm:$0xff] }
 0xe45   : > { %v5420_v43 = vpop.f32.mrf.mxu1 }
 0xe46   : > { %v6752_v46 = vadd.f32 %v4951_v39, %v3585_v38 }
 0xe47   : > { %v3574_v30 = vpop.f32.mrf.mxu1 }
 0xe48   : > { %v3586_v48 = vadd.f32 %v5835_v47, %v3574_v30  ;;  %3597 = vadd.xlane.f32.xlu1 %v6752_v46 }
 0xe4a   : > { %v6755_v45 = vadd.f32 %v4951_v39, %v3586_v48 }
 0xe4c   : > { %3599 = vadd.xlane.f32.xlu0 %v6755_v45 }
 0xe50   : > { %3601 = vadd.xlane.f32.xlu0 %v6758_v51 }
 0xed1   : > { %v3598_v53 = vpop.xlane.xlu1 %3597 }
 0xed2   : > { %v3603_v54 = vmul.f32 0.0078125, %v3598_v53 }
 0xed4   : > { %v6766_v56 = vsub.f32 %v6752_v46, %v3603_v54 }
 0xed5   : > { %v3600_v57 = vpop.xlane.xlu0 %3599 }
 0xed6   : > { %v3604_v58 = vmul.f32 0.0078125, %v3600_v57  ;;  %v3609_v59 = vmul.f32 %v6766_v56, %v6766_v56 }
 0xed8   : > { %v6771_v40 = vsub.f32 %v6755_v45, %v3604_v58  ;;  %3612 = vadd.xlane.f32.xlu0 %v3609_v59 }
 0xed9   : > { %v3602_v61 = vpop.xlane.xlu0 %3601 }
 0xeda   : > { %v3605_v62 = vmul.f32 0.0078125, %v3602_v61  ;;  %v3610_v63 = vmul.f32 %v6771_v40, %v6771_v40 }
 0xedc   : > { %v6776_v60 = vsub.f32 %v6758_v51, %v3605_v62  ;;  %3614 = vadd.xlane.f32.xlu1 %v3610_v63  ;;  %v5694_v63 = vld [vmem:[%s6344_s28 + $0x78] sm:$0xff]  }
 0xedd   : > { %5144 = vmatprep.subr.bf16.mxu0 %v5694_v63 }
 0xede   : > { %v3611_v3 = vmul.f32 %v6776_v60, %v6776_v60 }
 0xee0   : > { %3616 = vadd.xlane.f32.xlu0 %v3611_v3  ;;  %v5695_v3 = vld [vmem:[%s6344_s28 + $0xf8] sm:$0xff]  }
 0xee1   : > { %5172 = vmatprep.subr.bf16.mxu1 %v5695_v3 }
 0xf61   : > { %v3613_v7 = vpop.xlane.xlu0 %3612 }
 0xf62   : > { %v3618_v34 = vmul.f32 0.0078125, %v3613_v7  ;;  %v1676_v7 = vld [vmem:[%s6341_s25] sm:$0xf]  ;;  %s4563_s25 = sld [smem:[#allocation3]] (!%p5019_p11) }
 0xf64   : > { %v3621_v33 = vadd.f32 1e-05, %v3618_v34  ;;  %v3665_v34 = vsub.s32 3, %v6450_v19 }
 0xf65   : > { %v3615_v37 = vpop.xlane.xlu1 %3614 }
 0xf66   : > { %5780 = vrsqrt.f32 %v3621_v33  ;;  %v3619_v38 = vmul.f32 0.0078125, %v3615_v37  ;;  %v3654_v33 = vrot.slane %v1676_v7, %v1799_v20  ;;  %v3662_v37 = vrot.slane %v1676_v7, %v1807_v35 }
 0xf68   : > { %v3622_v39 = vadd.f32 1e-05, %v3619_v38  ;;  %v3658_v38 = vrot.slane %v1676_v7, %v1803_v22 }
 0xf69   : > { %v3617_v43 = vpop.xlane.xlu0 %3616 }
 0xf6a   : > { %5782 = vrsqrt.f32 %v3622_v39  ;;  %v3620_v30 = vmul.f32 0.0078125, %v3617_v43  ;;  %v3666_v39 = vrot.slane %v1676_v7, %v3665_v34 }
 0xf6c   : > { %v3623_v47 = vadd.f32 1e-05, %v3620_v30 }
 0xf6e   : > { %5784 = vrsqrt.f32 %v3623_v47 }
 0xf73   : > { %v5781_v48 = vpop.eup %5780 }
 0xf74   : > { %v3627_v49 = vmul.f32 %v5781_v48, %v6766_v56 }
 0xf76   : > { %v3636_v17 = vmul.f32 %v4952_v50, %v3627_v49 }
 0xf77   : > { %v5783_v36 = vpop.eup %5782 }
 0xf78   : > { %v3628_v13 = vmul.f32 %v5783_v36, %v6771_v40  ;;  %v3645_v57 = vadd.f32 %v4953_v52, %v3636_v17 }
 0xf7a   : > { %v3637_v53 = vmul.f32 %v4952_v50, %v3628_v13 }
 0xf7b   : > { %v5785_v54 = vpop.eup %5784 }
 0xf7c   : > { %v3646_v58 = vadd.f32 %v4953_v52, %v3637_v53  ;;  %v3629_v59 = vmul.f32 %v5785_v54, %v6776_v60  ;;  %v5696_v60 = vld [vmem:[%s6344_s28 + $0x38] sm:$0xff]  }
 0xf7e   : > { %v3648_v61 = vpack.c.bf16 %v3646_v58, %v3645_v57  ;;  %v3638_v56 = vmul.f32 %v4952_v50, %v3629_v59 }
 0xf80   : > { %3864 = vmatmul.mubr.bf16.vlgmr.msra.gmra.mxu0 %v3648_v61  ;;  %3915 = vmatmul.mubr.bf16.vlgmr.msra.gmra.mxu1 %v3648_v61  ;;  %v3647_v40 = vadd.f32 %v4953_v52, %v3638_v56 }
 0xf81   : > { %3873 = vmatprep.mubr.bf16.mxu0 %v6042_v42  ;;  %3924 = vmatprep.mubr.bf16.mxu1 %v6042_v42  ;;  %v5699_v42 = vld [vmem:[%s6344_s28 + $0xf0] sm:$0xff]  }
 0xf82   : > { %v3649_v62 = vpack.c.bf16 %v3647_v40, %v3647_v40  ;;  %5145 = vmatpush3.bf16.msra.mxu0 %v5696_v60  ;;  %5173 = vmatpush3.bf16.msra.mxu1 %v5697_v1 }
 0xf83   : > { %5146 = vmatprep.subr.bf16.mxu0 %v5698_v4  ;;  %5174 = vmatprep.subr.bf16.mxu1 %v5699_v42 }
 0xf86   : > { %5147 = vmatpush3.bf16.msra.mxu0 %v5700_v6  ;;  %5175 = vmatpush3.bf16.msra.mxu1 %v5701_v5 }
 0xf87   : > { %5148 = vmatprep.subr.bf16.mxu0 %v5702_v55  ;;  %5176 = vmatprep.subr.bf16.mxu1 %v5703_v8 }
 0xf88   : > { %3874 = vmatmul.mubr.bf16.gmra.mxu0 %v3649_v62  ;;  %3925 = vmatmul.mubr.bf16.gmra.mxu1 %v3649_v62 }
 0xf8a   : > { %5149 = vmatpush3.bf16.msra.mxu0 %v5704_v9  ;;  %5177 = vmatpush3.bf16.msra.mxu1 %v5705_v11 }
 0xf8b   : > { %5150 = vmatprep.subr.bf16.mxu0 %v5706_v12  ;;  %5178 = vmatprep.subr.bf16.mxu1 %v5707_v14 }
 0xf8e   : > { %5151 = vmatpush3.bf16.msra.mxu0 %v5708_v16  ;;  %5179 = vmatpush3.bf16.msra.mxu1 %v5709_v18 }
 0xf8f   : > { %5152 = vmatprep.subr.bf16.mxu0 %v5710_v44  ;;  %5180 = vmatprep.subr.bf16.mxu1 %v5711_v21 }
 0xf92   : > { %5153 = vmatpush3.bf16.msra.mxu0 %v5712_v23  ;;  %5181 = vmatpush3.bf16.msra.mxu1 %v5713_v2 }
 0xf93   : > { %5154 = vmatprep.subr.bf16.mxu0 %v5714_v10  ;;  %5182 = vmatprep.subr.bf16.mxu1 %v5715_v25 }
 0xf96   : > { %5155 = vmatpush3.bf16.msra.mxu0 %v5716_v24  ;;  %5183 = vmatpush3.bf16.msra.mxu1 %v5717_v15 }
 0xf97   : > { %5156 = vmatprep.subr.bf16.mxu0 %v5718_v26  ;;  %5184 = vmatprep.subr.bf16.mxu1 %v5719_v27 }
 0xf9a   : > { %5157 = vmatpush3.bf16.msra.mxu0 %v5720_v28  ;;  %5185 = vmatpush3.bf16.msra.mxu1 %v5721_v29 }
 0xf9b   : > { %5158 = vmatprep.subr.bf16.mxu0 %v5722_v31  ;;  %5186 = vmatprep.subr.bf16.mxu1 %v5723_v32 }
 0xf9e   : > { %5159 = vmatpush3.bf16.msra.mxu0 %v5724_v41  ;;  %5187 = vmatpush3.bf16.msra.mxu1 %v5725_v0 }
0x1040   : > { %v3865_v43 = vpop.f32.mrf.mxu0  ;;  %v3916_v30 = vpop.f32.mrf.mxu1 }
0x1041   : > { %v6859_v47 = vadd.f32 %v3865_v43, %v3654_v33  ;;  %v6861_v48 = vadd.f32 %v3916_v30, %v3662_v37 }
0x1042   : > { %v3867_v49 = vpop.f32.mrf.mxu0  ;;  %v3918_v50 = vpop.f32.mrf.mxu1 }
0x1043   : > { %v3933_v36 = vmul.f32 -1.702, %v6859_v47  ;;  %v3935_v13 = vmul.f32 -1.702, %v6861_v48  ;;  %v6865_v20 = vadd.f32 %v3867_v49, %v3658_v38  ;;  %v6867_v17 = vadd.f32 %v3918_v50, %v3666_v39 }
0x1044   : > { %v3869_v35 = vpop.f32.mrf.mxu0  ;;  %v3920_v19 = vpop.f32.mrf.mxu1 }
0x1045   : > { %v3945_v22 = vmul.f32 1.442695, %v3933_v36  ;;  %v3949_v52 = vmul.f32 1.442695, %v3935_v13  ;;  %v3934_v53 = vmul.f32 -1.702, %v6865_v20  ;;  %v6870_v54 = vadd.f32 %v3869_v35, %v3654_v33 }
0x1046   : > { %v3936_v57 = vmul.f32 -1.702, %v6867_v17  ;;  %v6873_v58 = vadd.f32 %v3920_v19, %v3662_v37  ;;  %v3871_v59 = vpop.f32.mrf.mxu0  ;;  %v3922_v61 = vpop.f32.mrf.mxu1 }
0x1047   : > { %5786 = vpow2.f32 %v3945_v22  ;;  %v3947_v56 = vmul.f32 1.442695, %v3934_v53  ;;  %v3937_v40 = vmul.f32 -1.702, %v6870_v54  ;;  %v6876_v62 = vadd.f32 %v3871_v59, %v3658_v38 }
0x1048   : > { %5788 = vpow2.f32 %v3949_v52  ;;  %v3951_v63 = vmul.f32 1.442695, %v3936_v57  ;;  %v3939_v3 = vmul.f32 -1.702, %v6873_v58  ;;  %v6879_v60 = vadd.f32 %v3922_v61, %v3666_v39  ;;  %v3875_v1 = vpop.f32.mrf.mxu0  ;;  %v3926_v4 = vpop.f32.mrf.mxu1 }
0x1049   : > { %5790 = vpow2.f32 %v3947_v56  ;;  %v3953_v42 = vmul.f32 1.442695, %v3937_v40  ;;  %v3938_v6 = vmul.f32 -1.702, %v6876_v62  ;;  %v6882_v5 = vadd.f32 %v3875_v1, %v3654_v33 }
0x104a   : > { %5792 = vpow2.f32 %v3951_v63  ;;  %v3957_v55 = vmul.f32 1.442695, %v3939_v3  ;;  %v3940_v8 = vmul.f32 -1.702, %v6879_v60  ;;  %v6885_v9 = vadd.f32 %v3926_v4, %v3662_v37  ;;  %v3877_v11 = vpop.f32.mrf.mxu0  ;;  %v3928_v12 = vpop.f32.mrf.mxu1 }
0x104b   : > { %5794 = vpow2.f32 %v3953_v42  ;;  %v3955_v14 = vmul.f32 1.442695, %v3938_v6  ;;  %v3941_v16 = vmul.f32 -1.702, %v6882_v5  ;;  %v6888_v18 = vadd.f32 %v3877_v11, %v3658_v38 }
0x104c   : > { %5796 = vpow2.f32 %v3957_v55  ;;  %v3959_v44 = vmul.f32 1.442695, %v3940_v8  ;;  %v3943_v21 = vmul.f32 -1.702, %v6885_v9  ;;  %v6891_v23 = vadd.f32 %v3928_v12, %v3666_v39  ;;  %v3879_v2 = vpop.f32.mrf.mxu0  ;;  %v3930_v10 = vpop.f32.mrf.mxu1 }
0x104d   : > { %5798 = vpow2.f32 %v3955_v14  ;;  %v3961_v25 = vmul.f32 1.442695, %v3941_v16  ;;  %v3942_v24 = vmul.f32 -1.702, %v6888_v18 }
0x104e   : > { %5800 = vpow2.f32 %v3959_v44  ;;  %v3965_v15 = vmul.f32 1.442695, %v3943_v21  ;;  %v3944_v26 = vmul.f32 -1.702, %v6891_v23  ;;  %v3880_v27 = vpop.f32.mrf.mxu0  ;;  %v3931_v28 = vpop.f32.mrf.mxu1 }
0x104f   : > { %5802 = vpow2.f32 %v3961_v25  ;;  %v3963_v29 = vmul.f32 1.442695, %v3942_v24 }
0x1050   : > { %5804 = vpow2.f32 %v3965_v15  ;;  %v3967_v31 = vmul.f32 1.442695, %v3944_v26 }
0x1051   : > { %5806 = vpow2.f32 %v3963_v29 }
0x1052   : > { %5808 = vpow2.f32 %v3967_v31 }
0x1054   : > { %v5787_v32 = vpop.eup %5786 }
0x1055   : > { %v5789_v41 = vpop.eup %5788  ;;  %v3969_v0 = vadd.f32 1.0, %v5787_v32 }
0x1056   : > { %v5791_v7 = vpop.eup %5790  ;;  %v3971_v34 = vadd.f32 1.0, %v5789_v41 }
0x1057   : > { %v5793_v33 = vpop.eup %5792  ;;  %5810 = vrcp.f32 %v3969_v0  ;;  %v3970_v37 = vadd.f32 1.0, %v5791_v7 }
0x1058   : > { %v5795_v38 = vpop.eup %5794  ;;  %5812 = vrcp.f32 %v3971_v34  ;;  %v3972_v39 = vadd.f32 1.0, %v5793_v33 }
0x1059   : > { %v5797_v43 = vpop.eup %5796  ;;  %5814 = vrcp.f32 %v3970_v37  ;;  %v3973_v30 = vadd.f32 1.0, %v5795_v38 }
0x105a   : > { %v5799_v49 = vpop.eup %5798  ;;  %5816 = vrcp.f32 %v3972_v39  ;;  %v3975_v50 = vadd.f32 1.0, %v5797_v43 }
0x105b   : > { %v5801_v36 = vpop.eup %5800  ;;  %5818 = vrcp.f32 %v3973_v30  ;;  %v3974_v13 = vadd.f32 1.0, %v5799_v49 }
0x105c   : > { %v5803_v35 = vpop.eup %5802  ;;  %5820 = vrcp.f32 %v3975_v50  ;;  %v3976_v19 = vadd.f32 1.0, %v5801_v36 }
0x105d   : > { %v5805_v22 = vpop.eup %5804  ;;  %5822 = vrcp.f32 %v3974_v13  ;;  %v3977_v52 = vadd.f32 1.0, %v5803_v35 }
0x105e   : > { %v5807_v53 = vpop.eup %5806  ;;  %5824 = vrcp.f32 %v3976_v19  ;;  %v3979_v59 = vadd.f32 1.0, %v5805_v22 }
0x105f   : > { %v5809_v57 = vpop.eup %5808  ;;  %v3978_v61 = vadd.f32 1.0, %v5807_v53  ;;  %5826 = vrcp.f32 %v3977_v52 }
0x1060   : > { %v3980_v56 = vadd.f32 1.0, %v5809_v57 }
0x1061   : > { %5828 = vrcp.f32 %v3978_v61 }
0x1062   : > { %5830 = vrcp.f32 %v3980_v56 }
0x1063   : > { %5832 = vrcp.f32 %v3979_v59 }
0x1064   : > { %v5811_v40 = vpop.eup %5810 }
0x1065   : > { %v5813_v63 = vpop.eup %5812  ;;  %v3993_v16 = vmul.f32 %v5811_v40, %v6859_v47 }
0x1066   : > { %v5815_v3 = vpop.eup %5814  ;;  %v3995_v10 = vmul.f32 %v5813_v63, %v6861_v48 }
0x1067   : > { %v5817_v1 = vpop.eup %5816  ;;  %v3994_v11 = vmul.f32 %v5815_v3, %v6865_v20 }
0x1068   : > { %v5819_v4 = vpop.eup %5818  ;;  %v3996_v44 = vmul.f32 %v5817_v1, %v6867_v17 }
0x1069   : > { %v5821_v42 = vpop.eup %5820  ;;  %v3997_v55 = vmul.f32 %v5819_v4, %v6870_v54 }
0x106a   : > { %v5823_v6 = vpop.eup %5822  ;;  %v3999_v12 = vmul.f32 %v5821_v42, %v6873_v58 }
0x106b   : > { %v5825_v8 = vpop.eup %5824  ;;  %v3998_v14 = vmul.f32 %v5823_v6, %v6876_v62  ;;  %v4005_v15 = vpack.c.bf16 %v3997_v55, %v3993_v16 }
0x106c   : > { %v4000_v21 = vmul.f32 %v5825_v8, %v6879_v60  ;;  %v5827_v2 = vpop.eup %5826  ;;  %v4007_v27 = vpack.c.bf16 %v3999_v12, %v3995_v10 }
0x106d   : > { %v4006_v25 = vpack.c.bf16 %v3998_v14, %v3994_v11  ;;  %v4001_v17 = vmul.f32 %v5827_v2, %v6882_v5 }
0x106e   : > { %v5829_v24 = vpop.eup %5828  ;;  %v4008_v54 = vpack.c.bf16 %v4000_v21, %v3996_v44 }
0x106f   : > { %v5831_v26 = vpop.eup %5830  ;;  %v4002_v20 = vmul.f32 %v5829_v24, %v6888_v18  ;;  %4237 = vmatprep.mubr.bf16.mxu0 %v4006_v25  ;;  %v4009_v28 = vpack.c.bf16 %v4001_v17, %v4001_v17 }
0x1070   : > { %v5833_v58 = vpop.eup %5832  ;;  %v4004_v62 = vmul.f32 %v5831_v26, %v6891_v23  ;;  %4285 = vmatprep.mubr.bf16.mxu1 %v4008_v54  ;;  %4238 = vmatmul.mubr.bf16.vlgmr.msra.gmra.mxu0 %v4005_v15 }
0x1071   : > { %v4010_v47 = vpack.c.bf16 %v4002_v20, %v4002_v20  ;;  %4286 = vmatmul.mubr.bf16.vlgmr.msra.gmra.mxu1 %v4007_v27  ;;  %v4003_v48 = vmul.f32 %v5833_v58, %v6885_v9  ;;  %v5018_v9 = vld [vmem:[%s1152_s6] ss:$0 sm:$0xff] }
0x1072   : > { %v4012_v60 = vpack.c.bf16 %v4004_v62, %v4004_v62 }
0x1073   : > { %4245 = vmatprep.mubr.bf16.mxu0 %v4010_v47  ;;  %v4011_v29 = vpack.c.bf16 %v4003_v48, %v4003_v48 }
0x1074   : > { %4293 = vmatprep.mubr.bf16.mxu1 %v4012_v60 }
0x1078   : > { %4246 = vmatmul.mubr.bf16.gmra.mxu0 %v4009_v28 }
0x1079   : > { %4294 = vmatmul.mubr.bf16.gmra.mxu1 %v4011_v29 }
0x1130   : > { %v5160_v18 = vpop.f32.mrf.mxu0 }
0x1131   : > { %v5188_v31 = vpop.f32.mrf.mxu1 }
0x1132   : > { %v5161_v23 = vpop.f32.mrf.mxu0 }
0x1133   : > { %v5162_v32 = vadd.f32 %v5161_v23, %v5160_v18  ;;  %v5189_v41 = vpop.f32.mrf.mxu1 }
0x1134   : > { %v5190_v0 = vadd.f32 %v5189_v41, %v5188_v31  ;;  %v5163_v7 = vpop.f32.mrf.mxu0 }
0x1135   : > { %v5191_v34 = vpop.f32.mrf.mxu1 }
0x1136   : > { %v4288_v5 = vadd.f32 %v5190_v0, %v5162_v32  ;;  %v5164_v33 = vpop.f32.mrf.mxu0 }
0x1137   : > { %v5165_v37 = vadd.f32 %v5164_v33, %v5163_v7  ;;  %v5192_v38 = vpop.f32.mrf.mxu1 }
0x1138   : > { %v4301_v39 = vadd.f32 %v4288_v5, %v6752_v46  ;;  %v5193_v43 = vadd.f32 %v5192_v38, %v5191_v34  ;;  %v5166_v30 = vpop.f32.mrf.mxu0 }
0x1139   : > { %v5194_v49 = vpop.f32.mrf.mxu1 }
0x113a   : > { %v4310_v50 = vadd.f32 %v5018_v9, %v4301_v39  ;;  %v4291_v36 = vadd.f32 %v5193_v43, %v5165_v37  ;;  %v5167_v13 = vpop.f32.mrf.mxu0 }
0x113b   : > { %v5168_v35 = vadd.f32 %v5167_v13, %v5166_v30  ;;  %v5195_v19 = vpop.f32.mrf.mxu1 }
0x113c   : > { %4313 = vst [vmem:[#allocation2] sm:$0xff] %v4310_v50  ;;  %v4302_v22 = vadd.f32 %v4291_v36, %v6755_v45  ;;  %v5196_v52 = vadd.f32 %v5195_v19, %v5194_v49  ;;  %v5169_v53 = vpop.f32.mrf.mxu0 }
0x113d   : > { %v5197_v57 = vpop.f32.mrf.mxu1 }
0x113e   : > { %v4311_v59 = vadd.f32 %v5018_v9, %v4302_v22  ;;  %v4296_v61 = vadd.f32 %v5196_v52, %v5168_v35  ;;  %v5170_v56 = vpop.f32.mrf.mxu0 }
0x113f   : > { %v5198_v40 = vpop.f32.mrf.mxu1 }
0x1140   : > { %4314 = vst [vmem:[#allocation2 + $0x8] sm:$0xff] %v4311_v59  ;;  %v4303_v46 = vadd.f32 %v4296_v61, %v6758_v51  ;;  %4319 = sbr.rel (%p5019_p11) target bundleno = 5387 (0x150b), region = 164 }
0x1142   : > { %v4312_v63 = vadd.f32 %v5018_v9, %v4303_v46 }
0x1144   : > { %4315 = vst [vmem:[#allocation2 + $0x10] sm:$0xff] %v4312_v63 }
0x1145   : > { %v4322_v3 = vld [vmem:[%s7023_s13 + $0x10] sm:$0xff]  ;;  %v4320_v45 = vld [vmem:[%s7023_s13] sm:$0xff]  ;;  %v6049_v1 = vmov 0   ;;  %v4321_v4 = vld [vmem:[%s7023_s13 + $0x8] sm:$0xff]  ;;  %vm4364_vm11 = vcmask 1041409   ;;  %vm4366_vm12 = vcmask 1042434  }
0x1146   : > { %5838 = vset.pattern.permute.xlu1 %v6049_v1  ;;  %5837 = vset.pattern.permute.xlu0 %v6049_v1  ;;  %vm4369_vm13 = vcmask 1042432   ;;  %v5839_v43 = vld [vmem:[%s7024_s21 + $0x38] sm:$0xff]   ;;  %v6050_v30 = vmov 0.0   ;;  %v5840_v49 = vld [vmem:[%s7024_s21 + $0x30] sm:$0xff]   ;;  %vm6051_vm14 = vmmov 0   ;;  %v5842_v36 = vld [vmem:[%s7024_s21 + $0x20] sm:$0xff]  }
0x1147   : > { %4335 = vperm.xlu1 %5838, %v4322_v3   ;;  %4325 = vperm.xlu0 %5837, %v4320_v45   ;;  %v5843_v13 = vld [vmem:[%s7024_s21 + $0x18] sm:$0xff]   ;;  %v5844_v35 = vld [vmem:[%s7024_s21 + $0x10] sm:$0xff]   ;;  %v5845_v19 = vld [vmem:[%s7024_s21 + $0x8] sm:$0xff]   ;;  %vm4566_vm15 = vcmask 2048  }
0x1148   : > { %5421 = vmatprep.subr.bf16.mxu0 %v6050_v30  ;;  %5437 = vmatprep.mubr.msk.bf16.mxu0 %vm6051_vm14, %v6050_v30  ;;  %v5846_v22 = vld [vmem:[%s7024_s21] sm:$0xff]   ;;  %v5020_v61 = vld [vmem:[#allocation8] ss:$0 sm:$0xff] }
0x1149   : > { %5422 = vmatpush3.bf16.msra.mxu0 %v5839_v43 }
0x114a   : > { %5423 = vmatprep.subr.bf16.mxu0 %v6050_v30 }
0x114b   : > { %4330 = vperm.xlu0 %5837, %v4321_v4  }
0x114d   : > { %5424 = vmatpush3.bf16.msra.mxu0 %v5840_v49 }
0x114e   : > { %5425 = vmatprep.subr.bf16.mxu0 %v6050_v30 }
0x11c2   : > { %v4336_v42 = vpop.permute.xlu1 %4335  ;;  %v4326_v6 = vpop.permute.xlu0 %4325 }
0x11c3   : > { %v4340_v51 = vmul.f32 %v4336_v42, %v4312_v63  ;;  %v4338_v55 = vmul.f32 %v4326_v6, %v4310_v50  ;;  %v5841_v50 = vld [vmem:[%s7024_s21 + $0x28] sm:$0xff]   ;;  %v5021_v63 = vld [vmem:[#allocation9] ss:$0 sm:$0xff] }
0x11c4   : > { %5426 = vmatpush3.bf16.msra.mxu0 %v5841_v50 }
0x11c5   : > { %v4353_v8 = vrot.slane %v4340_v51, 4  ;;  %v4341_v11 = vrot.slane %v4338_v55, 4  ;;  %5427 = vmatprep.subr.bf16.mxu0 %v6050_v30 }
0x11c6   : > { %v4331_v12 = vpop.permute.xlu0 %4330 }
0x11c7   : > { %v4354_v14 = vadd.f32 %v4353_v8, %v4340_v51  ;;  %v4342_v16 = vadd.f32 %v4341_v11, %v4338_v55  ;;  %v4339_v44 = vmul.f32 %v4331_v12, %v4311_v59 }
0x11c8   : > { %5428 = vmatpush3.bf16.msra.mxu0 %v5842_v36 }
0x11c9   : > { %v4355_v21 = vrot.slane %v4354_v14, 2  ;;  %v4343_v2 = vrot.slane %v4342_v16, 2  ;;  %v4347_v10 = vrot.slane %v4339_v44, 4  ;;  %5429 = vmatprep.subr.bf16.mxu0 %v6050_v30 }
0x11cb   : > { %v4344_v25 = vadd.f32 %v4343_v2, %v4342_v16  ;;  %v4348_v24 = vadd.f32 %v4347_v10, %v4339_v44  ;;  %v4356_v15 = vadd.f32 %v4355_v21, %v4354_v14 }
0x11cc   : > { %5430 = vmatpush3.bf16.msra.mxu0 %v5843_v13 }
0x11cd   : > { %v4349_v54 = vrot.slane %v4348_v24, 2  ;;  %v4345_v26 = vrot.slane %v4344_v25, 1  ;;  %v4357_v20 = vrot.slane %v4356_v15, 1  ;;  %5431 = vmatprep.subr.bf16.mxu0 %v6050_v30 }
0x11cf   : > { %v4350_v27 = vadd.f32 %v4349_v54, %v4348_v24  ;;  %v4346_v62 = vadd.f32 %v4345_v26, %v4344_v25  ;;  %v4358_v17 = vadd.f32 %v4357_v20, %v4356_v15 }
0x11d0   : > { %5432 = vmatpush3.bf16.msra.mxu0 %v5844_v35 }
0x11d1   : > { %v4351_v58 = vrot.slane %v4350_v27, 1  ;;  %5433 = vmatprep.subr.bf16.mxu0 %v6050_v30 }
0x11d3   : > { %v4352_v47 = vadd.f32 %v4351_v58, %v4350_v27 }
0x11d4   : > { %5434 = vmatpush3.bf16.msra.mxu0 %v5845_v19 }
0x11d5   : > { %v4365_v60 = vsel %vm4364_vm11, %v4352_v47, %v4346_v62  ;;  %5435 = vmatprep.subr.bf16.mxu0 %v6050_v30 }
0x11d6   : > { %v4367_v48 = vsel %vm4366_vm12, %v4358_v17, %v4365_v60 }
0x11d7   : > { %v4370_v28 = vsel %vm4369_vm13, %v4367_v48, 0.0 }
0x11d8   : > { %4371 = vadd.xlane.f32.xlu1 %v4370_v28  ;;  %5436 = vmatpush3.bf16.msra.mxu0 %v5846_v22 }
0x1261   : > { %v4372_v29 = vpop.xlane.xlu1 %4371 }
0x1262   : > { %v4373_v18 = vmul.f32 0.0078125, %v4372_v29  ;;  %v4564_v29 = vstv %s4563_s25 }
0x1264   : > { %v4375_v31 = vrot.slane %v4373_v18, 1  ;;  %v4376_v23 = vrot.slane %v4373_v18, 2  ;;  %v4380_v32 = vsub.f32 %v4346_v62, %v4373_v18 }
0x1266   : > { %v4381_v41 = vsub.f32 %v4352_v47, %v4375_v31  ;;  %v4382_v0 = vsub.f32 %v4358_v17, %v4376_v23  ;;  %v4383_v5 = vmul.f32 %v4380_v32, %v4380_v32  ;;  %v5030_v17 = vld [vmem:[%s6311_s22] ss:$0 sm:$0xff] }
0x1268   : > { %v4384_v7 = vmul.f32 %v4381_v41, %v4381_v41  ;;  %v4385_v34 = vmul.f32 %v4382_v0, %v4382_v0 }
0x126a   : > { %v4389_v33 = vrot.slane %v4384_v7, 7  ;;  %v4391_v9 = vrot.slane %v4385_v34, 6 }
0x126c   : > { %v4390_v37 = vsel %vm4364_vm11, %v4389_v33, %v4383_v5 }
0x126d   : > { %v4392_v38 = vsel %vm4366_vm12, %v4391_v9, %v4390_v37 }
0x126e   : > { %v4394_v39 = vsel %vm4369_vm13, %v4392_v38, 0.0 }
0x126f   : > { %4395 = vadd.xlane.f32.xlu0 %v4394_v39 }
0x12f8   : > { %v4396_v52 = vpop.xlane.xlu0 %4395 }
0x12f9   : > { %v4397_v53 = vmul.f32 0.0078125, %v4396_v52 }
0x12fb   : > { %v4398_v57 = vadd.f32 1e-05, %v4397_v53 }
0x12fd   : > { %5847 = vrsqrt.f32 %v4398_v57 }
0x130a   : > { %v5848_v59 = vpop.eup %5847 }
0x130b   : > { %v4401_v56 = vrot.slane %v5848_v59, 1  ;;  %v4402_v40 = vrot.slane %v5848_v59, 2  ;;  %v4406_v46 = vmul.f32 %v5848_v59, %v4380_v32 }
0x130d   : > { %v4407_v3 = vmul.f32 %v4401_v56, %v4381_v41  ;;  %v4408_v45 = vmul.f32 %v4402_v40, %v4382_v0  ;;  %v4415_v1 = vmul.f32 %v5020_v61, %v4406_v46 }
0x130f   : > { %v4416_v4 = vmul.f32 %v5020_v61, %v4407_v3  ;;  %v4417_v42 = vmul.f32 %v5020_v61, %v4408_v45  ;;  %v4424_v6 = vadd.f32 %v5021_v63, %v4415_v1 }
0x1311   : > { %v4425_v51 = vadd.f32 %v5021_v63, %v4416_v4  ;;  %v4426_v55 = vadd.f32 %v5021_v63, %v4417_v42  ;;  %v4427_v8 = vpack.c.bf16 %v4424_v6, %v4424_v6 }
0x1313   : > { %v4428_v11 = vpack.c.bf16 %v4425_v51, %v4425_v51  ;;  %v4429_v12 = vpack.c.bf16 %v4426_v55, %v4426_v55  ;;  %v4449_v44 = vunpack.c.l.b16 %v4427_v8 }
0x1315   : > { %v4450_v14 = vunpack.c.l.b16 %v4428_v11  ;;  %v4451_v16 = vunpack.c.l.b16 %v4429_v12 }
0x1317   : > { %v4452_v21 = vrot.slane %v4450_v14, 7  ;;  %v4454_v2 = vrot.slane %v4451_v16, 6 }
0x1319   : > { %v4453_v10 = vsel %vm4364_vm11, %v4452_v21, %v4449_v44 }
0x131a   : > { %v4455_v25 = vsel %vm4366_vm12, %v4454_v2, %v4453_v10 }
0x131b   : > { %v4456_v24 = vpack.c.b16 %v4455_v25, %v4455_v25 }
0x131d   : > { %5438 = vmatmul.mubr.bf16.vlgmr.msra.gmra.mxu0 %v4456_v24 }
0x13dd   : > { %v4540_v15 = vpop.f32.mrf.mxu0 }
0x13de   : > { %v4546_v54 = vmul.f32 %v4540_v15, %v4540_v15 }
0x13df   : > { %v5439_v26 = vpop.f32.mrf.mxu0 }
0x13e0   : > { %v4547_v27 = vsel %vm4369_vm13, %v4546_v54, 0.0 }
0x13e1   : > { %4548 = vadd.xlane.f32.xlu0 %v4547_v27  ;;  %v4543_v20 = vpop.f32.mrf.mxu0 }
0x13e3   : > { %v5440_v58 = vpop.f32.mrf.mxu0 }
0x146a   : > { %v4549_v62 = vpop.xlane.xlu0 %4548 }
0x146b   : > { %5849 = vrsqrt.f32 %v4549_v62 }
0x1478   : > { %v5850_v47 = vpop.eup %5849 }
0x1479   : > { %v4551_v60 = vmul.f32 %v5850_v47, %v4540_v15 }
0x147b   : > { %v4559_v48 = vmul.f32 %v5030_v17, %v4551_v60 }
0x147d   : > { %v4560_v28 = vsel %vm4369_vm13, %v4559_v48, 0.0 }
0x147e   : > { %4561 = vadd.xlane.f32.xlu1 %v4560_v28 }
0x1507   : > { %v4562_v18 = vpop.xlane.xlu1 %4561 }
0x1508   : > { %v4565_v31 = vmul.f32 %v4564_v29, %v4562_v18 }
0x150a   : > { %4567 = vst.msk [vmem:[%s6349_s30] sm:$0x7] %vm4566_vm15, %v4565_v31 }
0x150b PF: > { %s7025_s6 = sld [smem:[#allocation37_spill]] }
0x150c   : > { %s7026_s7 = sld [smem:[#allocation35_spill]] }
0x150d   : > { %s7027_s10 = sld [smem:[#allocation36_spill]] }
0x150e   : > { %s7028_s11 = sld [smem:[#allocation38_spill]] }
0x150f   : > { %s7029_s15 = sld [smem:[#allocation39_spill]] }
0x1511   : > { %s73_s16 = sadd.s32 1, %s7025_s6  }
0x1512   : > { %p70_p1 = scmp.ge.s32.totalorder %s73_s16, 6  }
0x1514   :  { %72 = sbr.rel (!%p70_p1) target bundleno = 61 (0x3d), region = 267 }
0x1519   :  { %4587 = vsyncpa [#allocation5], 1 }
0x151a   :  { %4589 = vsyncpa [#allocation5 + $0x1], 1 }
0x151b   :  { %4590 = vsyncpa [#allocation7], 1 }
0x151c   :  { %4591 = vsyncpa [#allocation10], 1 }

// kernel: custom_clip_forward.2
= control target key start
LH: loop header
LB: loop body
LE: loop exit
PB: predicated region body
PF: predicated region fallthrough
CT: control target
= control target key end

     0   :  { %s8132_s0 = inlined_call_operand.vmem [shape: f32[2,4,192], index: 0, kind: input, shape index: {}]   ;;  %s8133_s1 = inlined_call_operand.vmem [shape: bf16[192,256], index: 1, kind: input, shape index: {}]   ;;  %s8134_s2 = inlined_call_operand.vmem [shape: f32[1,256], index: 2, kind: input, shape index: {}]   ;;  %s8135_s3 = inlined_call_operand.vmem [shape: f32[5,256], index: 3, kind: input, shape index: {}]   ;;  %s8136_s4 = inlined_call_operand.vmem [shape: f32[2,128], index: 4, kind: input, shape index: {}]   ;;  %s8137_s5 = inlined_call_operand.vmem [shape: bf16[128,256], index: 5, kind: input, shape index: {}]   ;;  %s8138_s6 = inlined_call_operand.vmem [shape: f32[1,256], index: 6, kind: input, shape index: {}]   ;;  %s8139_s7 = inlined_call_operand.vmem [shape: f32[1,256], index: 7, kind: input, shape index: {}]   ;;  %s8140_s8 = inlined_call_operand.vmem [shape: f32[1,256], index: 8, kind: input, shape index: {}]   ;;  %s8141_s9 = inlined_call_operand.vmem [shape: f32[1,2,256], index: 9, kind: input, shape index: {}]   ;;  %s8142_s10 = inlined_call_operand.vmem [shape: f32[2,1,256], index: 10, kind: input, shape index: {}]   ;;  %s8143_s11 = inlined_call_operand.vmem [shape: f32[2,1,256], index: 11, kind: input, shape index: {}]   ;;  %s8144_s12 = inlined_call_operand.hbm [shape: bf16[2,256,768], index: 12, kind: input, shape index: {}]   ;;  %s8145_s13 = inlined_call_operand.vmem [shape: f32[2,1,768], index: 13, kind: input, shape index: {}]   ;;  %s8146_s14 = inlined_call_operand.vmem [shape: bf16[2,256,256], index: 14, kind: input, shape index: {}]   ;;  %s8147_s15 = inlined_call_operand.vmem [shape: f32[2,1,256], index: 15, kind: input, shape index: {}]   ;;  %s8148_s16 = inlined_call_operand.vmem [shape: f32[2,1,256], index: 16, kind: input, shape index: {}]   ;;  %s8149_s17 = inlined_call_operand.vmem [shape: f32[2,1,256], index: 17, kind: input, shape index: {}]   ;;  %s8150_s18 = inlined_call_operand.hbm [shape: bf16[2,256,1024], index: 18, kind: input, shape index: {}]   ;;  %s8151_s19 = inlined_call_operand.vmem [shape: f32[2,1,1024], index: 19, kind: input, shape index: {}]   ;;  %s8152_s20 = inlined_call_operand.hbm [shape: bf16[2,1024,256], index: 20, kind: input, shape index: {}]   ;;  %s8153_s21 = inlined_call_operand.vmem [shape: f32[2,1,256], index: 21, kind: input, shape index: {}]   ;;  %s8154_s22 = inlined_call_operand.vmem [shape: f32[1,256], index: 22, kind: input, shape index: {}]   ;;  %s8155_s23 = inlined_call_operand.vmem [shape: f32[1,256], index: 23, kind: input, shape index: {}]   ;;  %s8156_s24 = inlined_call_operand.hbm [shape: bf16[256,128], index: 24, kind: input, shape index: {}]   ;;  %s8157_s25 = inlined_call_operand.vmem [shape: f32[2,1,128], index: 25, kind: output, shape index: {}]  }
   0x1   :  { %8169 = sst [smem:[#allocation21_spill]] %s8132_s0 }
   0x2   :  { %8170 = sst [smem:[#allocation22_spill]] %s8133_s1 }
   0x3   :  { %8171 = sst [smem:[#allocation23_spill]] %s8134_s2 }
   0x4   :  { %8172 = sst [smem:[#allocation24_spill]] %s8135_s3 }
   0x5   :  { %8173 = sst [smem:[#allocation25_spill]] %s8136_s4 }
   0x6   :  { %8174 = sst [smem:[#allocation26_spill]] %s8137_s5 }
   0x7   :  { %8175 = sst [smem:[#allocation27_spill]] %s8138_s6 }
   0x8   :  { %8176 = sst [smem:[#allocation28_spill]] %s8139_s7 }
   0x9   :  { %8177 = sst [smem:[#allocation29_spill]] %s8140_s8 }
   0xa   :  { %8178 = sst [smem:[#allocation30_spill]] %s8141_s9 }
   0xb   :  { %8179 = sst [smem:[#allocation31_spill]] %s8142_s10 }
   0xc   :  { %8180 = sst [smem:[#allocation32_spill]] %s8143_s11 }
   0xd   :  { %8181 = sst [smem:[#allocation33_spill]] %s8144_s12 }
   0xe   :  { %8182 = sst [smem:[#allocation34_spill]] %s8145_s13 }
   0xf   :  { %8183 = sst [smem:[#allocation35_spill]] %s8146_s14 }
  0x10   :  { %8184 = sst [smem:[#allocation36_spill]] %s8147_s15 }
  0x11   :  { %8185 = sst [smem:[#allocation37_spill]] %s8148_s16 }
  0x12   :  { %8186 = sst [smem:[#allocation38_spill]] %s8149_s17 }
  0x13   :  { %8187 = sst [smem:[#allocation39_spill]] %s8150_s18 }
  0x14   :  { %8188 = sst [smem:[#allocation40_spill]] %s8151_s19 }
  0x15   :  { %8189 = sst [smem:[#allocation41_spill]] %s8152_s20 }
  0x16   :  { %8190 = sst [smem:[#allocation42_spill]] %s8153_s21 }
  0x17   :  { %8191 = sst [smem:[#allocation43_spill]] %s8154_s22 }
  0x18   :  { %8192 = sst [smem:[#allocation44_spill]] %s8155_s23 }
  0x19   :  { %8193 = sst [smem:[#allocation45_spill]] %s8156_s24 }
  0x1a   :  { %8194 = sst [smem:[#allocation46_spill]] %s8157_s25 }
  0x1b   :  { %30 = vsyncpa [#allocation4], 0 }
  0x1c   :  { %32 = vsyncpa [#allocation4 + $0x1], 0 }
  0x1d   :  { %33 = vsyncpa [#allocation6], 0 }
  0x1e   :  { %35 = vsyncpa [#allocation6 + $0x1], 0 }
  0x1f   :  { %36 = vsyncpa [#allocation9], 0  ;;  %s7098_s29 = smov 0   ;;  %s7100_s2 = smov 0  }
  0x20   :  { %s7102_s6 = smov 0   ;;  %s7104_s30 = smov 0  }
  0x21   :  { %s7106_s7 = smov 0   ;;  %s7108_s3 = smov 0  }
  0x22   :  { %s7110_s26 = smov 0   ;;  %s7112_s1 = smov 0  }
  0x23 LB: > { %8195 = sst [smem:[#allocation13_spill]] %s6924_s2  ;;  %s51_s8 = sadd.s32 1, %s6940_s3  ;;  %s6948_s1 = sphi %s7112_s1, %s42_s1   ;;  %s6944_s26 = sphi %s7110_s26, %s8254_s26   ;;  %s6940_s3 = sphi %s7108_s3, %s8253_s3   ;;  %s6936_s7 = sphi %s7106_s7, %s8252_s7   ;;  %s6932_s30 = sphi %s7104_s30, %s8251_s30   ;;  %s6928_s6 = sphi %s7102_s6, %s8250_s6   ;;  %s6924_s2 = sphi %s7100_s2, %s8249_s2   ;;  %s6920_s29 = sphi %s7098_s29, %s8248_s29  }
  0x24   : > { %8196 = sst [smem:[#allocation14_spill]] %s6928_s6  ;;  %s54_s27 = sadd.s32 1, %s6944_s26 }
  0x25   : > { %8197 = sst [smem:[#allocation15_spill]] %s6940_s3  ;;  %p52_p0 = scmp.ge.s32.totalorder %s51_s8, 2 }
  0x26   : > { %8198 = sst [smem:[#allocation16_spill]] %s6944_s26  ;;  %s328_s4 = sadd.s32 1, %s6928_s6 }
  0x27   : > { %8199 = sst [smem:[#allocation17_spill]] %s6948_s1  ;;  %p335_p1 = scmp.ne.s32.totalorder %s6928_s6, %s6924_s2 }
  0x28   : > { %p336_p2 = scmp.eq.s32.totalorder %s6948_s1, 0  ;;  %s8256_s8 = smov (%p52_p0, %s51_s8), 0 }
  0x29   : > { %8200 = sst [smem:[#allocation18_spill]] %s8256_s8  ;;  %s8258_s27 = smov (!%p52_p0, %s54_s27), %s6944_s26 }
  0x2a   : > { %s325_s28 = ssub.s32 %s6940_s3, %s8256_s8  ;;  %p337_p3 = por %p336_p2, %p335_p1 }
  0x2b   : > { %p56_p4 = scmp.ge.s32.totalorder %s8258_s27, 2  ;;  %p326_p5 = scmp.eq.s32.totalorder %s325_s28, 0 }
  0x2c   : > { %p6156_p6 = scmp.lt.s32.totalorder %s6948_s1, 4  ;;  %s7156_s5 = sand.u32 1, %s6928_s6  }
  0x2d   : > { %s8260_s27 = smov (%p56_p4, %s8258_s27), 0  ;;  %s813_s23 = sand.u32 1, %s6948_s1  }
  0x2e   : > { %8201 = sst [smem:[#allocation19_spill]] %s8260_s27  ;;  %p7158_p7 = pnand %p6156_p6, %p337_p3 }
  0x2f   : > { %s7153_s9 = scalar_select %p326_p5, %s6928_s6, %s328_s4  }
  0x30   : > { %s5558_s26 = sshll.u32 %s7156_s5, 10  ;;  %s6036_s8 = sshll.u32 %s6940_s3, 14 }
  0x31   : > { %8202 = sst [smem:[#allocation20_spill]] %s7153_s9  ;;  %s817_s19 = scalar_lea.vmem [#allocation5], %s5558_s26 }
  0x32   : > { %s8204_s18 = sld [smem:[#allocation39_spill]]  ;;  %s824_s27 = sshll.u32 %s817_s19, 4  ;;  %s825_s27 = int_to_ptr.vmem [resolvable:$true] %s824_s27 }
  0x33   : > { %s7168_s4 = scalar_lea.sflag [#allocation6], %s813_s23  ;;  %p8164_p8 = pneg %p7158_p7 }
  0x34   : > { %s6777_s9 = scalar_lea.vmem %s825_s27, 16384  ;;  %s6950_s6 = smov [#allocation5]  }
  0x35   : > { %p6778_p9 = scmp.ne.s32.totalorder %s825_s27, %s6777_s9  ;;  %s6782_s17 = sshll.u32 %s6950_s6, 4  ;;  %s6783_s17 = int_to_ptr.vmem [resolvable:$false] %s6782_s17 }
  0x36   : > { %s6784_s16 = scalar_lea.vmem %s6783_s17, 32768  ;;  %p6785_p12 = scmp.lt.s32.totalorder %s825_s27, %s6783_s17 }
  0x37   : > { %p6780_p10 = pnand %p6778_p9, %p8164_p8  ;;  %p6786_p13 = scmp.lt.s32.totalorder %s6784_s16, %s6777_s9 }
  0x38   : > { %s823_s28 = scalar_lea.hbm %s8204_s18, %s6036_s8 }
  0x39   : > { %p6781_p11 = pneg %p6780_p10  ;;  %p6787_p0 = por %p6786_p13, %p6785_p12 }
  0x3b   : > { %p6788_p1 = pnand %p6787_p0, %p6781_p11 }
  0x3d   : > { %6791 = shalt.err (!%p6788_p1)
}
  0x3e   : > { %s6951_s19 = smov 512   ;;  %s6952_s21 = smov 32  }
  0x3f   : > { %6151 = dma.hbm_to_vmem [thread:$0]  (!%p7158_p7), %s823_s28, 16384, %s825_s27, %s7168_s4, %s6951_s19, %s6951_s19, %s6952_s21  }
  0x40   : > { %s8205_s20 = sld [smem:[#allocation41_spill]]  ;;  %s845_s16 = scalar_lea.vmem [#allocation7], %s5558_s26 }
  0x41   : > { %s852_s6 = sshll.u32 %s845_s16, 4  ;;  %s8165_s9 = sadd.s32 4294967295, %s6948_s1   ;;  %s7183_s6 = int_to_ptr.vmem [resolvable:$true] %s852_s6 }
  0x42   : > { %p341_p2 = scmp.ne.s32.totalorder %s6924_s2, %s6920_s29  ;;  %p7190_p3 = scmp.eq.s32.totalorder %s8165_s9, 0 }
  0x43   : > { %p5554_p4 = scmp.ge.s32.totalorder %s6948_s1, 1  ;;  %p675_p5 = scmp.lt.s32.totalorder %s6948_s1, 5 }
  0x44   : > { %p7198_p6 = por %p7190_p3, %p341_p2  ;;  %s6953_s29 = smov [#allocation8]  }
  0x45   : > { %p7202_p9 = pnand %p5554_p4, %p675_p5  ;;  %s720_s27 = sshll.u32 %s6953_s29, 4  ;;  %s721_s27 = int_to_ptr.vmem [resolvable:$true] %s720_s27 }
  0x46   : > { %s7181_s17 = scalar_lea.hbm %s8205_s20, %s6036_s8  ;;  %s6127_s19 = smul.u32 768, %s7156_s5 }
  0x47   : > { %p6141_p10 = pneg %p7202_p9  ;;  %s6128_s21 = smul.u32 12288, %s6940_s3 }
  0x48   : > { %s6803_s22 = scalar_lea.vmem %s721_s27, 2048  ;;  %p6811_p2 = scmp.lt.s32.totalorder %s721_s27, %s721_s27 }
  0x49   : > { %p7210_p11 = pnand %p6141_p10, %p7190_p3  ;;  %p6804_p13 = scmp.ne.s32.totalorder %s721_s27, %s6803_s22 }
  0x4a   : > { %p6812_p4 = scmp.lt.s32.totalorder %s6803_s22, %s6803_s22 }
  0x4b   : > { %p6794_p12 = pneg %p7210_p11 }
  0x4c   : > { %p6813_p5 = por %p6812_p4, %p6811_p2 }
  0x4d   : > { %p6806_p0 = pnand %p6804_p13, %p6794_p12 }
  0x4f   : > { %p6807_p1 = pneg %p6806_p0 }
  0x51   : > { %p6814_p8 = pnand %p6813_p5, %p6807_p1 }
  0x53   : > { %6817 = shalt.err (!%p6814_p8)
}
  0x54   : > { %s6954_s23 = smov 64   ;;  %s6955_s16 = smov 4  }
  0x55   : > { %s8210_s24 = sld [smem:[#allocation45_spill]]  ;;  %s760_s15 = scalar_lea.vmem [#allocation3], %s6127_s19 }
  0x56   : > { %s8211_s12 = sld [smem:[#allocation33_spill]]  ;;  %s767_s14 = sshll.u32 %s760_s15, 4  ;;  %s768_s14 = int_to_ptr.vmem [resolvable:$true] %s767_s14 }
  0x57   : > { %s757_s22 = scalar_lea.sflag [#allocation4], %s7156_s5  ;;  %s6831_s11 = scalar_lea.vmem %s768_s14, 12288 }
  0x58   : > { %p6832_p8 = scmp.ne.s32.totalorder %s768_s14, %s6831_s11  ;;  %p8212_p10 = pneg %p7158_p7 }
  0x59   : > { %s6956_s10 = smov [#allocation3]  }
  0x5a   : > { %p6834_p12 = pnand %p6832_p8, %p8212_p10  ;;  %s6836_s28 = sshll.u32 %s6956_s10, 4  ;;  %s6837_s28 = int_to_ptr.vmem [resolvable:$false] %s6836_s28 }
  0x5b   : > { %6144 = dma.hbm_to_vmem [thread:$0]  (!%p7210_p11), %s8210_s24, 2048, %s721_s27, [#allocation9], %s6954_s23, %s6954_s23, %s6955_s16  }
  0x5c   : > { %s766_s13 = scalar_lea.hbm %s8211_s12, %s6128_s21  ;;  %p6835_p13 = pneg %p6834_p12 }
  0x5d   : > { %s6838_s25 = scalar_lea.vmem %s6837_s28, 24576  ;;  %p6839_p0 = scmp.lt.s32.totalorder %s768_s14, %s6837_s28 }
  0x5e   : > { %p6840_p11 = scmp.lt.s32.totalorder %s6838_s25, %s6831_s11 }
  0x60   : > { %p6841_p1 = por %p6840_p11, %p6839_p0 }
  0x62   : > { %p6842_p2 = pnand %p6841_p1, %p6835_p13 }
  0x64   : > { %6845 = shalt.err (!%p6842_p2)
}
  0x65   : > { %s6957_s20 = smov 384   ;;  %s6958_s15 = smov 24  }
  0x66   : > { %6148 = dma.hbm_to_vmem [thread:$0]  (!%p7158_p7), %s766_s13, 12288, %s768_s14, %s757_s22, %s6957_s20, %s6957_s20, %s6958_s15  }
  0x67   : > { %s6859_s3 = scalar_lea.vmem %s7183_s6, 16384  ;;  %p8213_p5 = pmov %p8212_p10 }
  0x68   : > { %p6860_p4 = scmp.ne.s32.totalorder %s7183_s6, %s6859_s3  ;;  %s6959_s10 = smov [#allocation7]  }
  0x69   : > { %s6864_s11 = sshll.u32 %s6959_s10, 4  ;;  %s6865_s11 = int_to_ptr.vmem [resolvable:$false] %s6864_s11 }
  0x6a   : > { %p6862_p8 = pnand %p6860_p4, %p8213_p5  ;;  %s6866_s25 = scalar_lea.vmem %s6865_s11, 32768 }
  0x6b   : > { %p6867_p12 = scmp.lt.s32.totalorder %s7183_s6, %s6865_s11  ;;  %p6868_p13 = scmp.lt.s32.totalorder %s6866_s25, %s6859_s3 }
  0x6c   : > { %p6863_p10 = pneg %p6862_p8 }
  0x6d   : > { %p6869_p0 = por %p6868_p13, %p6867_p12 }
  0x6f   : > { %p6870_p11 = pnand %p6869_p0, %p6863_p10 }
  0x71   : > { %6873 = shalt.err (!%p6870_p11)
}
  0x72   : > { %s6960_s5 = smov 128   ;;  %s6961_s13 = smov 8  }
  0x73   : > { %6154 = dma.hbm_to_vmem [thread:$0]  (!%p7158_p7), %s7181_s17, 16384, %s7183_s6, %s7168_s4, %s6960_s5, %s6960_s5, %s6961_s13  }
  0x74   : > { %871 = sbr.rel (%p7202_p9) target bundleno = 3895 (0xf37), region = 120  ;;  %s873_s14 = sand.u32 (!%p7202_p9), 1, %s6924_s2  }
  0x75   : > { %s6129_s9 = smul.u32 (!%p7202_p9), 768, %s873_s14  ;;  %s874_s27 = scalar_lea.sflag (!%p7202_p9), [#allocation4], %s873_s14 }
  0x77   : > { %s7246_s19 = scalar_lea.vmem (!%p7202_p9), [#allocation3], %s6129_s9 }
  0x79   : > { %6907 = dma.done.wait (%p7198_p6), %s874_s27, 12288  }
  0x7a   : > { %6909 = vsyncadd (%p7198_p6), %s874_s27, 4294955008  ;;  %s8214_s21 = sadd.s32 4294967295, %s6948_s1   ;;  %s5565_s4 = sshll.u32 %s873_s14, 10 }
  0x7b   : > { %s882_s0 = sand.u32 1, %s8214_s21   ;;  %s7254_s6 = scalar_lea.vmem [#allocation5], %s5565_s4 }
  0x7c   : > { %s883_s17 = scalar_lea.sflag [#allocation6], %s882_s0 }
  0x7d   : > { %6911 = dma.done.wait (%p7198_p6), %s883_s17, 32768  }
  0x7e   : > { %6913 = vsyncadd (%p7198_p6), %s883_s17, 4294934528  ;;  %s7260_s26 = scalar_lea.vmem [#allocation7], %s5565_s4 }
  0x7f   : > { %6915 = dma.done.wait (%p7190_p3), [#allocation9], 2048  }
  0x80   : > { %6917 = vsyncadd (%p7190_p3), [#allocation9], 4294965248  ;;  %p1016_p7 = scmp.lt.s32.totalorder %s6936_s7, 1  ;;  %p1021_p9 = scmp.lt.s32.totalorder %s6932_s30, 1 }
  0x81   : > { %s8216_s18 = sld [smem:[#allocation21_spill]]  ;;  %p5579_p3 = scmp.ne.s32.totalorder %s6932_s30, 0 }
  0x82   : > { %s8262_s7 = smov (!%p1016_p7, %s6936_s7), 1  ;;  %s8219_s16 = sld [smem:[#allocation35_spill]] }
  0x83   : > { %s1022_s8 = scalar_select %p1021_p9, %s6932_s30, 1 }
  0x84   : > { %s6038_s23 = sshll.u32 %s8262_s7, 3  ;;  %s8220_s15 = sld [smem:[#allocation36_spill]] }
  0x85   : > { %s7282_s10 = sshll.u32 %s1022_s8, 1  ;;  %s6130_s0 = smul.u32 6, %s1022_s8 }
  0x86   : > { %s6039_s4 = sshll.u32 %s1022_s8, 8  ;;  %s8221_s28 = sld [smem:[#allocation34_spill]] }
  0x87   : > { %s7280_s3 = scalar_lea.vmem %s8216_s18, %s6038_s23  ;;  %s8222_s14 = sld [smem:[#allocation37_spill]] }
  0x88   : > { %s7295_s29 = scalar_lea.vmem %s8219_s16, %s6039_s4  ;;  %s8223_s24 = sld [smem:[#allocation38_spill]] }
  0x89   : > { %s5577_s17 = sshll.u32 %s1022_s8, 3  ;;  %s8224_s16 = sld [smem:[#allocation40_spill]] }
  0x8a   : > { %s1041_s18 = scalar_lea.vmem %s8220_s15, %s7282_s10  ;;  %s8225_s15 = sld [smem:[#allocation42_spill]] }
  0x8b   : > { %s8229_s27 = sld [smem:[#allocation24_spill]] (!%p5579_p3) }
  0x8c   : > { %s7304_s12 = scalar_lea.vmem %s8221_s28, %s6130_s0  ;;  %1065 = sbr.rel (%p5579_p3) target bundleno = 709 (0x2c5), region = 140 }
  0x8d   : > { %s1045_s9 = scalar_lea.vmem %s8222_s14, %s7282_s10  ;;  %s8226_s0 = sld [smem:[#allocation22_spill]] (!%p5579_p3) }
  0x8e   : > { %s1049_s2 = scalar_lea.vmem %s8223_s24, %s7282_s10  ;;  %s8230_s20 = sld [smem:[#allocation27_spill]] (!%p5579_p3) }
  0x8f   : > { %s7317_s1 = scalar_lea.vmem %s8224_s16, %s5577_s17  ;;  %s8227_s16 = sld [smem:[#allocation26_spill]] (!%p5579_p3) }
  0x90   : > { %s1057_s11 = scalar_lea.vmem %s8225_s15, %s7282_s10  ;;  %s8228_s17 = sld [smem:[#allocation25_spill]] (!%p5579_p3) }
  0x91   : > { %v6962_v2 = vmov 0   ;;  %v1066_v31 = vld [vmem:[%s7280_s3] sm:$0xff]  ;;  %vm1393_vm0 = vcmask 523264   ;;  %v1118_v47 = vlaneseq  ;;  %v6963_v48 = vmov 1966171168   ;;  %s8231_s13 = sld [smem:[#allocation23_spill]] }
  0x92   : > { %1240 = vmatprep.mubr.bf16.mxu0 %v6962_v2  ;;  %v1068_v34 = vcombine.high %v1066_v31, %v1066_v31  ;;  %v1070_v46 = vpack.c.bf16 %v1066_v31, %v1066_v31  ;;  %v1254_v49 = vunpack.c.l.s4 %v6963_v48  ;;  %v1096_v52 = vld [vmem:[%s8229_s27] sm:$0x1f]  ;;  %v1097_v53 = vld [vmem:[%s8229_s27 + $0x8] sm:$0x1f]  ;;  %vm1461_vm1 = vcmask 1040384   ;;  %s8232_s24 = sld [smem:[#allocation28_spill]] }
  0x93   : > { %v6237_v0 = vld [vmem:[%s8226_s0 + $0x74] ss:$8 sps:$4 sm:$0xff]   ;;  %v6239_v1 = vld [vmem:[%s8226_s0 + $0x70] ss:$8 sps:$4 sm:$0xff]   ;;  %v6240_v3 = vld [vmem:[%s8226_s0 + $0x64] ss:$8 sps:$4 sm:$0xff]   ;;  %v1252_v54 = vcombine.low %v1096_v52, %v1097_v53 }
  0x94   : > { %1397 = vmatprep.subr.bf16.mxu1 %v6237_v0  ;;  %v6242_v4 = vld [vmem:[%s8226_s0 + $0x60] ss:$8 sps:$4 sm:$0xff]   ;;  %v6243_v5 = vld [vmem:[%s8226_s0 + $0x54] ss:$8 sps:$4 sm:$0xff]   ;;  %v6245_v8 = vld [vmem:[%s8226_s0 + $0x50] ss:$8 sps:$4 sm:$0xff]   ;;  %v1071_v35 = vpack.c.bf16 %v1068_v34, %v1068_v34  ;;  %v1255_v51 = vunpack.c.0.s8 %v1254_v49 }
  0x95   : > { %1398 = vmatpush1.bf16.msra.mxu1 %v6239_v1  ;;  %v6246_v6 = vld [vmem:[%s8227_s16 + $0x74] ss:$8 sps:$4 sm:$0xff]   ;;  %v6248_v7 = vld [vmem:[%s8227_s16 + $0x70] ss:$8 sps:$4 sm:$0xff]   ;;  %v6252_v9 = vld [vmem:[%s8227_s16 + $0x64] ss:$8 sps:$4 sm:$0xff]  }
  0x96   : > { %1399 = vmatprep.subr.bf16.mxu1 %v6240_v3  ;;  %1208 = vmatprep.subr.bf16.mxu0 %v6246_v6  ;;  %v6254_v10 = vld [vmem:[%s8227_s16 + $0x60] ss:$8 sps:$4 sm:$0xff]   ;;  %v6249_v11 = vld [vmem:[%s8226_s0 + $0x44] ss:$8 sps:$4 sm:$0xff]   ;;  %v6258_v13 = vld [vmem:[%s8227_s16 + $0x54] ss:$8 sps:$4 sm:$0xff]  }
  0x97   : > { %1209 = vmatpush1.bf16.msra.mxu0 %v6248_v7  ;;  %v6251_v12 = vld [vmem:[%s8226_s0 + $0x40] ss:$8 sps:$4 sm:$0xff]   ;;  %v6255_v14 = vld [vmem:[%s8226_s0 + $0x34] ss:$8 sps:$4 sm:$0xff]   ;;  %v6260_v15 = vld [vmem:[%s8227_s16 + $0x50] ss:$8 sps:$4 sm:$0xff]   ;;  %5620 = vmatprep.mubr.msk.bf16.mxu1 %vm1393_vm0, %v1071_v35 }
  0x98   : > { %1210 = vmatprep.subr.bf16.mxu0 %v6252_v9  ;;  %v6264_v16 = vld [vmem:[%s8227_s16 + $0x44] ss:$8 sps:$4 sm:$0xff]   ;;  %v6257_v17 = vld [vmem:[%s8226_s0 + $0x30] ss:$8 sps:$4 sm:$0xff]   ;;  %v6266_v19 = vld [vmem:[%s8227_s16 + $0x40] ss:$8 sps:$4 sm:$0xff]  }
  0x99   : > { %1400 = vmatpush1.bf16.msra.mxu1 %v6242_v4  ;;  %v6261_v18 = vld [vmem:[%s8226_s0 + $0x24] ss:$8 sps:$4 sm:$0xff]   ;;  %v6270_v20 = vld [vmem:[%s8227_s16 + $0x34] ss:$8 sps:$4 sm:$0xff]   ;;  %v6263_v21 = vld [vmem:[%s8226_s0 + $0x20] ss:$8 sps:$4 sm:$0xff]  }
  0x9a   : > { %1401 = vmatprep.subr.bf16.mxu1 %v6243_v5  ;;  %v6267_v22 = vld [vmem:[%s8226_s0 + $0x14] ss:$8 sps:$4 sm:$0xff]   ;;  %v6272_v23 = vld [vmem:[%s8227_s16 + $0x30] ss:$8 sps:$4 sm:$0xff]   ;;  %v6276_v24 = vld [vmem:[%s8227_s16 + $0x24] ss:$8 sps:$4 sm:$0xff]  }
  0x9b   : > { %1211 = vmatpush1.bf16.msra.mxu0 %v6254_v10  ;;  %v6269_v25 = vld [vmem:[%s8226_s0 + $0x10] ss:$8 sps:$4 sm:$0xff]   ;;  %v6273_v26 = vld [vmem:[%s8226_s0 + $0x4] ss:$8 sps:$4 sm:$0xff]   ;;  %v6278_v27 = vld [vmem:[%s8227_s16 + $0x20] ss:$8 sps:$4 sm:$0xff]  }
  0x9c   : > { %1212 = vmatprep.subr.bf16.mxu0 %v6258_v13  ;;  %v6282_v28 = vld [vmem:[%s8227_s16 + $0x14] ss:$8 sps:$4 sm:$0xff]   ;;  %v6275_v29 = vld [vmem:[%s8226_s0] ss:$8 sps:$4 sm:$0xff]   ;;  %v6284_v30 = vld [vmem:[%s8227_s16 + $0x10] ss:$8 sps:$4 sm:$0xff]  }
  0x9d   : > { %1402 = vmatpush1.bf16.msra.mxu1 %v6245_v8  ;;  %v6279_v32 = vld [vmem:[%s8226_s0 + $0xb4] ss:$8 sps:$4 sm:$0xff]   ;;  %v6288_v33 = vld [vmem:[%s8227_s16 + $0x4] ss:$8 sps:$4 sm:$0xff]   ;;  %v6281_v36 = vld [vmem:[%s8226_s0 + $0xb0] ss:$8 sps:$4 sm:$0xff]  }
  0x9e   : > { %1403 = vmatprep.subr.bf16.mxu1 %v6249_v11  ;;  %v6290_v37 = vld [vmem:[%s8227_s16] ss:$8 sps:$4 sm:$0xff]   ;;  %v6285_v39 = vld [vmem:[%s8226_s0 + $0xa4] ss:$8 sps:$4 sm:$0xff]   ;;  %v6291_v42 = vld [vmem:[%s8226_s0 + $0x94] ss:$8 sps:$4 sm:$0xff]  }
  0x9f   : > { %1213 = vmatpush1.bf16.msra.mxu0 %v6260_v15  ;;  %v1098_v38 = vld [vmem:[%s8228_s17] sm:$0x3]  ;;  %v6293_v43 = vld [vmem:[%s8226_s0 + $0x90] ss:$8 sps:$4 sm:$0xff]   ;;  %v6294_v44 = vld [vmem:[%s8226_s0 + $0x84] ss:$8 sps:$4 sm:$0xff]  }
  0xa0   : > { %1214 = vmatprep.subr.bf16.mxu0 %v6264_v16  ;;  %v1099_v40 = vpack.c.bf16 %v1098_v38, %v1098_v38  ;;  %v6287_v41 = vld [vmem:[%s8226_s0 + $0xa0] ss:$8 sps:$4 sm:$0xff]   ;;  %v1119_v50 = vshrl.u32 %v1118_v47, 7  ;;  %v1389_v3 = vrot.slane %v1096_v52, 1  ;;  %v1390_v7 = vrot.slane %v1097_v53, 1  ;;  %s8233_s5 = sld [smem:[#allocation29_spill]] }
  0xa1   : > { %1404 = vmatpush1.bf16.msra.mxu1 %v6251_v12  ;;  %v6296_v45 = vld [vmem:[%s8226_s0 + $0x80] ss:$8 sps:$4 sm:$0xff]   ;;  %vm1464_vm2 = vcmask 1044480   ;;  %vm1467_vm3 = vcmask 1046528  }
  0xa2   : > { %1405 = vmatprep.subr.bf16.mxu1 %v6255_v14  ;;  %v1258_v55 = vsub.s32 %v1255_v51, %v1119_v50  ;;  %v1120_v58 = vsub.s32 0, %v1119_v50  ;;  %v1116_v60 = vld [vmem:[%s8230_s20] sm:$0x3]  ;;  %v1124_v0 = vsub.s32 1, %v1119_v50 }
  0xa3   : > { %1215 = vmatpush1.bf16.msra.mxu0 %v6266_v19  ;;  %v1249_v2 = vld [vmem:[%s8231_s13] sm:$0x3] }
  0xa4   : > { %1216 = vmatprep.subr.bf16.mxu0 %v6270_v20  ;;  %v1259_v57 = vrot.slane %v1252_v54, %v1258_v55  ;;  %v1121_v63 = vrot.slane %v1116_v60, %v1120_v58  ;;  %v1125_v6 = vrot.slane %v1116_v60, %v1124_v0  ;;  %v1470_v38 = vld [vmem:[%s8232_s24] sm:$0x3] }
  0xa5   : > { %1406 = vmatpush1.bf16.msra.mxu1 %v6257_v17 }
  0xa6   : > { %1407 = vmatprep.subr.bf16.mxu1 %v6261_v18  ;;  %v1266_v62 = vrot.slane %v1259_v57, %v1258_v55 }
  0xa7   : > { %1217 = vmatpush1.bf16.msra.mxu0 %v6272_v23 }
  0xa8   : > { %1218 = vmatprep.subr.bf16.mxu0 %v6276_v24  ;;  %v1268_v4 = vadd.f32 %v1266_v62, %v1249_v2 }
  0xa9   : > { %1408 = vmatpush1.bf16.msra.mxu1 %v6263_v21 }
  0xaa   : > { %1409 = vmatprep.subr.bf16.mxu1 %v6267_v22  ;;  %v1442_v10 = vrot.slane %v1268_v4, %v1120_v58  ;;  %v1446_v16 = vrot.slane %v1268_v4, %v1124_v0 }
  0xab   : > { %1219 = vmatpush1.bf16.msra.mxu0 %v6278_v27 }
  0xac   : > { %1220 = vmatprep.subr.bf16.mxu0 %v6282_v28 }
  0xad   : > { %1410 = vmatpush1.bf16.msra.mxu1 %v6269_v25 }
  0xae   : > { %1411 = vmatprep.subr.bf16.mxu1 %v6273_v26 }
  0xaf   : > { %1221 = vmatpush1.bf16.msra.mxu0 %v6284_v30 }
  0xb0   : > { %1222 = vmatprep.subr.bf16.mxu0 %v6288_v33 }
  0xb1   : > { %1412 = vmatpush1.bf16.msra.mxu1 %v6275_v29 }
  0xb2   : > { %1421 = vmatprep.subr.bf16.mxu1 %v6279_v32 }
  0xb3   : > { %1223 = vmatpush1.bf16.msra.mxu0 %v6290_v37 }
  0xb5   : > { %1422 = vmatpush2.bf16.msra.mxu1 %v6281_v36 }
  0xb6   : > { %1423 = vmatprep.subr.bf16.mxu1 %v6285_v39  ;;  %1241 = vmatmul.mubr.bf16.vlgmr.msra.gmra.mxu0 %v1099_v40  ;;  %v1471_v39 = vld [vmem:[%s8233_s5] sm:$0x3]  ;;  %v1493_v40 = vrot.slane %v1470_v38, %v1120_v58 }
  0xb9   : > { %1424 = vmatpush2.bf16.msra.mxu1 %v6287_v41  ;;  %v1497_v41 = vrot.slane %v1470_v38, %v1124_v0 }
  0xba   : > { %1425 = vmatprep.subr.bf16.mxu1 %v6291_v42 }
  0xbd   : > { %1426 = vmatpush2.bf16.msra.mxu1 %v6293_v43  ;;  %v1506_v43 = vrot.slane %v1471_v39, %v1120_v58 }
  0xbe   : > { %1427 = vmatprep.subr.bf16.mxu1 %v6294_v44  ;;  %v1510_v44 = vrot.slane %v1471_v39, %v1124_v0 }
  0xc1   : > { %1428 = vmatpush2.bf16.msra.mxu1 %v6296_v45 }
  0xc4   : > { %1430 = vmatmul.mubr.bf16.vlgmr.msra.gmra.mxu1 %v1070_v46 }
 0x176   : > { %v1242_v56 = vpop.f32.mrf.mxu0 }
 0x177   : > { %v1243_v5 = vadd.f32 %v1242_v56, %v1121_v63 }
 0x178   : > { %v1244_v59 = vpop.f32.mrf.mxu0 }
 0x179   : > { %v1457_v11 = vrot.slane %v1243_v5, 3  ;;  %v1245_v12 = vadd.f32 %v1244_v59, %v1125_v6 }
 0x17a   : > { %v1246_v61 = vpop.f32.mrf.mxu0 }
 0x17b   : > { %v1458_v20 = vrot.slane %v1245_v12, 3 }
 0x17c   : > { %v1247_v1 = vpop.f32.mrf.mxu0 }
 0x184   : > { %v1431_v8 = vpop.f32.mrf.mxu1 }
 0x185   : > { %v1432_v9 = vadd.f32 %v1431_v8, %v1389_v3 }
 0x186   : > { %v1433_v13 = vpop.f32.mrf.mxu1 }
 0x187   : > { %v1451_v14 = vrot.slane %v1432_v9, 7  ;;  %v1434_v15 = vadd.f32 %v1433_v13, %v1390_v7 }
 0x188   : > { %v1435_v17 = vpop.f32.mrf.mxu1 }
 0x189   : > { %v1452_v18 = vrot.slane %v1434_v15, 7  ;;  %v1462_v19 = vsel %vm1461_vm1, %v1442_v10, %v1451_v14 }
 0x18a   : > { %v1436_v21 = vpop.f32.mrf.mxu1  ;;  %v1465_v22 = vsel %vm1464_vm2, %v1462_v19, %v1457_v11 }
 0x18b   : > { %v1463_v23 = vsel %vm1461_vm1, %v1446_v16, %v1452_v18  ;;  %v1468_v25 = vsel %vm1467_vm3, %v1465_v22, 0.0 }
 0x18c   : > { %v1466_v24 = vsel %vm1464_vm2, %v1463_v23, %v1458_v20 }
 0x18d   : > { %v1469_v26 = vsel %vm1467_vm3, %v1466_v24, 0.0 }
 0x18e   : > { %v1472_v27 = vadd.f32 %v1469_v26, %v1468_v25 }
 0x190   : > { %1473 = vadd.xlane.f32.xlu0 %v1472_v27 }
 0x219   : > { %v1474_v28 = vpop.xlane.xlu0 %1473 }
 0x21a   : > { %v1476_v29 = vmul.f32 0.00390625, %v1474_v28 }
 0x21c   : > { %v1477_v30 = vsub.f32 %v1468_v25, %v1476_v29  ;;  %v1478_v31 = vsub.f32 %v1469_v26, %v1476_v29 }
 0x21e   : > { %v1479_v32 = vmul.f32 %v1477_v30, %v1477_v30  ;;  %v1480_v33 = vmul.f32 %v1478_v31, %v1478_v31 }
 0x220   : > { %v1481_v34 = vadd.f32 %v1480_v33, %v1479_v32 }
 0x222   : > { %1482 = vadd.xlane.f32.xlu0 %v1481_v34 }
 0x2ab   : > { %v1483_v35 = vpop.xlane.xlu0 %1482 }
 0x2ac   : > { %v1484_v36 = vmul.f32 0.00390625, %v1483_v35 }
 0x2ae   : > { %v1485_v37 = vadd.f32 1e-05, %v1484_v36 }
 0x2b0   : > { %6299 = vrsqrt.f32 %v1485_v37 }
 0x2bd   : > { %v6300_v42 = vpop.eup %6299 }
 0x2be   : > { %v1487_v45 = vmul.f32 %v6300_v42, %v1477_v30  ;;  %v1488_v46 = vmul.f32 %v6300_v42, %v1478_v31 }
 0x2c0   : > { %v1500_v47 = vmul.f32 %v1493_v40, %v1487_v45  ;;  %v1501_v48 = vmul.f32 %v1497_v41, %v1488_v46 }
 0x2c2   : > { %v1513_v49 = vadd.f32 %v1506_v43, %v1500_v47  ;;  %v1514_v50 = vadd.f32 %v1510_v44, %v1501_v48 }
 0x2c4   : > { %1515 = vst [vmem:[#allocation2] sm:$0xff] %v1513_v49  ;;  %1516 = vst [vmem:[#allocation2 + $0x8] sm:$0xff] %v1514_v50 }
 0x2c5 PF: > { %p1517_p6 = scmp.ge.s32.totalorder %s6932_s30, 1  ;;  %p1518_p1 = scmp.lt.s32.totalorder %s6932_s30, 2 }
 0x2c7   : > { %p1519_p2 = pnand %p1518_p1, %p1517_p6 }
 0x2c8   : > { %s5621_s14 = sadd.s32 (!%p1519_p2), 4294967295, %s6932_s30  ;;  %s8234_s22 = sld [smem:[#allocation30_spill]] (!%p1519_p2) }
 0x2c9   : > { %1522 = sbr.rel (%p1519_p2) target bundleno = 725 (0x2d5), region = 144  ;;  %s6040_s17 = sshll.u32 (!%p1519_p2), %s5621_s14, 2 }
 0x2ce   : > { %s1526_s20 = scalar_lea.vmem %s8234_s22, %s6040_s17 }
 0x2cf   : > { %v5624_v51 = vld.sshfl [vmem:[%s1526_s20] sm:$0x33 pattern:$0x76325410] }
 0x2d0   : > { %v1537_v52 = vrot.slane %v5624_v51, 3  ;;  %v1536_v53 = vcombine.high %v5624_v51, %v5624_v51 }
 0x2d2   : > { %1541 = vst [vmem:[#allocation2] sm:$0x60] %v1537_v52  ;;  %v1538_v54 = vrot.slane %v1536_v53, 3 }
 0x2d4   : > { %1542 = vst [vmem:[#allocation2 + $0x8] sm:$0x60] %v1538_v54 }
 0x2d5 PF: > { %v6306_v58 = vld [vmem:[%s7246_s19 + $0x154] ss:$24 sps:$4 sm:$0xff]   ;;  %v6308_v59 = vld [vmem:[%s7246_s19 + $0x150] ss:$24 sps:$4 sm:$0xff]   ;;  %v6312_v62 = vld [vmem:[%s7246_s19 + $0x124] ss:$24 sps:$4 sm:$0xff]  }
 0x2d6   : > { %v6309_v60 = vld [vmem:[%s7246_s19 + $0x15c] ss:$24 sps:$4 sm:$0xff]   ;;  %v6311_v61 = vld [vmem:[%s7246_s19 + $0x158] ss:$24 sps:$4 sm:$0xff]   ;;  %2497 = vmatprep.subr.bf16.mxu0 %v6306_v58  ;;  %v6315_v63 = vld [vmem:[%s7246_s19 + $0x12c] ss:$24 sps:$4 sm:$0xff]  }
 0x2d7   : > { %2538 = vmatprep.subr.bf16.mxu1 %v6309_v60  ;;  %2498 = vmatpush1.bf16.msra.mxu0 %v6308_v59  ;;  %v6314_v0 = vld [vmem:[%s7246_s19 + $0x120] ss:$24 sps:$4 sm:$0xff]   ;;  %v6318_v2 = vld [vmem:[%s7246_s19 + $0xf4] ss:$24 sps:$4 sm:$0xff]   ;;  %v6320_v4 = vld [vmem:[%s7246_s19 + $0xf0] ss:$24 sps:$4 sm:$0xff]  }
 0x2d8   : > { %2539 = vmatpush1.bf16.msra.mxu1 %v6311_v61  ;;  %v6317_v1 = vld [vmem:[%s7246_s19 + $0x128] ss:$24 sps:$4 sm:$0xff]   ;;  %2499 = vmatprep.subr.bf16.mxu0 %v6312_v62  ;;  %v6321_v3 = vld [vmem:[%s7246_s19 + $0xfc] ss:$24 sps:$4 sm:$0xff]   ;;  %v6323_v5 = vld [vmem:[%s7246_s19 + $0xf8] ss:$24 sps:$4 sm:$0xff]  }
 0x2d9   : > { %v7472_v55 = vld [vmem:[#allocation2] sm:$0xff]  ;;  %2540 = vmatprep.subr.bf16.mxu1 %v6315_v63  ;;  %v6324_v6 = vld [vmem:[%s7246_s19 + $0xc4] ss:$24 sps:$4 sm:$0xff]   ;;  %v6326_v8 = vld [vmem:[%s7246_s19 + $0xc0] ss:$24 sps:$4 sm:$0xff]   ;;  %s8235_s13 = sld [smem:[#allocation31_spill]] }
 0x2da   : > { %v6327_v7 = vld [vmem:[%s7246_s19 + $0xcc] ss:$24 sps:$4 sm:$0xff]   ;;  %v6329_v9 = vld [vmem:[%s7246_s19 + $0xc8] ss:$24 sps:$4 sm:$0xff]   ;;  %v6333_v11 = vld [vmem:[%s7246_s19 + $0x9c] ss:$24 sps:$4 sm:$0xff]  }
 0x2db   : > { %v7474_v56 = vld [vmem:[#allocation2 + $0x8] sm:$0xff]  ;;  %2500 = vmatpush1.bf16.msra.mxu0 %v6314_v0  ;;  %v6330_v10 = vld [vmem:[%s7246_s19 + $0x94] ss:$24 sps:$4 sm:$0xff]   ;;  %v6332_v12 = vld [vmem:[%s7246_s19 + $0x90] ss:$24 sps:$4 sm:$0xff]   ;;  %s8237_s8 = sld [smem:[#allocation32_spill]] }
 0x2dc   : > { %v1941_v57 = vadd.f32 %v7474_v56, %v7472_v55  ;;  %2541 = vmatpush1.bf16.msra.mxu1 %v6317_v1  ;;  %2501 = vmatprep.subr.bf16.mxu0 %v6318_v2  ;;  %v6335_v13 = vld [vmem:[%s7246_s19 + $0x98] ss:$24 sps:$4 sm:$0xff]   ;;  %v6336_v14 = vld [vmem:[%s7246_s19 + $0x64] ss:$24 sps:$4 sm:$0xff]   ;;  %v6341_v17 = vld [vmem:[%s7246_s19 + $0x68] ss:$24 sps:$4 sm:$0xff]  }
 0x2dd   : > { %2542 = vmatprep.subr.bf16.mxu1 %v6321_v3  ;;  %v6339_v15 = vld [vmem:[%s7246_s19 + $0x6c] ss:$24 sps:$4 sm:$0xff]   ;;  %v6338_v16 = vld [vmem:[%s7246_s19 + $0x60] ss:$24 sps:$4 sm:$0xff]   ;;  %v6345_v19 = vld [vmem:[%s7246_s19 + $0x3c] ss:$24 sps:$4 sm:$0xff]  }
 0x2de   : > { %1942 = vadd.xlane.f32.xlu0 %v1941_v57  ;;  %v6342_v18 = vld [vmem:[%s7246_s19 + $0x34] ss:$24 sps:$4 sm:$0xff]   ;;  %v6344_v20 = vld [vmem:[%s7246_s19 + $0x30] ss:$24 sps:$4 sm:$0xff]   ;;  %v6348_v22 = vld [vmem:[%s7246_s19 + $0x4] ss:$24 sps:$4 sm:$0xff]  }
 0x2df   : > { %2502 = vmatpush1.bf16.msra.mxu0 %v6320_v4  ;;  %v6347_v21 = vld [vmem:[%s7246_s19 + $0x38] ss:$24 sps:$4 sm:$0xff]   ;;  %v6351_v23 = vld [vmem:[%s7246_s19 + $0xc] ss:$24 sps:$4 sm:$0xff]   ;;  %v6353_v25 = vld [vmem:[%s7246_s19 + $0x8] ss:$24 sps:$4 sm:$0xff]   ;;  %s8236_s25 = scalar_lea.vmem %s8235_s13, %s7282_s10 }
 0x2e0   : > { %2543 = vmatpush1.bf16.msra.mxu1 %v6323_v5  ;;  %2503 = vmatprep.subr.bf16.mxu0 %v6324_v6  ;;  %v6350_v24 = vld [vmem:[%s7246_s19] ss:$24 sps:$4 sm:$0xff]   ;;  %v6354_v26 = vld [vmem:[%s7246_s19 + $0x2d4] ss:$24 sps:$4 sm:$0xff]   ;;  %v6356_v28 = vld [vmem:[%s7246_s19 + $0x2d0] ss:$24 sps:$4 sm:$0xff]   ;;  %v1543_v5 = vlaneseq }
 0x2e1   : > { %2544 = vmatprep.subr.bf16.mxu1 %v6327_v7  ;;  %v6357_v27 = vld [vmem:[%s7246_s19 + $0x2dc] ss:$24 sps:$4 sm:$0xff]   ;;  %v6359_v29 = vld [vmem:[%s7246_s19 + $0x2d8] ss:$24 sps:$4 sm:$0xff]   ;;  %v6363_v31 = vld [vmem:[%s7246_s19 + $0x2ac] ss:$24 sps:$4 sm:$0xff]   ;;  %s8238_s3 = scalar_lea.vmem %s8237_s8, %s7282_s10 }
 0x2e2   : > { %v6360_v30 = vld [vmem:[%s7246_s19 + $0x2a4] ss:$24 sps:$4 sm:$0xff]   ;;  %v6362_v32 = vld [vmem:[%s7246_s19 + $0x2a0] ss:$24 sps:$4 sm:$0xff]   ;;  %v6366_v41 = vld [vmem:[%s7246_s19 + $0x274] ss:$24 sps:$4 sm:$0xff]  }
 0x2e3   : > { %2504 = vmatpush1.bf16.msra.mxu0 %v6326_v8  ;;  %v6365_v40 = vld [vmem:[%s7246_s19 + $0x2a8] ss:$24 sps:$4 sm:$0xff]   ;;  %v6369_v43 = vld [vmem:[%s7246_s19 + $0x27c] ss:$24 sps:$4 sm:$0xff]   ;;  %v6371_v44 = vld [vmem:[%s7246_s19 + $0x278] ss:$24 sps:$4 sm:$0xff]  }
 0x2e4   : > { %2545 = vmatpush1.bf16.msra.mxu1 %v6329_v9  ;;  %2505 = vmatprep.subr.bf16.mxu0 %v6330_v10  ;;  %v6368_v42 = vld [vmem:[%s7246_s19 + $0x270] ss:$24 sps:$4 sm:$0xff]   ;;  %v6372_v45 = vld [vmem:[%s7246_s19 + $0x244] ss:$24 sps:$4 sm:$0xff]   ;;  %v6374_v46 = vld [vmem:[%s7246_s19 + $0x240] ss:$24 sps:$4 sm:$0xff]  }
 0x2e5   : > { %2546 = vmatprep.subr.bf16.mxu1 %v6333_v11  ;;  %v6375_v47 = vld [vmem:[%s7246_s19 + $0x24c] ss:$24 sps:$4 sm:$0xff]   ;;  %v6377_v48 = vld [vmem:[%s7246_s19 + $0x248] ss:$24 sps:$4 sm:$0xff]   ;;  %v6381_v50 = vld [vmem:[%s7246_s19 + $0x21c] ss:$24 sps:$4 sm:$0xff]  }
 0x2e6   : > { %v6378_v49 = vld [vmem:[%s7246_s19 + $0x214] ss:$24 sps:$4 sm:$0xff]   ;;  %v6380_v51 = vld [vmem:[%s7246_s19 + $0x210] ss:$24 sps:$4 sm:$0xff]   ;;  %v6384_v53 = vld [vmem:[%s7246_s19 + $0x1e4] ss:$24 sps:$4 sm:$0xff]  }
 0x2e7   : > { %2506 = vmatpush1.bf16.msra.mxu0 %v6332_v12  ;;  %v6383_v52 = vld [vmem:[%s7246_s19 + $0x218] ss:$24 sps:$4 sm:$0xff]   ;;  %v6387_v54 = vld [vmem:[%s7246_s19 + $0x1ec] ss:$24 sps:$4 sm:$0xff]   ;;  %v6393_v58 = vld [vmem:[%s7246_s19 + $0x1bc] ss:$24 sps:$4 sm:$0xff]  }
 0x2e8   : > { %2547 = vmatpush1.bf16.msra.mxu1 %v6335_v13  ;;  %2507 = vmatprep.subr.bf16.mxu0 %v6336_v14  ;;  %v6390_v57 = vld [vmem:[%s7246_s19 + $0x1b4] ss:$24 sps:$4 sm:$0xff]   ;;  %v6392_v59 = vld [vmem:[%s7246_s19 + $0x1b0] ss:$24 sps:$4 sm:$0xff]   ;;  %v6396_v61 = vld [vmem:[%s7246_s19 + $0x184] ss:$24 sps:$4 sm:$0xff]  }
 0x2e9   : > { %2548 = vmatprep.subr.bf16.mxu1 %v6339_v15  ;;  %v6395_v60 = vld [vmem:[%s7246_s19 + $0x1b8] ss:$24 sps:$4 sm:$0xff]   ;;  %v6399_v62 = vld [vmem:[%s7246_s19 + $0x18c] ss:$24 sps:$4 sm:$0xff]   ;;  %v6401_v0 = vld [vmem:[%s7246_s19 + $0x188] ss:$24 sps:$4 sm:$0xff]  }
 0x2ea   : > { %v6398_v63 = vld [vmem:[%s7246_s19 + $0x180] ss:$24 sps:$4 sm:$0xff]   ;;  %v6404_v1 = vld [vmem:[%s7246_s19 + $0x164] ss:$24 sps:$4 sm:$0xff]   ;;  %v7554_v6 = vshrl.u32 %v1543_v5, 7  ;;  %vm6965_vm4 = vmmov 0  }
 0x2eb   : > { %2508 = vmatpush1.bf16.msra.mxu0 %v6338_v16  ;;  %v1549_v9 = vld [vmem:[%s8236_s25] sm:$0x3]  ;;  %vm2652_vm5 = vcmask 523264   ;;  %vm2901_vm6 = vcmask 1043456   ;;  %vm2845_vm8 = vcmask 64512   ;;  %p6017_p4 = scmp.ne.s32.totalorder %s6932_s30, 1 }
 0x2ec   : > { %2549 = vmatpush1.bf16.msra.mxu1 %v6341_v17  ;;  %2509 = vmatprep.subr.bf16.mxu0 %v6342_v18  ;;  %v7557_v7 = vsub.s32 1, %v7554_v6  ;;  %v7560_v8 = vsub.s32 0, %v7554_v6  ;;  %v1550_v10 = vld [vmem:[%s8238_s3] sm:$0x3]  ;;  %s8243_s10 = sld [smem:[#allocation43_spill]] (!%p6017_p4) }
 0x2ed   : > { %2550 = vmatprep.subr.bf16.mxu1 %v6345_v19  ;;  %s8244_s20 = sld [smem:[#allocation44_spill]] (!%p6017_p4) }
 0x2ee   : > { %v1966_v11 = vrot.slane %v1549_v9, %v7557_v7  ;;  %v1962_v12 = vrot.slane %v1549_v9, %v7560_v8  ;;  %v1979_v15 = vrot.slane %v1550_v10, %v7557_v7  ;;  %v1975_v17 = vrot.slane %v1550_v10, %v7560_v8  ;;  %s8245_s13 = sld [smem:[#allocation46_spill]] (!%p6017_p4) }
 0x2ef   : > { %2510 = vmatpush1.bf16.msra.mxu0 %v6344_v20 }
 0x2f0   : > { %2551 = vmatpush1.bf16.msra.mxu1 %v6347_v21  ;;  %2511 = vmatprep.subr.bf16.mxu0 %v6348_v22 }
 0x2f1   : > { %2552 = vmatprep.subr.bf16.mxu1 %v6351_v23  ;;  %v6402_v23 = vld [vmem:[%s7246_s19 + $0x160] ss:$24 sps:$4 sm:$0xff]  }
 0x2f3   : > { %2512 = vmatpush1.bf16.msra.mxu0 %v6350_v24 }
 0x2f4   : > { %2553 = vmatpush1.bf16.msra.mxu1 %v6353_v25  ;;  %2513 = vmatprep.subr.bf16.mxu0 %v6354_v26  ;;  %v6407_v25 = vld [vmem:[%s7246_s19 + $0x134] ss:$24 sps:$4 sm:$0xff]   ;;  %v6405_v26 = vld [vmem:[%s7246_s19 + $0x130] ss:$24 sps:$4 sm:$0xff]   ;;  %s8246_s25 = scalar_lea.vmem (!%p6017_p4), %s8245_s13, %s8262_s7 }
 0x2f5   : > { %2554 = vmatprep.subr.bf16.mxu1 %v6357_v27  ;;  %v6410_v27 = vld [vmem:[%s7246_s19 + $0x104] ss:$24 sps:$4 sm:$0xff]  }
 0x2f7   : > { %2514 = vmatpush2.bf16.msra.mxu0 %v6356_v28  ;;  %v6408_v28 = vld [vmem:[%s7246_s19 + $0x100] ss:$24 sps:$4 sm:$0xff]  }
 0x2f8   : > { %2555 = vmatpush2.bf16.msra.mxu1 %v6359_v29  ;;  %2515 = vmatprep.subr.bf16.mxu0 %v6360_v30  ;;  %v6413_v29 = vld [vmem:[%s7246_s19 + $0xd4] ss:$24 sps:$4 sm:$0xff]   ;;  %v6411_v30 = vld [vmem:[%s7246_s19 + $0xd0] ss:$24 sps:$4 sm:$0xff]  }
 0x2f9   : > { %2556 = vmatprep.subr.bf16.mxu1 %v6363_v31  ;;  %v6416_v31 = vld [vmem:[%s7246_s19 + $0xa4] ss:$24 sps:$4 sm:$0xff]  }
 0x2fb   : > { %2516 = vmatpush2.bf16.msra.mxu0 %v6362_v32  ;;  %v6414_v32 = vld [vmem:[%s7246_s19 + $0xa0] ss:$24 sps:$4 sm:$0xff]  }
 0x2fc   : > { %2557 = vmatpush2.bf16.msra.mxu1 %v6365_v40  ;;  %2517 = vmatprep.subr.bf16.mxu0 %v6366_v41  ;;  %v6426_v40 = vld [vmem:[%s7246_s19 + $0x2e0] ss:$24 sps:$4 sm:$0xff]   ;;  %v6431_v41 = vld [vmem:[%s7246_s19 + $0x2b4] ss:$24 sps:$4 sm:$0xff]  }
 0x2fd   : > { %2558 = vmatprep.subr.bf16.mxu1 %v6369_v43  ;;  %v6434_v43 = vld [vmem:[%s7246_s19 + $0x284] ss:$24 sps:$4 sm:$0xff]  }
 0x2ff   : > { %2518 = vmatpush2.bf16.msra.mxu0 %v6368_v42  ;;  %v6429_v42 = vld [vmem:[%s7246_s19 + $0x2b0] ss:$24 sps:$4 sm:$0xff]  }
 0x300   : > { %2559 = vmatpush2.bf16.msra.mxu1 %v6371_v44  ;;  %2519 = vmatprep.subr.bf16.mxu0 %v6372_v45  ;;  %v6432_v44 = vld [vmem:[%s7246_s19 + $0x280] ss:$24 sps:$4 sm:$0xff]   ;;  %v6437_v45 = vld [vmem:[%s7246_s19 + $0x254] ss:$24 sps:$4 sm:$0xff]  }
 0x301   : > { %2560 = vmatprep.subr.bf16.mxu1 %v6375_v47  ;;  %v6440_v47 = vld [vmem:[%s7246_s19 + $0x224] ss:$24 sps:$4 sm:$0xff]  }
 0x303   : > { %2520 = vmatpush2.bf16.msra.mxu0 %v6374_v46  ;;  %v6435_v46 = vld [vmem:[%s7246_s19 + $0x250] ss:$24 sps:$4 sm:$0xff]  }
 0x304   : > { %2561 = vmatpush2.bf16.msra.mxu1 %v6377_v48  ;;  %2521 = vmatprep.subr.bf16.mxu0 %v6378_v49  ;;  %v6438_v48 = vld [vmem:[%s7246_s19 + $0x220] ss:$24 sps:$4 sm:$0xff]   ;;  %v6443_v49 = vld [vmem:[%s7246_s19 + $0x1f4] ss:$24 sps:$4 sm:$0xff]  }
 0x305   : > { %2562 = vmatprep.subr.bf16.mxu1 %v6381_v50  ;;  %v6441_v50 = vld [vmem:[%s7246_s19 + $0x1f0] ss:$24 sps:$4 sm:$0xff]  }
 0x307   : > { %2522 = vmatpush2.bf16.msra.mxu0 %v6380_v51  ;;  %v6446_v51 = vld [vmem:[%s7246_s19 + $0x1c4] ss:$24 sps:$4 sm:$0xff]  }
 0x308   : > { %2563 = vmatpush2.bf16.msra.mxu1 %v6383_v52  ;;  %2523 = vmatprep.subr.bf16.mxu0 %v6384_v53  ;;  %v6444_v52 = vld [vmem:[%s7246_s19 + $0x1c0] ss:$24 sps:$4 sm:$0xff]   ;;  %v6449_v53 = vld [vmem:[%s7246_s19 + $0x194] ss:$24 sps:$4 sm:$0xff]  }
 0x309   : > { %2564 = vmatprep.subr.bf16.mxu1 %v6387_v54  ;;  %v6447_v54 = vld [vmem:[%s7246_s19 + $0x190] ss:$24 sps:$4 sm:$0xff]  }
 0x367   : > { %v1943_v33 = vpop.xlane.xlu0 %1942 }
 0x368   : > { %v1945_v34 = vmul.f32 0.00390625, %v1943_v33  ;;  %v6419_v33 = vld [vmem:[%s7246_s19 + $0x74] ss:$24 sps:$4 sm:$0xff]  }
 0x36a   : > { %v7518_v35 = vsub.f32 %v7472_v55, %v1945_v34  ;;  %v7521_v36 = vsub.f32 %v7474_v56, %v1945_v34  ;;  %v6386_v55 = vld [vmem:[%s7246_s19 + $0x1e0] ss:$24 sps:$4 sm:$0xff]   ;;  %v6417_v34 = vld [vmem:[%s7246_s19 + $0x70] ss:$24 sps:$4 sm:$0xff]  }
 0x36b   : > { %v6389_v56 = vld [vmem:[%s7246_s19 + $0x1e8] ss:$24 sps:$4 sm:$0xff]   ;;  %2524 = vmatpush2.bf16.msra.mxu0 %v6386_v55  ;;  %v6964_v55 = vmov 0.0  }
 0x36c   : > { %v1948_v37 = vmul.f32 %v7518_v35, %v7518_v35  ;;  %v1949_v38 = vmul.f32 %v7521_v36, %v7521_v36  ;;  %2565 = vmatpush2.bf16.msra.mxu1 %v6389_v56  ;;  %2525 = vmatprep.subr.bf16.mxu0 %v6390_v57  ;;  %v1997_v56 = vsub.s32 2, %v7554_v6  ;;  %v7619_v57 = vld [vmem:[%s7304_s12] sm:$0x3f]  ;;  %s6966_s12 = smov 64  }
 0x36d   : > { %2566 = vmatprep.subr.bf16.mxu1 %v6393_v58  ;;  %v2001_v58 = vsub.s32 3, %v7554_v6 }
 0x36e   : > { %v1950_v39 = vadd.f32 %v1949_v38, %v1948_v37  ;;  %v6425_v37 = vld [vmem:[%s7246_s19 + $0x14] ss:$24 sps:$4 sm:$0xff]   ;;  %v6423_v38 = vld [vmem:[%s7246_s19 + $0x10] ss:$24 sps:$4 sm:$0xff]  }
 0x36f   : > { %2526 = vmatpush2.bf16.msra.mxu0 %v6392_v59  ;;  %v1998_v59 = vrot.slane %v7619_v57, %v1997_v56 }
 0x370   : > { %1951 = vadd.xlane.f32.xlu0 %v1950_v39  ;;  %2567 = vmatpush2.bf16.msra.mxu1 %v6395_v60  ;;  %v6428_v39 = vld [vmem:[%s7246_s19 + $0x2e4] ss:$24 sps:$4 sm:$0xff]   ;;  %v2002_v60 = vrot.slane %v7619_v57, %v2001_v58 }
 0x371   : > { %2527 = vmatprep.subr.bf16.mxu0 %v6396_v61  ;;  %2568 = vmatprep.subr.bf16.mxu1 %v6399_v62 }
 0x373   : > { %2528 = vmatpush2.bf16.msra.mxu0 %v6398_v63  ;;  %v1990_v63 = vrot.slane %v7619_v57, %v7560_v8 }
 0x374   : > { %2569 = vmatpush2.bf16.msra.mxu1 %v6401_v0  ;;  %2579 = vmatprep.subr.bf16.mxu0 %v6404_v1 }
 0x375   : > { %6079 = vmatprep.subr.bf16.mxu1 %v6964_v55 }
 0x3f9   : > { %v1952_v2 = vpop.xlane.xlu0 %1951 }
 0x3fa   : > { %v1953_v3 = vmul.f32 0.00390625, %v1952_v2 }
 0x3fc   : > { %v1954_v4 = vadd.f32 1e-05, %v1953_v3 }
 0x3fe   : > { %6690 = vrsqrt.f32 %v1954_v4 }
 0x40b   : > { %v6691_v13 = vpop.eup %6690 }
 0x40c   : > { %v1957_v14 = vmul.f32 %v6691_v13, %v7521_v36  ;;  %v1956_v16 = vmul.f32 %v6691_v13, %v7518_v35  ;;  %v6422_v35 = vld [vmem:[%s7246_s19 + $0x44] ss:$24 sps:$4 sm:$0xff]   ;;  %v6420_v36 = vld [vmem:[%s7246_s19 + $0x40] ss:$24 sps:$4 sm:$0xff]  }
 0x40e   : > { %v1970_v18 = vmul.f32 %v1966_v11, %v1957_v14  ;;  %v1969_v19 = vmul.f32 %v1962_v12, %v1956_v16  ;;  %v1994_v12 = vrot.slane %v7619_v57, %v7557_v7 }
 0x410   : > { %v1983_v20 = vadd.f32 %v1979_v15, %v1970_v18  ;;  %v1982_v21 = vadd.f32 %v1975_v17, %v1969_v19 }
 0x412   : > { %v1985_v22 = vpack.c.bf16 %v1983_v20, %v1983_v20  ;;  %v7579_v24 = vpack.c.bf16 %v1982_v21, %v1982_v21 }
 0x414   : > { %2529 = vmatprep.mubr.bf16.mxu0 %v1985_v22  ;;  %2570 = vmatprep.mubr.bf16.mxu1 %v1985_v22 }
 0x415   : > { %2530 = vmatmul.mubr.bf16.vlgmr.msra.gmra.mxu0 %v7579_v24  ;;  %2571 = vmatmul.mubr.bf16.vlgmr.msra.gmra.mxu1 %v7579_v24 }
 0x416   : > { %2580 = vmatpush1.bf16.msra.mxu0 %v6402_v23  ;;  %2611 = vmatprep.mubr.bf16.mxu0 %v1985_v22 }
 0x417   : > { %2581 = vmatprep.subr.bf16.mxu0 %v6407_v25  ;;  %6081 = vmatprep.mubr.msk.bf16.mxu1 %vm6965_vm4, %v6964_v55 }
 0x41a   : > { %2582 = vmatpush1.bf16.msra.mxu0 %v6405_v26 }
 0x41b   : > { %2583 = vmatprep.subr.bf16.mxu0 %v6410_v27 }
 0x41e   : > { %2584 = vmatpush1.bf16.msra.mxu0 %v6408_v28  ;;  %v2005_v28 = vsub.s32 4, %v7554_v6 }
 0x41f   : > { %2585 = vmatprep.subr.bf16.mxu0 %v6413_v29 }
 0x422   : > { %2586 = vmatpush1.bf16.msra.mxu0 %v6411_v30 }
 0x423   : > { %2587 = vmatprep.subr.bf16.mxu0 %v6416_v31  ;;  %v2006_v31 = vrot.slane %v7619_v57, %v2005_v28 }
 0x426   : > { %2588 = vmatpush1.bf16.msra.mxu0 %v6414_v32 }
 0x427   : > { %2589 = vmatprep.subr.bf16.mxu0 %v6419_v33 }
 0x42a   : > { %2590 = vmatpush1.bf16.msra.mxu0 %v6417_v34 }
 0x42b   : > { %2591 = vmatprep.subr.bf16.mxu0 %v6422_v35 }
 0x42e   : > { %2592 = vmatpush1.bf16.msra.mxu0 %v6420_v36 }
 0x42f   : > { %2593 = vmatprep.subr.bf16.mxu0 %v6425_v37 }
 0x432   : > { %2594 = vmatpush1.bf16.msra.mxu0 %v6423_v38 }
 0x433   : > { %2595 = vmatprep.subr.bf16.mxu0 %v6428_v39 }
 0x436   : > { %2596 = vmatpush2.bf16.msra.mxu0 %v6426_v40  ;;  %v1544_v40 = vand.u32 127, %v1543_v5 }
 0x437   : > { %2597 = vmatprep.subr.bf16.mxu0 %v6431_v41 }
 0x438   : > { %vm1545_vm7 = vcmp.lt.s32.totalorder %v1544_v40, 7 }
 0x43a   : > { %2598 = vmatpush2.bf16.msra.mxu0 %v6429_v42  ;;  %v6967_v42 = vmov -1e+09  }
 0x43b   : > { %2599 = vmatprep.subr.bf16.mxu0 %v6434_v43  ;;  %v1546_v43 = vsel %vm1545_vm7, 0.0, %v6967_v42 }
 0x43e   : > { %2600 = vmatpush2.bf16.msra.mxu0 %v6432_v44 }
 0x43f   : > { %2601 = vmatprep.subr.bf16.mxu0 %v6437_v45 }
 0x442   : > { %2602 = vmatpush2.bf16.msra.mxu0 %v6435_v46 }
 0x443   : > { %2603 = vmatprep.subr.bf16.mxu0 %v6440_v47 }
 0x446   : > { %2604 = vmatpush2.bf16.msra.mxu0 %v6438_v48 }
 0x447   : > { %2605 = vmatprep.subr.bf16.mxu0 %v6443_v49 }
 0x44a   : > { %2606 = vmatpush2.bf16.msra.mxu0 %v6441_v50 }
 0x44b   : > { %2607 = vmatprep.subr.bf16.mxu0 %v6446_v51 }
 0x44e   : > { %2608 = vmatpush2.bf16.msra.mxu0 %v6444_v52 }
 0x44f   : > { %2609 = vmatprep.subr.bf16.mxu0 %v6449_v53 }
 0x452   : > { %2610 = vmatpush2.bf16.msra.mxu0 %v6447_v54 }
 0x455   : > { %2612 = vmatmul.mubr.bf16.vlgmr.msra.gmra.mxu0 %v7579_v24 }
 0x4d5   : > { %v2531_v61 = vpop.f32.mrf.mxu0  ;;  %v2572_v62 = vpop.f32.mrf.mxu1 }
 0x4d6   : > { %v2573_v0 = vadd.f32 %v2572_v62, %v1998_v59  ;;  %v2532_v11 = vadd.f32 %v2531_v61, %v1990_v63 }
 0x4d7   : > { %v2533_v1 = vpop.f32.mrf.mxu0  ;;  %v2574_v2 = vpop.f32.mrf.mxu1 }
 0x4d8   : > { %v2648_v3 = vpack.c.bf16 %v2573_v0, %v2573_v0  ;;  %v2575_v4 = vadd.f32 %v2574_v2, %v2002_v60  ;;  %2629 = vrot.lane.b32.xlu1 %v2573_v0, %s6966_s12  ;;  %v2534_v16 = vadd.f32 %v2533_v1, %v1994_v12  ;;  %v2644_v17 = vpack.c.bf16 %v2532_v11, %v2532_v11 }
 0x4d9   : > { %v2535_v9 = vpop.f32.mrf.mxu0  ;;  %v2576_v10 = vpop.f32.mrf.mxu1 }
 0x4da   : > { %2633 = vrot.lane.b32.xlu0 %v2575_v4, %s6966_s12  ;;  %v2657_v13 = vsel %vm2652_vm5, %v2648_v3, 0  ;;  %v2650_v26 = vpack.c.bf16 %v2575_v4, %v2575_v4  ;;  %v2646_v33 = vpack.c.bf16 %v2534_v16, %v2534_v16 }
 0x4db   : > { %v2536_v14 = vpop.f32.mrf.mxu0  ;;  %v2577_v15 = vpop.f32.mrf.mxu1  ;;  %6080 = vmatpush3.bf16.xpose.msra.mxu1 %v2657_v13 }
 0x4dc   : > { %2621 = vrot.lane.b32.xlu1 %v2532_v11, %s6966_s12  ;;  %6085 = vmatprep.subr.bf16.mxu1 %v6964_v55  ;;  %v2749_v29 = vsel %vm2652_vm5, %v2650_v26, 0 }
 0x4e0   : > { %2625 = vrot.lane.b32.xlu1 %v2534_v16, %s6966_s12 }
 0x4e2   : > { %6082 = vmatmul.mubr.msk.bf16.vlgmr.msra.gmra.mxu1 %vm2652_vm5, %v2644_v17 }
 0x4e3   : > { %6087 = vmatprep.mubr.msk.bf16.mxu1 %vm6965_vm4, %v6964_v55 }
 0x515   : > { %v2613_v18 = vpop.f32.mrf.mxu0 }
 0x516   : > { %v7654_v34 = vadd.f32 %v2613_v18, %v2006_v31 }
 0x517   : > { %v7641_v19 = vpop.f32.mrf.mxu0 }
 0x518   : > { %v2894_v37 = vpack.c.bf16 %v7654_v34, %v7654_v34 }
 0x519   : > { %v2617_v20 = vpop.f32.mrf.mxu0 }
 0x51a   : > { %v2903_v39 = vsel %vm2901_vm6, %v2894_v37, 0 }
 0x51b   : > { %v2618_v21 = vpop.f32.mrf.mxu0 }
 0x54a   : > { %v2630_v22 = vpop.permute.xlu1 %2629 }
 0x54b   : > { %v2649_v23 = vpack.c.bf16 %v2630_v22, %v2630_v22 }
 0x54c   : > { %v2634_v30 = vpop.permute.xlu0 %2633 }
 0x54d   : > { %v2703_v24 = vsel %vm2652_vm5, %v2649_v23, 0  ;;  %v2651_v32 = vpack.c.bf16 %v2634_v30, %v2634_v30 }
 0x54e   : > { %6086 = vmatpush3.bf16.xpose.msra.mxu1 %v2703_v24  ;;  %v2622_v25 = vpop.permute.xlu1 %2621 }
 0x54f   : > { %6091 = vmatprep.subr.bf16.mxu1 %v6964_v55  ;;  %v2645_v27 = vpack.c.bf16 %v2622_v25, %v2622_v25  ;;  %v2795_v35 = vsel %vm2652_vm5, %v2651_v32, 0 }
 0x552   : > { %v2626_v36 = vpop.permute.xlu1 %2625 }
 0x553   : > { %v2647_v38 = vpack.c.bf16 %v2626_v36, %v2626_v36 }
 0x555   : > { %6088 = vmatmul.mubr.msk.bf16.vlgmr.msra.gmra.mxu1 %vm2652_vm5, %v2645_v27 }
 0x556   : > { %6092 = vmatpush3.bf16.xpose.msra.mxu1 %v2749_v29  ;;  %6093 = vmatprep.mubr.msk.bf16.mxu1 %vm6965_vm4, %v6964_v55 }
 0x557   : > { %6097 = vmatprep.subr.bf16.mxu1 %v6964_v55 }
 0x55d   : > { %6094 = vmatmul.mubr.msk.bf16.vlgmr.msra.gmra.mxu1 %vm2652_vm5, %v2646_v33 }
 0x55e   : > { %6098 = vmatpush3.bf16.xpose.msra.mxu1 %v2795_v35  ;;  %6099 = vmatprep.mubr.msk.bf16.mxu1 %vm6965_vm4, %v6964_v55 }
 0x55f   : > { %6103 = vmatprep.subr.bf16.mxu1 %v6964_v55 }
 0x565   : > { %6100 = vmatmul.mubr.msk.bf16.vlgmr.msra.gmra.mxu1 %vm2652_vm5, %v2647_v38  ;;  %v2009_v38 = vsub.s32 5, %v7554_v6 }
 0x566   : > { %6104 = vmatpush3.bf16.msra.mxu1 %v2903_v39  ;;  %6105 = vmatprep.mubr.msk.bf16.mxu1 %vm6965_vm4, %v6964_v55 }
 0x567   : > { %6109 = vmatprep.subr.bf16.mxu1 %v6964_v55  ;;  %v2010_v39 = vrot.slane %v7619_v57, %v2009_v38 }
 0x569   : > { %v2616_v40 = vadd.f32 %v7641_v19, %v2010_v39  ;;  %v6494_v39 = vld [vmem:[%s7295_s29 + $0x94] ss:$8 sps:$4 sm:$0xff]  }
 0x5a2   : > { %v2693_v41 = vpop.f32.mrf.mxu1 }
 0x5a3   : > { %v2837_v44 = vmul.f32 0.125, %v2693_v41 }
 0x5a4   : > { %v6083_v45 = vpop.f32.mrf.mxu1 }
 0x5a5   : > { %v2841_v46 = vadd.f32 %v2837_v44, %v1546_v43 }
 0x5a6   : > { %v2696_v47 = vpop.f32.mrf.mxu1 }
 0x5a7   : > { %v2846_v48 = vsel %vm2845_vm8, %v2841_v46, -inf }
 0x5a8   : > { %v6084_v49 = vpop.f32.mrf.mxu1  ;;  %2847 = vmax.xlane.f32.xlu1 %v2846_v48 }
 0x615   : > { %v2739_v50 = vpop.f32.mrf.mxu1 }
 0x616   : > { %v2838_v51 = vmul.f32 0.125, %v2739_v50 }
 0x617   : > { %v6089_v52 = vpop.f32.mrf.mxu1 }
 0x618   : > { %v2842_v53 = vadd.f32 %v2838_v51, %v1546_v43 }
 0x619   : > { %v2742_v54 = vpop.f32.mrf.mxu1 }
 0x61a   : > { %v2849_v5 = vsel %vm2845_vm8, %v2842_v53, -inf }
 0x61b   : > { %v6090_v59 = vpop.f32.mrf.mxu1  ;;  %2850 = vmax.xlane.f32.xlu0 %v2849_v5 }
 0x61d   : > { %v2785_v60 = vpop.f32.mrf.mxu1 }
 0x61e   : > { %v2839_v61 = vmul.f32 0.125, %v2785_v60 }
 0x61f   : > { %v6095_v62 = vpop.f32.mrf.mxu1 }
 0x620   : > { %v2843_v63 = vadd.f32 %v2839_v61, %v1546_v43 }
 0x621   : > { %v2788_v0 = vpop.f32.mrf.mxu1 }
 0x622   : > { %v2852_v1 = vsel %vm2845_vm8, %v2843_v63, -inf }
 0x623   : > { %v6096_v2 = vpop.f32.mrf.mxu1  ;;  %2853 = vmax.xlane.f32.xlu1 %v2852_v1 }
 0x625   : > { %v2831_v3 = vpop.f32.mrf.mxu1 }
 0x626   : > { %v2840_v4 = vmul.f32 0.125, %v2831_v3 }
 0x627   : > { %v6101_v9 = vpop.f32.mrf.mxu1 }
 0x628   : > { %v2844_v10 = vadd.f32 %v2840_v4, %v1546_v43  ;;  %v6450_v4 = vld [vmem:[%s7295_s29 + $0x70] ss:$8 sps:$4 sm:$0xff]   ;;  %v6452_v9 = vld [vmem:[%s7295_s29 + $0x74] ss:$8 sps:$4 sm:$0xff]  }
 0x629   : > { %v2834_v11 = vpop.f32.mrf.mxu1  ;;  %3255 = vmatprep.subr.bf16.mxu0 %v6452_v9 }
 0x62a   : > { %v2855_v12 = vsel %vm2845_vm8, %v2844_v10, -inf  ;;  %3256 = vmatpush1.bf16.msra.mxu0 %v6450_v4  ;;  %v6458_v11 = vld [vmem:[%s7295_s29 + $0x54] ss:$8 sps:$4 sm:$0xff]  }
 0x62b   : > { %v6102_v13 = vpop.f32.mrf.mxu1  ;;  %2856 = vmax.xlane.f32.xlu1 %v2855_v12  ;;  %v6456_v12 = vld [vmem:[%s7295_s29 + $0x50] ss:$8 sps:$4 sm:$0xff]  }
 0x62c   : > { %v6461_v13 = vld [vmem:[%s7295_s29 + $0x44] ss:$8 sps:$4 sm:$0xff]  }
 0x631   : > { %v2848_v14 = vpop.xlane.xlu1 %2847 }
 0x632   : > { %v2858_v15 = vsub.f32 %v2841_v46, %v2848_v14  ;;  %v6459_v14 = vld [vmem:[%s7295_s29 + $0x40] ss:$8 sps:$4 sm:$0xff]  }
 0x634   : > { %v2862_v16 = vmul.f32 1.442695, %v2858_v15  ;;  %v6464_v15 = vld [vmem:[%s7295_s29 + $0x34] ss:$8 sps:$4 sm:$0xff]  }
 0x636   : > { %6692 = vpow2.f32 %v2862_v16  ;;  %v6462_v16 = vld [vmem:[%s7295_s29 + $0x30] ss:$8 sps:$4 sm:$0xff]  }
 0x643   : > { %v6693_v17 = vpop.eup %6692 }
 0x644   : > { %v2870_v18 = vsel %vm2845_vm8, %v6693_v17, 0.0 }
 0x645   : > { %2871 = vadd.xlane.f32.xlu1 %v2870_v18  ;;  %v6465_v18 = vld [vmem:[%s7295_s29 + $0x20] ss:$8 sps:$4 sm:$0xff]  }
 0x6a4   : > { %v2851_v20 = vpop.xlane.xlu0 %2850 }
 0x6a5   : > { %v2859_v21 = vsub.f32 %v2842_v53, %v2851_v20  ;;  %v6470_v20 = vld [vmem:[%s7295_s29 + $0x14] ss:$8 sps:$4 sm:$0xff]  }
 0x6a7   : > { %v2864_v22 = vmul.f32 1.442695, %v2859_v21  ;;  %v6468_v21 = vld [vmem:[%s7295_s29 + $0x10] ss:$8 sps:$4 sm:$0xff]  }
 0x6a9   : > { %6694 = vpow2.f32 %v2864_v22  ;;  %v6473_v22 = vld [vmem:[%s7295_s29 + $0x4] ss:$8 sps:$4 sm:$0xff]  }
 0x6ac   : > { %v2854_v23 = vpop.xlane.xlu1 %2853 }
 0x6ad   : > { %v2860_v24 = vsub.f32 %v2843_v63, %v2854_v23  ;;  %v6471_v23 = vld [vmem:[%s7295_s29] ss:$8 sps:$4 sm:$0xff]  }
 0x6af   : > { %v2866_v25 = vmul.f32 1.442695, %v2860_v24  ;;  %v6476_v24 = vld [vmem:[%s7295_s29 + $0xf4] ss:$8 sps:$4 sm:$0xff]  }
 0x6b1   : > { %6696 = vpow2.f32 %v2866_v25  ;;  %v6474_v25 = vld [vmem:[%s7295_s29 + $0xf0] ss:$8 sps:$4 sm:$0xff]  }
 0x6b4   : > { %v2857_v26 = vpop.xlane.xlu1 %2856 }
 0x6b5   : > { %v2861_v27 = vsub.f32 %v2844_v10, %v2857_v26  ;;  %v6455_v10 = vld [vmem:[%s7295_s29 + $0x64] ss:$8 sps:$4 sm:$0xff]  }
 0x6b6   : > { %v6695_v29 = vpop.eup %6694  ;;  %3257 = vmatprep.subr.bf16.mxu0 %v6455_v10  ;;  %v6479_v26 = vld [vmem:[%s7295_s29 + $0xe4] ss:$8 sps:$4 sm:$0xff]  }
 0x6b7   : > { %v2868_v30 = vmul.f32 1.442695, %v2861_v27  ;;  %v2873_v31 = vsel %vm2845_vm8, %v6695_v29, 0.0  ;;  %v6477_v27 = vld [vmem:[%s7295_s29 + $0xe0] ss:$8 sps:$4 sm:$0xff]  }
 0x6b8   : > { %2874 = vadd.xlane.f32.xlu1 %v2873_v31  ;;  %v6485_v31 = vld [vmem:[%s7295_s29 + $0xc4] ss:$8 sps:$4 sm:$0xff]  }
 0x6b9   : > { %6698 = vpow2.f32 %v2868_v30  ;;  %v6480_v30 = vld [vmem:[%s7295_s29 + $0xd0] ss:$8 sps:$4 sm:$0xff]   ;;  %v6743_v10 = vld [vmem:[#allocation2 + $0x8] sm:$0xff] }
 0x6be   : > { %v6697_v32 = vpop.eup %6696 }
 0x6bf   : > { %v2876_v33 = vsel %vm2845_vm8, %v6697_v32, 0.0 }
 0x6c0   : > { %2877 = vadd.xlane.f32.xlu0 %v2876_v33  ;;  %v6488_v33 = vld [vmem:[%s7295_s29 + $0xb4] ss:$8 sps:$4 sm:$0xff]  }
 0x6c6   : > { %v6699_v35 = vpop.eup %6698 }
 0x6c7   : > { %v2879_v36 = vsel %vm2845_vm8, %v6699_v35, 0.0 }
 0x6c8   : > { %2880 = vadd.xlane.f32.xlu1 %v2879_v36  ;;  %v6491_v36 = vld [vmem:[%s7295_s29 + $0xa4] ss:$8 sps:$4 sm:$0xff]  }
 0x6ce   : > { %v2872_v37 = vpop.xlane.xlu1 %2871 }
 0x6cf   : > { %6700 = vrcp.f32 %v2872_v37  ;;  %v6489_v37 = vld [vmem:[%s7295_s29 + $0xa0] ss:$8 sps:$4 sm:$0xff]  }
 0x6d6   : > { %2637 = vrot.lane.b32.xlu0 %v7654_v34, %s6966_s12  ;;  %v2896_v34 = vpack.c.bf16 %v2616_v40, %v2616_v40 }
 0x6d8   : > { %v2995_v51 = vsel %vm2901_vm6, %v2896_v34, 0 }
 0x6d9   : > { %2641 = vrot.lane.b32.xlu1 %v2616_v40, %s6966_s12  ;;  %v6492_v40 = vld [vmem:[%s7295_s29 + $0x90] ss:$8 sps:$4 sm:$0xff]  }
 0x6dc   : > { %v6701_v41 = vpop.eup %6700 }
 0x6dd   : > { %v2886_v42 = vmul.f32 %v6701_v41, %v6693_v17  ;;  %v6467_v17 = vld [vmem:[%s7295_s29 + $0x24] ss:$8 sps:$4 sm:$0xff]  }
 0x6df   : > { %v2890_v43 = vpack.c.bf16 %v2886_v42, %v2886_v42 }
 0x6e1   : > { %6106 = vmatmul.mubr.msk.bf16.vlgmr.msra.gmra.mxu1 %vm2845_vm8, %v2890_v43 }
 0x6e2   : > { %6111 = vmatprep.mubr.msk.bf16.mxu1 %vm6965_vm4, %v6964_v55 }
 0x741   : > { %v2875_v44 = vpop.xlane.xlu1 %2874 }
 0x742   : > { %6702 = vrcp.f32 %v2875_v44 }
 0x749   : > { %v2878_v45 = vpop.xlane.xlu0 %2877 }
 0x74a   : > { %6704 = vrcp.f32 %v2878_v45  ;;  %v6497_v45 = vld [vmem:[%s7295_s29 + $0x84] ss:$8 sps:$4 sm:$0xff]  }
 0x74d   : > { %v2638_v57 = vpop.permute.xlu0 %2637 }
 0x74e   : > { %v2895_v46 = vpack.c.bf16 %v2638_v57, %v2638_v57 }
 0x74f   : > { %v6703_v47 = vpop.eup %6702 }
 0x750   : > { %v2949_v19 = vsel %vm2901_vm6, %v2895_v46, 0  ;;  %v2887_v48 = vmul.f32 %v6703_v47, %v6695_v29  ;;  %v6482_v29 = vld [vmem:[%s7295_s29 + $0xd4] ss:$8 sps:$4 sm:$0xff]   ;;  %v6495_v46 = vld [vmem:[%s7295_s29 + $0x80] ss:$8 sps:$4 sm:$0xff]  }
 0x751   : > { %6110 = vmatpush3.bf16.msra.mxu1 %v2949_v19  ;;  %v2881_v49 = vpop.xlane.xlu1 %2880 }
 0x752   : > { %6706 = vrcp.f32 %v2881_v49  ;;  %v2891_v50 = vpack.c.bf16 %v2887_v48, %v2887_v48  ;;  %6115 = vmatprep.subr.bf16.mxu1 %v6964_v55 }
 0x754   : > { %6112 = vmatmul.mubr.msk.bf16.vlgmr.msra.gmra.mxu1 %vm2845_vm8, %v2891_v50 }
 0x755   : > { %6116 = vmatpush3.bf16.msra.mxu1 %v2995_v51  ;;  %v2642_v52 = vpop.permute.xlu1 %2641  ;;  %6117 = vmatprep.mubr.msk.bf16.mxu1 %vm6965_vm4, %v6964_v55 }
 0x756   : > { %6121 = vmatprep.subr.bf16.mxu1 %v6964_v55  ;;  %v2897_v54 = vpack.c.bf16 %v2642_v52, %v2642_v52 }
 0x757   : > { %v6705_v53 = vpop.eup %6704 }
 0x758   : > { %v2888_v5 = vmul.f32 %v6705_v53, %v6697_v32  ;;  %v3041_v60 = vsel %vm2901_vm6, %v2897_v54, 0  ;;  %v6483_v32 = vld [vmem:[%s7295_s29 + $0xc0] ss:$8 sps:$4 sm:$0xff]  }
 0x75a   : > { %v2892_v59 = vpack.c.bf16 %v2888_v5, %v2888_v5 }
 0x75c   : > { %6118 = vmatmul.mubr.msk.bf16.vlgmr.msra.gmra.mxu1 %vm2845_vm8, %v2892_v59 }
 0x75d   : > { %6122 = vmatpush3.bf16.msra.mxu1 %v3041_v60  ;;  %6123 = vmatprep.mubr.msk.bf16.mxu1 %vm6965_vm4, %v6964_v55  ;;  %v6453_v55 = vld [vmem:[%s7295_s29 + $0x60] ss:$8 sps:$4 sm:$0xff]  }
 0x75e   : > { %3258 = vmatpush1.bf16.msra.mxu0 %v6453_v55 }
 0x75f   : > { %v6707_v61 = vpop.eup %6706  ;;  %3259 = vmatprep.subr.bf16.mxu0 %v6458_v11 }
 0x760   : > { %v2889_v62 = vmul.f32 %v6707_v61, %v6699_v35  ;;  %v6486_v35 = vld [vmem:[%s7295_s29 + $0xb0] ss:$8 sps:$4 sm:$0xff]  }
 0x762   : > { %v2893_v63 = vpack.c.bf16 %v2889_v62, %v2889_v62  ;;  %3260 = vmatpush1.bf16.msra.mxu0 %v6456_v12 }
 0x763   : > { %3261 = vmatprep.subr.bf16.mxu0 %v6461_v13 }
 0x764   : > { %6124 = vmatmul.mubr.msk.bf16.vlgmr.msra.gmra.mxu1 %vm2845_vm8, %v2893_v63  ;;  %v1680_v63 = vld [vmem:[%s1041_s18] sm:$0x3] }
 0x765   : > { %v3302_v4 = vrot.slane %v1680_v63, %v7560_v8 }
 0x766   : > { %3262 = vmatpush1.bf16.msra.mxu0 %v6459_v14 }
 0x767   : > { %3263 = vmatprep.subr.bf16.mxu0 %v6464_v15 }
 0x76a   : > { %3264 = vmatpush1.bf16.msra.mxu0 %v6462_v16  ;;  %v1739_v16 = vld [vmem:[%s7254_s6 + $0x1c0] sm:$0xff] }
 0x76b   : > { %3265 = vmatprep.subr.bf16.mxu0 %v6467_v17  ;;  %v1743_v17 = vld [vmem:[%s7254_s6 + $0x1e0] sm:$0xff] }
 0x76e   : > { %3266 = vmatpush1.bf16.msra.mxu0 %v6465_v18  ;;  %v1740_v18 = vld [vmem:[%s7254_s6 + $0x1c8] sm:$0xff] }
 0x76f   : > { %3267 = vmatprep.subr.bf16.mxu0 %v6470_v20  ;;  %v5817_v20 = vcombine.low %v1739_v16, %v1743_v17 }
 0x772   : > { %3268 = vmatpush1.bf16.msra.mxu0 %v6468_v21  ;;  %v5818_v21 = vcombine.high %v1739_v16, %v1743_v17  ;;  %v1687_v16 = vld [vmem:[%s7254_s6 + $0x20] sm:$0xff]  ;;  %v1684_v17 = vld [vmem:[%s7254_s6 + $0x8] sm:$0xff] }
 0x773   : > { %3269 = vmatprep.subr.bf16.mxu0 %v6473_v22  ;;  %v1744_v22 = vld [vmem:[%s7254_s6 + $0x1e8] sm:$0xff] }
 0x774   : > { %4036 = vmatprep.subr.bf16.mxu1 %v5818_v21 }
 0x775   : > { %4037 = vmatpush1.bf16.msra.mxu1 %v5817_v20 }
 0x776   : > { %3270 = vmatpush1.bf16.msra.mxu0 %v6471_v23  ;;  %v1731_v23 = vld [vmem:[%s7254_s6 + $0x180] sm:$0xff] }
 0x777   : > { %3271 = vmatprep.subr.bf16.mxu0 %v6476_v24  ;;  %v1735_v24 = vld [vmem:[%s7254_s6 + $0x1a0] sm:$0xff] }
 0x77a   : > { %3272 = vmatpush2.bf16.msra.mxu0 %v6474_v25  ;;  %v5819_v25 = vcombine.low %v1740_v18, %v1744_v22 }
 0x77b   : > { %3273 = vmatprep.subr.bf16.mxu0 %v6479_v26  ;;  %v5820_v26 = vcombine.high %v1740_v18, %v1744_v22  ;;  %v1688_v18 = vld [vmem:[%s7254_s6 + $0x28] sm:$0xff] }
 0x77e   : > { %3274 = vmatpush2.bf16.msra.mxu0 %v6477_v27  ;;  %v5810_v27 = vcombine.high %v1731_v23, %v1735_v24 }
 0x77f   : > { %3275 = vmatprep.subr.bf16.mxu0 %v6482_v29  ;;  %v1732_v29 = vld [vmem:[%s7254_s6 + $0x188] sm:$0xff] }
 0x780   : > { %4038 = vmatprep.subr.bf16.mxu1 %v5810_v27  ;;  %v1808_v27 = vld [vmem:[%s7254_s6 + $0x3e8] sm:$0xff] }
 0x782   : > { %3276 = vmatpush2.bf16.msra.mxu0 %v6480_v30  ;;  %v1736_v30 = vld [vmem:[%s7254_s6 + $0x1a8] sm:$0xff] }
 0x783   : > { %3277 = vmatprep.subr.bf16.mxu0 %v6485_v31  ;;  %v1723_v31 = vld [vmem:[%s7254_s6 + $0x140] sm:$0xff] }
 0x786   : > { %3278 = vmatpush2.bf16.msra.mxu0 %v6483_v32  ;;  %v5812_v32 = vcombine.high %v1732_v29, %v1736_v30 }
 0x787   : > { %3279 = vmatprep.subr.bf16.mxu0 %v6488_v33  ;;  %v1727_v33 = vld [vmem:[%s7254_s6 + $0x160] sm:$0xff] }
 0x78a   : > { %3280 = vmatpush2.bf16.msra.mxu0 %v6486_v35  ;;  %v1724_v35 = vld [vmem:[%s7254_s6 + $0x148] sm:$0xff] }
 0x78b   : > { %3281 = vmatprep.subr.bf16.mxu0 %v6491_v36  ;;  %v1728_v36 = vld [vmem:[%s7254_s6 + $0x168] sm:$0xff] }
 0x78e   : > { %3282 = vmatpush2.bf16.msra.mxu0 %v6489_v37  ;;  %v5809_v37 = vcombine.low %v1731_v23, %v1735_v24  ;;  %v5764_v23 = vcombine.high %v1684_v17, %v1688_v18  ;;  %v1803_v24 = vld [vmem:[%s7254_s6 + $0x3c0] sm:$0xff] }
 0x78f   : > { %3283 = vmatprep.subr.bf16.mxu0 %v6494_v39  ;;  %v5811_v39 = vcombine.low %v1732_v29, %v1736_v30  ;;  %v5763_v30 = vcombine.low %v1684_v17, %v1688_v18  ;;  %v1764_v17 = vld [vmem:[%s7254_s6 + $0x288] sm:$0xff] }
 0x790   : > { %4039 = vmatpush1.bf16.msra.mxu1 %v5809_v37  ;;  %v1800_v37 = vld [vmem:[%s7254_s6 + $0x3a8] sm:$0xff] }
 0x791   : > { %v1768_v18 = vld [vmem:[%s7254_s6 + $0x2a8] sm:$0xff] }
 0x792   : > { %3284 = vmatpush2.bf16.msra.mxu0 %v6492_v40  ;;  %v5802_v40 = vcombine.high %v1723_v31, %v1727_v33 }
 0x793   : > { %3285 = vmatprep.subr.bf16.mxu0 %v6497_v45  ;;  %v1720_v45 = vld [vmem:[%s7254_s6 + $0x128] sm:$0xff] }
 0x794   : > { %4040 = vmatprep.subr.bf16.mxu1 %v5802_v40 }
 0x796   : > { %3286 = vmatpush2.bf16.msra.mxu0 %v6495_v46  ;;  %v5803_v46 = vcombine.low %v1724_v35, %v1728_v36 }
 0x797   : > { %4077 = vmatprep.subr.bf16.mxu0 %v5820_v26  ;;  %v1804_v26 = vld [vmem:[%s7254_s6 + $0x3c8] sm:$0xff] }
 0x798   : > { %v5883_v40 = vcombine.low %v1804_v26, %v1808_v27 }
 0x7a1   : > { %v7700_v0 = vpop.f32.mrf.mxu1 }
 0x7a3   : > { %v6107_v1 = vpop.f32.mrf.mxu1 }
 0x7a5   : > { %v2942_v2 = vpop.f32.mrf.mxu1 }
 0x7a6   : > { %v6742_v2 = vld [vmem:[#allocation2] sm:$0xff] }
 0x7a7   : > { %v6108_v3 = vpop.f32.mrf.mxu1 }
 0x814   : > { %v2985_v41 = vpop.f32.mrf.mxu1 }
 0x816   : > { %v6113_v42 = vpop.f32.mrf.mxu1 }
 0x817   : > { %v1715_v42 = vld [vmem:[%s7254_s6 + $0x100] sm:$0xff] }
 0x818   : > { %v2988_v43 = vpop.f32.mrf.mxu1 }
 0x819   : > { %v1719_v43 = vld [vmem:[%s7254_s6 + $0x120] sm:$0xff] }
 0x81a   : > { %v6114_v44 = vpop.f32.mrf.mxu1 }
 0x81b   : > { %v1716_v44 = vld [vmem:[%s7254_s6 + $0x108] sm:$0xff] }
 0x81c   : > { %v3031_v57 = vpop.f32.mrf.mxu1 }
 0x81e   : > { %v6119_v47 = vpop.f32.mrf.mxu1 }
 0x81f   : > { %v5794_v47 = vcombine.high %v1715_v42, %v1719_v43 }
 0x820   : > { %v3034_v34 = vpop.f32.mrf.mxu1 }
 0x821   : > { %v5796_v34 = vcombine.high %v1716_v44, %v1720_v45 }
 0x822   : > { %v6120_v19 = vpop.f32.mrf.mxu1 }
 0x823   : > { %v1707_v19 = vld [vmem:[%s7254_s6 + $0xc0] sm:$0xff] }
 0x824   : > { %v3077_v48 = vpop.f32.mrf.mxu1 }
 0x825   : > { %v6301_v49 = vpack.i.bf16 %v2985_v41, %v3077_v48  ;;  %v5804_v41 = vcombine.high %v1724_v35, %v1728_v36  ;;  %v1711_v48 = vld [vmem:[%s7254_s6 + $0xe0] sm:$0xff]  ;;  %v1796_v36 = vld [vmem:[%s7254_s6 + $0x388] sm:$0xff] }
 0x826   : > { %v6125_v50 = vpop.f32.mrf.mxu1  ;;  %v1799_v35 = vld [vmem:[%s7254_s6 + $0x3a0] sm:$0xff] }
 0x827   : > { %6302 = vrot.lane.b32.xlu1 %v6301_v49, %s6966_s12  ;;  %v1708_v49 = vld [vmem:[%s7254_s6 + $0xc8] sm:$0xff] }
 0x828   : > { %v3080_v51 = vpop.f32.mrf.mxu1  ;;  %v1712_v50 = vld [vmem:[%s7254_s6 + $0xe8] sm:$0xff] }
 0x829   : > { %v5793_v51 = vcombine.low %v1715_v42, %v1719_v43  ;;  %v5876_v42 = vcombine.high %v1796_v36, %v1800_v37 }
 0x82a   : > { %v6126_v52 = vpop.f32.mrf.mxu1 }
 0x82b   : > { %v5795_v52 = vcombine.low %v1716_v44, %v1720_v45  ;;  %v5875_v44 = vcombine.low %v1796_v36, %v1800_v37  ;;  %v1748_v36 = vld [vmem:[%s7254_s6 + $0x208] sm:$0xff] }
 0x82c   : > { %v1752_v37 = vld [vmem:[%s7254_s6 + $0x228] sm:$0xff] }
 0x899   : > { %v6303_v53 = vpop.permute.xlu1 %6302 }
 0x89a   : > { %v6305_v54 = vunpack.i.h.bf16 %v6303_v53  ;;  %v6304_v5 = vunpack.i.l.bf16 %v6303_v53  ;;  %v5786_v53 = vcombine.high %v1707_v19, %v1711_v48 }
 0x89c   : > { %v3091_v59 = vsel %vm2652_vm5, %v7700_v0, %v6305_v54  ;;  %v3092_v60 = vsel %vm2652_vm5, %v3031_v57, %v6304_v5  ;;  %v3306_v0 = vrot.slane %v1680_v63, %v7557_v7  ;;  %v5801_v57 = vcombine.low %v1723_v31, %v1727_v33  ;;  %v1699_v5 = vld [vmem:[%s7254_s6 + $0x80] sm:$0xff] }
 0x89d   : > { %v3093_v61 = vpack.c.bf16 %v3091_v59, %v3091_v59  ;;  %v3094_v62 = vpack.c.bf16 %v3092_v60, %v3092_v60  ;;  %v5788_v54 = vcombine.high %v1708_v49, %v1712_v50  ;;  %v1703_v59 = vld [vmem:[%s7254_s6 + $0xa0] sm:$0xff]  ;;  %v1700_v60 = vld [vmem:[%s7254_s6 + $0x88] sm:$0xff]  ;;  %v5787_v63 = vcombine.low %v1708_v49, %v1712_v50 }
 0x89e   : > { %4041 = vmatpush1.bf16.msra.mxu1 %v5801_v57  ;;  %v1795_v33 = vld [vmem:[%s7254_s6 + $0x380] sm:$0xff] }
 0x89f   : > { %3287 = vmatprep.mubr.bf16.mxu0 %v3094_v62  ;;  %4042 = vmatprep.subr.bf16.mxu1 %v5794_v47  ;;  %v5785_v62 = vcombine.low %v1707_v19, %v1711_v48  ;;  %v5873_v43 = vcombine.low %v1795_v33, %v1799_v35  ;;  %v1787_v49 = vld [vmem:[%s7254_s6 + $0x340] sm:$0xff] }
 0x8a0   : > { %3288 = vmatmul.mubr.bf16.vlgmr.msra.gmra.mxu0 %v3093_v61  ;;  %v1704_v61 = vld [vmem:[%s7254_s6 + $0xa8] sm:$0xff]  ;;  %v1791_v50 = vld [vmem:[%s7254_s6 + $0x360] sm:$0xff] }
 0x8a1   : > { %4078 = vmatpush1.bf16.msra.mxu0 %v5819_v25  ;;  %v1807_v25 = vld [vmem:[%s7254_s6 + $0x3e0] sm:$0xff] }
 0x8a2   : > { %4079 = vmatprep.subr.bf16.mxu0 %v5812_v32  ;;  %4043 = vmatpush1.bf16.msra.mxu1 %v5793_v51  ;;  %v5882_v31 = vcombine.high %v1803_v24, %v1807_v25  ;;  %v5884_v32 = vcombine.high %v1804_v26, %v1808_v27  ;;  %v1788_v51 = vld [vmem:[%s7254_s6 + $0x348] sm:$0xff] }
 0x8a3   : > { %4044 = vmatprep.subr.bf16.mxu1 %v5786_v53  ;;  %v1792_v53 = vld [vmem:[%s7254_s6 + $0x368] sm:$0xff] }
 0x8a4   : > { %v1756_v26 = vld [vmem:[%s7254_s6 + $0x248] sm:$0xff] }
 0x8a5   : > { %4080 = vmatpush1.bf16.msra.mxu0 %v5811_v39  ;;  %v5881_v39 = vcombine.low %v1803_v24, %v1807_v25  ;;  %v1755_v24 = vld [vmem:[%s7254_s6 + $0x240] sm:$0xff]  ;;  %v1760_v27 = vld [vmem:[%s7254_s6 + $0x268] sm:$0xff] }
 0x8a6   : > { %4081 = vmatprep.subr.bf16.mxu0 %v5804_v41  ;;  %4045 = vmatpush1.bf16.msra.mxu1 %v5785_v62  ;;  %v5874_v41 = vcombine.high %v1795_v33, %v1799_v35  ;;  %v1780_v62 = vld [vmem:[%s7254_s6 + $0x308] sm:$0xff]  ;;  %v1759_v25 = vld [vmem:[%s7254_s6 + $0x260] sm:$0xff] }
 0x8a7   : > { %v1747_v33 = vld [vmem:[%s7254_s6 + $0x200] sm:$0xff] }
 0x8a8   : > { %v1751_v35 = vld [vmem:[%s7254_s6 + $0x220] sm:$0xff] }
 0x8a9   : > { %4082 = vmatpush1.bf16.msra.mxu0 %v5803_v46 }
 0x8aa   : > { %4083 = vmatprep.subr.bf16.mxu0 %v5796_v34 }
 0x8ad   : > { %4084 = vmatpush1.bf16.msra.mxu0 %v5795_v52  ;;  %v5866_v52 = vcombine.high %v1787_v49, %v1791_v50 }
 0x8ae   : > { %4085 = vmatprep.subr.bf16.mxu0 %v5788_v54  ;;  %v5865_v54 = vcombine.low %v1787_v49, %v1791_v50 }
 0x8b1   : > { %4086 = vmatpush1.bf16.msra.mxu0 %v5787_v63 }
 0x960   : > { %v3289_v1 = vpop.f32.mrf.mxu0 }
 0x961   : > { %v3296_v3 = vadd.f32 %v6742_v2, %v3289_v1  ;;  %v5778_v1 = vcombine.high %v1699_v5, %v1703_v59  ;;  %v5780_v2 = vcombine.high %v1700_v60, %v1704_v61 }
 0x962   : > { %v3291_v9 = vpop.f32.mrf.mxu0 }
 0x963   : > { %v3297_v55 = vadd.f32 %v6743_v10, %v3291_v9  ;;  %v7745_v12 = vadd.f32 %v3302_v4, %v3296_v3  ;;  %v1691_v3 = vld [vmem:[%s7254_s6 + $0x40] sm:$0xff]  ;;  %v1696_v9 = vld [vmem:[%s7254_s6 + $0x68] sm:$0xff]  ;;  %v5777_v10 = vcombine.low %v1699_v5, %v1703_v59  ;;  %4046 = vmatprep.subr.bf16.mxu1 %v5778_v1  ;;  %4087 = vmatprep.subr.bf16.mxu0 %v5780_v2 }
 0x964   : > { %v3293_v11 = vpop.f32.mrf.mxu0  ;;  %v1695_v4 = vld [vmem:[%s7254_s6 + $0x60] sm:$0xff]  ;;  %v5867_v5 = vcombine.low %v1788_v51, %v1792_v53  ;;  %v5868_v59 = vcombine.high %v1788_v51, %v1792_v53  ;;  %v1784_v2 = vld [vmem:[%s7254_s6 + $0x328] sm:$0xff] }
 0x965   : > { %v7747_v13 = vadd.f32 %v3306_v0, %v3297_v55  ;;  %v1692_v0 = vld [vmem:[%s7254_s6 + $0x48] sm:$0xff]  ;;  %v5779_v55 = vcombine.low %v1700_v60, %v1704_v61  ;;  %v5770_v11 = vcombine.high %v1691_v3, %v1695_v4  ;;  %4047 = vmatpush1.bf16.msra.mxu1 %v5777_v10  ;;  %v5769_v20 = vcombine.low %v1691_v3, %v1695_v4  ;;  %v1779_v60 = vld [vmem:[%s7254_s6 + $0x300] sm:$0xff] }
 0x966   : > { %v3294_v14 = vpop.f32.mrf.mxu0  ;;  %v5771_v21 = vcombine.low %v1692_v0, %v1696_v9  ;;  %v1783_v61 = vld [vmem:[%s7254_s6 + $0x320] sm:$0xff] }
 0x967   : > { %v3311_v15 = vadd.f32 %v7747_v13, %v7745_v12  ;;  %v5772_v14 = vcombine.high %v1692_v0, %v1696_v9  ;;  %4088 = vmatpush1.bf16.msra.mxu0 %v5779_v55  ;;  %4048 = vmatprep.subr.bf16.mxu1 %v5770_v11  ;;  %v5857_v63 = vcombine.low %v1779_v60, %v1783_v61  ;;  %v1771_v3 = vld [vmem:[%s7254_s6 + $0x2c0] sm:$0xff]  ;;  %v1772_v55 = vld [vmem:[%s7254_s6 + $0x2c8] sm:$0xff] }
 0x968   : > { %v5858_v1 = vcombine.high %v1779_v60, %v1783_v61  ;;  %v1775_v4 = vld [vmem:[%s7254_s6 + $0x2e0] sm:$0xff]  ;;  %v5859_v0 = vcombine.low %v1780_v62, %v1784_v2  ;;  %v5860_v9 = vcombine.high %v1780_v62, %v1784_v2  ;;  %v1776_v11 = vld [vmem:[%s7254_s6 + $0x2e8] sm:$0xff] }
 0x969   : > { %3312 = vadd.xlane.f32.xlu0 %v3311_v15  ;;  %v1683_v15 = vld [vmem:[%s7254_s6] sm:$0xff]  ;;  %4089 = vmatprep.subr.bf16.mxu0 %v5772_v14  ;;  %v5850_v10 = vcombine.high %v1771_v3, %v1775_v4 }
 0x96a   : > { %v5762_v22 = vcombine.high %v1683_v15, %v1687_v16  ;;  %4049 = vmatpush1.bf16.msra.mxu1 %v5769_v20  ;;  %v5761_v29 = vcombine.low %v1683_v15, %v1687_v16  ;;  %v1763_v14 = vld [vmem:[%s7254_s6 + $0x280] sm:$0xff]  ;;  %v5852_v15 = vcombine.high %v1772_v55, %v1776_v11  ;;  %v5849_v20 = vcombine.low %v1771_v3, %v1775_v4 }
 0x96b   : > { %4090 = vmatpush1.bf16.msra.mxu0 %v5771_v21  ;;  %v1767_v16 = vld [vmem:[%s7254_s6 + $0x2a0] sm:$0xff]  ;;  %v5851_v21 = vcombine.low %v1772_v55, %v1776_v11  ;;  %v1733_v55 = vld [vmem:[%s7254_s6 + $0x190] sm:$0xff] }
 0x96c   : > { %4050 = vmatprep.subr.bf16.mxu1 %v5762_v22  ;;  %4091 = vmatprep.subr.bf16.mxu0 %v5764_v23  ;;  %v5842_v22 = vcombine.high %v1763_v14, %v1767_v16  ;;  %v5844_v23 = vcombine.high %v1764_v17, %v1768_v18  ;;  %v1737_v11 = vld [vmem:[%s7254_s6 + $0x1b0] sm:$0xff] }
 0x96e   : > { %4051 = vmatpush1.bf16.msra.mxu1 %v5761_v29  ;;  %v5841_v29 = vcombine.low %v1763_v14, %v1767_v16  ;;  %v1734_v14 = vld [vmem:[%s7254_s6 + $0x198] sm:$0xff] }
 0x96f   : > { %4092 = vmatpush1.bf16.msra.mxu0 %v5763_v30  ;;  %4052 = vmatprep.subr.bf16.mxu1 %v5882_v31  ;;  %v5843_v30 = vcombine.low %v1764_v17, %v1768_v18  ;;  %v5834_v31 = vcombine.high %v1755_v24, %v1759_v25 }
 0x970   : > { %4093 = vmatprep.subr.bf16.mxu0 %v5884_v32  ;;  %v5836_v32 = vcombine.high %v1756_v26, %v1760_v27 }
 0x972   : > { %4053 = vmatpush2.bf16.msra.mxu1 %v5881_v39  ;;  %v5833_v39 = vcombine.low %v1755_v24, %v1759_v25 }
 0x973   : > { %4094 = vmatpush2.bf16.msra.mxu0 %v5883_v40  ;;  %4054 = vmatprep.subr.bf16.mxu1 %v5874_v41  ;;  %v5835_v40 = vcombine.low %v1756_v26, %v1760_v27  ;;  %v5826_v41 = vcombine.high %v1747_v33, %v1751_v35  ;;  %v1717_v27 = vld [vmem:[%s7254_s6 + $0x110] sm:$0xff] }
 0x974   : > { %4095 = vmatprep.subr.bf16.mxu0 %v5876_v42  ;;  %v5828_v42 = vcombine.high %v1748_v36, %v1752_v37 }
 0x976   : > { %4055 = vmatpush2.bf16.msra.mxu1 %v5873_v43  ;;  %v5825_v43 = vcombine.low %v1747_v33, %v1751_v35 }
 0x977   : > { %4096 = vmatpush2.bf16.msra.mxu0 %v5875_v44  ;;  %4056 = vmatprep.subr.bf16.mxu1 %v5866_v52  ;;  %v5827_v44 = vcombine.low %v1748_v36, %v1752_v37  ;;  %v1709_v37 = vld [vmem:[%s7254_s6 + $0xd0] sm:$0xff] }
 0x978   : > { %4097 = vmatprep.subr.bf16.mxu0 %v5868_v59  ;;  %v1682_v59 = vld [vmem:[%s1049_s2] sm:$0x3] }
 0x979   : > { %v3344_v3 = vrot.slane %v1682_v59, %v7560_v8 }
 0x97a   : > { %4057 = vmatpush2.bf16.msra.mxu1 %v5865_v54 }
 0x97b   : > { %4098 = vmatpush2.bf16.msra.mxu0 %v5867_v5  ;;  %4058 = vmatprep.subr.bf16.mxu1 %v5858_v1  ;;  %v1681_v5 = vld [vmem:[%s1045_s9] sm:$0x3]  ;;  %v3348_v1 = vrot.slane %v1682_v59, %v7557_v7  ;;  %v1698_v59 = vld [vmem:[%s7254_s6 + $0x78] sm:$0xff] }
 0x97c   : > { %4099 = vmatprep.subr.bf16.mxu0 %v5860_v9  ;;  %v3335_v60 = vrot.slane %v1681_v5, %v7557_v7  ;;  %v3331_v61 = vrot.slane %v1681_v5, %v7560_v8  ;;  %v1694_v5 = vld [vmem:[%s7254_s6 + $0x58] sm:$0xff] }
 0x97e   : > { %4059 = vmatpush2.bf16.msra.mxu1 %v5857_v63 }
 0x97f   : > { %4100 = vmatpush2.bf16.msra.mxu0 %v5859_v0  ;;  %4060 = vmatprep.subr.bf16.mxu1 %v5850_v10 }
 0x980   : > { %4101 = vmatprep.subr.bf16.mxu0 %v5852_v15  ;;  %v1738_v15 = vld [vmem:[%s7254_s6 + $0x1b8] sm:$0xff] }
 0x981   : > { %v5816_v18 = vcombine.high %v1734_v14, %v1738_v15  ;;  %v5815_v24 = vcombine.low %v1734_v14, %v1738_v15  ;;  %v1809_v14 = vld [vmem:[%s7254_s6 + $0x3f0] sm:$0xff]  ;;  %v1806_v15 = vld [vmem:[%s7254_s6 + $0x3d8] sm:$0xff] }
 0x982   : > { %4061 = vmatpush2.bf16.msra.mxu1 %v5849_v20  ;;  %v1729_v20 = vld [vmem:[%s7254_s6 + $0x170] sm:$0xff] }
 0x983   : > { %4102 = vmatpush2.bf16.msra.mxu0 %v5851_v21  ;;  %4062 = vmatprep.subr.bf16.mxu1 %v5842_v22  ;;  %v1726_v21 = vld [vmem:[%s7254_s6 + $0x158] sm:$0xff] }
 0x984   : > { %4103 = vmatprep.subr.bf16.mxu0 %v5844_v23  ;;  %v1730_v22 = vld [vmem:[%s7254_s6 + $0x178] sm:$0xff]  ;;  %v5813_v23 = vcombine.low %v1733_v55, %v1737_v11 }
 0x985   : > { %v5808_v26 = vcombine.high %v1726_v21, %v1730_v22  ;;  %v5807_v33 = vcombine.low %v1726_v21, %v1730_v22  ;;  %v1797_v21 = vld [vmem:[%s7254_s6 + $0x390] sm:$0xff] }
 0x986   : > { %4063 = vmatpush2.bf16.msra.mxu1 %v5841_v29  ;;  %v1721_v29 = vld [vmem:[%s7254_s6 + $0x130] sm:$0xff] }
 0x987   : > { %4104 = vmatpush2.bf16.msra.mxu0 %v5843_v30  ;;  %4064 = vmatprep.subr.bf16.mxu1 %v5834_v31  ;;  %v1718_v30 = vld [vmem:[%s7254_s6 + $0x118] sm:$0xff]  ;;  %v5798_v35 = vcombine.high %v1717_v27, %v1721_v29  ;;  %v1801_v22 = vld [vmem:[%s7254_s6 + $0x3b0] sm:$0xff] }
 0x988   : > { %4105 = vmatprep.subr.bf16.mxu0 %v5836_v32  ;;  %v1722_v31 = vld [vmem:[%s7254_s6 + $0x138] sm:$0xff] }
 0x989   : > { %v5800_v36 = vcombine.high %v1718_v30, %v1722_v31 }
 0x98a   : > { %4065 = vmatpush2.bf16.msra.mxu1 %v5833_v39  ;;  %v1713_v39 = vld [vmem:[%s7254_s6 + $0xf0] sm:$0xff] }
 0x98b   : > { %4106 = vmatpush2.bf16.msra.mxu0 %v5835_v40  ;;  %4066 = vmatprep.subr.bf16.mxu1 %v5826_v41  ;;  %v1710_v40 = vld [vmem:[%s7254_s6 + $0xd8] sm:$0xff] }
 0x98c   : > { %4107 = vmatprep.subr.bf16.mxu0 %v5828_v42  ;;  %v1714_v41 = vld [vmem:[%s7254_s6 + $0xf8] sm:$0xff]  ;;  %v5797_v42 = vcombine.low %v1717_v27, %v1721_v29  ;;  %v5878_v27 = vcombine.high %v1797_v21, %v1801_v22 }
 0x98e   : > { %4067 = vmatpush2.bf16.msra.mxu1 %v5825_v43  ;;  %v5799_v43 = vcombine.low %v1718_v30, %v1722_v31  ;;  %v1789_v30 = vld [vmem:[%s7254_s6 + $0x350] sm:$0xff] }
 0x98f   : > { %4108 = vmatpush2.bf16.msra.mxu0 %v5827_v44  ;;  %v5790_v44 = vcombine.high %v1709_v37, %v1713_v39  ;;  %v1793_v31 = vld [vmem:[%s7254_s6 + $0x370] sm:$0xff] }
 0x9f2   : > { %v3313_v45 = vpop.xlane.xlu0 %3312 }
 0x9f3   : > { %v3314_v57 = vmul.f32 0.00390625, %v3313_v45  ;;  %v1741_v45 = vld [vmem:[%s7254_s6 + $0x1d0] sm:$0xff] }
 0x9f5   : > { %v7792_v46 = vsub.f32 %v7745_v12, %v3314_v57  ;;  %v7795_v47 = vsub.f32 %v7747_v13, %v3314_v57  ;;  %v1745_v57 = vld [vmem:[%s7254_s6 + $0x1f0] sm:$0xff] }
 0x9f6   : > { %v5821_v49 = vcombine.low %v1741_v45, %v1745_v57 }
 0x9f7   : > { %v3317_v34 = vmul.f32 %v7792_v46, %v7792_v46  ;;  %v3318_v19 = vmul.f32 %v7795_v47, %v7795_v47 }
 0x9f9   : > { %v3319_v48 = vadd.f32 %v3318_v19, %v3317_v34  ;;  %v1742_v34 = vld [vmem:[%s7254_s6 + $0x1d8] sm:$0xff]  ;;  %v5822_v19 = vcombine.high %v1741_v45, %v1745_v57  ;;  %v5792_v45 = vcombine.high %v1710_v40, %v1714_v41  ;;  %v1701_v57 = vld [vmem:[%s7254_s6 + $0x90] sm:$0xff] }
 0x9fb   : > { %3320 = vadd.xlane.f32.xlu1 %v3319_v48  ;;  %v1746_v48 = vld [vmem:[%s7254_s6 + $0x1f8] sm:$0xff]  ;;  %4118 = vmatprep.subr.bf16.mxu1 %v5822_v19 }
 0x9fc   : > { %v5823_v50 = vcombine.low %v1742_v34, %v1746_v48  ;;  %v5824_v51 = vcombine.high %v1742_v34, %v1746_v48  ;;  %v1705_v34 = vld [vmem:[%s7254_s6 + $0xb0] sm:$0xff]  ;;  %v1702_v19 = vld [vmem:[%s7254_s6 + $0x98] sm:$0xff] }
 0x9fd   : > { %v1706_v48 = vld [vmem:[%s7254_s6 + $0xb8] sm:$0xff] }
 0x9fe   : > { %4159 = vmatprep.subr.bf16.mxu0 %v5824_v51  ;;  %v5782_v51 = vcombine.high %v1701_v57, %v1705_v34 }
 0xa84   : > { %v3321_v52 = vpop.xlane.xlu1 %3320 }
 0xa85   : > { %v3322_v53 = vmul.f32 0.00390625, %v3321_v52  ;;  %v5784_v52 = vcombine.high %v1702_v19, %v1706_v48 }
 0xa87   : > { %v3323_v54 = vadd.f32 1e-05, %v3322_v53  ;;  %v1693_v53 = vld [vmem:[%s7254_s6 + $0x50] sm:$0xff] }
 0xa89   : > { %6708 = vrsqrt.f32 %v3323_v54  ;;  %v1697_v54 = vld [vmem:[%s7254_s6 + $0x70] sm:$0xff] }
 0xa96   : > { %v6709_v62 = vpop.eup %6708 }
 0xa97   : > { %v3326_v63 = vmul.f32 %v6709_v62, %v7795_v47  ;;  %v3325_v2 = vmul.f32 %v6709_v62, %v7792_v46  ;;  %v1725_v47 = vld [vmem:[%s7254_s6 + $0x150] sm:$0xff]  ;;  %v5814_v46 = vcombine.high %v1733_v55, %v1737_v11  ;;  %v5774_v62 = vcombine.high %v1693_v53, %v1697_v54 }
 0xa98   : > { %v5806_v25 = vcombine.high %v1725_v47, %v1729_v20  ;;  %v5805_v32 = vcombine.low %v1725_v47, %v1729_v20  ;;  %v1805_v11 = vld [vmem:[%s7254_s6 + $0x3d0] sm:$0xff] }
 0xa99   : > { %v3339_v4 = vmul.f32 %v3335_v60, %v3326_v63  ;;  %v3338_v0 = vmul.f32 %v3331_v61, %v3325_v2  ;;  %v5781_v60 = vcombine.low %v1701_v57, %v1705_v34  ;;  %v5783_v61 = vcombine.low %v1702_v19, %v1706_v48  ;;  %v1689_v2 = vld [vmem:[%s7254_s6 + $0x30] sm:$0xff] }
 0xa9a   : > { %v5776_v63 = vcombine.high %v1694_v5, %v1698_v59  ;;  %v1773_v19 = vld [vmem:[%s7254_s6 + $0x2d0] sm:$0xff] }
 0xa9b   : > { %v3352_v9 = vadd.f32 %v3348_v1, %v3339_v4  ;;  %v3351_v10 = vadd.f32 %v3344_v3, %v3338_v0  ;;  %v1685_v1 = vld [vmem:[%s7254_s6 + $0x10] sm:$0xff]  ;;  %v1686_v3 = vld [vmem:[%s7254_s6 + $0x18] sm:$0xff]  ;;  %v5773_v0 = vcombine.low %v1693_v53, %v1697_v54 }
 0xa9c   : > { %v1690_v4 = vld [vmem:[%s7254_s6 + $0x38] sm:$0xff]  ;;  %v5765_v47 = vcombine.low %v1685_v1, %v1689_v2  ;;  %v1777_v48 = vld [vmem:[%s7254_s6 + $0x2f0] sm:$0xff] }
 0xa9d   : > { %v3354_v16 = vpack.c.bf16 %v3352_v9, %v3352_v9  ;;  %v7849_v17 = vpack.c.bf16 %v3351_v10, %v3351_v10  ;;  %v5775_v9 = vcombine.low %v1694_v5, %v1698_v59  ;;  %v5766_v10 = vcombine.high %v1685_v1, %v1689_v2  ;;  %v1765_v5 = vld [vmem:[%s7254_s6 + $0x290] sm:$0xff] }
 0xa9e   : > { %v5768_v55 = vcombine.high %v1686_v3, %v1690_v4  ;;  %v5854_v53 = vcombine.high %v1773_v19, %v1777_v48  ;;  %v1769_v59 = vld [vmem:[%s7254_s6 + $0x2b0] sm:$0xff] }
 0xa9f   : > { %4068 = vmatprep.mubr.bf16.mxu1 %v3354_v16  ;;  %4109 = vmatprep.mubr.bf16.mxu0 %v3354_v16  ;;  %v5846_v1 = vcombine.high %v1765_v5, %v1769_v59 }
 0xaa0   : > { %4069 = vmatmul.mubr.bf16.vlgmr.msra.gmra.mxu1 %v7849_v17  ;;  %4110 = vmatmul.mubr.bf16.vlgmr.msra.gmra.mxu0 %v7849_v17 }
 0xaa1   : > { %4119 = vmatpush1.bf16.msra.mxu1 %v5821_v49  ;;  %4160 = vmatpush1.bf16.msra.mxu0 %v5823_v50  ;;  %v5789_v49 = vcombine.low %v1709_v37, %v1713_v39  ;;  %v5791_v50 = vcombine.low %v1710_v40, %v1714_v41  ;;  %v5870_v37 = vcombine.high %v1789_v30, %v1793_v31  ;;  %v1781_v40 = vld [vmem:[%s7254_s6 + $0x310] sm:$0xff] }
 0xaa2   : > { %4150 = vmatprep.mubr.bf16.mxu1 %v3354_v16  ;;  %4191 = vmatprep.mubr.bf16.mxu0 %v3354_v16  ;;  %v1810_v16 = vld [vmem:[%s7254_s6 + $0x3f8] sm:$0xff]  ;;  %v1785_v41 = vld [vmem:[%s7254_s6 + $0x330] sm:$0xff] }
 0xaa3   : > { %4120 = vmatprep.subr.bf16.mxu1 %v5814_v46  ;;  %4161 = vmatprep.subr.bf16.mxu0 %v5816_v18  ;;  %v5767_v46 = vcombine.low %v1686_v3, %v1690_v4  ;;  %v5886_v18 = vcombine.high %v1805_v11, %v1809_v14  ;;  %v5888_v20 = vcombine.high %v1806_v15, %v1810_v16  ;;  %v1757_v3 = vld [vmem:[%s7254_s6 + $0x250] sm:$0xff] }
 0xaa4   : > { %v5862_v57 = vcombine.high %v1781_v40, %v1785_v41  ;;  %v1761_v4 = vld [vmem:[%s7254_s6 + $0x270] sm:$0xff] }
 0xaa5   : > { %4121 = vmatpush1.bf16.msra.mxu1 %v5813_v23  ;;  %4162 = vmatpush1.bf16.msra.mxu0 %v5815_v24  ;;  %v1798_v23 = vld [vmem:[%s7254_s6 + $0x398] sm:$0xff] }
 0xaa6   : > { %4122 = vmatprep.subr.bf16.mxu1 %v5806_v25  ;;  %4163 = vmatprep.subr.bf16.mxu0 %v5808_v26  ;;  %v1802_v24 = vld [vmem:[%s7254_s6 + $0x3b8] sm:$0xff]  ;;  %v5885_v25 = vcombine.low %v1805_v11, %v1809_v14  ;;  %v5887_v26 = vcombine.low %v1806_v15, %v1810_v16  ;;  %v5838_v11 = vcombine.high %v1757_v3, %v1761_v4  ;;  %v1749_v15 = vld [vmem:[%s7254_s6 + $0x210] sm:$0xff] }
 0xaa7   : > { %v5880_v29 = vcombine.high %v1798_v23, %v1802_v24  ;;  %v1753_v16 = vld [vmem:[%s7254_s6 + $0x230] sm:$0xff] }
 0xaa9   : > { %4123 = vmatpush1.bf16.msra.mxu1 %v5805_v32  ;;  %4164 = vmatpush1.bf16.msra.mxu0 %v5807_v33  ;;  %v1790_v32 = vld [vmem:[%s7254_s6 + $0x358] sm:$0xff] }
 0xaaa   : > { %4124 = vmatprep.subr.bf16.mxu1 %v5798_v35  ;;  %4165 = vmatprep.subr.bf16.mxu0 %v5800_v36  ;;  %v1794_v33 = vld [vmem:[%s7254_s6 + $0x378] sm:$0xff]  ;;  %v5877_v35 = vcombine.low %v1797_v21, %v1801_v22  ;;  %v5879_v36 = vcombine.low %v1798_v23, %v1802_v24  ;;  %v5830_v21 = vcombine.high %v1749_v15, %v1753_v16 }
 0xaab   : > { %v5872_v39 = vcombine.high %v1790_v32, %v1794_v33  ;;  %v5829_v23 = vcombine.low %v1749_v15, %v1753_v16  ;;  %v6569_v15 = vld [vmem:[%s7260_s26 + $0x1c4] ss:$8 sps:$4 sm:$0xff]   ;;  %v6564_v16 = vld [vmem:[%s7260_s26 + $0xc0] ss:$8 sps:$4 sm:$0xff]  }
 0xaad   : > { %4125 = vmatpush1.bf16.msra.mxu1 %v5797_v42  ;;  %4166 = vmatpush1.bf16.msra.mxu0 %v5799_v43  ;;  %v1782_v42 = vld [vmem:[%s7254_s6 + $0x318] sm:$0xff] }
 0xaae   : > { %4126 = vmatprep.subr.bf16.mxu1 %v5790_v44  ;;  %4167 = vmatprep.subr.bf16.mxu0 %v5792_v45  ;;  %v1786_v43 = vld [vmem:[%s7254_s6 + $0x338] sm:$0xff]  ;;  %v5869_v44 = vcombine.low %v1789_v30, %v1793_v31  ;;  %v5871_v45 = vcombine.low %v1790_v32, %v1794_v33  ;;  %v6506_v30 = vld [vmem:[%s7260_s26 + $0x64] ss:$8 sps:$4 sm:$0xff]   ;;  %v6504_v32 = vld [vmem:[%s7260_s26 + $0x60] ss:$8 sps:$4 sm:$0xff]  }
 0xaaf   : > { %v5864_v34 = vcombine.high %v1782_v42, %v1786_v43  ;;  %v6509_v31 = vld [vmem:[%s7260_s26 + $0x164] ss:$8 sps:$4 sm:$0xff]   ;;  %v6507_v33 = vld [vmem:[%s7260_s26 + $0x160] ss:$8 sps:$4 sm:$0xff]  }
 0xab1   : > { %4127 = vmatpush1.bf16.msra.mxu1 %v5789_v49  ;;  %4168 = vmatpush1.bf16.msra.mxu0 %v5791_v50  ;;  %v1774_v49 = vld [vmem:[%s7254_s6 + $0x2d8] sm:$0xff] }
 0xab2   : > { %4128 = vmatprep.subr.bf16.mxu1 %v5782_v51  ;;  %4169 = vmatprep.subr.bf16.mxu0 %v5784_v52  ;;  %v1778_v50 = vld [vmem:[%s7254_s6 + $0x2f8] sm:$0xff]  ;;  %v5861_v51 = vcombine.low %v1781_v40, %v1785_v41  ;;  %v5863_v52 = vcombine.low %v1782_v42, %v1786_v43  ;;  %v6521_v40 = vld [vmem:[%s7260_s26 + $0x144] ss:$8 sps:$4 sm:$0xff]   ;;  %v6516_v41 = vld [vmem:[%s7260_s26 + $0x40] ss:$8 sps:$4 sm:$0xff]  }
 0xab3   : > { %v5856_v54 = vcombine.high %v1774_v49, %v1778_v50  ;;  %v6519_v42 = vld [vmem:[%s7260_s26 + $0x140] ss:$8 sps:$4 sm:$0xff]   ;;  %v6524_v43 = vld [vmem:[%s7260_s26 + $0x34] ss:$8 sps:$4 sm:$0xff]  }
 0xab5   : > { %4129 = vmatpush1.bf16.msra.mxu1 %v5781_v60  ;;  %4170 = vmatpush1.bf16.msra.mxu0 %v5783_v61  ;;  %v1766_v60 = vld [vmem:[%s7254_s6 + $0x298] sm:$0xff] }
 0xab6   : > { %4130 = vmatprep.subr.bf16.mxu1 %v5774_v62  ;;  %4171 = vmatprep.subr.bf16.mxu0 %v5776_v63  ;;  %v1770_v61 = vld [vmem:[%s7254_s6 + $0x2b8] sm:$0xff]  ;;  %v5853_v62 = vcombine.low %v1773_v19, %v1777_v48  ;;  %v5855_v63 = vcombine.low %v1774_v49, %v1778_v50  ;;  %v6533_v19 = vld [vmem:[%s7260_s26 + $0x124] ss:$8 sps:$4 sm:$0xff]   ;;  %v6528_v48 = vld [vmem:[%s7260_s26 + $0x20] ss:$8 sps:$4 sm:$0xff]  }
 0xab7   : > { %v5848_v2 = vcombine.high %v1766_v60, %v1770_v61  ;;  %v6531_v49 = vld [vmem:[%s7260_s26 + $0x120] ss:$8 sps:$4 sm:$0xff]   ;;  %v6536_v50 = vld [vmem:[%s7260_s26 + $0x14] ss:$8 sps:$4 sm:$0xff]  }
 0xab9   : > { %4131 = vmatpush1.bf16.msra.mxu1 %v5773_v0  ;;  %4172 = vmatpush1.bf16.msra.mxu0 %v5775_v9  ;;  %v1758_v0 = vld [vmem:[%s7254_s6 + $0x258] sm:$0xff] }
 0xaba   : > { %4132 = vmatprep.subr.bf16.mxu1 %v5766_v10  ;;  %4173 = vmatprep.subr.bf16.mxu0 %v5768_v55  ;;  %v1762_v9 = vld [vmem:[%s7254_s6 + $0x278] sm:$0xff]  ;;  %v5845_v10 = vcombine.low %v1765_v5, %v1769_v59  ;;  %v5847_v55 = vcombine.low %v1766_v60, %v1770_v61  ;;  %v6545_v5 = vld [vmem:[%s7260_s26 + $0x104] ss:$8 sps:$4 sm:$0xff]   ;;  %v6540_v59 = vld [vmem:[%s7260_s26] ss:$8 sps:$4 sm:$0xff]  }
 0xabb   : > { %v5840_v14 = vcombine.high %v1758_v0, %v1762_v9  ;;  %v6543_v60 = vld [vmem:[%s7260_s26 + $0x100] ss:$8 sps:$4 sm:$0xff]   ;;  %v6548_v61 = vld [vmem:[%s7260_s26 + $0xf4] ss:$8 sps:$4 sm:$0xff]  }
 0xabd   : > { %4133 = vmatpush1.bf16.msra.mxu1 %v5765_v47  ;;  %4174 = vmatpush1.bf16.msra.mxu0 %v5767_v46  ;;  %v1750_v47 = vld [vmem:[%s7254_s6 + $0x218] sm:$0xff] }
 0xabe   : > { %4134 = vmatprep.subr.bf16.mxu1 %v5886_v18  ;;  %4175 = vmatprep.subr.bf16.mxu0 %v5888_v20  ;;  %v1754_v46 = vld [vmem:[%s7254_s6 + $0x238] sm:$0xff]  ;;  %v5837_v18 = vcombine.low %v1757_v3, %v1761_v4  ;;  %v5839_v20 = vcombine.low %v1758_v0, %v1762_v9  ;;  %v6557_v3 = vld [vmem:[%s7260_s26 + $0x1e4] ss:$8 sps:$4 sm:$0xff]   ;;  %v6552_v4 = vld [vmem:[%s7260_s26 + $0xe0] ss:$8 sps:$4 sm:$0xff]  }
 0xabf   : > { %v5832_v22 = vcombine.high %v1750_v47, %v1754_v46  ;;  %v5831_v24 = vcombine.low %v1750_v47, %v1754_v46  ;;  %v6555_v0 = vld [vmem:[%s7260_s26 + $0x1e0] ss:$8 sps:$4 sm:$0xff]   ;;  %v6560_v9 = vld [vmem:[%s7260_s26 + $0xd4] ss:$8 sps:$4 sm:$0xff]  }
 0xac0   : > { %v6567_v47 = vld [vmem:[%s7260_s26 + $0x1c0] ss:$8 sps:$4 sm:$0xff]   ;;  %v6572_v46 = vld [vmem:[%s7260_s26 + $0xb4] ss:$8 sps:$4 sm:$0xff]  }
 0xac1   : > { %4135 = vmatpush2.bf16.msra.mxu1 %v5885_v25  ;;  %4176 = vmatpush2.bf16.msra.mxu0 %v5887_v26  ;;  %v6500_v25 = vld [vmem:[%s7260_s26 + $0x74] ss:$8 sps:$4 sm:$0xff]  }
 0xac2   : > { %4136 = vmatprep.subr.bf16.mxu1 %v5878_v27  ;;  %4177 = vmatprep.subr.bf16.mxu0 %v5880_v29  ;;  %v6503_v26 = vld [vmem:[%s7260_s26 + $0x174] ss:$8 sps:$4 sm:$0xff]   ;;  %v6498_v27 = vld [vmem:[%s7260_s26 + $0x70] ss:$8 sps:$4 sm:$0xff]  }
 0xac3   : > { %v6501_v29 = vld [vmem:[%s7260_s26 + $0x170] ss:$8 sps:$4 sm:$0xff]  }
 0xac5   : > { %4137 = vmatpush2.bf16.msra.mxu1 %v5877_v35  ;;  %4178 = vmatpush2.bf16.msra.mxu0 %v5879_v36  ;;  %v6512_v35 = vld [vmem:[%s7260_s26 + $0x54] ss:$8 sps:$4 sm:$0xff]  }
 0xac6   : > { %4138 = vmatprep.subr.bf16.mxu1 %v5870_v37  ;;  %4179 = vmatprep.subr.bf16.mxu0 %v5872_v39  ;;  %v6515_v36 = vld [vmem:[%s7260_s26 + $0x154] ss:$8 sps:$4 sm:$0xff]   ;;  %v6510_v37 = vld [vmem:[%s7260_s26 + $0x50] ss:$8 sps:$4 sm:$0xff]  }
 0xac7   : > { %v6513_v39 = vld [vmem:[%s7260_s26 + $0x150] ss:$8 sps:$4 sm:$0xff]  }
 0xac9   : > { %4139 = vmatpush2.bf16.msra.mxu1 %v5869_v44  ;;  %4180 = vmatpush2.bf16.msra.mxu0 %v5871_v45  ;;  %v6527_v44 = vld [vmem:[%s7260_s26 + $0x134] ss:$8 sps:$4 sm:$0xff]   ;;  %v6522_v45 = vld [vmem:[%s7260_s26 + $0x30] ss:$8 sps:$4 sm:$0xff]  }
 0xaca   : > { %4140 = vmatprep.subr.bf16.mxu1 %v5862_v57  ;;  %4181 = vmatprep.subr.bf16.mxu0 %v5864_v34  ;;  %v6525_v57 = vld [vmem:[%s7260_s26 + $0x130] ss:$8 sps:$4 sm:$0xff]   ;;  %v6530_v34 = vld [vmem:[%s7260_s26 + $0x24] ss:$8 sps:$4 sm:$0xff]  }
 0xacd   : > { %4141 = vmatpush2.bf16.msra.mxu1 %v5861_v51  ;;  %4182 = vmatpush2.bf16.msra.mxu0 %v5863_v52  ;;  %v6539_v51 = vld [vmem:[%s7260_s26 + $0x114] ss:$8 sps:$4 sm:$0xff]   ;;  %v6534_v52 = vld [vmem:[%s7260_s26 + $0x10] ss:$8 sps:$4 sm:$0xff]  }
 0xace   : > { %4142 = vmatprep.subr.bf16.mxu1 %v5854_v53  ;;  %4183 = vmatprep.subr.bf16.mxu0 %v5856_v54  ;;  %v6537_v53 = vld [vmem:[%s7260_s26 + $0x110] ss:$8 sps:$4 sm:$0xff]   ;;  %v6542_v54 = vld [vmem:[%s7260_s26 + $0x4] ss:$8 sps:$4 sm:$0xff]  }
 0xad1   : > { %4143 = vmatpush2.bf16.msra.mxu1 %v5853_v62  ;;  %4184 = vmatpush2.bf16.msra.mxu0 %v5855_v63  ;;  %v6551_v62 = vld [vmem:[%s7260_s26 + $0x1f4] ss:$8 sps:$4 sm:$0xff]   ;;  %v6546_v63 = vld [vmem:[%s7260_s26 + $0xf0] ss:$8 sps:$4 sm:$0xff]  }
 0xad2   : > { %4144 = vmatprep.subr.bf16.mxu1 %v5846_v1  ;;  %4185 = vmatprep.subr.bf16.mxu0 %v5848_v2  ;;  %v6549_v1 = vld [vmem:[%s7260_s26 + $0x1f0] ss:$8 sps:$4 sm:$0xff]   ;;  %v6554_v2 = vld [vmem:[%s7260_s26 + $0xe4] ss:$8 sps:$4 sm:$0xff]  }
 0xad5   : > { %4145 = vmatpush2.bf16.msra.mxu1 %v5845_v10  ;;  %4186 = vmatpush2.bf16.msra.mxu0 %v5847_v55  ;;  %v6563_v10 = vld [vmem:[%s7260_s26 + $0x1d4] ss:$8 sps:$4 sm:$0xff]   ;;  %v6558_v55 = vld [vmem:[%s7260_s26 + $0xd0] ss:$8 sps:$4 sm:$0xff]  }
 0xad6   : > { %4146 = vmatprep.subr.bf16.mxu1 %v5838_v11  ;;  %4187 = vmatprep.subr.bf16.mxu0 %v5840_v14  ;;  %v6561_v11 = vld [vmem:[%s7260_s26 + $0x1d0] ss:$8 sps:$4 sm:$0xff]   ;;  %v6566_v14 = vld [vmem:[%s7260_s26 + $0xc4] ss:$8 sps:$4 sm:$0xff]  }
 0xad9   : > { %4147 = vmatpush2.bf16.msra.mxu1 %v5837_v18  ;;  %4188 = vmatpush2.bf16.msra.mxu0 %v5839_v20  ;;  %v6575_v18 = vld [vmem:[%s7260_s26 + $0x1b4] ss:$8 sps:$4 sm:$0xff]   ;;  %v6570_v20 = vld [vmem:[%s7260_s26 + $0xb0] ss:$8 sps:$4 sm:$0xff]  }
 0xada   : > { %4148 = vmatprep.subr.bf16.mxu1 %v5830_v21  ;;  %4189 = vmatprep.subr.bf16.mxu0 %v5832_v22  ;;  %v6573_v21 = vld [vmem:[%s7260_s26 + $0x1b0] ss:$8 sps:$4 sm:$0xff]   ;;  %v6578_v22 = vld [vmem:[%s7260_s26 + $0xa4] ss:$8 sps:$4 sm:$0xff]  }
 0xadd   : > { %4149 = vmatpush2.bf16.msra.mxu1 %v5829_v23  ;;  %4190 = vmatpush2.bf16.msra.mxu0 %v5831_v24  ;;  %v6581_v23 = vld [vmem:[%s7260_s26 + $0x1a4] ss:$8 sps:$4 sm:$0xff]   ;;  %v6576_v24 = vld [vmem:[%s7260_s26 + $0xa0] ss:$8 sps:$4 sm:$0xff]  }
 0xade   : > { %4896 = vmatprep.subr.bf16.mxu1 %v6500_v25  ;;  %4937 = vmatprep.subr.bf16.mxu0 %v6503_v26  ;;  %v6579_v25 = vld [vmem:[%s7260_s26 + $0x1a0] ss:$8 sps:$4 sm:$0xff]   ;;  %v6584_v26 = vld [vmem:[%s7260_s26 + $0x94] ss:$8 sps:$4 sm:$0xff]  }
 0xae0   : > { %4151 = vmatmul.mubr.bf16.vlgmr.msra.gmra.mxu1 %v7849_v17  ;;  %4192 = vmatmul.mubr.bf16.vlgmr.msra.gmra.mxu0 %v7849_v17  ;;  %v6518_v17 = vld [vmem:[%s7260_s26 + $0x44] ss:$8 sps:$4 sm:$0xff]  }
 0xae1   : > { %4897 = vmatpush1.bf16.msra.mxu1 %v6498_v27  ;;  %4938 = vmatpush1.bf16.msra.mxu0 %v6501_v29  ;;  %v6587_v27 = vld [vmem:[%s7260_s26 + $0x194] ss:$8 sps:$4 sm:$0xff]   ;;  %v6582_v29 = vld [vmem:[%s7260_s26 + $0x90] ss:$8 sps:$4 sm:$0xff]  }
 0xae2   : > { %4898 = vmatprep.subr.bf16.mxu1 %v6506_v30  ;;  %4939 = vmatprep.subr.bf16.mxu0 %v6509_v31  ;;  %v6585_v30 = vld [vmem:[%s7260_s26 + $0x190] ss:$8 sps:$4 sm:$0xff]   ;;  %v6590_v31 = vld [vmem:[%s7260_s26 + $0x84] ss:$8 sps:$4 sm:$0xff]  }
 0xae5   : > { %4899 = vmatpush1.bf16.msra.mxu1 %v6504_v32  ;;  %4940 = vmatpush1.bf16.msra.mxu0 %v6507_v33  ;;  %v6593_v32 = vld [vmem:[%s7260_s26 + $0x184] ss:$8 sps:$4 sm:$0xff]   ;;  %v6588_v33 = vld [vmem:[%s7260_s26 + $0x80] ss:$8 sps:$4 sm:$0xff]  }
 0xae6   : > { %4900 = vmatprep.subr.bf16.mxu1 %v6512_v35  ;;  %4941 = vmatprep.subr.bf16.mxu0 %v6515_v36  ;;  %v6591_v35 = vld [vmem:[%s7260_s26 + $0x180] ss:$8 sps:$4 sm:$0xff]   ;;  %v6596_v36 = vld [vmem:[%s7260_s26 + $0x274] ss:$8 sps:$4 sm:$0xff]  }
 0xae9   : > { %4901 = vmatpush1.bf16.msra.mxu1 %v6510_v37  ;;  %4942 = vmatpush1.bf16.msra.mxu0 %v6513_v39  ;;  %v6599_v37 = vld [vmem:[%s7260_s26 + $0x374] ss:$8 sps:$4 sm:$0xff]  }
 0xaea   : > { %4902 = vmatprep.subr.bf16.mxu1 %v6518_v17  ;;  %4943 = vmatprep.subr.bf16.mxu0 %v6521_v40  ;;  %v7978_v39 = vld [vmem:[%s7317_s1] sm:$0xff] }
 0xaeb   : > { %v3359_v17 = vrot.slane %v7978_v39, %v7560_v8  ;;  %v3367_v40 = vrot.slane %v7978_v39, %v1997_v56 }
 0xaed   : > { %4903 = vmatpush1.bf16.msra.mxu1 %v6516_v41  ;;  %4944 = vmatpush1.bf16.msra.mxu0 %v6519_v42  ;;  %v3363_v41 = vrot.slane %v7978_v39, %v7557_v7  ;;  %v3371_v42 = vrot.slane %v7978_v39, %v2001_v58 }
 0xaee   : > { %4904 = vmatprep.subr.bf16.mxu1 %v6524_v43  ;;  %4945 = vmatprep.subr.bf16.mxu0 %v6527_v44 }
 0xaf1   : > { %4905 = vmatpush1.bf16.msra.mxu1 %v6522_v45  ;;  %4946 = vmatpush1.bf16.msra.mxu0 %v6525_v57 }
 0xaf2   : > { %4906 = vmatprep.subr.bf16.mxu1 %v6530_v34  ;;  %4947 = vmatprep.subr.bf16.mxu0 %v6533_v19 }
 0xaf5   : > { %4907 = vmatpush1.bf16.msra.mxu1 %v6528_v48  ;;  %4948 = vmatpush1.bf16.msra.mxu0 %v6531_v49 }
 0xaf6   : > { %4908 = vmatprep.subr.bf16.mxu1 %v6536_v50  ;;  %4949 = vmatprep.subr.bf16.mxu0 %v6539_v51 }
 0xaf9   : > { %4909 = vmatpush1.bf16.msra.mxu1 %v6534_v52  ;;  %4950 = vmatpush1.bf16.msra.mxu0 %v6537_v53 }
 0xafa   : > { %4910 = vmatprep.subr.bf16.mxu1 %v6542_v54  ;;  %4951 = vmatprep.subr.bf16.mxu0 %v6545_v5 }
 0xafd   : > { %4911 = vmatpush1.bf16.msra.mxu1 %v6540_v59  ;;  %4952 = vmatpush1.bf16.msra.mxu0 %v6543_v60 }
 0xafe   : > { %4912 = vmatprep.subr.bf16.mxu1 %v6548_v61  ;;  %4953 = vmatprep.subr.bf16.mxu0 %v6551_v62 }
 0xb01   : > { %4913 = vmatpush2.bf16.msra.mxu1 %v6546_v63  ;;  %4954 = vmatpush2.bf16.msra.mxu0 %v6549_v1 }
 0xb02   : > { %4914 = vmatprep.subr.bf16.mxu1 %v6554_v2  ;;  %4955 = vmatprep.subr.bf16.mxu0 %v6557_v3 }
 0xb05   : > { %4915 = vmatpush2.bf16.msra.mxu1 %v6552_v4  ;;  %4956 = vmatpush2.bf16.msra.mxu0 %v6555_v0 }
 0xb06   : > { %4916 = vmatprep.subr.bf16.mxu1 %v6560_v9  ;;  %4957 = vmatprep.subr.bf16.mxu0 %v6563_v10 }
 0xb09   : > { %4917 = vmatpush2.bf16.msra.mxu1 %v6558_v55  ;;  %4958 = vmatpush2.bf16.msra.mxu0 %v6561_v11 }
 0xb0a   : > { %4918 = vmatprep.subr.bf16.mxu1 %v6566_v14  ;;  %4959 = vmatprep.subr.bf16.mxu0 %v6569_v15 }
 0xb0d   : > { %4919 = vmatpush2.bf16.msra.mxu1 %v6564_v16  ;;  %4960 = vmatpush2.bf16.msra.mxu0 %v6567_v47 }
 0xb0e   : > { %4920 = vmatprep.subr.bf16.mxu1 %v6572_v46  ;;  %4961 = vmatprep.subr.bf16.mxu0 %v6575_v18 }
 0xb11   : > { %4921 = vmatpush2.bf16.msra.mxu1 %v6570_v20  ;;  %4962 = vmatpush2.bf16.msra.mxu0 %v6573_v21  ;;  %v6594_v21 = vld [vmem:[%s7260_s26 + $0x270] ss:$8 sps:$4 sm:$0xff]  }
 0xb12   : > { %4922 = vmatprep.subr.bf16.mxu1 %v6578_v22  ;;  %4963 = vmatprep.subr.bf16.mxu0 %v6581_v23 }
 0xb15   : > { %4923 = vmatpush2.bf16.msra.mxu1 %v6576_v24  ;;  %4964 = vmatpush2.bf16.msra.mxu0 %v6579_v25  ;;  %v6597_v24 = vld [vmem:[%s7260_s26 + $0x370] ss:$8 sps:$4 sm:$0xff]   ;;  %v6602_v25 = vld [vmem:[%s7260_s26 + $0x264] ss:$8 sps:$4 sm:$0xff]  }
 0xb16   : > { %4924 = vmatprep.subr.bf16.mxu1 %v6584_v26  ;;  %4965 = vmatprep.subr.bf16.mxu0 %v6587_v27  ;;  %v6605_v27 = vld [vmem:[%s7260_s26 + $0x364] ss:$8 sps:$4 sm:$0xff]  }
 0xb19   : > { %4925 = vmatpush2.bf16.msra.mxu1 %v6582_v29  ;;  %4966 = vmatpush2.bf16.msra.mxu0 %v6585_v30  ;;  %v6600_v29 = vld [vmem:[%s7260_s26 + $0x260] ss:$8 sps:$4 sm:$0xff]  }
 0xb1a   : > { %4926 = vmatprep.subr.bf16.mxu1 %v6590_v31  ;;  %4967 = vmatprep.subr.bf16.mxu0 %v6593_v32  ;;  %v6603_v30 = vld [vmem:[%s7260_s26 + $0x360] ss:$8 sps:$4 sm:$0xff]   ;;  %v6608_v31 = vld [vmem:[%s7260_s26 + $0x254] ss:$8 sps:$4 sm:$0xff]  }
 0xb1b   : > { %v6611_v32 = vld [vmem:[%s7260_s26 + $0x354] ss:$8 sps:$4 sm:$0xff]  }
 0xb1d   : > { %4927 = vmatpush2.bf16.msra.mxu1 %v6588_v33  ;;  %4968 = vmatpush2.bf16.msra.mxu0 %v6591_v35  ;;  %v6606_v33 = vld [vmem:[%s7260_s26 + $0x250] ss:$8 sps:$4 sm:$0xff]  }
 0xb1e   : > { %4978 = vmatprep.subr.bf16.mxu1 %v6596_v36  ;;  %5019 = vmatprep.subr.bf16.mxu0 %v6599_v37  ;;  %v6609_v35 = vld [vmem:[%s7260_s26 + $0x350] ss:$8 sps:$4 sm:$0xff]   ;;  %v6614_v36 = vld [vmem:[%s7260_s26 + $0x244] ss:$8 sps:$4 sm:$0xff]  }
 0xb1f   : > { %v6617_v37 = vld [vmem:[%s7260_s26 + $0x344] ss:$8 sps:$4 sm:$0xff]  }
 0xb60   : > { %v4070_v43 = vpop.f32.mrf.mxu1  ;;  %v4111_v44 = vpop.f32.mrf.mxu0 }
 0xb61   : > { %v4071_v45 = vadd.f32 %v4070_v43, %v3359_v17  ;;  %v4112_v57 = vadd.f32 %v4111_v44, %v3367_v40  ;;  %v6612_v17 = vld [vmem:[%s7260_s26 + $0x240] ss:$8 sps:$4 sm:$0xff]   ;;  %v6618_v43 = vld [vmem:[%s7260_s26 + $0x230] ss:$8 sps:$4 sm:$0xff]   ;;  %v3382_v44 = vsub.s32 6, %v7554_v6 }
 0xb62   : > { %v4072_v34 = vpop.f32.mrf.mxu1  ;;  %v4113_v19 = vpop.f32.mrf.mxu0  ;;  %v6615_v40 = vld [vmem:[%s7260_s26 + $0x340] ss:$8 sps:$4 sm:$0xff]  }
 0xb63   : > { %v4200_v48 = vmul.f32 -1.702, %v4071_v45  ;;  %v4202_v49 = vmul.f32 -1.702, %v4112_v57  ;;  %v4073_v50 = vadd.f32 %v4072_v34, %v3363_v41  ;;  %v4114_v51 = vadd.f32 %v4113_v19, %v3371_v42  ;;  %v6620_v41 = vld [vmem:[%s7260_s26 + $0x234] ss:$8 sps:$4 sm:$0xff]  }
 0xb64   : > { %v4074_v52 = vpop.f32.mrf.mxu1  ;;  %v4115_v53 = vpop.f32.mrf.mxu0  ;;  %v6623_v42 = vld [vmem:[%s7260_s26 + $0x334] ss:$8 sps:$4 sm:$0xff]   ;;  %v6629_v34 = vld [vmem:[%s7260_s26 + $0x324] ss:$8 sps:$4 sm:$0xff]   ;;  %v3386_v19 = vsub.s32 7, %v7554_v6 }
 0xb65   : > { %v4208_v56 = vmul.f32 1.442695, %v4200_v48  ;;  %v4212_v54 = vmul.f32 1.442695, %v4202_v49  ;;  %v4201_v5 = vmul.f32 -1.702, %v4073_v50  ;;  %v3375_v48 = vrot.slane %v7978_v39, %v2005_v28 }
 0xb66   : > { %v4203_v59 = vmul.f32 -1.702, %v4114_v51  ;;  %v4075_v60 = vpop.f32.mrf.mxu1  ;;  %v4116_v61 = vpop.f32.mrf.mxu0  ;;  %v3383_v49 = vrot.slane %v7978_v39, %v3382_v44  ;;  %v6632_v52 = vld [vmem:[%s7260_s26 + $0x214] ss:$8 sps:$4 sm:$0xff]   ;;  %v3379_v53 = vrot.slane %v7978_v39, %v2009_v38  ;;  %v6633_v6 = vld [vmem:[%s7260_s26 + $0x310] ss:$8 sps:$4 sm:$0xff]  }
 0xb67   : > { %6710 = vpow2.f32 %v4208_v56  ;;  %v4210_v58 = vmul.f32 1.442695, %v4201_v5  ;;  %v3387_v56 = vrot.slane %v7978_v39, %v3386_v19  ;;  %v6630_v61 = vld [vmem:[%s7260_s26 + $0x210] ss:$8 sps:$4 sm:$0xff]   ;;  %v6668_v44 = vld [vmem:[%s7260_s26 + $0x2b4] ss:$8 sps:$4 sm:$0xff]  }
 0xb68   : > { %6712 = vpow2.f32 %v4212_v54  ;;  %v4214_v62 = vmul.f32 1.442695, %v4203_v59  ;;  %v6635_v54 = vld [vmem:[%s7260_s26 + $0x314] ss:$8 sps:$4 sm:$0xff]  }
 0xb69   : > { %6714 = vpow2.f32 %v4210_v58 }
 0xb6a   : > { %6716 = vpow2.f32 %v4214_v62 }
 0xb74   : > { %v6711_v63 = vpop.eup %6710 }
 0xb75   : > { %v6713_v1 = vpop.eup %6712  ;;  %v4224_v2 = vadd.f32 1.0, %v6711_v63  ;;  %v6638_v63 = vld [vmem:[%s7260_s26 + $0x204] ss:$8 sps:$4 sm:$0xff]  }
 0xb76   : > { %v6715_v3 = vpop.eup %6714  ;;  %v4226_v4 = vadd.f32 1.0, %v6713_v1 }
 0xb77   : > { %v6717_v0 = vpop.eup %6716  ;;  %6718 = vrcp.f32 %v4224_v2  ;;  %v4225_v9 = vadd.f32 1.0, %v6715_v3  ;;  %v6641_v3 = vld [vmem:[%s7260_s26 + $0x304] ss:$8 sps:$4 sm:$0xff]  }
 0xb78   : > { %6720 = vrcp.f32 %v4226_v4  ;;  %v4227_v10 = vadd.f32 1.0, %v6717_v0 }
 0xb79   : > { %6722 = vrcp.f32 %v4225_v9  ;;  %v6636_v9 = vld [vmem:[%s7260_s26 + $0x200] ss:$8 sps:$4 sm:$0xff]  }
 0xb7a   : > { %6724 = vrcp.f32 %v4227_v10 }
 0xb84   : > { %v6719_v55 = vpop.eup %6718 }
 0xb85   : > { %v6721_v11 = vpop.eup %6720  ;;  %v4240_v15 = vmul.f32 %v6719_v55, %v4071_v45  ;;  %v6621_v45 = vld [vmem:[%s7260_s26 + $0x330] ss:$8 sps:$4 sm:$0xff]  }
 0xb86   : > { %v6723_v14 = vpop.eup %6722  ;;  %v4242_v47 = vmul.f32 %v6721_v11, %v4112_v57  ;;  %v6626_v57 = vld [vmem:[%s7260_s26 + $0x224] ss:$8 sps:$4 sm:$0xff]  }
 0xb87   : > { %v6725_v16 = vpop.eup %6724  ;;  %v4241_v46 = vmul.f32 %v6723_v14, %v4073_v50  ;;  %v4248_v22 = vpack.c.bf16 %v4240_v15, %v4240_v15  ;;  %v6624_v50 = vld [vmem:[%s7260_s26 + $0x220] ss:$8 sps:$4 sm:$0xff]  }
 0xb88   : > { %v4243_v18 = vmul.f32 %v6725_v16, %v4114_v51  ;;  %v4250_v26 = vpack.c.bf16 %v4242_v47, %v4242_v47  ;;  %v6627_v51 = vld [vmem:[%s7260_s26 + $0x320] ss:$8 sps:$4 sm:$0xff]  }
 0xb89   : > { %v4249_v20 = vpack.c.bf16 %v4241_v46, %v4241_v46  ;;  %v6639_v47 = vld [vmem:[%s7260_s26 + $0x300] ss:$8 sps:$4 sm:$0xff]   ;;  %v6644_v46 = vld [vmem:[%s7260_s26 + $0x2f4] ss:$8 sps:$4 sm:$0xff]  }
 0xb8a   : > { %v4251_v23 = vpack.c.bf16 %v4243_v18, %v4243_v18 }
 0xb8b   : > { %4928 = vmatprep.mubr.bf16.mxu1 %v4249_v20  ;;  %v6647_v20 = vld [vmem:[%s7260_s26 + $0x3f4] ss:$8 sps:$4 sm:$0xff]  }
 0xb8c   : > { %4969 = vmatprep.mubr.bf16.mxu0 %v4251_v23  ;;  %4929 = vmatmul.mubr.bf16.vlgmr.msra.gmra.mxu1 %v4248_v22  ;;  %v6642_v22 = vld [vmem:[%s7260_s26 + $0x2f0] ss:$8 sps:$4 sm:$0xff]  }
 0xb8d   : > { %4970 = vmatmul.mubr.bf16.vlgmr.msra.gmra.mxu0 %v4250_v26  ;;  %4979 = vmatpush1.bf16.msra.mxu1 %v6594_v21  ;;  %v6645_v23 = vld [vmem:[%s7260_s26 + $0x3f0] ss:$8 sps:$4 sm:$0xff]   ;;  %v6648_v26 = vld [vmem:[%s7260_s26 + $0x2e0] ss:$8 sps:$4 sm:$0xff]  }
 0xb8e   : > { %5020 = vmatpush1.bf16.msra.mxu0 %v6597_v24  ;;  %4980 = vmatprep.subr.bf16.mxu1 %v6602_v25  ;;  %v6650_v24 = vld [vmem:[%s7260_s26 + $0x2e4] ss:$8 sps:$4 sm:$0xff]  }
 0xb8f   : > { %5021 = vmatprep.subr.bf16.mxu0 %v6605_v27  ;;  %v6653_v25 = vld [vmem:[%s7260_s26 + $0x3e4] ss:$8 sps:$4 sm:$0xff]   ;;  %v6651_v27 = vld [vmem:[%s7260_s26 + $0x3e0] ss:$8 sps:$4 sm:$0xff]  }
 0xb91   : > { %4981 = vmatpush1.bf16.msra.mxu1 %v6600_v29  ;;  %v6656_v29 = vld [vmem:[%s7260_s26 + $0x2d4] ss:$8 sps:$4 sm:$0xff]  }
 0xb92   : > { %5022 = vmatpush1.bf16.msra.mxu0 %v6603_v30  ;;  %4982 = vmatprep.subr.bf16.mxu1 %v6608_v31  ;;  %v6659_v30 = vld [vmem:[%s7260_s26 + $0x3d4] ss:$8 sps:$4 sm:$0xff]   ;;  %v6654_v31 = vld [vmem:[%s7260_s26 + $0x2d0] ss:$8 sps:$4 sm:$0xff]  }
 0xb93   : > { %5023 = vmatprep.subr.bf16.mxu0 %v6611_v32  ;;  %v6657_v32 = vld [vmem:[%s7260_s26 + $0x3d0] ss:$8 sps:$4 sm:$0xff]  }
 0xb95   : > { %4983 = vmatpush1.bf16.msra.mxu1 %v6606_v33  ;;  %v6662_v33 = vld [vmem:[%s7260_s26 + $0x2c4] ss:$8 sps:$4 sm:$0xff]  }
 0xb96   : > { %5024 = vmatpush1.bf16.msra.mxu0 %v6609_v35  ;;  %4984 = vmatprep.subr.bf16.mxu1 %v6614_v36  ;;  %v6665_v35 = vld [vmem:[%s7260_s26 + $0x3c4] ss:$8 sps:$4 sm:$0xff]  }
 0xb97   : > { %5025 = vmatprep.subr.bf16.mxu0 %v6617_v37 }
 0xb99   : > { %4985 = vmatpush1.bf16.msra.mxu1 %v6612_v17 }
 0xb9a   : > { %5026 = vmatpush1.bf16.msra.mxu0 %v6615_v40  ;;  %4986 = vmatprep.subr.bf16.mxu1 %v6620_v41  ;;  %v6660_v40 = vld [vmem:[%s7260_s26 + $0x2c0] ss:$8 sps:$4 sm:$0xff]  }
 0xb9b   : > { %5027 = vmatprep.subr.bf16.mxu0 %v6623_v42 }
 0xb9d   : > { %4987 = vmatpush1.bf16.msra.mxu1 %v6618_v43  ;;  %v6663_v43 = vld [vmem:[%s7260_s26 + $0x3c0] ss:$8 sps:$4 sm:$0xff]  }
 0xb9e   : > { %5028 = vmatpush1.bf16.msra.mxu0 %v6621_v45  ;;  %4988 = vmatprep.subr.bf16.mxu1 %v6626_v57 }
 0xb9f   : > { %5029 = vmatprep.subr.bf16.mxu0 %v6629_v34  ;;  %v6671_v34 = vld [vmem:[%s7260_s26 + $0x3b4] ss:$8 sps:$4 sm:$0xff]  }
 0xba0   : > { %v4152_v5 = vpop.f32.mrf.mxu1  ;;  %v4193_v28 = vpop.f32.mrf.mxu0 }
 0xba1   : > { %v8024_v59 = vadd.f32 %v4152_v5, %v3375_v48  ;;  %v8026_v60 = vadd.f32 %v4193_v28, %v3383_v49  ;;  %4989 = vmatpush1.bf16.msra.mxu1 %v6624_v50  ;;  %v6666_v48 = vld [vmem:[%s7260_s26 + $0x2b0] ss:$8 sps:$4 sm:$0xff]   ;;  %v6674_v50 = vld [vmem:[%s7260_s26 + $0x2a4] ss:$8 sps:$4 sm:$0xff]  }
 0xba2   : > { %5030 = vmatpush1.bf16.msra.mxu0 %v6627_v51  ;;  %v4154_v58 = vpop.f32.mrf.mxu1  ;;  %v4195_v62 = vpop.f32.mrf.mxu0  ;;  %4990 = vmatprep.subr.bf16.mxu1 %v6632_v52  ;;  %v6669_v49 = vld [vmem:[%s7260_s26 + $0x3b0] ss:$8 sps:$4 sm:$0xff]   ;;  %v6677_v51 = vld [vmem:[%s7260_s26 + $0x3a4] ss:$8 sps:$4 sm:$0xff]   ;;  %v6672_v52 = vld [vmem:[%s7260_s26 + $0x2a0] ss:$8 sps:$4 sm:$0xff]  }
 0xba3   : > { %v4204_v38 = vmul.f32 -1.702, %v8024_v59  ;;  %v4206_v39 = vmul.f32 -1.702, %v8026_v60  ;;  %v8033_v1 = vadd.f32 %v4154_v58, %v3379_v53  ;;  %v8035_v2 = vadd.f32 %v4195_v62, %v3387_v56  ;;  %5031 = vmatprep.subr.bf16.mxu0 %v6635_v54  ;;  %v6675_v53 = vld [vmem:[%s7260_s26 + $0x3a0] ss:$8 sps:$4 sm:$0xff]  }
 0xba4   : > { %v4156_v4 = vpop.f32.mrf.mxu1  ;;  %v4197_v0 = vpop.f32.mrf.mxu0  ;;  %v6680_v56 = vld [vmem:[%s7260_s26 + $0x294] ss:$8 sps:$4 sm:$0xff]   ;;  %v6678_v5 = vld [vmem:[%s7260_s26 + $0x290] ss:$8 sps:$4 sm:$0xff]   ;;  %v6689_v58 = vld [vmem:[%s7260_s26 + $0x384] ss:$8 sps:$4 sm:$0xff]  }
 0xba5   : > { %v4216_v10 = vmul.f32 1.442695, %v4204_v38  ;;  %v4220_v55 = vmul.f32 1.442695, %v4206_v39  ;;  %v4205_v11 = vmul.f32 -1.702, %v8033_v1  ;;  %4991 = vmatpush1.bf16.msra.mxu1 %v6630_v61 }
 0xba6   : > { %v4207_v14 = vmul.f32 -1.702, %v8035_v2  ;;  %5032 = vmatpush1.bf16.msra.mxu0 %v6633_v6  ;;  %v4157_v15 = vpop.f32.mrf.mxu1  ;;  %v4198_v16 = vpop.f32.mrf.mxu0  ;;  %4992 = vmatprep.subr.bf16.mxu1 %v6638_v63  ;;  %v6683_v54 = vld [vmem:[%s7260_s26 + $0x394] ss:$8 sps:$4 sm:$0xff]   ;;  %v6681_v28 = vld [vmem:[%s7260_s26 + $0x390] ss:$8 sps:$4 sm:$0xff]  }
 0xba7   : > { %6726 = vpow2.f32 %v4216_v10  ;;  %v4218_v18 = vmul.f32 1.442695, %v4205_v11  ;;  %5033 = vmatprep.subr.bf16.mxu0 %v6641_v3  ;;  %v6686_v61 = vld [vmem:[%s7260_s26 + $0x284] ss:$8 sps:$4 sm:$0xff]   ;;  %v6684_v63 = vld [vmem:[%s7260_s26 + $0x280] ss:$8 sps:$4 sm:$0xff]  }
 0xba8   : > { %6728 = vpow2.f32 %v4220_v55  ;;  %v4222_v21 = vmul.f32 1.442695, %v4207_v14  ;;  %v6687_v3 = vld [vmem:[%s7260_s26 + $0x380] ss:$8 sps:$4 sm:$0xff]  }
 0xba9   : > { %6730 = vpow2.f32 %v4218_v18  ;;  %4993 = vmatpush1.bf16.msra.mxu1 %v6636_v9 }
 0xbaa   : > { %6732 = vpow2.f32 %v4222_v21  ;;  %5034 = vmatpush1.bf16.msra.mxu0 %v6639_v47  ;;  %4994 = vmatprep.subr.bf16.mxu1 %v6644_v46 }
 0xbab   : > { %5035 = vmatprep.subr.bf16.mxu0 %v6647_v20 }
 0xbad   : > { %4995 = vmatpush2.bf16.msra.mxu1 %v6642_v22  ;;  %v1940_v22 = vld [vmem:[%s1057_s11] sm:$0x3] }
 0xbae   : > { %5036 = vmatpush2.bf16.msra.mxu0 %v6645_v23  ;;  %4996 = vmatprep.subr.bf16.mxu1 %v6650_v24 }
 0xbaf   : > { %5037 = vmatprep.subr.bf16.mxu0 %v6653_v25 }
 0xbb1   : > { %4997 = vmatpush2.bf16.msra.mxu1 %v6648_v26 }
 0xbb2   : > { %5038 = vmatpush2.bf16.msra.mxu0 %v6651_v27  ;;  %4998 = vmatprep.subr.bf16.mxu1 %v6656_v29  ;;  %v5066_v29 = vrot.slane %v1940_v22, %v7560_v8 }
 0xbb3   : > { %5039 = vmatprep.subr.bf16.mxu0 %v6659_v30 }
 0xbb4   : > { %v6727_v36 = vpop.eup %6726 }
 0xbb5   : > { %v6729_v37 = vpop.eup %6728  ;;  %v4228_v17 = vadd.f32 1.0, %v6727_v36  ;;  %4999 = vmatpush2.bf16.msra.mxu1 %v6654_v31  ;;  %v5070_v36 = vrot.slane %v1940_v22, %v7557_v7 }
 0xbb6   : > { %v6731_v41 = vpop.eup %6730  ;;  %v4230_v42 = vadd.f32 1.0, %v6729_v37  ;;  %5040 = vmatpush2.bf16.msra.mxu0 %v6657_v32  ;;  %5000 = vmatprep.subr.bf16.mxu1 %v6662_v33 }
 0xbb7   : > { %v6733_v45 = vpop.eup %6732  ;;  %6734 = vrcp.f32 %v4228_v17  ;;  %v4229_v57 = vadd.f32 1.0, %v6731_v41  ;;  %5041 = vmatprep.subr.bf16.mxu0 %v6665_v35 }
 0xbb8   : > { %6736 = vrcp.f32 %v4230_v42  ;;  %v4231_v19 = vadd.f32 1.0, %v6733_v45 }
 0xbb9   : > { %6738 = vrcp.f32 %v4229_v57  ;;  %5001 = vmatpush2.bf16.msra.mxu1 %v6660_v40 }
 0xbba   : > { %6740 = vrcp.f32 %v4231_v19  ;;  %5042 = vmatpush2.bf16.msra.mxu0 %v6663_v43  ;;  %5002 = vmatprep.subr.bf16.mxu1 %v6668_v44 }
 0xbbb   : > { %5043 = vmatprep.subr.bf16.mxu0 %v6671_v34 }
 0xbbd   : > { %5003 = vmatpush2.bf16.msra.mxu1 %v6666_v48 }
 0xbbe   : > { %5044 = vmatpush2.bf16.msra.mxu0 %v6669_v49  ;;  %5004 = vmatprep.subr.bf16.mxu1 %v6674_v50 }
 0xbbf   : > { %5045 = vmatprep.subr.bf16.mxu0 %v6677_v51 }
 0xbc1   : > { %5005 = vmatpush2.bf16.msra.mxu1 %v6672_v52 }
 0xbc2   : > { %5046 = vmatpush2.bf16.msra.mxu0 %v6675_v53  ;;  %5006 = vmatprep.subr.bf16.mxu1 %v6680_v56 }
 0xbc3   : > { %5047 = vmatprep.subr.bf16.mxu0 %v6683_v54 }
 0xbc4   : > { %v6735_v62 = vpop.eup %6734 }
 0xbc5   : > { %v6737_v6 = vpop.eup %6736  ;;  %5007 = vmatpush2.bf16.msra.mxu1 %v6678_v5  ;;  %v4244_v39 = vmul.f32 %v6735_v62, %v8024_v59 }
 0xbc6   : > { %v6739_v38 = vpop.eup %6738  ;;  %5048 = vmatpush2.bf16.msra.mxu0 %v6681_v28  ;;  %5008 = vmatprep.subr.bf16.mxu1 %v6686_v61  ;;  %v4246_v0 = vmul.f32 %v6737_v6, %v8026_v60 }
 0xbc7   : > { %v6741_v4 = vpop.eup %6740  ;;  %v4245_v9 = vmul.f32 %v6739_v38, %v8033_v1  ;;  %5049 = vmatprep.subr.bf16.mxu0 %v6689_v58  ;;  %v4252_v11 = vpack.c.bf16 %v4244_v39, %v4244_v39 }
 0xbc8   : > { %v4247_v10 = vmul.f32 %v6741_v4, %v8035_v2  ;;  %v4254_v15 = vpack.c.bf16 %v4246_v0, %v4246_v0 }
 0xbc9   : > { %v4253_v55 = vpack.c.bf16 %v4245_v9, %v4245_v9  ;;  %5009 = vmatpush2.bf16.msra.mxu1 %v6684_v63 }
 0xbca   : > { %v4255_v14 = vpack.c.bf16 %v4247_v10, %v4247_v10  ;;  %5050 = vmatpush2.bf16.msra.mxu0 %v6687_v3 }
 0xbcb   : > { %5010 = vmatprep.mubr.bf16.mxu1 %v4253_v55 }
 0xbcc   : > { %5051 = vmatprep.mubr.bf16.mxu0 %v4255_v14  ;;  %5011 = vmatmul.mubr.bf16.vlgmr.msra.gmra.mxu1 %v4252_v11 }
 0xbcd   : > { %5052 = vmatmul.mubr.bf16.vlgmr.msra.gmra.mxu0 %v4254_v15 }
 0xc4c   : > { %v4930_v59 = vpop.f32.mrf.mxu1 }
 0xc4d   : > { %v4971_v16 = vpop.f32.mrf.mxu0 }
 0xc4e   : > { %v4932_v47 = vpop.f32.mrf.mxu1  ;;  %v4972_v2 = vadd.f32 %v4971_v16, %v4930_v59 }
 0xc4f   : > { %v4973_v60 = vpop.f32.mrf.mxu0 }
 0xc50   : > { %v4934_v46 = vpop.f32.mrf.mxu1  ;;  %v4974_v23 = vadd.f32 %v4973_v60, %v4932_v47 }
 0xc51   : > { %v4975_v1 = vpop.f32.mrf.mxu0 }
 0xc52   : > { %v4935_v18 = vpop.f32.mrf.mxu1 }
 0xc53   : > { %v4976_v20 = vpop.f32.mrf.mxu0 }
 0xc8c   : > { %v5012_v21 = vpop.f32.mrf.mxu1 }
 0xc8d   : > { %v5013_v24 = vadd.f32 %v5012_v21, %v4972_v2  ;;  %v5053_v25 = vpop.f32.mrf.mxu0 }
 0xc8e   : > { %v5014_v26 = vpop.f32.mrf.mxu1 }
 0xc8f   : > { %v5054_v27 = vadd.f32 %v5053_v25, %v5013_v24  ;;  %v5015_v30 = vadd.f32 %v5014_v26, %v4974_v23  ;;  %v5055_v31 = vpop.f32.mrf.mxu0 }
 0xc90   : > { %v5016_v32 = vpop.f32.mrf.mxu1 }
 0xc91   : > { %v5060_v33 = vadd.f32 %v5054_v27, %v7745_v12  ;;  %v5056_v35 = vadd.f32 %v5055_v31, %v5015_v30  ;;  %v5057_v37 = vpop.f32.mrf.mxu0 }
 0xc92   : > { %v5017_v17 = vpop.f32.mrf.mxu1 }
 0xc93   : > { %v5073_v40 = vadd.f32 %v5066_v29, %v5060_v33  ;;  %v5061_v41 = vadd.f32 %v5056_v35, %v7747_v13  ;;  %v5058_v42 = vpop.f32.mrf.mxu0  ;;  %5080 = sbr.rel (%p6017_p4) target bundleno = 3895 (0xf37), region = 148 }
 0xc95   : > { %5075 = vst [vmem:[#allocation2] sm:$0xff] %v5073_v40  ;;  %v5074_v43 = vadd.f32 %v5070_v36, %v5061_v41 }
 0xc97   : > { %5076 = vst [vmem:[#allocation2 + $0x8] sm:$0xff] %v5074_v43 }
 0xc98   : > { %vm5083_vm9 = vcmask 1040384   ;;  %v6744_v57 = vld [vmem:[#allocation8 + $0x78] sm:$0xff]   ;;  %v6746_v19 = vld [vmem:[#allocation8 + $0x70] sm:$0xff]   ;;  %v6748_v28 = vld [vmem:[#allocation8 + $0x68] sm:$0xff]  }
 0xc99   : > { %v5084_v44 = vsel %vm5083_vm9, %v5073_v40, 0.0  ;;  %v5085_v12 = vsel %vm5083_vm9, %v5074_v43, 0.0  ;;  %v6745_v34 = vld [vmem:[#allocation8 + $0x38] sm:$0xff]   ;;  %6057 = vmatprep.subr.bf16.mxu0 %v6744_v57  ;;  %v6747_v5 = vld [vmem:[#allocation8 + $0x30] sm:$0xff]   ;;  %v6749_v61 = vld [vmem:[#allocation8 + $0x28] sm:$0xff]  }
 0xc9a   : > { %v5086_v45 = vadd.f32 %v5085_v12, %v5084_v44  ;;  %6058 = vmatpush3.bf16.msra.mxu0 %v6745_v34  ;;  %v6750_v58 = vld [vmem:[#allocation8 + $0x60] sm:$0xff]   ;;  %v6752_v6 = vld [vmem:[#allocation8 + $0x58] sm:$0xff]   ;;  %v6754_v38 = vld [vmem:[#allocation8 + $0x50] sm:$0xff]  }
 0xc9b   : > { %6059 = vmatprep.subr.bf16.mxu0 %v6746_v19  ;;  %v6751_v62 = vld [vmem:[#allocation8 + $0x20] sm:$0xff]   ;;  %v6753_v63 = vld [vmem:[#allocation8 + $0x18] sm:$0xff]   ;;  %v6755_v39 = vld [vmem:[#allocation8 + $0x10] sm:$0xff]  }
 0xc9c   : > { %5087 = vadd.xlane.f32.xlu0 %v5086_v45  ;;  %v6756_v3 = vld [vmem:[#allocation8 + $0x48] sm:$0xff]   ;;  %v6758_v0 = vld [vmem:[#allocation8 + $0x40] sm:$0xff]   ;;  %v5081_v14 = vld [vmem:[%s8243_s10] sm:$0x3] }
 0xc9d   : > { %v6757_v4 = vld [vmem:[#allocation8 + $0x8] sm:$0xff]   ;;  %v6759_v9 = vld [vmem:[#allocation8] sm:$0xff]   ;;  %v5082_v15 = vld [vmem:[%s8244_s20] sm:$0x3]  ;;  %v5108_v59 = vrot.slane %v5081_v14, %v7560_v8  ;;  %v5112_v16 = vrot.slane %v5081_v14, %v7557_v7 }
 0xc9e   : > { %6060 = vmatpush3.bf16.msra.mxu0 %v6747_v5  ;;  %v5121_v46 = vrot.slane %v5082_v15, %v7560_v8  ;;  %v5125_v1 = vrot.slane %v5082_v15, %v7557_v7 }
 0xc9f   : > { %6061 = vmatprep.subr.bf16.mxu0 %v6748_v28 }
 0xca2   : > { %6062 = vmatpush3.bf16.msra.mxu0 %v6749_v61 }
 0xca3   : > { %6063 = vmatprep.subr.bf16.mxu0 %v6750_v58 }
 0xca6   : > { %6064 = vmatpush3.bf16.msra.mxu0 %v6751_v62 }
 0xca7   : > { %6065 = vmatprep.subr.bf16.mxu0 %v6752_v6 }
 0xcaa   : > { %6066 = vmatpush3.bf16.msra.mxu0 %v6753_v63 }
 0xcab   : > { %6067 = vmatprep.subr.bf16.mxu0 %v6754_v38 }
 0xcae   : > { %6068 = vmatpush3.bf16.msra.mxu0 %v6755_v39 }
 0xcaf   : > { %6069 = vmatprep.subr.bf16.mxu0 %v6756_v3 }
 0xcb2   : > { %6070 = vmatpush3.bf16.msra.mxu0 %v6757_v4 }
 0xcb3   : > { %6071 = vmatprep.subr.bf16.mxu0 %v6758_v0 }
 0xcb6   : > { %6072 = vmatpush3.bf16.msra.mxu0 %v6759_v9 }
 0xd25   : > { %v5088_v13 = vpop.xlane.xlu0 %5087 }
 0xd26   : > { %v5089_v48 = vmul.f32 0.00390625, %v5088_v13 }
 0xd28   : > { %v5090_v49 = vsub.f32 %v5073_v40, %v5089_v48  ;;  %v5091_v50 = vsub.f32 %v5074_v43, %v5089_v48 }
 0xd2a   : > { %v5092_v51 = vmul.f32 %v5090_v49, %v5090_v49  ;;  %v5093_v52 = vmul.f32 %v5091_v50, %v5091_v50 }
 0xd2c   : > { %v5094_v53 = vsel %vm5083_vm9, %v5092_v51, 0.0  ;;  %v5095_v56 = vsel %vm5083_vm9, %v5093_v52, 0.0 }
 0xd2d   : > { %v5096_v54 = vadd.f32 %v5095_v56, %v5094_v53 }
 0xd2f   : > { %5097 = vadd.xlane.f32.xlu0 %v5096_v54 }
 0xdb8   : > { %v5098_v10 = vpop.xlane.xlu0 %5097 }
 0xdb9   : > { %v5099_v55 = vmul.f32 0.00390625, %v5098_v10 }
 0xdbb   : > { %v5100_v11 = vadd.f32 1e-05, %v5099_v55 }
 0xdbd   : > { %6760 = vrsqrt.f32 %v5100_v11 }
 0xdca   : > { %v6761_v47 = vpop.eup %6760 }
 0xdcb   : > { %v5103_v60 = vmul.f32 %v6761_v47, %v5091_v50  ;;  %v5102_v18 = vmul.f32 %v6761_v47, %v5090_v49 }
 0xdcd   : > { %v5116_v20 = vmul.f32 %v5112_v16, %v5103_v60  ;;  %v5115_v2 = vmul.f32 %v5108_v59, %v5102_v18 }
 0xdcf   : > { %v5129_v21 = vadd.f32 %v5125_v1, %v5116_v20  ;;  %v5128_v22 = vadd.f32 %v5121_v46, %v5115_v2 }
 0xdd1   : > { %v5131_v23 = vpack.c.bf16 %v5129_v21, %v5129_v21  ;;  %v5130_v24 = vpack.c.bf16 %v5128_v22, %v5128_v22 }
 0xdd3   : > { %5292 = vmatprep.mubr.bf16.mxu0 %v5131_v23 }
 0xdd4   : > { %5293 = vmatmul.mubr.bf16.vlgmr.msra.gmra.mxu0 %v5130_v24 }
 0xe94   : > { %v6073_v25 = vpop.f32.mrf.mxu0 }
 0xe96   : > { %v6074_v26 = vpop.f32.mrf.mxu0 }
 0xe97   : > { %v6075_v27 = vadd.f32 %v6074_v26, %v6073_v25 }
 0xe98   : > { %v6076_v29 = vpop.f32.mrf.mxu0 }
 0xe99   : > { %v5300_v30 = vmul.f32 %v6075_v27, %v6075_v27 }
 0xe9a   : > { %v6077_v31 = vpop.f32.mrf.mxu0 }
 0xe9b   : > { %v5301_v8 = vsel %vm5083_vm9, %v5300_v30, 0.0 }
 0xe9c   : > { %5302 = vadd.xlane.f32.xlu1 %v5301_v8 }
 0xf25   : > { %v5303_v7 = vpop.xlane.xlu1 %5302 }
 0xf26   : > { %6762 = vrsqrt.f32 %v5303_v7 }
 0xf33   : > { %v6763_v32 = vpop.eup %6762 }
 0xf34   : > { %v5305_v33 = vmul.f32 %v6763_v32, %v6075_v27 }
 0xf36   : > { %5306 = vst [vmem:[%s8246_s25] sm:$0x1] %v5305_v33 }
 0xf37 PF: > { %s8247_s21 = sld [smem:[#allocation17_spill]] }
 0xf38   : > { %s8248_s29 = sld [smem:[#allocation13_spill]] }
 0xf39   : > { %s8249_s2 = sld [smem:[#allocation14_spill]] }
 0xf3a   : > { %s8250_s6 = sld [smem:[#allocation20_spill]] }
 0xf3b   : > { %s8251_s30 = sld [smem:[#allocation15_spill]] }
 0xf3c   : > { %s8252_s7 = sld [smem:[#allocation16_spill]] }
 0xf3d   : > { %s42_s1 = sadd.s32 1, %s8247_s21   ;;  %s8253_s3 = sld [smem:[#allocation18_spill]] }
 0xf3e   : > { %p39_p5 = scmp.ge.s32.totalorder %s42_s1, 6   ;;  %s8254_s26 = sld [smem:[#allocation19_spill]] }
 0xf40   :  { %41 = sbr.rel (!%p39_p5) target bundleno = 35 (0x23), region = 231 }
 0xf45   :  { %5324 = vsyncpa [#allocation4], 1 }
 0xf46   :  { %5326 = vsyncpa [#allocation4 + $0x1], 1 }
 0xf47   :  { %5327 = vsyncpa [#allocation6], 1 }
 0xf48   :  { %5329 = vsyncpa [#allocation6 + $0x1], 1 }
 0xf49   :  { %5330 = vsyncpa [#allocation9], 1 }

</bundles_post_ra>
